<compile_context>
chip_gen: v7x
topology: tpu7x:2x2x1
jax: 0.10.0
libtpu: 0.0.40
codegen_flags: <defaults>
</compile_context>

<pallas_src>
import math

import jax
import jax.numpy as jnp
import numpy as np
from jax import lax
from jax.experimental import pallas as pl
from jax.experimental.pallas import tpu as pltpu

# ----------------------------- model configuration ------------------------- #
NUM_LAYERS = 2
DOWN_CH = [2, 16, 32]                     # channels[0]
UP_CH_OUT = [16, 32]                      # channels[1]
UP_CH_IN = [DOWN_CH[1] + UP_CH_OUT[1], DOWN_CH[2]]   # [48, 32]
NEG_SLOPE = 0.01                          # F.leaky_relu default

N_BATCH = 2
H0 = W0 = 16
H1 = W1 = 8
H2 = W2 = 4
M0 = N_BATCH * H0 * W0                    # 512 (multiple of 128 -> lane dense)
M1 = N_BATCH * H1 * W1                    # 128
M2 = N_BATCH * H2 * W2                    # 32
CIN_PAD = 16                              # input channels padded 2 -> 16
LAST_CIN_PAD = 32                         # lastConv input channels 18 -> 32
LAST_COUT_PAD = 8                         # lastConv output channels 2 -> 8

OFFSETS = [(di, dj) for di in (-1, 0, 1) for dj in (-1, 0, 1)]   # (ki-1, kj-1)

PREP_ORDER = [
    "masks16", "wd0", "bd0", "p0", "d0",
    "gd1", "wd1", "bd1", "a1", "p1",
    "g34", "wt1", "bt1", "u1", "b1u",
    "g38", "wt0", "bt0", "u0", "b0u",
    "wl", "bl",
]


def leaky_relu(v):
    return jnp.where(v >= 0, v, NEG_SLOPE * v)


# ------------------------------ fused kernel -------------------------------- #

def _unet3_fused_kernel(
    x0_ref,                                    # (16, 512) f32 padded input (CNHW flat)
    masks_ref,                                 # (9, 1, 512) f32 tap-validity masks @16x16
    wd0_ref, bd0_ref, p0_ref, d0_ref,          # downConvs[0]
    gd1_ref, wd1_ref, bd1_ref, a1_ref, p1_ref,  # downConvs[1]
    g34_ref, wt1_ref, bt1_ref, u1_ref, b1u_ref,  # upConvs[1]
    g38_ref, wt0_ref, bt0_ref, u0_ref, b0u_ref,  # upConvs[0]
    wl_ref, bl_ref,                            # lastConv
    out_ref,                                   # (8, 512) f32 (first 2 rows real)
    pre_ref,                                   # (32, 512) f32 (first 18 rows real)
    cat48_ref,                                 # scratch (48, 128) f32
):
    f32 = jnp.float32
    bf16 = jnp.bfloat16

    def shift16(v, di, dj):
        # v[c, m] -> v[c, m + di*W0 + dj]; circular, callers mask invalid taps.
        s = di * W0 + dj
        if s == 0:
            return v
        return pltpu.roll(v, shift=(-s) % M0, axis=1)

    # ---- downConvs[0]: 2ch @16x16 -> 16ch @8x8, residual = avg_pool pad-front
    x0 = x0_ref[...]                                     # (16, 512) f32
    xl0 = leaky_relu(x0)
    acc0 = jnp.zeros((DOWN_CH[1], M0), f32)
    for t, (di, dj) in enumerate(OFFSETS):
        sh = shift16(xl0, di, dj) * masks_ref[t]
        acc0 = acc0 + jnp.dot(wd0_ref[t], sh.astype(bf16),
                              preferred_element_type=f32)
    # 2x2 avg pool on the pre-leaky input (ceil_mode irrelevant: H,W even).
    pooled = x0 + shift16(x0, 0, 1) + shift16(x0, 1, 0) + shift16(x0, 1, 1)
    acc0 = acc0 + jnp.dot(p0_ref[...], pooled, preferred_element_type=f32)
    h1 = jnp.dot(acc0, d0_ref[...], preferred_element_type=f32) + bd0_ref[...]
    # h1: (16, 128) f32 == 16ch @8x8

    # ---- downConvs[1]: 16ch @8x8 -> 32ch @4x4 (per-tap selection matmuls)
    xl1 = leaky_relu(h1)
    acc1 = jnp.zeros((DOWN_CH[2], M2), f32)
    for t in range(9):
        pt = jnp.dot(xl1, gd1_ref[t], preferred_element_type=f32)    # (16, 32)
        acc1 = acc1 + jnp.dot(wd1_ref[t], pt.astype(bf16),
                              preferred_element_type=f32)
    pooled1 = jnp.dot(h1, a1_ref[...], preferred_element_type=f32)   # (16, 32)
    acc1 = acc1 + jnp.dot(p1_ref[...], pooled1, preferred_element_type=f32)
    h2 = acc1 + bd1_ref[...]                                         # (32, 32)

    # ---- upConvs[1]: ConvT(32->32, k4 s2 p1) @4x4 -> 8x8, 4-phase decomposition
    xl2 = leaky_relu(h2)
    co1 = UP_CH_OUT[1]
    accp1 = jnp.zeros((4 * co1, M2), f32)
    for t in range(9):
        pt = jnp.dot(xl2, g34_ref[t], preferred_element_type=f32)    # (32, 32)
        accp1 = accp1 + jnp.dot(wt1_ref[t], pt.astype(bf16),
                                preferred_element_type=f32)          # (128, 32)
    hi1 = jnp.zeros((co1, M1), f32)
    for p in range(4):
        hi1 = hi1 + jnp.dot(accp1[p * co1:(p + 1) * co1, :], u1_ref[p],
                            preferred_element_type=f32)
    hi1 = hi1 + bt1_ref[...]
    # + bilinear x2 of the (non-leaky) 32ch input
    part_a1 = hi1 + jnp.dot(h2, b1u_ref[...], preferred_element_type=f32)
    # channel concat with skip h1, staged entirely in VMEM scratch
    cat48_ref[0:co1, :] = part_a1
    cat48_ref[co1:UP_CH_IN[0], :] = h1

    # ---- upConvs[0]: ConvT(48->16, k4 s2 p1) @8x8 -> 16x16
    x48 = cat48_ref[...]                                             # (48, 128)
    xl3 = leaky_relu(x48)
    co0 = UP_CH_OUT[0]
    accp0 = jnp.zeros((4 * co0, M1), f32)
    for t in range(9):
        pt = jnp.dot(xl3, g38_ref[t], preferred_element_type=f32)    # (48, 128)
        accp0 = accp0 + jnp.dot(wt0_ref[t], pt.astype(bf16),
                                preferred_element_type=f32)          # (64, 128)
    hi0 = jnp.zeros((co0, M0), f32)
    for p in range(4):
        hi0 = hi0 + jnp.dot(accp0[p * co0:(p + 1) * co0, :], u0_ref[p],
                            preferred_element_type=f32)
    hi0 = hi0 + bt0_ref[...]
    # pad_or_crop(x, 16ch) == first 16 channels of part_a1; bilinear x2 of it
    part_a2 = hi0 + jnp.dot(part_a1[0:co0, :], b0u_ref[...],
                            preferred_element_type=f32)              # (16, 512)

    # pre-lastConv activation = cat([part_a2 (16ch), input (2ch)]), written into
    # the padded 32-row output slab (rows 18..31 are zero from the padded input).
    pre_ref[0:co0, :] = part_a2
    pre_ref[co0:LAST_CIN_PAD, :] = x0

    # ---- lastConv: 18ch @16x16 -> 2ch, *0.1 fused in the epilogue (no relu)
    xin = pre_ref[...]                                               # (32, 512)
    accl = jnp.zeros((LAST_COUT_PAD, M0), f32)
    for t, (di, dj) in enumerate(OFFSETS):
        sh = shift16(xin, di, dj) * masks_ref[t]
        accl = accl + jnp.dot(wl_ref[t], sh.astype(bf16),
                              preferred_element_type=f32)
    out_ref[...] = (accl + bl_ref[...]) * 0.1


_VMEM = pl.BlockSpec(memory_space=pltpu.MemorySpace.VMEM)

_fused_call = pl.pallas_call(
    _unet3_fused_kernel,
    out_shape=(jax.ShapeDtypeStruct((LAST_COUT_PAD, M0), jnp.float32),
               jax.ShapeDtypeStruct((LAST_CIN_PAD, M0), jnp.float32)),
    in_specs=[_VMEM] * 23,
    out_specs=(_VMEM, _VMEM),
    scratch_shapes=[pltpu.VMEM((UP_CH_IN[0], M1), jnp.float32)],
    compiler_params=pltpu.CompilerParams(vmem_limit_bytes=32 * 1024 * 1024),
)


# ------------------------ init-time weight / geometry prep ------------------ #

def _shift1d(n, d):
    m = np.zeros((n, n), np.float32)
    for o in range(n):
        i = o + d
        if 0 <= i < n:
            m[i, o] = 1.0
    return m


def _downsel1d(n_in, d):
    n_out = n_in // 2
    m = np.zeros((n_in, n_out), np.float32)
    for o in range(n_out):
        i = 2 * o + d
        if 0 <= i < n_in:
            m[i, o] = 1.0
    return m


def _pool1d(n_in):
    n_out = n_in // 2
    m = np.zeros((n_in, n_out), np.float32)
    for o in range(n_out):
        m[2 * o, o] = 0.5
        m[2 * o + 1, o] = 0.5
    return m


def _upsel1d(n_in, a):
    m = np.zeros((n_in, 2 * n_in), np.float32)
    for i in range(n_in):
        m[i, 2 * i + a] = 1.0
    return m


def _uplin1d(n_in):
    # bilinear x2, align_corners=False: out[2i]   = .75 x[i] + .25 x[max(i-1,0)]
    #                                   out[2i+1] = .75 x[i] + .25 x[min(i+1,n-1)]
    m = np.zeros((n_in, 2 * n_in), np.float32)
    for i in range(n_in):
        m[i, 2 * i] += 0.75
        m[max(i - 1, 0), 2 * i] += 0.25
        m[i, 2 * i + 1] += 0.75
        m[min(i + 1, n_in - 1), 2 * i + 1] += 0.25
    return m


def _kron_nhw(mh, mw):
    return np.kron(np.eye(N_BATCH, dtype=np.float32),
                   np.kron(mh, mw)).astype(np.float32)


def _conv_taps(w):                       # (Co, Ci, 3, 3) -> (9, Co, Ci)
    w = np.asarray(w, np.float32)
    return np.stack([w[:, :, di + 1, dj + 1] for (di, dj) in OFFSETS], axis=0)


def _convT_phase_taps(w):                # (Ci, Co, 4, 4) -> (9, 4*Co, Ci)
    w = np.asarray(w, np.float32)
    ci, co = w.shape[0], w.shape[1]
    deltas = {0: (-1, 0), 1: (0, 1)}
    kidx = {(0, -1): 3, (0, 0): 1, (1, 0): 2, (1, 1): 0}
    out = np.zeros((9, 4 * co, ci), np.float32)
    for t, (di, dj) in enumerate(OFFSETS):
        for a in (0, 1):
            for b in (0, 1):
                if di in deltas[a] and dj in deltas[b]:
                    p = a * 2 + b
                    ki, kj = kidx[(a, di)], kidx[(b, dj)]
                    out[t, p * co:(p + 1) * co, :] = w[:, :, ki, kj].T
    return out


def prepare_inputs(params):
    """Bake all GEMM-ready weights + geometry ONCE (outside the hot path)."""
    f32 = np.float32
    out = {}

    masks = np.zeros((9, 1, M0), f32)
    for t, (di, dj) in enumerate(OFFSETS):
        mh = np.array([1.0 if 0 <= i + di < H0 else 0.0 for i in range(H0)], f32)
        mw = np.array([1.0 if 0 <= j + dj < W0 else 0.0 for j in range(W0)], f32)
        masks[t, 0] = np.kron(np.ones(N_BATCH, f32), np.kron(mh, mw))
    out["masks16"] = jnp.asarray(masks)

    # downConvs[0]
    wd0 = _conv_taps(params["down_w_0"])                           # (9, 16, 2)
    wd0 = np.pad(wd0, ((0, 0), (0, 0), (0, CIN_PAD - DOWN_CH[0])))
    out["wd0"] = jnp.asarray(wd0, dtype=jnp.bfloat16)
    out["bd0"] = jnp.asarray(np.asarray(params["down_b_0"], f32).reshape(-1, 1))
    p0 = np.zeros((DOWN_CH[1], CIN_PAD), f32)
    p0[DOWN_CH[1] - DOWN_CH[0]:, :DOWN_CH[0]] = 0.25 * np.eye(DOWN_CH[0], dtype=f32)
    out["p0"] = jnp.asarray(p0)
    sel_h, sel_w = _downsel1d(H0, 0), _downsel1d(W0, 0)
    out["d0"] = jnp.asarray(_kron_nhw(sel_h, sel_w))               # (512, 128)

    # downConvs[1]
    out["gd1"] = jnp.asarray(np.stack(
        [_kron_nhw(_downsel1d(H1, di), _downsel1d(W1, dj)) for (di, dj) in OFFSETS]))
    out["wd1"] = jnp.asarray(_conv_taps(params["down_w_1"]), dtype=jnp.bfloat16)
    out["bd1"] = jnp.asarray(np.asarray(params["down_b_1"], f32).reshape(-1, 1))
    out["a1"] = jnp.asarray(_kron_nhw(_pool1d(H1), _pool1d(W1)))   # (128, 32)
    p1 = np.zeros((DOWN_CH[2], DOWN_CH[1]), f32)
    p1[DOWN_CH[2] - DOWN_CH[1]:, :] = np.eye(DOWN_CH[1], dtype=f32)
    out["p1"] = jnp.asarray(p1)

    # upConvs[1]
    out["g34"] = jnp.asarray(np.stack(
        [_kron_nhw(_shift1d(H2, di), _shift1d(W2, dj)) for (di, dj) in OFFSETS]))
    out["wt1"] = jnp.asarray(_convT_phase_taps(params["up_w_1"]), dtype=jnp.bfloat16)
    out["bt1"] = jnp.asarray(np.asarray(params["up_b_1"], f32).reshape(-1, 1))
    out["u1"] = jnp.asarray(np.stack(
        [_kron_nhw(_upsel1d(H2, a), _upsel1d(W2, b)) for a in (0, 1) for b in (0, 1)]))
    out["b1u"] = jnp.asarray(_kron_nhw(_uplin1d(H2), _uplin1d(W2)))

    # upConvs[0]
    out["g38"] = jnp.asarray(np.stack(
        [_kron_nhw(_shift1d(H1, di), _shift1d(W1, dj)) for (di, dj) in OFFSETS]))
    out["wt0"] = jnp.asarray(_convT_phase_taps(params["up_w_0"]), dtype=jnp.bfloat16)
    out["bt0"] = jnp.asarray(np.asarray(params["up_b_0"], f32).reshape(-1, 1))
    out["u0"] = jnp.asarray(np.stack(
        [_kron_nhw(_upsel1d(H1, a), _upsel1d(W1, b)) for a in (0, 1) for b in (0, 1)]))
    out["b0u"] = jnp.asarray(_kron_nhw(_uplin1d(H1), _uplin1d(W1)))

    # lastConv (out padded 2->8, in padded 18->32)
    wl = _conv_taps(params["last_w"])                              # (9, 2, 18)
    wl = np.pad(wl, ((0, 0), (0, LAST_COUT_PAD - 2), (0, LAST_CIN_PAD - 18)))
    out["wl"] = jnp.asarray(wl, dtype=jnp.bfloat16)
    bl = np.zeros((LAST_COUT_PAD, 1), f32)
    bl[:2, 0] = np.asarray(params["last_b"], f32)
    out["bl"] = jnp.asarray(bl)
    return out


# ---------------------------------- model ----------------------------------- #

def init_params(key):
    params = {}
    for d in range(NUM_LAYERS):
        ci, co = DOWN_CH[d], DOWN_CH[d + 1]
        key, kw_, kb_ = jax.random.split(key, 3)
        bound = 1.0 / math.sqrt(ci * 9)
        params[f"down_w_{d}"] = jax.random.uniform(kw_, (co, ci, 3, 3),
                                                   jnp.float32, -bound, bound)
        params[f"down_b_{d}"] = jax.random.uniform(kb_, (co,), jnp.float32,
                                                   -bound, bound)
        cti, cto = UP_CH_IN[d], UP_CH_OUT[d]
        key, kw2, kb2 = jax.random.split(key, 3)
        bound = 1.0 / math.sqrt(cto * 16)
        params[f"up_w_{d}"] = jax.random.uniform(kw2, (cti, cto, 4, 4),
                                                 jnp.float32, -bound, bound)
        params[f"up_b_{d}"] = jax.random.uniform(kb2, (cto,), jnp.float32,
                                                 -bound, bound)
    key, kb_ = jax.random.split(key)
    params["last_w"] = jnp.zeros((2, 18, 3, 3), jnp.float32)   # nn.init.zeros_
    bound = 1.0 / math.sqrt(18 * 9)
    params["last_b"] = jax.random.uniform(kb_, (2,), jnp.float32, -bound, bound)
    return params


def unet3_forward(prepped, x, y):
    """x, y: (N, 1, 16, 16) NCHW.  Returns (lastConv(.)/10, pre_lastConv)."""
    n = x.shape[0]
    m = n * H0 * W0
    xin = jnp.concatenate([x, y], axis=1)                     # (N, 2, H, W)
    x0 = jnp.transpose(xin, (1, 0, 2, 3)).reshape(DOWN_CH[0], m)
    x0 = jnp.pad(x0, ((0, CIN_PAD - DOWN_CH[0]), (0, 0))).astype(jnp.float32)
    out_pad, pre_pad = _fused_call(x0, *[prepped[k] for k in PREP_ORDER])
    out = out_pad[:2].reshape(2, n, H0, W0).transpose(1, 0, 2, 3)
    pre = pre_pad[:18].reshape(18, n, H0, W0).transpose(1, 0, 2, 3)
    return out, pre


# --------------------------- pure-JAX reference ----------------------------- #

def _ref_conv(x, w, b, stride, pad, lhs_dilation=(1, 1)):
    o = lax.conv_general_dilated(
        x, w, window_strides=(stride, stride), padding=((pad, pad), (pad, pad)),
        lhs_dilation=lhs_dilation, dimension_numbers=("NCHW", "OIHW", "NCHW"))
    return o + b.reshape(1, -1, 1, 1)


def _ref_pad_or_crop(x, c_t):
    c = x.shape[1]
    if c >= c_t:
        return x[:, :c_t]
    return jnp.pad(x, ((0, 0), (c_t - c, 0), (0, 0), (0, 0)))


def _ref_avg_pool(x):
    n, c, h, w = x.shape
    return x.reshape(n, c, h // 2, 2, w // 2, 2).mean(axis=(3, 5))


def _ref_upsample(x):                                   # NCHW bilinear x2
    def up_h(v):
        n, c, h, w = v.shape
        prev = jnp.concatenate([v[:, :, :1], v[:, :, :-1]], axis=2)
        nxt = jnp.concatenate([v[:, :, 1:], v[:, :, -1:]], axis=2)
        return jnp.stack([0.75 * v + 0.25 * prev, 0.75 * v + 0.25 * nxt],
                         axis=3).reshape(n, c, 2 * h, w)

    def up_w(v):
        n, c, h, w = v.shape
        prev = jnp.concatenate([v[..., :1], v[..., :-1]], axis=3)
        nxt = jnp.concatenate([v[..., 1:], v[..., -1:]], axis=3)
        return jnp.stack([0.75 * v + 0.25 * prev, 0.75 * v + 0.25 * nxt],
                         axis=4).reshape(n, c, h, 2 * w)

    return up_w(up_h(x))


def ref_forward(params, x, y):
    h = jnp.concatenate([x, y], axis=1)
    skips = []
    for d in range(NUM_LAYERS):
        skips.append(h)
        yv = _ref_conv(leaky_relu(h), params[f"down_w_{d}"],
                       params[f"down_b_{d}"], 2, 1)
        h = yv + _ref_pad_or_crop(_ref_avg_pool(h), yv.shape[1])
    for d in reversed(range(NUM_LAYERS)):
        w_conv = jnp.flip(params[f"up_w_{d}"], axis=(2, 3)).transpose(1, 0, 2, 3)
        yv = _ref_conv(leaky_relu(h), w_conv, params[f"up_b_{d}"], 1, 2,
                       lhs_dilation=(2, 2))
        h = yv + _ref_upsample(_ref_pad_or_crop(h, yv.shape[1]))
        h = h[:, :, :skips[d].shape[2], :skips[d].shape[3]]
        h = jnp.concatenate([h, skips[d]], axis=1)
    pre_last = h
    out = _ref_conv(h, params["last_w"], params["last_b"], 1, 1) / 10.0
    return out, pre_last


# ----------------------------------- main ------------------------------------ #

if __name__ == "__main__":
    key = jax.random.PRNGKey(0)
    kp, kx, ky, kw = jax.random.split(key, 4)
    params = init_params(kp)

    # cat(x, y) -> 2 channels = DOWN_CH[0]
    x = jax.random.normal(kx, (N_BATCH, 1, H0, W0), jnp.float32)
    y = jax.random.normal(ky, (N_BATCH, 1, H0, W0), jnp.float32)

    fwd = jax.jit(unet3_forward)

    prepped = prepare_inputs(params)
    out, pre_last = fwd(prepped, x, y)
    out = jax.block_until_ready(out)
    pre_last = jax.block_until_ready(pre_last)

    ref_out, ref_pre = ref_forward(params, x, y)
    assert out.shape == (N_BATCH, 2, H0, W0), out.shape
    assert pre_last.shape == (N_BATCH, 18, H0, W0), pre_last.shape
    assert jnp.allclose(pre_last, ref_pre, rtol=5e-2, atol=5e-2), \
        float(jnp.max(jnp.abs(pre_last - ref_pre)))
    assert jnp.allclose(out, ref_out, rtol=5e-2, atol=5e-2), \
        float(jnp.max(jnp.abs(out - ref_out)))

    # Extra coverage: lastConv weights are zero-initialized in the module, so
    # also check a variant with random lastConv weights (exercises that GEMM).
    params_rnd = dict(params)
    params_rnd["last_w"] = 0.05 * jax.random.normal(kw, (2, 18, 3, 3), jnp.float32)
    out2, pre2 = fwd(prepare_inputs(params_rnd), x, y)
    out2 = jax.block_until_ready(out2)
    ref_out2, _ = ref_forward(params_rnd, x, y)
    assert jnp.allclose(out2, ref_out2, rtol=5e-2, atol=5e-2), \
        float(jnp.max(jnp.abs(out2 - ref_out2)))

    print("KERNEL_OK")
</pallas_src>

<mosaic_0001>
module attributes {stable_mosaic.version = 11 : i64} {
  func.func @_unet3_fused_kernel(%arg0: memref<16x512xf32, #tpu.memory_space<vmem>>, %arg1: memref<9x1x512xf32, #tpu.memory_space<vmem>>, %arg2: memref<9x16x16xbf16, #tpu.memory_space<vmem>>, %arg3: memref<16x1xf32, #tpu.memory_space<vmem>>, %arg4: memref<16x16xf32, #tpu.memory_space<vmem>>, %arg5: memref<512x128xf32, #tpu.memory_space<vmem>>, %arg6: memref<9x128x32xf32, #tpu.memory_space<vmem>>, %arg7: memref<9x32x16xbf16, #tpu.memory_space<vmem>>, %arg8: memref<32x1xf32, #tpu.memory_space<vmem>>, %arg9: memref<128x32xf32, #tpu.memory_space<vmem>>, %arg10: memref<32x16xf32, #tpu.memory_space<vmem>>, %arg11: memref<9x32x32xf32, #tpu.memory_space<vmem>>, %arg12: memref<9x128x32xbf16, #tpu.memory_space<vmem>>, %arg13: memref<32x1xf32, #tpu.memory_space<vmem>>, %arg14: memref<4x32x128xf32, #tpu.memory_space<vmem>>, %arg15: memref<32x128xf32, #tpu.memory_space<vmem>>, %arg16: memref<9x128x128xf32, #tpu.memory_space<vmem>>, %arg17: memref<9x64x48xbf16, #tpu.memory_space<vmem>>, %arg18: memref<16x1xf32, #tpu.memory_space<vmem>>, %arg19: memref<4x128x512xf32, #tpu.memory_space<vmem>>, %arg20: memref<128x512xf32, #tpu.memory_space<vmem>>, %arg21: memref<9x8x32xbf16, #tpu.memory_space<vmem>>, %arg22: memref<8x1xf32, #tpu.memory_space<vmem>>, %arg23: memref<8x512xf32, #tpu.memory_space<vmem>>, %arg24: memref<32x512xf32, #tpu.memory_space<vmem>>, %arg25: memref<48x128xf32, #tpu.memory_space<vmem>>) attributes {dimension_semantics = [], scalar_prefetch = 0 : i64, scratch_operands = 1 : i64, tpu.core_type = #tpu.core_type<tc>} {
    %c0 = arith.constant 0 : index
    %c0_0 = arith.constant 0 : index
    %0 = vector.load %arg0[%c0, %c0_0] : memref<16x512xf32, #tpu.memory_space<vmem>>, vector<16x512xf32>
    %cst = arith.constant 0.000000e+00 : f32
    %1 = vector.broadcast %cst : f32 to vector<16x512xf32>
    %2 = arith.cmpf oge, %0, %1 : vector<16x512xf32>
    %cst_1 = arith.constant 0.00999999977 : f32
    %3 = vector.broadcast %cst_1 : f32 to vector<16x512xf32>
    %4 = arith.mulf %3, %0 : vector<16x512xf32>
    %5 = arith.select %2, %0, %4 : vector<16x512xi1>, vector<16x512xf32>
    %cst_2 = arith.constant 0.000000e+00 : f32
    %6 = vector.broadcast %cst_2 : f32 to vector<16x512xf32>
    %c17_i32 = arith.constant 17 : i32
    %7 = tpu.dynamic_rotate %5 by %c17_i32 dim 1 : vector<16x512xf32>, i32 -> vector<16x512xf32>
    %c0_3 = arith.constant 0 : index
    %c0_4 = arith.constant 0 : index
    %c0_5 = arith.constant 0 : index
    %8 = vector.load %arg1[%c0_3, %c0_4, %c0_5] : memref<9x1x512xf32, #tpu.memory_space<vmem>>, vector<1x1x512xf32>
    %9 = vector.shape_cast %8 : vector<1x1x512xf32> to vector<1x512xf32>
    %10 = vector.broadcast %9 : vector<1x512xf32> to vector<16x512xf32>
    %11 = arith.mulf %7, %10 : vector<16x512xf32>
    %c0_6 = arith.constant 0 : index
    %c0_7 = arith.constant 0 : index
    %c0_8 = arith.constant 0 : index
    %12 = vector.load %arg2[%c0_6, %c0_7, %c0_8] : memref<9x16x16xbf16, #tpu.memory_space<vmem>>, vector<1x16x16xbf16>
    %13 = vector.shape_cast %12 : vector<1x16x16xbf16> to vector<16x16xbf16>
    %14 = arith.truncf %11 : vector<16x512xf32> to vector<16x512xbf16>
    %cst_9 = arith.constant dense<0.000000e+00> : vector<16x512xf32>
    %15 = tpu.matmul %13, %14, %cst_9 {dimension_numbers = #tpu.dot_dimension_numbers<[1], [0], [0], [1], [0, 0, 1, 1], [], []>} : vector<16x16xbf16>, vector<16x512xbf16>, vector<16x512xf32> -> vector<16x512xf32>
    %16 = arith.addf %6, %15 : vector<16x512xf32>
    %c16_i32 = arith.constant 16 : i32
    %17 = tpu.dynamic_rotate %5 by %c16_i32 dim 1 : vector<16x512xf32>, i32 -> vector<16x512xf32>
    %c1 = arith.constant 1 : index
    %c0_10 = arith.constant 0 : index
    %c0_11 = arith.constant 0 : index
    %18 = vector.load %arg1[%c1, %c0_10, %c0_11] : memref<9x1x512xf32, #tpu.memory_space<vmem>>, vector<1x1x512xf32>
    %19 = vector.shape_cast %18 : vector<1x1x512xf32> to vector<1x512xf32>
    %20 = vector.broadcast %19 : vector<1x512xf32> to vector<16x512xf32>
    %21 = arith.mulf %17, %20 : vector<16x512xf32>
    %c1_12 = arith.constant 1 : index
    %c0_13 = arith.constant 0 : index
    %c0_14 = arith.constant 0 : index
    %22 = vector.load %arg2[%c1_12, %c0_13, %c0_14] : memref<9x16x16xbf16, #tpu.memory_space<vmem>>, vector<1x16x16xbf16>
    %23 = vector.shape_cast %22 : vector<1x16x16xbf16> to vector<16x16xbf16>
    %24 = arith.truncf %21 : vector<16x512xf32> to vector<16x512xbf16>
    %cst_15 = arith.constant dense<0.000000e+00> : vector<16x512xf32>
    %25 = tpu.matmul %23, %24, %cst_15 {dimension_numbers = #tpu.dot_dimension_numbers<[1], [0], [0], [1], [0, 0, 1, 1], [], []>} : vector<16x16xbf16>, vector<16x512xbf16>, vector<16x512xf32> -> vector<16x512xf32>
    %26 = arith.addf %16, %25 : vector<16x512xf32>
    %c15_i32 = arith.constant 15 : i32
    %27 = tpu.dynamic_rotate %5 by %c15_i32 dim 1 : vector<16x512xf32>, i32 -> vector<16x512xf32>
    %c2 = arith.constant 2 : index
    %c0_16 = arith.constant 0 : index
    %c0_17 = arith.constant 0 : index
    %28 = vector.load %arg1[%c2, %c0_16, %c0_17] : memref<9x1x512xf32, #tpu.memory_space<vmem>>, vector<1x1x512xf32>
    %29 = vector.shape_cast %28 : vector<1x1x512xf32> to vector<1x512xf32>
    %30 = vector.broadcast %29 : vector<1x512xf32> to vector<16x512xf32>
    %31 = arith.mulf %27, %30 : vector<16x512xf32>
    %c2_18 = arith.constant 2 : index
    %c0_19 = arith.constant 0 : index
    %c0_20 = arith.constant 0 : index
    %32 = vector.load %arg2[%c2_18, %c0_19, %c0_20] : memref<9x16x16xbf16, #tpu.memory_space<vmem>>, vector<1x16x16xbf16>
    %33 = vector.shape_cast %32 : vector<1x16x16xbf16> to vector<16x16xbf16>
    %34 = arith.truncf %31 : vector<16x512xf32> to vector<16x512xbf16>
    %cst_21 = arith.constant dense<0.000000e+00> : vector<16x512xf32>
    %35 = tpu.matmul %33, %34, %cst_21 {dimension_numbers = #tpu.dot_dimension_numbers<[1], [0], [0], [1], [0, 0, 1, 1], [], []>} : vector<16x16xbf16>, vector<16x512xbf16>, vector<16x512xf32> -> vector<16x512xf32>
    %36 = arith.addf %26, %35 : vector<16x512xf32>
    %c1_i32 = arith.constant 1 : i32
    %37 = tpu.dynamic_rotate %5 by %c1_i32 dim 1 : vector<16x512xf32>, i32 -> vector<16x512xf32>
    %c3 = arith.constant 3 : index
    %c0_22 = arith.constant 0 : index
    %c0_23 = arith.constant 0 : index
    %38 = vector.load %arg1[%c3, %c0_22, %c0_23] : memref<9x1x512xf32, #tpu.memory_space<vmem>>, vector<1x1x512xf32>
    %39 = vector.shape_cast %38 : vector<1x1x512xf32> to vector<1x512xf32>
    %40 = vector.broadcast %39 : vector<1x512xf32> to vector<16x512xf32>
    %41 = arith.mulf %37, %40 : vector<16x512xf32>
    %c3_24 = arith.constant 3 : index
    %c0_25 = arith.constant 0 : index
    %c0_26 = arith.constant 0 : index
    %42 = vector.load %arg2[%c3_24, %c0_25, %c0_26] : memref<9x16x16xbf16, #tpu.memory_space<vmem>>, vector<1x16x16xbf16>
    %43 = vector.shape_cast %42 : vector<1x16x16xbf16> to vector<16x16xbf16>
    %44 = arith.truncf %41 : vector<16x512xf32> to vector<16x512xbf16>
    %cst_27 = arith.constant dense<0.000000e+00> : vector<16x512xf32>
    %45 = tpu.matmul %43, %44, %cst_27 {dimension_numbers = #tpu.dot_dimension_numbers<[1], [0], [0], [1], [0, 0, 1, 1], [], []>} : vector<16x16xbf16>, vector<16x512xbf16>, vector<16x512xf32> -> vector<16x512xf32>
    %46 = arith.addf %36, %45 : vector<16x512xf32>
    %c4 = arith.constant 4 : index
    %c0_28 = arith.constant 0 : index
    %c0_29 = arith.constant 0 : index
    %47 = vector.load %arg1[%c4, %c0_28, %c0_29] : memref<9x1x512xf32, #tpu.memory_space<vmem>>, vector<1x1x512xf32>
    %48 = vector.shape_cast %47 : vector<1x1x512xf32> to vector<1x512xf32>
    %49 = vector.broadcast %48 : vector<1x512xf32> to vector<16x512xf32>
    %50 = arith.mulf %5, %49 : vector<16x512xf32>
    %c4_30 = arith.constant 4 : index
    %c0_31 = arith.constant 0 : index
    %c0_32 = arith.constant 0 : index
    %51 = vector.load %arg2[%c4_30, %c0_31, %c0_32] : memref<9x16x16xbf16, #tpu.memory_space<vmem>>, vector<1x16x16xbf16>
    %52 = vector.shape_cast %51 : vector<1x16x16xbf16> to vector<16x16xbf16>
    %53 = arith.truncf %50 : vector<16x512xf32> to vector<16x512xbf16>
    %cst_33 = arith.constant dense<0.000000e+00> : vector<16x512xf32>
    %54 = tpu.matmul %52, %53, %cst_33 {dimension_numbers = #tpu.dot_dimension_numbers<[1], [0], [0], [1], [0, 0, 1, 1], [], []>} : vector<16x16xbf16>, vector<16x512xbf16>, vector<16x512xf32> -> vector<16x512xf32>
    %55 = arith.addf %46, %54 : vector<16x512xf32>
    %c511_i32 = arith.constant 511 : i32
    %56 = tpu.dynamic_rotate %5 by %c511_i32 dim 1 : vector<16x512xf32>, i32 -> vector<16x512xf32>
    %c5 = arith.constant 5 : index
    %c0_34 = arith.constant 0 : index
    %c0_35 = arith.constant 0 : index
    %57 = vector.load %arg1[%c5, %c0_34, %c0_35] : memref<9x1x512xf32, #tpu.memory_space<vmem>>, vector<1x1x512xf32>
    %58 = vector.shape_cast %57 : vector<1x1x512xf32> to vector<1x512xf32>
    %59 = vector.broadcast %58 : vector<1x512xf32> to vector<16x512xf32>
    %60 = arith.mulf %56, %59 : vector<16x512xf32>
    %c5_36 = arith.constant 5 : index
    %c0_37 = arith.constant 0 : index
    %c0_38 = arith.constant 0 : index
    %61 = vector.load %arg2[%c5_36, %c0_37, %c0_38] : memref<9x16x16xbf16, #tpu.memory_space<vmem>>, vector<1x16x16xbf16>
    %62 = vector.shape_cast %61 : vector<1x16x16xbf16> to vector<16x16xbf16>
    %63 = arith.truncf %60 : vector<16x512xf32> to vector<16x512xbf16>
    %cst_39 = arith.constant dense<0.000000e+00> : vector<16x512xf32>
    %64 = tpu.matmul %62, %63, %cst_39 {dimension_numbers = #tpu.dot_dimension_numbers<[1], [0], [0], [1], [0, 0, 1, 1], [], []>} : vector<16x16xbf16>, vector<16x512xbf16>, vector<16x512xf32> -> vector<16x512xf32>
    %65 = arith.addf %55, %64 : vector<16x512xf32>
    %c497_i32 = arith.constant 497 : i32
    %66 = tpu.dynamic_rotate %5 by %c497_i32 dim 1 : vector<16x512xf32>, i32 -> vector<16x512xf32>
    %c6 = arith.constant 6 : index
    %c0_40 = arith.constant 0 : index
    %c0_41 = arith.constant 0 : index
    %67 = vector.load %arg1[%c6, %c0_40, %c0_41] : memref<9x1x512xf32, #tpu.memory_space<vmem>>, vector<1x1x512xf32>
    %68 = vector.shape_cast %67 : vector<1x1x512xf32> to vector<1x512xf32>
    %69 = vector.broadcast %68 : vector<1x512xf32> to vector<16x512xf32>
    %70 = arith.mulf %66, %69 : vector<16x512xf32>
    %c6_42 = arith.constant 6 : index
    %c0_43 = arith.constant 0 : index
    %c0_44 = arith.constant 0 : index
    %71 = vector.load %arg2[%c6_42, %c0_43, %c0_44] : memref<9x16x16xbf16, #tpu.memory_space<vmem>>, vector<1x16x16xbf16>
    %72 = vector.shape_cast %71 : vector<1x16x16xbf16> to vector<16x16xbf16>
    %73 = arith.truncf %70 : vector<16x512xf32> to vector<16x512xbf16>
    %cst_45 = arith.constant dense<0.000000e+00> : vector<16x512xf32>
    %74 = tpu.matmul %72, %73, %cst_45 {dimension_numbers = #tpu.dot_dimension_numbers<[1], [0], [0], [1], [0, 0, 1, 1], [], []>} : vector<16x16xbf16>, vector<16x512xbf16>, vector<16x512xf32> -> vector<16x512xf32>
    %75 = arith.addf %65, %74 : vector<16x512xf32>
    %c496_i32 = arith.constant 496 : i32
    %76 = tpu.dynamic_rotate %5 by %c496_i32 dim 1 : vector<16x512xf32>, i32 -> vector<16x512xf32>
    %c7 = arith.constant 7 : index
    %c0_46 = arith.constant 0 : index
    %c0_47 = arith.constant 0 : index
    %77 = vector.load %arg1[%c7, %c0_46, %c0_47] : memref<9x1x512xf32, #tpu.memory_space<vmem>>, vector<1x1x512xf32>
    %78 = vector.shape_cast %77 : vector<1x1x512xf32> to vector<1x512xf32>
    %79 = vector.broadcast %78 : vector<1x512xf32> to vector<16x512xf32>
    %80 = arith.mulf %76, %79 : vector<16x512xf32>
    %c7_48 = arith.constant 7 : index
    %c0_49 = arith.constant 0 : index
    %c0_50 = arith.constant 0 : index
    %81 = vector.load %arg2[%c7_48, %c0_49, %c0_50] : memref<9x16x16xbf16, #tpu.memory_space<vmem>>, vector<1x16x16xbf16>
    %82 = vector.shape_cast %81 : vector<1x16x16xbf16> to vector<16x16xbf16>
    %83 = arith.truncf %80 : vector<16x512xf32> to vector<16x512xbf16>
    %cst_51 = arith.constant dense<0.000000e+00> : vector<16x512xf32>
    %84 = tpu.matmul %82, %83, %cst_51 {dimension_numbers = #tpu.dot_dimension_numbers<[1], [0], [0], [1], [0, 0, 1, 1], [], []>} : vector<16x16xbf16>, vector<16x512xbf16>, vector<16x512xf32> -> vector<16x512xf32>
    %85 = arith.addf %75, %84 : vector<16x512xf32>
    %c495_i32 = arith.constant 495 : i32
    %86 = tpu.dynamic_rotate %5 by %c495_i32 dim 1 : vector<16x512xf32>, i32 -> vector<16x512xf32>
    %c8 = arith.constant 8 : index
    %c0_52 = arith.constant 0 : index
    %c0_53 = arith.constant 0 : index
    %87 = vector.load %arg1[%c8, %c0_52, %c0_53] : memref<9x1x512xf32, #tpu.memory_space<vmem>>, vector<1x1x512xf32>
    %88 = vector.shape_cast %87 : vector<1x1x512xf32> to vector<1x512xf32>
    %89 = vector.broadcast %88 : vector<1x512xf32> to vector<16x512xf32>
    %90 = arith.mulf %86, %89 : vector<16x512xf32>
    %c8_54 = arith.constant 8 : index
    %c0_55 = arith.constant 0 : index
    %c0_56 = arith.constant 0 : index
    %91 = vector.load %arg2[%c8_54, %c0_55, %c0_56] : memref<9x16x16xbf16, #tpu.memory_space<vmem>>, vector<1x16x16xbf16>
    %92 = vector.shape_cast %91 : vector<1x16x16xbf16> to vector<16x16xbf16>
    %93 = arith.truncf %90 : vector<16x512xf32> to vector<16x512xbf16>
    %cst_57 = arith.constant dense<0.000000e+00> : vector<16x512xf32>
    %94 = tpu.matmul %92, %93, %cst_57 {dimension_numbers = #tpu.dot_dimension_numbers<[1], [0], [0], [1], [0, 0, 1, 1], [], []>} : vector<16x16xbf16>, vector<16x512xbf16>, vector<16x512xf32> -> vector<16x512xf32>
    %95 = arith.addf %85, %94 : vector<16x512xf32>
    %c511_i32_58 = arith.constant 511 : i32
    %96 = tpu.dynamic_rotate %0 by %c511_i32_58 dim 1 : vector<16x512xf32>, i32 -> vector<16x512xf32>
    %97 = arith.addf %0, %96 : vector<16x512xf32>
    %c496_i32_59 = arith.constant 496 : i32
    %98 = tpu.dynamic_rotate %0 by %c496_i32_59 dim 1 : vector<16x512xf32>, i32 -> vector<16x512xf32>
    %99 = arith.addf %97, %98 : vector<16x512xf32>
    %c495_i32_60 = arith.constant 495 : i32
    %100 = tpu.dynamic_rotate %0 by %c495_i32_60 dim 1 : vector<16x512xf32>, i32 -> vector<16x512xf32>
    %101 = arith.addf %99, %100 : vector<16x512xf32>
    %c0_61 = arith.constant 0 : index
    %c0_62 = arith.constant 0 : index
    %102 = vector.load %arg4[%c0_61, %c0_62] : memref<16x16xf32, #tpu.memory_space<vmem>>, vector<16x16xf32>
    %cst_63 = arith.constant dense<0.000000e+00> : vector<16x512xf32>
    %103 = tpu.matmul %102, %101, %cst_63 {dimension_numbers = #tpu.dot_dimension_numbers<[1], [0], [0], [1], [0, 0, 1, 1], [], []>} : vector<16x16xf32>, vector<16x512xf32>, vector<16x512xf32> -> vector<16x512xf32>
    %104 = arith.addf %95, %103 : vector<16x512xf32>
    %c0_64 = arith.constant 0 : index
    %c0_65 = arith.constant 0 : index
    %105 = vector.load %arg5[%c0_64, %c0_65] : memref<512x128xf32, #tpu.memory_space<vmem>>, vector<512x128xf32>
    %cst_66 = arith.constant dense<0.000000e+00> : vector<16x128xf32>
    %106 = tpu.matmul %104, %105, %cst_66 {dimension_numbers = #tpu.dot_dimension_numbers<[1], [0], [0], [1], [0, 0, 1, 1], [], []>} : vector<16x512xf32>, vector<512x128xf32>, vector<16x128xf32> -> vector<16x128xf32>
    %c0_67 = arith.constant 0 : index
    %c0_68 = arith.constant 0 : index
    %107 = vector.load %arg3[%c0_67, %c0_68] : memref<16x1xf32, #tpu.memory_space<vmem>>, vector<16x1xf32>
    %108 = vector.broadcast %107 : vector<16x1xf32> to vector<16x128xf32>
    %109 = arith.addf %106, %108 : vector<16x128xf32>
    %cst_69 = arith.constant 0.000000e+00 : f32
    %110 = vector.broadcast %cst_69 : f32 to vector<16x128xf32>
    %111 = arith.cmpf oge, %109, %110 : vector<16x128xf32>
    %cst_70 = arith.constant 0.00999999977 : f32
    %112 = vector.broadcast %cst_70 : f32 to vector<16x128xf32>
    %113 = arith.mulf %112, %109 : vector<16x128xf32>
    %114 = arith.select %111, %109, %113 : vector<16x128xi1>, vector<16x128xf32>
    %cst_71 = arith.constant 0.000000e+00 : f32
    %115 = vector.broadcast %cst_71 : f32 to vector<32x32xf32>
    %c0_72 = arith.constant 0 : index
    %c0_73 = arith.constant 0 : index
    %c0_74 = arith.constant 0 : index
    %116 = vector.load %arg6[%c0_72, %c0_73, %c0_74] : memref<9x128x32xf32, #tpu.memory_space<vmem>>, vector<1x128x32xf32>
    %117 = vector.shape_cast %116 : vector<1x128x32xf32> to vector<128x32xf32>
    %cst_75 = arith.constant dense<0.000000e+00> : vector<16x32xf32>
    %118 = tpu.matmul %114, %117, %cst_75 {dimension_numbers = #tpu.dot_dimension_numbers<[1], [0], [0], [1], [0, 0, 1, 1], [], []>} : vector<16x128xf32>, vector<128x32xf32>, vector<16x32xf32> -> vector<16x32xf32>
    %c0_76 = arith.constant 0 : index
    %c0_77 = arith.constant 0 : index
    %c0_78 = arith.constant 0 : index
    %119 = vector.load %arg7[%c0_76, %c0_77, %c0_78] : memref<9x32x16xbf16, #tpu.memory_space<vmem>>, vector<1x32x16xbf16>
    %120 = vector.shape_cast %119 : vector<1x32x16xbf16> to vector<32x16xbf16>
    %121 = arith.truncf %118 : vector<16x32xf32> to vector<16x32xbf16>
    %cst_79 = arith.constant dense<0.000000e+00> : vector<32x32xf32>
    %122 = tpu.matmul %120, %121, %cst_79 {dimension_numbers = #tpu.dot_dimension_numbers<[1], [0], [0], [1], [0, 0, 1, 1], [], []>} : vector<32x16xbf16>, vector<16x32xbf16>, vector<32x32xf32> -> vector<32x32xf32>
    %123 = arith.addf %115, %122 : vector<32x32xf32>
    %c1_80 = arith.constant 1 : index
    %c0_81 = arith.constant 0 : index
    %c0_82 = arith.constant 0 : index
    %124 = vector.load %arg6[%c1_80, %c0_81, %c0_82] : memref<9x128x32xf32, #tpu.memory_space<vmem>>, vector<1x128x32xf32>
    %125 = vector.shape_cast %124 : vector<1x128x32xf32> to vector<128x32xf32>
    %cst_83 = arith.constant dense<0.000000e+00> : vector<16x32xf32>
    %126 = tpu.matmul %114, %125, %cst_83 {dimension_numbers = #tpu.dot_dimension_numbers<[1], [0], [0], [1], [0, 0, 1, 1], [], []>} : vector<16x128xf32>, vector<128x32xf32>, vector<16x32xf32> -> vector<16x32xf32>
    %c1_84 = arith.constant 1 : index
    %c0_85 = arith.constant 0 : index
    %c0_86 = arith.constant 0 : index
    %127 = vector.load %arg7[%c1_84, %c0_85, %c0_86] : memref<9x32x16xbf16, #tpu.memory_space<vmem>>, vector<1x32x16xbf16>
    %128 = vector.shape_cast %127 : vector<1x32x16xbf16> to vector<32x16xbf16>
    %129 = arith.truncf %126 : vector<16x32xf32> to vector<16x32xbf16>
    %cst_87 = arith.constant dense<0.000000e+00> : vector<32x32xf32>
    %130 = tpu.matmul %128, %129, %cst_87 {dimension_numbers = #tpu.dot_dimension_numbers<[1], [0], [0], [1], [0, 0, 1, 1], [], []>} : vector<32x16xbf16>, vector<16x32xbf16>, vector<32x32xf32> -> vector<32x32xf32>
    %131 = arith.addf %123, %130 : vector<32x32xf32>
    %c2_88 = arith.constant 2 : index
    %c0_89 = arith.constant 0 : index
    %c0_90 = arith.constant 0 : index
    %132 = vector.load %arg6[%c2_88, %c0_89, %c0_90] : memref<9x128x32xf32, #tpu.memory_space<vmem>>, vector<1x128x32xf32>
    %133 = vector.shape_cast %132 : vector<1x128x32xf32> to vector<128x32xf32>
    %cst_91 = arith.constant dense<0.000000e+00> : vector<16x32xf32>
    %134 = tpu.matmul %114, %133, %cst_91 {dimension_numbers = #tpu.dot_dimension_numbers<[1], [0], [0], [1], [0, 0, 1, 1], [], []>} : vector<16x128xf32>, vector<128x32xf32>, vector<16x32xf32> -> vector<16x32xf32>
    %c2_92 = arith.constant 2 : index
    %c0_93 = arith.constant 0 : index
    %c0_94 = arith.constant 0 : index
    %135 = vector.load %arg7[%c2_92, %c0_93, %c0_94] : memref<9x32x16xbf16, #tpu.memory_space<vmem>>, vector<1x32x16xbf16>
    %136 = vector.shape_cast %135 : vector<1x32x16xbf16> to vector<32x16xbf16>
    %137 = arith.truncf %134 : vector<16x32xf32> to vector<16x32xbf16>
    %cst_95 = arith.constant dense<0.000000e+00> : vector<32x32xf32>
    %138 = tpu.matmul %136, %137, %cst_95 {dimension_numbers = #tpu.dot_dimension_numbers<[1], [0], [0], [1], [0, 0, 1, 1], [], []>} : vector<32x16xbf16>, vector<16x32xbf16>, vector<32x32xf32> -> vector<32x32xf32>
    %139 = arith.addf %131, %138 : vector<32x32xf32>
    %c3_96 = arith.constant 3 : index
    %c0_97 = arith.constant 0 : index
    %c0_98 = arith.constant 0 : index
    %140 = vector.load %arg6[%c3_96, %c0_97, %c0_98] : memref<9x128x32xf32, #tpu.memory_space<vmem>>, vector<1x128x32xf32>
    %141 = vector.shape_cast %140 : vector<1x128x32xf32> to vector<128x32xf32>
    %cst_99 = arith.constant dense<0.000000e+00> : vector<16x32xf32>
    %142 = tpu.matmul %114, %141, %cst_99 {dimension_numbers = #tpu.dot_dimension_numbers<[1], [0], [0], [1], [0, 0, 1, 1], [], []>} : vector<16x128xf32>, vector<128x32xf32>, vector<16x32xf32> -> vector<16x32xf32>
    %c3_100 = arith.constant 3 : index
    %c0_101 = arith.constant 0 : index
    %c0_102 = arith.constant 0 : index
    %143 = vector.load %arg7[%c3_100, %c0_101, %c0_102] : memref<9x32x16xbf16, #tpu.memory_space<vmem>>, vector<1x32x16xbf16>
    %144 = vector.shape_cast %143 : vector<1x32x16xbf16> to vector<32x16xbf16>
    %145 = arith.truncf %142 : vector<16x32xf32> to vector<16x32xbf16>
    %cst_103 = arith.constant dense<0.000000e+00> : vector<32x32xf32>
    %146 = tpu.matmul %144, %145, %cst_103 {dimension_numbers = #tpu.dot_dimension_numbers<[1], [0], [0], [1], [0, 0, 1, 1], [], []>} : vector<32x16xbf16>, vector<16x32xbf16>, vector<32x32xf32> -> vector<32x32xf32>
    %147 = arith.addf %139, %146 : vector<32x32xf32>
    %c4_104 = arith.constant 4 : index
    %c0_105 = arith.constant 0 : index
    %c0_106 = arith.constant 0 : index
    %148 = vector.load %arg6[%c4_104, %c0_105, %c0_106] : memref<9x128x32xf32, #tpu.memory_space<vmem>>, vector<1x128x32xf32>
    %149 = vector.shape_cast %148 : vector<1x128x32xf32> to vector<128x32xf32>
    %cst_107 = arith.constant dense<0.000000e+00> : vector<16x32xf32>
    %150 = tpu.matmul %114, %149, %cst_107 {dimension_numbers = #tpu.dot_dimension_numbers<[1], [0], [0], [1], [0, 0, 1, 1], [], []>} : vector<16x128xf32>, vector<128x32xf32>, vector<16x32xf32> -> vector<16x32xf32>
    %c4_108 = arith.constant 4 : index
    %c0_109 = arith.constant 0 : index
    %c0_110 = arith.constant 0 : index
    %151 = vector.load %arg7[%c4_108, %c0_109, %c0_110] : memref<9x32x16xbf16, #tpu.memory_space<vmem>>, vector<1x32x16xbf16>
    %152 = vector.shape_cast %151 : vector<1x32x16xbf16> to vector<32x16xbf16>
    %153 = arith.truncf %150 : vector<16x32xf32> to vector<16x32xbf16>
    %cst_111 = arith.constant dense<0.000000e+00> : vector<32x32xf32>
    %154 = tpu.matmul %152, %153, %cst_111 {dimension_numbers = #tpu.dot_dimension_numbers<[1], [0], [0], [1], [0, 0, 1, 1], [], []>} : vector<32x16xbf16>, vector<16x32xbf16>, vector<32x32xf32> -> vector<32x32xf32>
    %155 = arith.addf %147, %154 : vector<32x32xf32>
    %c5_112 = arith.constant 5 : index
    %c0_113 = arith.constant 0 : index
    %c0_114 = arith.constant 0 : index
    %156 = vector.load %arg6[%c5_112, %c0_113, %c0_114] : memref<9x128x32xf32, #tpu.memory_space<vmem>>, vector<1x128x32xf32>
    %157 = vector.shape_cast %156 : vector<1x128x32xf32> to vector<128x32xf32>
    %cst_115 = arith.constant dense<0.000000e+00> : vector<16x32xf32>
    %158 = tpu.matmul %114, %157, %cst_115 {dimension_numbers = #tpu.dot_dimension_numbers<[1], [0], [0], [1], [0, 0, 1, 1], [], []>} : vector<16x128xf32>, vector<128x32xf32>, vector<16x32xf32> -> vector<16x32xf32>
    %c5_116 = arith.constant 5 : index
    %c0_117 = arith.constant 0 : index
    %c0_118 = arith.constant 0 : index
    %159 = vector.load %arg7[%c5_116, %c0_117, %c0_118] : memref<9x32x16xbf16, #tpu.memory_space<vmem>>, vector<1x32x16xbf16>
    %160 = vector.shape_cast %159 : vector<1x32x16xbf16> to vector<32x16xbf16>
    %161 = arith.truncf %158 : vector<16x32xf32> to vector<16x32xbf16>
    %cst_119 = arith.constant dense<0.000000e+00> : vector<32x32xf32>
    %162 = tpu.matmul %160, %161, %cst_119 {dimension_numbers = #tpu.dot_dimension_numbers<[1], [0], [0], [1], [0, 0, 1, 1], [], []>} : vector<32x16xbf16>, vector<16x32xbf16>, vector<32x32xf32> -> vector<32x32xf32>
    %163 = arith.addf %155, %162 : vector<32x32xf32>
    %c6_120 = arith.constant 6 : index
    %c0_121 = arith.constant 0 : index
    %c0_122 = arith.constant 0 : index
    %164 = vector.load %arg6[%c6_120, %c0_121, %c0_122] : memref<9x128x32xf32, #tpu.memory_space<vmem>>, vector<1x128x32xf32>
    %165 = vector.shape_cast %164 : vector<1x128x32xf32> to vector<128x32xf32>
    %cst_123 = arith.constant dense<0.000000e+00> : vector<16x32xf32>
    %166 = tpu.matmul %114, %165, %cst_123 {dimension_numbers = #tpu.dot_dimension_numbers<[1], [0], [0], [1], [0, 0, 1, 1], [], []>} : vector<16x128xf32>, vector<128x32xf32>, vector<16x32xf32> -> vector<16x32xf32>
    %c6_124 = arith.constant 6 : index
    %c0_125 = arith.constant 0 : index
    %c0_126 = arith.constant 0 : index
    %167 = vector.load %arg7[%c6_124, %c0_125, %c0_126] : memref<9x32x16xbf16, #tpu.memory_space<vmem>>, vector<1x32x16xbf16>
    %168 = vector.shape_cast %167 : vector<1x32x16xbf16> to vector<32x16xbf16>
    %169 = arith.truncf %166 : vector<16x32xf32> to vector<16x32xbf16>
    %cst_127 = arith.constant dense<0.000000e+00> : vector<32x32xf32>
    %170 = tpu.matmul %168, %169, %cst_127 {dimension_numbers = #tpu.dot_dimension_numbers<[1], [0], [0], [1], [0, 0, 1, 1], [], []>} : vector<32x16xbf16>, vector<16x32xbf16>, vector<32x32xf32> -> vector<32x32xf32>
    %171 = arith.addf %163, %170 : vector<32x32xf32>
    %c7_128 = arith.constant 7 : index
    %c0_129 = arith.constant 0 : index
    %c0_130 = arith.constant 0 : index
    %172 = vector.load %arg6[%c7_128, %c0_129, %c0_130] : memref<9x128x32xf32, #tpu.memory_space<vmem>>, vector<1x128x32xf32>
    %173 = vector.shape_cast %172 : vector<1x128x32xf32> to vector<128x32xf32>
    %cst_131 = arith.constant dense<0.000000e+00> : vector<16x32xf32>
    %174 = tpu.matmul %114, %173, %cst_131 {dimension_numbers = #tpu.dot_dimension_numbers<[1], [0], [0], [1], [0, 0, 1, 1], [], []>} : vector<16x128xf32>, vector<128x32xf32>, vector<16x32xf32> -> vector<16x32xf32>
    %c7_132 = arith.constant 7 : index
    %c0_133 = arith.constant 0 : index
    %c0_134 = arith.constant 0 : index
    %175 = vector.load %arg7[%c7_132, %c0_133, %c0_134] : memref<9x32x16xbf16, #tpu.memory_space<vmem>>, vector<1x32x16xbf16>
    %176 = vector.shape_cast %175 : vector<1x32x16xbf16> to vector<32x16xbf16>
    %177 = arith.truncf %174 : vector<16x32xf32> to vector<16x32xbf16>
    %cst_135 = arith.constant dense<0.000000e+00> : vector<32x32xf32>
    %178 = tpu.matmul %176, %177, %cst_135 {dimension_numbers = #tpu.dot_dimension_numbers<[1], [0], [0], [1], [0, 0, 1, 1], [], []>} : vector<32x16xbf16>, vector<16x32xbf16>, vector<32x32xf32> -> vector<32x32xf32>
    %179 = arith.addf %171, %178 : vector<32x32xf32>
    %c8_136 = arith.constant 8 : index
    %c0_137 = arith.constant 0 : index
    %c0_138 = arith.constant 0 : index
    %180 = vector.load %arg6[%c8_136, %c0_137, %c0_138] : memref<9x128x32xf32, #tpu.memory_space<vmem>>, vector<1x128x32xf32>
    %181 = vector.shape_cast %180 : vector<1x128x32xf32> to vector<128x32xf32>
    %cst_139 = arith.constant dense<0.000000e+00> : vector<16x32xf32>
    %182 = tpu.matmul %114, %181, %cst_139 {dimension_numbers = #tpu.dot_dimension_numbers<[1], [0], [0], [1], [0, 0, 1, 1], [], []>} : vector<16x128xf32>, vector<128x32xf32>, vector<16x32xf32> -> vector<16x32xf32>
    %c8_140 = arith.constant 8 : index
    %c0_141 = arith.constant 0 : index
    %c0_142 = arith.constant 0 : index
    %183 = vector.load %arg7[%c8_140, %c0_141, %c0_142] : memref<9x32x16xbf16, #tpu.memory_space<vmem>>, vector<1x32x16xbf16>
    %184 = vector.shape_cast %183 : vector<1x32x16xbf16> to vector<32x16xbf16>
    %185 = arith.truncf %182 : vector<16x32xf32> to vector<16x32xbf16>
    %cst_143 = arith.constant dense<0.000000e+00> : vector<32x32xf32>
    %186 = tpu.matmul %184, %185, %cst_143 {dimension_numbers = #tpu.dot_dimension_numbers<[1], [0], [0], [1], [0, 0, 1, 1], [], []>} : vector<32x16xbf16>, vector<16x32xbf16>, vector<32x32xf32> -> vector<32x32xf32>
    %187 = arith.addf %179, %186 : vector<32x32xf32>
    %c0_144 = arith.constant 0 : index
    %c0_145 = arith.constant 0 : index
    %188 = vector.load %arg9[%c0_144, %c0_145] : memref<128x32xf32, #tpu.memory_space<vmem>>, vector<128x32xf32>
    %cst_146 = arith.constant dense<0.000000e+00> : vector<16x32xf32>
    %189 = tpu.matmul %109, %188, %cst_146 {dimension_numbers = #tpu.dot_dimension_numbers<[1], [0], [0], [1], [0, 0, 1, 1], [], []>} : vector<16x128xf32>, vector<128x32xf32>, vector<16x32xf32> -> vector<16x32xf32>
    %c0_147 = arith.constant 0 : index
    %c0_148 = arith.constant 0 : index
    %190 = vector.load %arg10[%c0_147, %c0_148] : memref<32x16xf32, #tpu.memory_space<vmem>>, vector<32x16xf32>
    %cst_149 = arith.constant dense<0.000000e+00> : vector<32x32xf32>
    %191 = tpu.matmul %190, %189, %cst_149 {dimension_numbers = #tpu.dot_dimension_numbers<[1], [0], [0], [1], [0, 0, 1, 1], [], []>} : vector<32x16xf32>, vector<16x32xf32>, vector<32x32xf32> -> vector<32x32xf32>
    %192 = arith.addf %187, %191 : vector<32x32xf32>
    %c0_150 = arith.constant 0 : index
    %c0_151 = arith.constant 0 : index
    %193 = vector.load %arg8[%c0_150, %c0_151] : memref<32x1xf32, #tpu.memory_space<vmem>>, vector<32x1xf32>
    %194 = vector.broadcast %193 : vector<32x1xf32> to vector<32x32xf32>
    %195 = arith.addf %192, %194 : vector<32x32xf32>
    %cst_152 = arith.constant 0.000000e+00 : f32
    %196 = vector.broadcast %cst_152 : f32 to vector<32x32xf32>
    %197 = arith.cmpf oge, %195, %196 : vector<32x32xf32>
    %cst_153 = arith.constant 0.00999999977 : f32
    %198 = vector.broadcast %cst_153 : f32 to vector<32x32xf32>
    %199 = arith.mulf %198, %195 : vector<32x32xf32>
    %200 = arith.select %197, %195, %199 : vector<32x32xi1>, vector<32x32xf32>
    %cst_154 = arith.constant 0.000000e+00 : f32
    %201 = vector.broadcast %cst_154 : f32 to vector<128x32xf32>
    %c0_155 = arith.constant 0 : index
    %c0_156 = arith.constant 0 : index
    %c0_157 = arith.constant 0 : index
    %202 = vector.load %arg11[%c0_155, %c0_156, %c0_157] : memref<9x32x32xf32, #tpu.memory_space<vmem>>, vector<1x32x32xf32>
    %203 = vector.shape_cast %202 : vector<1x32x32xf32> to vector<32x32xf32>
    %cst_158 = arith.constant dense<0.000000e+00> : vector<32x32xf32>
    %204 = tpu.matmul %200, %203, %cst_158 {dimension_numbers = #tpu.dot_dimension_numbers<[1], [0], [0], [1], [0, 0, 1, 1], [], []>} : vector<32x32xf32>, vector<32x32xf32>, vector<32x32xf32> -> vector<32x32xf32>
    %c0_159 = arith.constant 0 : index
    %c0_160 = arith.constant 0 : index
    %c0_161 = arith.constant 0 : index
    %205 = vector.load %arg12[%c0_159, %c0_160, %c0_161] : memref<9x128x32xbf16, #tpu.memory_space<vmem>>, vector<1x128x32xbf16>
    %206 = vector.shape_cast %205 : vector<1x128x32xbf16> to vector<128x32xbf16>
    %207 = arith.truncf %204 : vector<32x32xf32> to vector<32x32xbf16>
    %cst_162 = arith.constant dense<0.000000e+00> : vector<128x32xf32>
    %208 = tpu.matmul %206, %207, %cst_162 {dimension_numbers = #tpu.dot_dimension_numbers<[1], [0], [0], [1], [0, 0, 1, 1], [], []>} : vector<128x32xbf16>, vector<32x32xbf16>, vector<128x32xf32> -> vector<128x32xf32>
    %209 = arith.addf %201, %208 : vector<128x32xf32>
    %c1_163 = arith.constant 1 : index
    %c0_164 = arith.constant 0 : index
    %c0_165 = arith.constant 0 : index
    %210 = vector.load %arg11[%c1_163, %c0_164, %c0_165] : memref<9x32x32xf32, #tpu.memory_space<vmem>>, vector<1x32x32xf32>
    %211 = vector.shape_cast %210 : vector<1x32x32xf32> to vector<32x32xf32>
    %cst_166 = arith.constant dense<0.000000e+00> : vector<32x32xf32>
    %212 = tpu.matmul %200, %211, %cst_166 {dimension_numbers = #tpu.dot_dimension_numbers<[1], [0], [0], [1], [0, 0, 1, 1], [], []>} : vector<32x32xf32>, vector<32x32xf32>, vector<32x32xf32> -> vector<32x32xf32>
    %c1_167 = arith.constant 1 : index
    %c0_168 = arith.constant 0 : index
    %c0_169 = arith.constant 0 : index
    %213 = vector.load %arg12[%c1_167, %c0_168, %c0_169] : memref<9x128x32xbf16, #tpu.memory_space<vmem>>, vector<1x128x32xbf16>
    %214 = vector.shape_cast %213 : vector<1x128x32xbf16> to vector<128x32xbf16>
    %215 = arith.truncf %212 : vector<32x32xf32> to vector<32x32xbf16>
    %cst_170 = arith.constant dense<0.000000e+00> : vector<128x32xf32>
    %216 = tpu.matmul %214, %215, %cst_170 {dimension_numbers = #tpu.dot_dimension_numbers<[1], [0], [0], [1], [0, 0, 1, 1], [], []>} : vector<128x32xbf16>, vector<32x32xbf16>, vector<128x32xf32> -> vector<128x32xf32>
    %217 = arith.addf %209, %216 : vector<128x32xf32>
    %c2_171 = arith.constant 2 : index
    %c0_172 = arith.constant 0 : index
    %c0_173 = arith.constant 0 : index
    %218 = vector.load %arg11[%c2_171, %c0_172, %c0_173] : memref<9x32x32xf32, #tpu.memory_space<vmem>>, vector<1x32x32xf32>
    %219 = vector.shape_cast %218 : vector<1x32x32xf32> to vector<32x32xf32>
    %cst_174 = arith.constant dense<0.000000e+00> : vector<32x32xf32>
    %220 = tpu.matmul %200, %219, %cst_174 {dimension_numbers = #tpu.dot_dimension_numbers<[1], [0], [0], [1], [0, 0, 1, 1], [], []>} : vector<32x32xf32>, vector<32x32xf32>, vector<32x32xf32> -> vector<32x32xf32>
    %c2_175 = arith.constant 2 : index
    %c0_176 = arith.constant 0 : index
    %c0_177 = arith.constant 0 : index
    %221 = vector.load %arg12[%c2_175, %c0_176, %c0_177] : memref<9x128x32xbf16, #tpu.memory_space<vmem>>, vector<1x128x32xbf16>
    %222 = vector.shape_cast %221 : vector<1x128x32xbf16> to vector<128x32xbf16>
    %223 = arith.truncf %220 : vector<32x32xf32> to vector<32x32xbf16>
    %cst_178 = arith.constant dense<0.000000e+00> : vector<128x32xf32>
    %224 = tpu.matmul %222, %223, %cst_178 {dimension_numbers = #tpu.dot_dimension_numbers<[1], [0], [0], [1], [0, 0, 1, 1], [], []>} : vector<128x32xbf16>, vector<32x32xbf16>, vector<128x32xf32> -> vector<128x32xf32>
    %225 = arith.addf %217, %224 : vector<128x32xf32>
    %c3_179 = arith.constant 3 : index
    %c0_180 = arith.constant 0 : index
    %c0_181 = arith.constant 0 : index
    %226 = vector.load %arg11[%c3_179, %c0_180, %c0_181] : memref<9x32x32xf32, #tpu.memory_space<vmem>>, vector<1x32x32xf32>
    %227 = vector.shape_cast %226 : vector<1x32x32xf32> to vector<32x32xf32>
    %cst_182 = arith.constant dense<0.000000e+00> : vector<32x32xf32>
    %228 = tpu.matmul %200, %227, %cst_182 {dimension_numbers = #tpu.dot_dimension_numbers<[1], [0], [0], [1], [0, 0, 1, 1], [], []>} : vector<32x32xf32>, vector<32x32xf32>, vector<32x32xf32> -> vector<32x32xf32>
    %c3_183 = arith.constant 3 : index
    %c0_184 = arith.constant 0 : index
    %c0_185 = arith.constant 0 : index
    %229 = vector.load %arg12[%c3_183, %c0_184, %c0_185] : memref<9x128x32xbf16, #tpu.memory_space<vmem>>, vector<1x128x32xbf16>
    %230 = vector.shape_cast %229 : vector<1x128x32xbf16> to vector<128x32xbf16>
    %231 = arith.truncf %228 : vector<32x32xf32> to vector<32x32xbf16>
    %cst_186 = arith.constant dense<0.000000e+00> : vector<128x32xf32>
    %232 = tpu.matmul %230, %231, %cst_186 {dimension_numbers = #tpu.dot_dimension_numbers<[1], [0], [0], [1], [0, 0, 1, 1], [], []>} : vector<128x32xbf16>, vector<32x32xbf16>, vector<128x32xf32> -> vector<128x32xf32>
    %233 = arith.addf %225, %232 : vector<128x32xf32>
    %c4_187 = arith.constant 4 : index
    %c0_188 = arith.constant 0 : index
    %c0_189 = arith.constant 0 : index
    %234 = vector.load %arg11[%c4_187, %c0_188, %c0_189] : memref<9x32x32xf32, #tpu.memory_space<vmem>>, vector<1x32x32xf32>
    %235 = vector.shape_cast %234 : vector<1x32x32xf32> to vector<32x32xf32>
    %cst_190 = arith.constant dense<0.000000e+00> : vector<32x32xf32>
    %236 = tpu.matmul %200, %235, %cst_190 {dimension_numbers = #tpu.dot_dimension_numbers<[1], [0], [0], [1], [0, 0, 1, 1], [], []>} : vector<32x32xf32>, vector<32x32xf32>, vector<32x32xf32> -> vector<32x32xf32>
    %c4_191 = arith.constant 4 : index
    %c0_192 = arith.constant 0 : index
    %c0_193 = arith.constant 0 : index
    %237 = vector.load %arg12[%c4_191, %c0_192, %c0_193] : memref<9x128x32xbf16, #tpu.memory_space<vmem>>, vector<1x128x32xbf16>
    %238 = vector.shape_cast %237 : vector<1x128x32xbf16> to vector<128x32xbf16>
    %239 = arith.truncf %236 : vector<32x32xf32> to vector<32x32xbf16>
    %cst_194 = arith.constant dense<0.000000e+00> : vector<128x32xf32>
    %240 = tpu.matmul %238, %239, %cst_194 {dimension_numbers = #tpu.dot_dimension_numbers<[1], [0], [0], [1], [0, 0, 1, 1], [], []>} : vector<128x32xbf16>, vector<32x32xbf16>, vector<128x32xf32> -> vector<128x32xf32>
    %241 = arith.addf %233, %240 : vector<128x32xf32>
    %c5_195 = arith.constant 5 : index
    %c0_196 = arith.constant 0 : index
    %c0_197 = arith.constant 0 : index
    %242 = vector.load %arg11[%c5_195, %c0_196, %c0_197] : memref<9x32x32xf32, #tpu.memory_space<vmem>>, vector<1x32x32xf32>
    %243 = vector.shape_cast %242 : vector<1x32x32xf32> to vector<32x32xf32>
    %cst_198 = arith.constant dense<0.000000e+00> : vector<32x32xf32>
    %244 = tpu.matmul %200, %243, %cst_198 {dimension_numbers = #tpu.dot_dimension_numbers<[1], [0], [0], [1], [0, 0, 1, 1], [], []>} : vector<32x32xf32>, vector<32x32xf32>, vector<32x32xf32> -> vector<32x32xf32>
    %c5_199 = arith.constant 5 : index
    %c0_200 = arith.constant 0 : index
    %c0_201 = arith.constant 0 : index
    %245 = vector.load %arg12[%c5_199, %c0_200, %c0_201] : memref<9x128x32xbf16, #tpu.memory_space<vmem>>, vector<1x128x32xbf16>
    %246 = vector.shape_cast %245 : vector<1x128x32xbf16> to vector<128x32xbf16>
    %247 = arith.truncf %244 : vector<32x32xf32> to vector<32x32xbf16>
    %cst_202 = arith.constant dense<0.000000e+00> : vector<128x32xf32>
    %248 = tpu.matmul %246, %247, %cst_202 {dimension_numbers = #tpu.dot_dimension_numbers<[1], [0], [0], [1], [0, 0, 1, 1], [], []>} : vector<128x32xbf16>, vector<32x32xbf16>, vector<128x32xf32> -> vector<128x32xf32>
    %249 = arith.addf %241, %248 : vector<128x32xf32>
    %c6_203 = arith.constant 6 : index
    %c0_204 = arith.constant 0 : index
    %c0_205 = arith.constant 0 : index
    %250 = vector.load %arg11[%c6_203, %c0_204, %c0_205] : memref<9x32x32xf32, #tpu.memory_space<vmem>>, vector<1x32x32xf32>
    %251 = vector.shape_cast %250 : vector<1x32x32xf32> to vector<32x32xf32>
    %cst_206 = arith.constant dense<0.000000e+00> : vector<32x32xf32>
    %252 = tpu.matmul %200, %251, %cst_206 {dimension_numbers = #tpu.dot_dimension_numbers<[1], [0], [0], [1], [0, 0, 1, 1], [], []>} : vector<32x32xf32>, vector<32x32xf32>, vector<32x32xf32> -> vector<32x32xf32>
    %c6_207 = arith.constant 6 : index
    %c0_208 = arith.constant 0 : index
    %c0_209 = arith.constant 0 : index
    %253 = vector.load %arg12[%c6_207, %c0_208, %c0_209] : memref<9x128x32xbf16, #tpu.memory_space<vmem>>, vector<1x128x32xbf16>
    %254 = vector.shape_cast %253 : vector<1x128x32xbf16> to vector<128x32xbf16>
    %255 = arith.truncf %252 : vector<32x32xf32> to vector<32x32xbf16>
    %cst_210 = arith.constant dense<0.000000e+00> : vector<128x32xf32>
    %256 = tpu.matmul %254, %255, %cst_210 {dimension_numbers = #tpu.dot_dimension_numbers<[1], [0], [0], [1], [0, 0, 1, 1], [], []>} : vector<128x32xbf16>, vector<32x32xbf16>, vector<128x32xf32> -> vector<128x32xf32>
    %257 = arith.addf %249, %256 : vector<128x32xf32>
    %c7_211 = arith.constant 7 : index
    %c0_212 = arith.constant 0 : index
    %c0_213 = arith.constant 0 : index
    %258 = vector.load %arg11[%c7_211, %c0_212, %c0_213] : memref<9x32x32xf32, #tpu.memory_space<vmem>>, vector<1x32x32xf32>
    %259 = vector.shape_cast %258 : vector<1x32x32xf32> to vector<32x32xf32>
    %cst_214 = arith.constant dense<0.000000e+00> : vector<32x32xf32>
    %260 = tpu.matmul %200, %259, %cst_214 {dimension_numbers = #tpu.dot_dimension_numbers<[1], [0], [0], [1], [0, 0, 1, 1], [], []>} : vector<32x32xf32>, vector<32x32xf32>, vector<32x32xf32> -> vector<32x32xf32>
    %c7_215 = arith.constant 7 : index
    %c0_216 = arith.constant 0 : index
    %c0_217 = arith.constant 0 : index
    %261 = vector.load %arg12[%c7_215, %c0_216, %c0_217] : memref<9x128x32xbf16, #tpu.memory_space<vmem>>, vector<1x128x32xbf16>
    %262 = vector.shape_cast %261 : vector<1x128x32xbf16> to vector<128x32xbf16>
    %263 = arith.truncf %260 : vector<32x32xf32> to vector<32x32xbf16>
    %cst_218 = arith.constant dense<0.000000e+00> : vector<128x32xf32>
    %264 = tpu.matmul %262, %263, %cst_218 {dimension_numbers = #tpu.dot_dimension_numbers<[1], [0], [0], [1], [0, 0, 1, 1], [], []>} : vector<128x32xbf16>, vector<32x32xbf16>, vector<128x32xf32> -> vector<128x32xf32>
    %265 = arith.addf %257, %264 : vector<128x32xf32>
    %c8_219 = arith.constant 8 : index
    %c0_220 = arith.constant 0 : index
    %c0_221 = arith.constant 0 : index
    %266 = vector.load %arg11[%c8_219, %c0_220, %c0_221] : memref<9x32x32xf32, #tpu.memory_space<vmem>>, vector<1x32x32xf32>
    %267 = vector.shape_cast %266 : vector<1x32x32xf32> to vector<32x32xf32>
    %cst_222 = arith.constant dense<0.000000e+00> : vector<32x32xf32>
    %268 = tpu.matmul %200, %267, %cst_222 {dimension_numbers = #tpu.dot_dimension_numbers<[1], [0], [0], [1], [0, 0, 1, 1], [], []>} : vector<32x32xf32>, vector<32x32xf32>, vector<32x32xf32> -> vector<32x32xf32>
    %c8_223 = arith.constant 8 : index
    %c0_224 = arith.constant 0 : index
    %c0_225 = arith.constant 0 : index
    %269 = vector.load %arg12[%c8_223, %c0_224, %c0_225] : memref<9x128x32xbf16, #tpu.memory_space<vmem>>, vector<1x128x32xbf16>
    %270 = vector.shape_cast %269 : vector<1x128x32xbf16> to vector<128x32xbf16>
    %271 = arith.truncf %268 : vector<32x32xf32> to vector<32x32xbf16>
    %cst_226 = arith.constant dense<0.000000e+00> : vector<128x32xf32>
    %272 = tpu.matmul %270, %271, %cst_226 {dimension_numbers = #tpu.dot_dimension_numbers<[1], [0], [0], [1], [0, 0, 1, 1], [], []>} : vector<128x32xbf16>, vector<32x32xbf16>, vector<128x32xf32> -> vector<128x32xf32>
    %273 = arith.addf %265, %272 : vector<128x32xf32>
    %cst_227 = arith.constant 0.000000e+00 : f32
    %274 = vector.broadcast %cst_227 : f32 to vector<32x128xf32>
    %275 = vector.extract_strided_slice %273 {offsets = [0, 0], sizes = [32, 32], strides = [1, 1]} : vector<128x32xf32> to vector<32x32xf32>
    %c0_228 = arith.constant 0 : index
    %c0_229 = arith.constant 0 : index
    %c0_230 = arith.constant 0 : index
    %276 = vector.load %arg14[%c0_228, %c0_229, %c0_230] : memref<4x32x128xf32, #tpu.memory_space<vmem>>, vector<1x32x128xf32>
    %277 = vector.shape_cast %276 : vector<1x32x128xf32> to vector<32x128xf32>
    %cst_231 = arith.constant dense<0.000000e+00> : vector<32x128xf32>
    %278 = tpu.matmul %275, %277, %cst_231 {dimension_numbers = #tpu.dot_dimension_numbers<[1], [0], [0], [1], [0, 0, 1, 1], [], []>} : vector<32x32xf32>, vector<32x128xf32>, vector<32x128xf32> -> vector<32x128xf32>
    %279 = arith.addf %274, %278 : vector<32x128xf32>
    %280 = vector.extract_strided_slice %273 {offsets = [32, 0], sizes = [32, 32], strides = [1, 1]} : vector<128x32xf32> to vector<32x32xf32>
    %c1_232 = arith.constant 1 : index
    %c0_233 = arith.constant 0 : index
    %c0_234 = arith.constant 0 : index
    %281 = vector.load %arg14[%c1_232, %c0_233, %c0_234] : memref<4x32x128xf32, #tpu.memory_space<vmem>>, vector<1x32x128xf32>
    %282 = vector.shape_cast %281 : vector<1x32x128xf32> to vector<32x128xf32>
    %cst_235 = arith.constant dense<0.000000e+00> : vector<32x128xf32>
    %283 = tpu.matmul %280, %282, %cst_235 {dimension_numbers = #tpu.dot_dimension_numbers<[1], [0], [0], [1], [0, 0, 1, 1], [], []>} : vector<32x32xf32>, vector<32x128xf32>, vector<32x128xf32> -> vector<32x128xf32>
    %284 = arith.addf %279, %283 : vector<32x128xf32>
    %285 = vector.extract_strided_slice %273 {offsets = [64, 0], sizes = [32, 32], strides = [1, 1]} : vector<128x32xf32> to vector<32x32xf32>
    %c2_236 = arith.constant 2 : index
    %c0_237 = arith.constant 0 : index
    %c0_238 = arith.constant 0 : index
    %286 = vector.load %arg14[%c2_236, %c0_237, %c0_238] : memref<4x32x128xf32, #tpu.memory_space<vmem>>, vector<1x32x128xf32>
    %287 = vector.shape_cast %286 : vector<1x32x128xf32> to vector<32x128xf32>
    %cst_239 = arith.constant dense<0.000000e+00> : vector<32x128xf32>
    %288 = tpu.matmul %285, %287, %cst_239 {dimension_numbers = #tpu.dot_dimension_numbers<[1], [0], [0], [1], [0, 0, 1, 1], [], []>} : vector<32x32xf32>, vector<32x128xf32>, vector<32x128xf32> -> vector<32x128xf32>
    %289 = arith.addf %284, %288 : vector<32x128xf32>
    %290 = vector.extract_strided_slice %273 {offsets = [96, 0], sizes = [32, 32], strides = [1, 1]} : vector<128x32xf32> to vector<32x32xf32>
    %c3_240 = arith.constant 3 : index
    %c0_241 = arith.constant 0 : index
    %c0_242 = arith.constant 0 : index
    %291 = vector.load %arg14[%c3_240, %c0_241, %c0_242] : memref<4x32x128xf32, #tpu.memory_space<vmem>>, vector<1x32x128xf32>
    %292 = vector.shape_cast %291 : vector<1x32x128xf32> to vector<32x128xf32>
    %cst_243 = arith.constant dense<0.000000e+00> : vector<32x128xf32>
    %293 = tpu.matmul %290, %292, %cst_243 {dimension_numbers = #tpu.dot_dimension_numbers<[1], [0], [0], [1], [0, 0, 1, 1], [], []>} : vector<32x32xf32>, vector<32x128xf32>, vector<32x128xf32> -> vector<32x128xf32>
    %294 = arith.addf %289, %293 : vector<32x128xf32>
    %c0_244 = arith.constant 0 : index
    %c0_245 = arith.constant 0 : index
    %295 = vector.load %arg13[%c0_244, %c0_245] : memref<32x1xf32, #tpu.memory_space<vmem>>, vector<32x1xf32>
    %296 = vector.broadcast %295 : vector<32x1xf32> to vector<32x128xf32>
    %297 = arith.addf %294, %296 : vector<32x128xf32>
    %c0_246 = arith.constant 0 : index
    %c0_247 = arith.constant 0 : index
    %298 = vector.load %arg15[%c0_246, %c0_247] : memref<32x128xf32, #tpu.memory_space<vmem>>, vector<32x128xf32>
    %cst_248 = arith.constant dense<0.000000e+00> : vector<32x128xf32>
    %299 = tpu.matmul %195, %298, %cst_248 {dimension_numbers = #tpu.dot_dimension_numbers<[1], [0], [0], [1], [0, 0, 1, 1], [], []>} : vector<32x32xf32>, vector<32x128xf32>, vector<32x128xf32> -> vector<32x128xf32>
    %300 = arith.addf %297, %299 : vector<32x128xf32>
    %c0_249 = arith.constant 0 : index
    %c0_250 = arith.constant 0 : index
    %301 = vector.load %arg25[%c0_249, %c0_250] : memref<48x128xf32, #tpu.memory_space<vmem>>, vector<32x128xf32>
    tpu.vector_store %arg25[%c0_249, %c0_250], %300 {strides = array<i32>} : memref<48x128xf32, #tpu.memory_space<vmem>>, vector<32x128xf32>,
    %c32 = arith.constant 32 : index
    %c0_251 = arith.constant 0 : index
    %302 = vector.load %arg25[%c32, %c0_251] : memref<48x128xf32, #tpu.memory_space<vmem>>, vector<16x128xf32>
    tpu.vector_store %arg25[%c32, %c0_251], %109 {strides = array<i32>} : memref<48x128xf32, #tpu.memory_space<vmem>>, vector<16x128xf32>,
    %c0_252 = arith.constant 0 : index
    %c0_253 = arith.constant 0 : index
    %303 = vector.load %arg25[%c0_252, %c0_253] : memref<48x128xf32, #tpu.memory_space<vmem>>, vector<48x128xf32>
    %cst_254 = arith.constant 0.000000e+00 : f32
    %304 = vector.broadcast %cst_254 : f32 to vector<48x128xf32>
    %305 = arith.cmpf oge, %303, %304 : vector<48x128xf32>
    %cst_255 = arith.constant 0.00999999977 : f32
    %306 = vector.broadcast %cst_255 : f32 to vector<48x128xf32>
    %307 = arith.mulf %306, %303 : vector<48x128xf32>
    %308 = arith.select %305, %303, %307 : vector<48x128xi1>, vector<48x128xf32>
    %cst_256 = arith.constant 0.000000e+00 : f32
    %309 = vector.broadcast %cst_256 : f32 to vector<64x128xf32>
    %c0_257 = arith.constant 0 : index
    %c0_258 = arith.constant 0 : index
    %c0_259 = arith.constant 0 : index
    %310 = vector.load %arg16[%c0_257, %c0_258, %c0_259] : memref<9x128x128xf32, #tpu.memory_space<vmem>>, vector<1x128x128xf32>
    %311 = vector.shape_cast %310 : vector<1x128x128xf32> to vector<128x128xf32>
    %cst_260 = arith.constant dense<0.000000e+00> : vector<48x128xf32>
    %312 = tpu.matmul %308, %311, %cst_260 {dimension_numbers = #tpu.dot_dimension_numbers<[1], [0], [0], [1], [0, 0, 1, 1], [], []>} : vector<48x128xf32>, vector<128x128xf32>, vector<48x128xf32> -> vector<48x128xf32>
    %c0_261 = arith.constant 0 : index
    %c0_262 = arith.constant 0 : index
    %c0_263 = arith.constant 0 : index
    %313 = vector.load %arg17[%c0_261, %c0_262, %c0_263] : memref<9x64x48xbf16, #tpu.memory_space<vmem>>, vector<1x64x48xbf16>
    %314 = vector.shape_cast %313 : vector<1x64x48xbf16> to vector<64x48xbf16>
    %315 = arith.truncf %312 : vector<48x128xf32> to vector<48x128xbf16>
    %cst_264 = arith.constant dense<0.000000e+00> : vector<64x128xf32>
    %316 = tpu.matmul %314, %315, %cst_264 {dimension_numbers = #tpu.dot_dimension_numbers<[1], [0], [0], [1], [0, 0, 1, 1], [], []>} : vector<64x48xbf16>, vector<48x128xbf16>, vector<64x128xf32> -> vector<64x128xf32>
    %317 = arith.addf %309, %316 : vector<64x128xf32>
    %c1_265 = arith.constant 1 : index
    %c0_266 = arith.constant 0 : index
    %c0_267 = arith.constant 0 : index
    %318 = vector.load %arg16[%c1_265, %c0_266, %c0_267] : memref<9x128x128xf32, #tpu.memory_space<vmem>>, vector<1x128x128xf32>
    %319 = vector.shape_cast %318 : vector<1x128x128xf32> to vector<128x128xf32>
    %cst_268 = arith.constant dense<0.000000e+00> : vector<48x128xf32>
    %320 = tpu.matmul %308, %319, %cst_268 {dimension_numbers = #tpu.dot_dimension_numbers<[1], [0], [0], [1], [0, 0, 1, 1], [], []>} : vector<48x128xf32>, vector<128x128xf32>, vector<48x128xf32> -> vector<48x128xf32>
    %c1_269 = arith.constant 1 : index
    %c0_270 = arith.constant 0 : index
    %c0_271 = arith.constant 0 : index
    %321 = vector.load %arg17[%c1_269, %c0_270, %c0_271] : memref<9x64x48xbf16, #tpu.memory_space<vmem>>, vector<1x64x48xbf16>
    %322 = vector.shape_cast %321 : vector<1x64x48xbf16> to vector<64x48xbf16>
    %323 = arith.truncf %320 : vector<48x128xf32> to vector<48x128xbf16>
    %cst_272 = arith.constant dense<0.000000e+00> : vector<64x128xf32>
    %324 = tpu.matmul %322, %323, %cst_272 {dimension_numbers = #tpu.dot_dimension_numbers<[1], [0], [0], [1], [0, 0, 1, 1], [], []>} : vector<64x48xbf16>, vector<48x128xbf16>, vector<64x128xf32> -> vector<64x128xf32>
    %325 = arith.addf %317, %324 : vector<64x128xf32>
    %c2_273 = arith.constant 2 : index
    %c0_274 = arith.constant 0 : index
    %c0_275 = arith.constant 0 : index
    %326 = vector.load %arg16[%c2_273, %c0_274, %c0_275] : memref<9x128x128xf32, #tpu.memory_space<vmem>>, vector<1x128x128xf32>
    %327 = vector.shape_cast %326 : vector<1x128x128xf32> to vector<128x128xf32>
    %cst_276 = arith.constant dense<0.000000e+00> : vector<48x128xf32>
    %328 = tpu.matmul %308, %327, %cst_276 {dimension_numbers = #tpu.dot_dimension_numbers<[1], [0], [0], [1], [0, 0, 1, 1], [], []>} : vector<48x128xf32>, vector<128x128xf32>, vector<48x128xf32> -> vector<48x128xf32>
    %c2_277 = arith.constant 2 : index
    %c0_278 = arith.constant 0 : index
    %c0_279 = arith.constant 0 : index
    %329 = vector.load %arg17[%c2_277, %c0_278, %c0_279] : memref<9x64x48xbf16, #tpu.memory_space<vmem>>, vector<1x64x48xbf16>
    %330 = vector.shape_cast %329 : vector<1x64x48xbf16> to vector<64x48xbf16>
    %331 = arith.truncf %328 : vector<48x128xf32> to vector<48x128xbf16>
    %cst_280 = arith.constant dense<0.000000e+00> : vector<64x128xf32>
    %332 = tpu.matmul %330, %331, %cst_280 {dimension_numbers = #tpu.dot_dimension_numbers<[1], [0], [0], [1], [0, 0, 1, 1], [], []>} : vector<64x48xbf16>, vector<48x128xbf16>, vector<64x128xf32> -> vector<64x128xf32>
    %333 = arith.addf %325, %332 : vector<64x128xf32>
    %c3_281 = arith.constant 3 : index
    %c0_282 = arith.constant 0 : index
    %c0_283 = arith.constant 0 : index
    %334 = vector.load %arg16[%c3_281, %c0_282, %c0_283] : memref<9x128x128xf32, #tpu.memory_space<vmem>>, vector<1x128x128xf32>
    %335 = vector.shape_cast %334 : vector<1x128x128xf32> to vector<128x128xf32>
    %cst_284 = arith.constant dense<0.000000e+00> : vector<48x128xf32>
    %336 = tpu.matmul %308, %335, %cst_284 {dimension_numbers = #tpu.dot_dimension_numbers<[1], [0], [0], [1], [0, 0, 1, 1], [], []>} : vector<48x128xf32>, vector<128x128xf32>, vector<48x128xf32> -> vector<48x128xf32>
    %c3_285 = arith.constant 3 : index
    %c0_286 = arith.constant 0 : index
    %c0_287 = arith.constant 0 : index
    %337 = vector.load %arg17[%c3_285, %c0_286, %c0_287] : memref<9x64x48xbf16, #tpu.memory_space<vmem>>, vector<1x64x48xbf16>
    %338 = vector.shape_cast %337 : vector<1x64x48xbf16> to vector<64x48xbf16>
    %339 = arith.truncf %336 : vector<48x128xf32> to vector<48x128xbf16>
    %cst_288 = arith.constant dense<0.000000e+00> : vector<64x128xf32>
    %340 = tpu.matmul %338, %339, %cst_288 {dimension_numbers = #tpu.dot_dimension_numbers<[1], [0], [0], [1], [0, 0, 1, 1], [], []>} : vector<64x48xbf16>, vector<48x128xbf16>, vector<64x128xf32> -> vector<64x128xf32>
    %341 = arith.addf %333, %340 : vector<64x128xf32>
    %c4_289 = arith.constant 4 : index
    %c0_290 = arith.constant 0 : index
    %c0_291 = arith.constant 0 : index
    %342 = vector.load %arg16[%c4_289, %c0_290, %c0_291] : memref<9x128x128xf32, #tpu.memory_space<vmem>>, vector<1x128x128xf32>
    %343 = vector.shape_cast %342 : vector<1x128x128xf32> to vector<128x128xf32>
    %cst_292 = arith.constant dense<0.000000e+00> : vector<48x128xf32>
    %344 = tpu.matmul %308, %343, %cst_292 {dimension_numbers = #tpu.dot_dimension_numbers<[1], [0], [0], [1], [0, 0, 1, 1], [], []>} : vector<48x128xf32>, vector<128x128xf32>, vector<48x128xf32> -> vector<48x128xf32>
    %c4_293 = arith.constant 4 : index
    %c0_294 = arith.constant 0 : index
    %c0_295 = arith.constant 0 : index
    %345 = vector.load %arg17[%c4_293, %c0_294, %c0_295] : memref<9x64x48xbf16, #tpu.memory_space<vmem>>, vector<1x64x48xbf16>
    %346 = vector.shape_cast %345 : vector<1x64x48xbf16> to vector<64x48xbf16>
    %347 = arith.truncf %344 : vector<48x128xf32> to vector<48x128xbf16>
    %cst_296 = arith.constant dense<0.000000e+00> : vector<64x128xf32>
    %348 = tpu.matmul %346, %347, %cst_296 {dimension_numbers = #tpu.dot_dimension_numbers<[1], [0], [0], [1], [0, 0, 1, 1], [], []>} : vector<64x48xbf16>, vector<48x128xbf16>, vector<64x128xf32> -> vector<64x128xf32>
    %349 = arith.addf %341, %348 : vector<64x128xf32>
    %c5_297 = arith.constant 5 : index
    %c0_298 = arith.constant 0 : index
    %c0_299 = arith.constant 0 : index
    %350 = vector.load %arg16[%c5_297, %c0_298, %c0_299] : memref<9x128x128xf32, #tpu.memory_space<vmem>>, vector<1x128x128xf32>
    %351 = vector.shape_cast %350 : vector<1x128x128xf32> to vector<128x128xf32>
    %cst_300 = arith.constant dense<0.000000e+00> : vector<48x128xf32>
    %352 = tpu.matmul %308, %351, %cst_300 {dimension_numbers = #tpu.dot_dimension_numbers<[1], [0], [0], [1], [0, 0, 1, 1], [], []>} : vector<48x128xf32>, vector<128x128xf32>, vector<48x128xf32> -> vector<48x128xf32>
    %c5_301 = arith.constant 5 : index
    %c0_302 = arith.constant 0 : index
    %c0_303 = arith.constant 0 : index
    %353 = vector.load %arg17[%c5_301, %c0_302, %c0_303] : memref<9x64x48xbf16, #tpu.memory_space<vmem>>, vector<1x64x48xbf16>
    %354 = vector.shape_cast %353 : vector<1x64x48xbf16> to vector<64x48xbf16>
    %355 = arith.truncf %352 : vector<48x128xf32> to vector<48x128xbf16>
    %cst_304 = arith.constant dense<0.000000e+00> : vector<64x128xf32>
    %356 = tpu.matmul %354, %355, %cst_304 {dimension_numbers = #tpu.dot_dimension_numbers<[1], [0], [0], [1], [0, 0, 1, 1], [], []>} : vector<64x48xbf16>, vector<48x128xbf16>, vector<64x128xf32> -> vector<64x128xf32>
    %357 = arith.addf %349, %356 : vector<64x128xf32>
    %c6_305 = arith.constant 6 : index
    %c0_306 = arith.constant 0 : index
    %c0_307 = arith.constant 0 : index
    %358 = vector.load %arg16[%c6_305, %c0_306, %c0_307] : memref<9x128x128xf32, #tpu.memory_space<vmem>>, vector<1x128x128xf32>
    %359 = vector.shape_cast %358 : vector<1x128x128xf32> to vector<128x128xf32>
    %cst_308 = arith.constant dense<0.000000e+00> : vector<48x128xf32>
    %360 = tpu.matmul %308, %359, %cst_308 {dimension_numbers = #tpu.dot_dimension_numbers<[1], [0], [0], [1], [0, 0, 1, 1], [], []>} : vector<48x128xf32>, vector<128x128xf32>, vector<48x128xf32> -> vector<48x128xf32>
    %c6_309 = arith.constant 6 : index
    %c0_310 = arith.constant 0 : index
    %c0_311 = arith.constant 0 : index
    %361 = vector.load %arg17[%c6_309, %c0_310, %c0_311] : memref<9x64x48xbf16, #tpu.memory_space<vmem>>, vector<1x64x48xbf16>
    %362 = vector.shape_cast %361 : vector<1x64x48xbf16> to vector<64x48xbf16>
    %363 = arith.truncf %360 : vector<48x128xf32> to vector<48x128xbf16>
    %cst_312 = arith.constant dense<0.000000e+00> : vector<64x128xf32>
    %364 = tpu.matmul %362, %363, %cst_312 {dimension_numbers = #tpu.dot_dimension_numbers<[1], [0], [0], [1], [0, 0, 1, 1], [], []>} : vector<64x48xbf16>, vector<48x128xbf16>, vector<64x128xf32> -> vector<64x128xf32>
    %365 = arith.addf %357, %364 : vector<64x128xf32>
    %c7_313 = arith.constant 7 : index
    %c0_314 = arith.constant 0 : index
    %c0_315 = arith.constant 0 : index
    %366 = vector.load %arg16[%c7_313, %c0_314, %c0_315] : memref<9x128x128xf32, #tpu.memory_space<vmem>>, vector<1x128x128xf32>
    %367 = vector.shape_cast %366 : vector<1x128x128xf32> to vector<128x128xf32>
    %cst_316 = arith.constant dense<0.000000e+00> : vector<48x128xf32>
    %368 = tpu.matmul %308, %367, %cst_316 {dimension_numbers = #tpu.dot_dimension_numbers<[1], [0], [0], [1], [0, 0, 1, 1], [], []>} : vector<48x128xf32>, vector<128x128xf32>, vector<48x128xf32> -> vector<48x128xf32>
    %c7_317 = arith.constant 7 : index
    %c0_318 = arith.constant 0 : index
    %c0_319 = arith.constant 0 : index
    %369 = vector.load %arg17[%c7_317, %c0_318, %c0_319] : memref<9x64x48xbf16, #tpu.memory_space<vmem>>, vector<1x64x48xbf16>
    %370 = vector.shape_cast %369 : vector<1x64x48xbf16> to vector<64x48xbf16>
    %371 = arith.truncf %368 : vector<48x128xf32> to vector<48x128xbf16>
    %cst_320 = arith.constant dense<0.000000e+00> : vector<64x128xf32>
    %372 = tpu.matmul %370, %371, %cst_320 {dimension_numbers = #tpu.dot_dimension_numbers<[1], [0], [0], [1], [0, 0, 1, 1], [], []>} : vector<64x48xbf16>, vector<48x128xbf16>, vector<64x128xf32> -> vector<64x128xf32>
    %373 = arith.addf %365, %372 : vector<64x128xf32>
    %c8_321 = arith.constant 8 : index
    %c0_322 = arith.constant 0 : index
    %c0_323 = arith.constant 0 : index
    %374 = vector.load %arg16[%c8_321, %c0_322, %c0_323] : memref<9x128x128xf32, #tpu.memory_space<vmem>>, vector<1x128x128xf32>
    %375 = vector.shape_cast %374 : vector<1x128x128xf32> to vector<128x128xf32>
    %cst_324 = arith.constant dense<0.000000e+00> : vector<48x128xf32>
    %376 = tpu.matmul %308, %375, %cst_324 {dimension_numbers = #tpu.dot_dimension_numbers<[1], [0], [0], [1], [0, 0, 1, 1], [], []>} : vector<48x128xf32>, vector<128x128xf32>, vector<48x128xf32> -> vector<48x128xf32>
    %c8_325 = arith.constant 8 : index
    %c0_326 = arith.constant 0 : index
    %c0_327 = arith.constant 0 : index
    %377 = vector.load %arg17[%c8_325, %c0_326, %c0_327] : memref<9x64x48xbf16, #tpu.memory_space<vmem>>, vector<1x64x48xbf16>
    %378 = vector.shape_cast %377 : vector<1x64x48xbf16> to vector<64x48xbf16>
    %379 = arith.truncf %376 : vector<48x128xf32> to vector<48x128xbf16>
    %cst_328 = arith.constant dense<0.000000e+00> : vector<64x128xf32>
    %380 = tpu.matmul %378, %379, %cst_328 {dimension_numbers = #tpu.dot_dimension_numbers<[1], [0], [0], [1], [0, 0, 1, 1], [], []>} : vector<64x48xbf16>, vector<48x128xbf16>, vector<64x128xf32> -> vector<64x128xf32>
    %381 = arith.addf %373, %380 : vector<64x128xf32>
    %cst_329 = arith.constant 0.000000e+00 : f32
    %382 = vector.broadcast %cst_329 : f32 to vector<16x512xf32>
    %383 = vector.extract_strided_slice %381 {offsets = [0, 0], sizes = [16, 128], strides = [1, 1]} : vector<64x128xf32> to vector<16x128xf32>
    %c0_330 = arith.constant 0 : index
    %c0_331 = arith.constant 0 : index
    %c0_332 = arith.constant 0 : index
    %384 = vector.load %arg19[%c0_330, %c0_331, %c0_332] : memref<4x128x512xf32, #tpu.memory_space<vmem>>, vector<1x128x512xf32>
    %385 = vector.shape_cast %384 : vector<1x128x512xf32> to vector<128x512xf32>
    %cst_333 = arith.constant dense<0.000000e+00> : vector<16x512xf32>
    %386 = tpu.matmul %383, %385, %cst_333 {dimension_numbers = #tpu.dot_dimension_numbers<[1], [0], [0], [1], [0, 0, 1, 1], [], []>} : vector<16x128xf32>, vector<128x512xf32>, vector<16x512xf32> -> vector<16x512xf32>
    %387 = arith.addf %382, %386 : vector<16x512xf32>
    %388 = vector.extract_strided_slice %381 {offsets = [16, 0], sizes = [16, 128], strides = [1, 1]} : vector<64x128xf32> to vector<16x128xf32>
    %c1_334 = arith.constant 1 : index
    %c0_335 = arith.constant 0 : index
    %c0_336 = arith.constant 0 : index
    %389 = vector.load %arg19[%c1_334, %c0_335, %c0_336] : memref<4x128x512xf32, #tpu.memory_space<vmem>>, vector<1x128x512xf32>
    %390 = vector.shape_cast %389 : vector<1x128x512xf32> to vector<128x512xf32>
    %cst_337 = arith.constant dense<0.000000e+00> : vector<16x512xf32>
    %391 = tpu.matmul %388, %390, %cst_337 {dimension_numbers = #tpu.dot_dimension_numbers<[1], [0], [0], [1], [0, 0, 1, 1], [], []>} : vector<16x128xf32>, vector<128x512xf32>, vector<16x512xf32> -> vector<16x512xf32>
    %392 = arith.addf %387, %391 : vector<16x512xf32>
    %393 = vector.extract_strided_slice %381 {offsets = [32, 0], sizes = [16, 128], strides = [1, 1]} : vector<64x128xf32> to vector<16x128xf32>
    %c2_338 = arith.constant 2 : index
    %c0_339 = arith.constant 0 : index
    %c0_340 = arith.constant 0 : index
    %394 = vector.load %arg19[%c2_338, %c0_339, %c0_340] : memref<4x128x512xf32, #tpu.memory_space<vmem>>, vector<1x128x512xf32>
    %395 = vector.shape_cast %394 : vector<1x128x512xf32> to vector<128x512xf32>
    %cst_341 = arith.constant dense<0.000000e+00> : vector<16x512xf32>
    %396 = tpu.matmul %393, %395, %cst_341 {dimension_numbers = #tpu.dot_dimension_numbers<[1], [0], [0], [1], [0, 0, 1, 1], [], []>} : vector<16x128xf32>, vector<128x512xf32>, vector<16x512xf32> -> vector<16x512xf32>
    %397 = arith.addf %392, %396 : vector<16x512xf32>
    %398 = vector.extract_strided_slice %381 {offsets = [48, 0], sizes = [16, 128], strides = [1, 1]} : vector<64x128xf32> to vector<16x128xf32>
    %c3_342 = arith.constant 3 : index
    %c0_343 = arith.constant 0 : index
    %c0_344 = arith.constant 0 : index
    %399 = vector.load %arg19[%c3_342, %c0_343, %c0_344] : memref<4x128x512xf32, #tpu.memory_space<vmem>>, vector<1x128x512xf32>
    %400 = vector.shape_cast %399 : vector<1x128x512xf32> to vector<128x512xf32>
    %cst_345 = arith.constant dense<0.000000e+00> : vector<16x512xf32>
    %401 = tpu.matmul %398, %400, %cst_345 {dimension_numbers = #tpu.dot_dimension_numbers<[1], [0], [0], [1], [0, 0, 1, 1], [], []>} : vector<16x128xf32>, vector<128x512xf32>, vector<16x512xf32> -> vector<16x512xf32>
    %402 = arith.addf %397, %401 : vector<16x512xf32>
    %c0_346 = arith.constant 0 : index
    %c0_347 = arith.constant 0 : index
    %403 = vector.load %arg18[%c0_346, %c0_347] : memref<16x1xf32, #tpu.memory_space<vmem>>, vector<16x1xf32>
    %404 = vector.broadcast %403 : vector<16x1xf32> to vector<16x512xf32>
    %405 = arith.addf %402, %404 : vector<16x512xf32>
    %406 = vector.extract_strided_slice %300 {offsets = [0, 0], sizes = [16, 128], strides = [1, 1]} : vector<32x128xf32> to vector<16x128xf32>
    %c0_348 = arith.constant 0 : index
    %c0_349 = arith.constant 0 : index
    %407 = vector.load %arg20[%c0_348, %c0_349] : memref<128x512xf32, #tpu.memory_space<vmem>>, vector<128x512xf32>
    %cst_350 = arith.constant dense<0.000000e+00> : vector<16x512xf32>
    %408 = tpu.matmul %406, %407, %cst_350 {dimension_numbers = #tpu.dot_dimension_numbers<[1], [0], [0], [1], [0, 0, 1, 1], [], []>} : vector<16x128xf32>, vector<128x512xf32>, vector<16x512xf32> -> vector<16x512xf32>
    %409 = arith.addf %405, %408 : vector<16x512xf32>
    %c0_351 = arith.constant 0 : index
    %c0_352 = arith.constant 0 : index
    %410 = vector.load %arg24[%c0_351, %c0_352] : memref<32x512xf32, #tpu.memory_space<vmem>>, vector<16x512xf32>
    tpu.vector_store %arg24[%c0_351, %c0_352], %409 {strides = array<i32>} : memref<32x512xf32, #tpu.memory_space<vmem>>, vector<16x512xf32>,
    %c16 = arith.constant 16 : index
    %c0_353 = arith.constant 0 : index
    %411 = vector.load %arg24[%c16, %c0_353] : memref<32x512xf32, #tpu.memory_space<vmem>>, vector<16x512xf32>
    tpu.vector_store %arg24[%c16, %c0_353], %0 {strides = array<i32>} : memref<32x512xf32, #tpu.memory_space<vmem>>, vector<16x512xf32>,
    %c0_354 = arith.constant 0 : index
    %c0_355 = arith.constant 0 : index
    %412 = vector.load %arg24[%c0_354, %c0_355] : memref<32x512xf32, #tpu.memory_space<vmem>>, vector<32x512xf32>
    %cst_356 = arith.constant 0.000000e+00 : f32
    %413 = vector.broadcast %cst_356 : f32 to vector<8x512xf32>
    %c17_i32_357 = arith.constant 17 : i32
    %414 = tpu.dynamic_rotate %412 by %c17_i32_357 dim 1 : vector<32x512xf32>, i32 -> vector<32x512xf32>
    %c0_358 = arith.constant 0 : index
    %c0_359 = arith.constant 0 : index
    %c0_360 = arith.constant 0 : index
    %415 = vector.load %arg1[%c0_358, %c0_359, %c0_360] : memref<9x1x512xf32, #tpu.memory_space<vmem>>, vector<1x1x512xf32>
    %416 = vector.shape_cast %415 : vector<1x1x512xf32> to vector<1x512xf32>
    %417 = vector.broadcast %416 : vector<1x512xf32> to vector<32x512xf32>
    %418 = arith.mulf %414, %417 : vector<32x512xf32>
    %c0_361 = arith.constant 0 : index
    %c0_362 = arith.constant 0 : index
    %c0_363 = arith.constant 0 : index
    %419 = vector.load %arg21[%c0_361, %c0_362, %c0_363] : memref<9x8x32xbf16, #tpu.memory_space<vmem>>, vector<1x8x32xbf16>
    %420 = vector.shape_cast %419 : vector<1x8x32xbf16> to vector<8x32xbf16>
    %421 = arith.truncf %418 : vector<32x512xf32> to vector<32x512xbf16>
    %cst_364 = arith.constant dense<0.000000e+00> : vector<8x512xf32>
    %422 = tpu.matmul %420, %421, %cst_364 {dimension_numbers = #tpu.dot_dimension_numbers<[1], [0], [0], [1], [0, 0, 1, 1], [], []>} : vector<8x32xbf16>, vector<32x512xbf16>, vector<8x512xf32> -> vector<8x512xf32>
    %423 = arith.addf %413, %422 : vector<8x512xf32>
    %c16_i32_365 = arith.constant 16 : i32
    %424 = tpu.dynamic_rotate %412 by %c16_i32_365 dim 1 : vector<32x512xf32>, i32 -> vector<32x512xf32>
    %c1_366 = arith.constant 1 : index
    %c0_367 = arith.constant 0 : index
    %c0_368 = arith.constant 0 : index
    %425 = vector.load %arg1[%c1_366, %c0_367, %c0_368] : memref<9x1x512xf32, #tpu.memory_space<vmem>>, vector<1x1x512xf32>
    %426 = vector.shape_cast %425 : vector<1x1x512xf32> to vector<1x512xf32>
    %427 = vector.broadcast %426 : vector<1x512xf32> to vector<32x512xf32>
    %428 = arith.mulf %424, %427 : vector<32x512xf32>
    %c1_369 = arith.constant 1 : index
    %c0_370 = arith.constant 0 : index
    %c0_371 = arith.constant 0 : index
    %429 = vector.load %arg21[%c1_369, %c0_370, %c0_371] : memref<9x8x32xbf16, #tpu.memory_space<vmem>>, vector<1x8x32xbf16>
    %430 = vector.shape_cast %429 : vector<1x8x32xbf16> to vector<8x32xbf16>
    %431 = arith.truncf %428 : vector<32x512xf32> to vector<32x512xbf16>
    %cst_372 = arith.constant dense<0.000000e+00> : vector<8x512xf32>
    %432 = tpu.matmul %430, %431, %cst_372 {dimension_numbers = #tpu.dot_dimension_numbers<[1], [0], [0], [1], [0, 0, 1, 1], [], []>} : vector<8x32xbf16>, vector<32x512xbf16>, vector<8x512xf32> -> vector<8x512xf32>
    %433 = arith.addf %423, %432 : vector<8x512xf32>
    %c15_i32_373 = arith.constant 15 : i32
    %434 = tpu.dynamic_rotate %412 by %c15_i32_373 dim 1 : vector<32x512xf32>, i32 -> vector<32x512xf32>
    %c2_374 = arith.constant 2 : index
    %c0_375 = arith.constant 0 : index
    %c0_376 = arith.constant 0 : index
    %435 = vector.load %arg1[%c2_374, %c0_375, %c0_376] : memref<9x1x512xf32, #tpu.memory_space<vmem>>, vector<1x1x512xf32>
    %436 = vector.shape_cast %435 : vector<1x1x512xf32> to vector<1x512xf32>
    %437 = vector.broadcast %436 : vector<1x512xf32> to vector<32x512xf32>
    %438 = arith.mulf %434, %437 : vector<32x512xf32>
    %c2_377 = arith.constant 2 : index
    %c0_378 = arith.constant 0 : index
    %c0_379 = arith.constant 0 : index
    %439 = vector.load %arg21[%c2_377, %c0_378, %c0_379] : memref<9x8x32xbf16, #tpu.memory_space<vmem>>, vector<1x8x32xbf16>
    %440 = vector.shape_cast %439 : vector<1x8x32xbf16> to vector<8x32xbf16>
    %441 = arith.truncf %438 : vector<32x512xf32> to vector<32x512xbf16>
    %cst_380 = arith.constant dense<0.000000e+00> : vector<8x512xf32>
    %442 = tpu.matmul %440, %441, %cst_380 {dimension_numbers = #tpu.dot_dimension_numbers<[1], [0], [0], [1], [0, 0, 1, 1], [], []>} : vector<8x32xbf16>, vector<32x512xbf16>, vector<8x512xf32> -> vector<8x512xf32>
    %443 = arith.addf %433, %442 : vector<8x512xf32>
    %c1_i32_381 = arith.constant 1 : i32
    %444 = tpu.dynamic_rotate %412 by %c1_i32_381 dim 1 : vector<32x512xf32>, i32 -> vector<32x512xf32>
    %c3_382 = arith.constant 3 : index
    %c0_383 = arith.constant 0 : index
    %c0_384 = arith.constant 0 : index
    %445 = vector.load %arg1[%c3_382, %c0_383, %c0_384] : memref<9x1x512xf32, #tpu.memory_space<vmem>>, vector<1x1x512xf32>
    %446 = vector.shape_cast %445 : vector<1x1x512xf32> to vector<1x512xf32>
    %447 = vector.broadcast %446 : vector<1x512xf32> to vector<32x512xf32>
    %448 = arith.mulf %444, %447 : vector<32x512xf32>
    %c3_385 = arith.constant 3 : index
    %c0_386 = arith.constant 0 : index
    %c0_387 = arith.constant 0 : index
    %449 = vector.load %arg21[%c3_385, %c0_386, %c0_387] : memref<9x8x32xbf16, #tpu.memory_space<vmem>>, vector<1x8x32xbf16>
    %450 = vector.shape_cast %449 : vector<1x8x32xbf16> to vector<8x32xbf16>
    %451 = arith.truncf %448 : vector<32x512xf32> to vector<32x512xbf16>
    %cst_388 = arith.constant dense<0.000000e+00> : vector<8x512xf32>
    %452 = tpu.matmul %450, %451, %cst_388 {dimension_numbers = #tpu.dot_dimension_numbers<[1], [0], [0], [1], [0, 0, 1, 1], [], []>} : vector<8x32xbf16>, vector<32x512xbf16>, vector<8x512xf32> -> vector<8x512xf32>
    %453 = arith.addf %443, %452 : vector<8x512xf32>
    %c4_389 = arith.constant 4 : index
    %c0_390 = arith.constant 0 : index
    %c0_391 = arith.constant 0 : index
    %454 = vector.load %arg1[%c4_389, %c0_390, %c0_391] : memref<9x1x512xf32, #tpu.memory_space<vmem>>, vector<1x1x512xf32>
    %455 = vector.shape_cast %454 : vector<1x1x512xf32> to vector<1x512xf32>
    %456 = vector.broadcast %455 : vector<1x512xf32> to vector<32x512xf32>
    %457 = arith.mulf %412, %456 : vector<32x512xf32>
    %c4_392 = arith.constant 4 : index
    %c0_393 = arith.constant 0 : index
    %c0_394 = arith.constant 0 : index
    %458 = vector.load %arg21[%c4_392, %c0_393, %c0_394] : memref<9x8x32xbf16, #tpu.memory_space<vmem>>, vector<1x8x32xbf16>
    %459 = vector.shape_cast %458 : vector<1x8x32xbf16> to vector<8x32xbf16>
    %460 = arith.truncf %457 : vector<32x512xf32> to vector<32x512xbf16>
    %cst_395 = arith.constant dense<0.000000e+00> : vector<8x512xf32>
    %461 = tpu.matmul %459, %460, %cst_395 {dimension_numbers = #tpu.dot_dimension_numbers<[1], [0], [0], [1], [0, 0, 1, 1], [], []>} : vector<8x32xbf16>, vector<32x512xbf16>, vector<8x512xf32> -> vector<8x512xf32>
    %462 = arith.addf %453, %461 : vector<8x512xf32>
    %c511_i32_396 = arith.constant 511 : i32
    %463 = tpu.dynamic_rotate %412 by %c511_i32_396 dim 1 : vector<32x512xf32>, i32 -> vector<32x512xf32>
    %c5_397 = arith.constant 5 : index
    %c0_398 = arith.constant 0 : index
    %c0_399 = arith.constant 0 : index
    %464 = vector.load %arg1[%c5_397, %c0_398, %c0_399] : memref<9x1x512xf32, #tpu.memory_space<vmem>>, vector<1x1x512xf32>
    %465 = vector.shape_cast %464 : vector<1x1x512xf32> to vector<1x512xf32>
    %466 = vector.broadcast %465 : vector<1x512xf32> to vector<32x512xf32>
    %467 = arith.mulf %463, %466 : vector<32x512xf32>
    %c5_400 = arith.constant 5 : index
    %c0_401 = arith.constant 0 : index
    %c0_402 = arith.constant 0 : index
    %468 = vector.load %arg21[%c5_400, %c0_401, %c0_402] : memref<9x8x32xbf16, #tpu.memory_space<vmem>>, vector<1x8x32xbf16>
    %469 = vector.shape_cast %468 : vector<1x8x32xbf16> to vector<8x32xbf16>
    %470 = arith.truncf %467 : vector<32x512xf32> to vector<32x512xbf16>
    %cst_403 = arith.constant dense<0.000000e+00> : vector<8x512xf32>
    %471 = tpu.matmul %469, %470, %cst_403 {dimension_numbers = #tpu.dot_dimension_numbers<[1], [0], [0], [1], [0, 0, 1, 1], [], []>} : vector<8x32xbf16>, vector<32x512xbf16>, vector<8x512xf32> -> vector<8x512xf32>
    %472 = arith.addf %462, %471 : vector<8x512xf32>
    %c497_i32_404 = arith.constant 497 : i32
    %473 = tpu.dynamic_rotate %412 by %c497_i32_404 dim 1 : vector<32x512xf32>, i32 -> vector<32x512xf32>
    %c6_405 = arith.constant 6 : index
    %c0_406 = arith.constant 0 : index
    %c0_407 = arith.constant 0 : index
    %474 = vector.load %arg1[%c6_405, %c0_406, %c0_407] : memref<9x1x512xf32, #tpu.memory_space<vmem>>, vector<1x1x512xf32>
    %475 = vector.shape_cast %474 : vector<1x1x512xf32> to vector<1x512xf32>
    %476 = vector.broadcast %475 : vector<1x512xf32> to vector<32x512xf32>
    %477 = arith.mulf %473, %476 : vector<32x512xf32>
    %c6_408 = arith.constant 6 : index
    %c0_409 = arith.constant 0 : index
    %c0_410 = arith.constant 0 : index
    %478 = vector.load %arg21[%c6_408, %c0_409, %c0_410] : memref<9x8x32xbf16, #tpu.memory_space<vmem>>, vector<1x8x32xbf16>
    %479 = vector.shape_cast %478 : vector<1x8x32xbf16> to vector<8x32xbf16>
    %480 = arith.truncf %477 : vector<32x512xf32> to vector<32x512xbf16>
    %cst_411 = arith.constant dense<0.000000e+00> : vector<8x512xf32>
    %481 = tpu.matmul %479, %480, %cst_411 {dimension_numbers = #tpu.dot_dimension_numbers<[1], [0], [0], [1], [0, 0, 1, 1], [], []>} : vector<8x32xbf16>, vector<32x512xbf16>, vector<8x512xf32> -> vector<8x512xf32>
    %482 = arith.addf %472, %481 : vector<8x512xf32>
    %c496_i32_412 = arith.constant 496 : i32
    %483 = tpu.dynamic_rotate %412 by %c496_i32_412 dim 1 : vector<32x512xf32>, i32 -> vector<32x512xf32>
    %c7_413 = arith.constant 7 : index
    %c0_414 = arith.constant 0 : index
    %c0_415 = arith.constant 0 : index
    %484 = vector.load %arg1[%c7_413, %c0_414, %c0_415] : memref<9x1x512xf32, #tpu.memory_space<vmem>>, vector<1x1x512xf32>
    %485 = vector.shape_cast %484 : vector<1x1x512xf32> to vector<1x512xf32>
    %486 = vector.broadcast %485 : vector<1x512xf32> to vector<32x512xf32>
    %487 = arith.mulf %483, %486 : vector<32x512xf32>
    %c7_416 = arith.constant 7 : index
    %c0_417 = arith.constant 0 : index
    %c0_418 = arith.constant 0 : index
    %488 = vector.load %arg21[%c7_416, %c0_417, %c0_418] : memref<9x8x32xbf16, #tpu.memory_space<vmem>>, vector<1x8x32xbf16>
    %489 = vector.shape_cast %488 : vector<1x8x32xbf16> to vector<8x32xbf16>
    %490 = arith.truncf %487 : vector<32x512xf32> to vector<32x512xbf16>
    %cst_419 = arith.constant dense<0.000000e+00> : vector<8x512xf32>
    %491 = tpu.matmul %489, %490, %cst_419 {dimension_numbers = #tpu.dot_dimension_numbers<[1], [0], [0], [1], [0, 0, 1, 1], [], []>} : vector<8x32xbf16>, vector<32x512xbf16>, vector<8x512xf32> -> vector<8x512xf32>
    %492 = arith.addf %482, %491 : vector<8x512xf32>
    %c495_i32_420 = arith.constant 495 : i32
    %493 = tpu.dynamic_rotate %412 by %c495_i32_420 dim 1 : vector<32x512xf32>, i32 -> vector<32x512xf32>
    %c8_421 = arith.constant 8 : index
    %c0_422 = arith.constant 0 : index
    %c0_423 = arith.constant 0 : index
    %494 = vector.load %arg1[%c8_421, %c0_422, %c0_423] : memref<9x1x512xf32, #tpu.memory_space<vmem>>, vector<1x1x512xf32>
    %495 = vector.shape_cast %494 : vector<1x1x512xf32> to vector<1x512xf32>
    %496 = vector.broadcast %495 : vector<1x512xf32> to vector<32x512xf32>
    %497 = arith.mulf %493, %496 : vector<32x512xf32>
    %c8_424 = arith.constant 8 : index
    %c0_425 = arith.constant 0 : index
    %c0_426 = arith.constant 0 : index
    %498 = vector.load %arg21[%c8_424, %c0_425, %c0_426] : memref<9x8x32xbf16, #tpu.memory_space<vmem>>, vector<1x8x32xbf16>
    %499 = vector.shape_cast %498 : vector<1x8x32xbf16> to vector<8x32xbf16>
    %500 = arith.truncf %497 : vector<32x512xf32> to vector<32x512xbf16>
    %cst_427 = arith.constant dense<0.000000e+00> : vector<8x512xf32>
    %501 = tpu.matmul %499, %500, %cst_427 {dimension_numbers = #tpu.dot_dimension_numbers<[1], [0], [0], [1], [0, 0, 1, 1], [], []>} : vector<8x32xbf16>, vector<32x512xbf16>, vector<8x512xf32> -> vector<8x512xf32>
    %502 = arith.addf %492, %501 : vector<8x512xf32>
    %c0_428 = arith.constant 0 : index
    %c0_429 = arith.constant 0 : index
    %503 = vector.load %arg22[%c0_428, %c0_429] : memref<8x1xf32, #tpu.memory_space<vmem>>, vector<8x1xf32>
    %504 = vector.broadcast %503 : vector<8x1xf32> to vector<8x512xf32>
    %505 = arith.addf %502, %504 : vector<8x512xf32>
    %cst_430 = arith.constant 1.000000e-01 : f32
    %506 = vector.broadcast %cst_430 : f32 to vector<8x512xf32>
    %507 = arith.mulf %505, %506 : vector<8x512xf32>
    %c0_431 = arith.constant 0 : index
    %c0_432 = arith.constant 0 : index
    %508 = vector.load %arg23[%c0_431, %c0_432] : memref<8x512xf32, #tpu.memory_space<vmem>>, vector<8x512xf32>
    tpu.vector_store %arg23[%c0_431, %c0_432], %507 {strides = array<i32>} : memref<8x512xf32, #tpu.memory_space<vmem>>, vector<8x512xf32>,
    return
  }
}

</mosaic_0001>

<bundles_post_ra>
// kernel: unet3_forward.1
= control target key start
LH: loop header
LB: loop body
LE: loop exit
PB: predicated region body
PF: predicated region fallthrough
CT: control target
= control target key end

     0   :  { %s21858_s0 = inlined_call_operand.vmem [shape: f32[16,512], index: 0, kind: input, shape index: {}]   ;;  %s21859_s1 = inlined_call_operand.hbm [shape: f32[9,1,512], index: 1, kind: input, shape index: {}]   ;;  %s21860_s2 = inlined_call_operand.hbm [shape: bf16[9,16,16], index: 2, kind: input, shape index: {}]   ;;  %s21861_s3 = inlined_call_operand.vmem [shape: f32[16,1], index: 3, kind: input, shape index: {}]   ;;  %s21862_s4 = inlined_call_operand.hbm [shape: f32[16,16], index: 4, kind: input, shape index: {}]   ;;  %s21863_s5 = inlined_call_operand.hbm [shape: f32[512,128], index: 5, kind: input, shape index: {}]   ;;  %s21864_s6 = inlined_call_operand.vmem [shape: f32[9,128,32], index: 6, kind: input, shape index: {}]   ;;  %s21865_s7 = inlined_call_operand.vmem [shape: bf16[9,32,16], index: 7, kind: input, shape index: {}]   ;;  %s21866_s8 = inlined_call_operand.vmem [shape: f32[32,1], index: 8, kind: input, shape index: {}]   ;;  %s21867_s9 = inlined_call_operand.vmem [shape: f32[128,32], index: 9, kind: input, shape index: {}]   ;;  %s21868_s10 = inlined_call_operand.vmem [shape: f32[32,16], index: 10, kind: input, shape index: {}]   ;;  %s21869_s11 = inlined_call_operand.vmem [shape: f32[9,32,32], index: 11, kind: input, shape index: {}]   ;;  %s21870_s12 = inlined_call_operand.vmem [shape: bf16[9,128,32], index: 12, kind: input, shape index: {}]   ;;  %s21871_s13 = inlined_call_operand.vmem [shape: f32[32,1], index: 13, kind: input, shape index: {}]   ;;  %s21872_s14 = inlined_call_operand.hbm [shape: f32[4,32,128], index: 14, kind: input, shape index: {}]   ;;  %s21873_s15 = inlined_call_operand.hbm [shape: f32[32,128], index: 15, kind: input, shape index: {}]   ;;  %s21874_s16 = inlined_call_operand.vmem [shape: f32[9,128,128], index: 16, kind: input, shape index: {}]   ;;  %s21875_s17 = inlined_call_operand.vmem [shape: bf16[9,64,48], index: 17, kind: input, shape index: {}]   ;;  %s21876_s18 = inlined_call_operand.vmem [shape: f32[16,1], index: 18, kind: input, shape index: {}]   ;;  %s21877_s19 = inlined_call_operand.vmem [shape: f32[4,128,512], index: 19, kind: input, shape index: {}]   ;;  %s21878_s20 = inlined_call_operand.hbm [shape: f32[128,512], index: 20, kind: input, shape index: {}]   ;;  %s21879_s21 = inlined_call_operand.hbm [shape: bf16[9,8,32], index: 21, kind: input, shape index: {}]   ;;  %s21880_s22 = inlined_call_operand.vmem [shape: f32[8,1], index: 22, kind: input, shape index: {}]   ;;  %s21881_s23 = inlined_call_operand.vmem [shape: f32[8,512], index: 23, kind: output, shape index: {0}]   ;;  %s21882_s24 = inlined_call_operand.vmem [shape: f32[32,512], index: 24, kind: output, shape index: {1}]  }
   0x1   :  { %21994 = sst [smem:[#allocation103_spill]] %s21858_s0 }
   0x2   :  { %21995 = sst [smem:[#allocation104_spill]] %s21859_s1 }
   0x3   :  { %21996 = sst [smem:[#allocation105_spill]] %s21860_s2 }
   0x4   :  { %21997 = sst [smem:[#allocation106_spill]] %s21861_s3 }
   0x5   :  { %21998 = sst [smem:[#allocation107_spill]] %s21862_s4 }
   0x6   :  { %21999 = sst [smem:[#allocation108_spill]] %s21863_s5 }
   0x7   :  { %22000 = sst [smem:[#allocation109_spill]] %s21864_s6 }
   0x8   :  { %22001 = sst [smem:[#allocation110_spill]] %s21865_s7 }
   0x9   :  { %22002 = sst [smem:[#allocation111_spill]] %s21866_s8 }
   0xa   :  { %22003 = sst [smem:[#allocation112_spill]] %s21877_s19 }
   0xb   :  { %22004 = sst [smem:[#allocation113_spill]] %s21880_s22 }
   0xc   :  { %22005 = sst [smem:[#allocation114_spill]] %s21881_s23 }
   0xd   :  { %30 = vsyncpa [#allocation4], 0 }
   0xe   :  { %31 = vsyncpa [#allocation6], 0 }
   0xf   :  { %32 = vsyncpa [#allocation9], 0 }
  0x10   :  { %33 = vsyncpa [#allocation12], 0 }
  0x11   :  { %34 = vsyncpa [#allocation15], 0  ;;  %s16808_s5 = smov [#allocation5]   ;;  %s22006_s6 = sld [smem:[#allocation105_spill]] }
  0x12   :  { %s54_s26 = sshll.u32 %s16808_s5, 4  ;;  %s55_s26 = int_to_ptr.vmem [resolvable:$true] %s54_s26 }
  0x17   :  { %s16622_s2 = scalar_lea.hbm %s22006_s6, 1152 }
  0x18   :  { %p16623_p0 = scmp.ne.s32.totalorder %s22006_s6, %s16622_s2  ;;  %p16626_p1 = scmp.lt.u32.totalorder %s16622_s2, %s22006_s6 }
  0x1a   :  { %p16628_p2 = pnand %p16626_p1, %p16623_p0 }
  0x1c   :  { %16631 = shalt.err (!%p16628_p2)
}
  0x1d   :  { %s16632_s3 = scalar_lea.vmem %s55_s26, 1152  ;;  %p16637_p4 = scmp.lt.s32.totalorder %s55_s26, %s55_s26 }
  0x1e   :  { %p16633_p3 = scmp.ne.s32.totalorder %s55_s26, %s16632_s3  ;;  %p16638_p5 = scmp.lt.s32.totalorder %s16632_s3, %s16632_s3 }
  0x20   :  { %p16639_p6 = por %p16638_p5, %p16637_p4 }
  0x22   :  { %p16640_p7 = pnand %p16639_p6, %p16633_p3 }
  0x24   :  { %16643 = shalt.err (!%p16640_p7)
}
  0x25   :  { %s21894_s25 = smov 64   ;;  %s16810_s8 = smov 4  }
  0x26   :  { %60 = dma.hbm_to_vmem [thread:$0]  %s22006_s6, 1152, %s55_s26, [#allocation6], %s21894_s25, %s21894_s25, %s16810_s8  }
  0x27   :  { %s16811_s5 = smov [#allocation8]   ;;  %s16812_s28 = smov [#allocation11]  }
  0x28   :  { %s80_s27 = sshll.u32 %s16811_s5, 4  ;;  %s120_s2 = sshll.u32 %s16812_s28, 4  ;;  %s81_s27 = int_to_ptr.vmem [resolvable:$true] %s80_s27  ;;  %s121_s2 = int_to_ptr.vmem [resolvable:$true] %s120_s2 }
  0x29   :  { %s22007_s7 = sld [smem:[#allocation108_spill]] }
  0x2f   :  { %s16644_s30 = scalar_lea.hbm %s22007_s7, 8192 }
  0x30   :  { %p16645_p8 = scmp.ne.s32.totalorder %s22007_s7, %s16644_s30  ;;  %p16648_p9 = scmp.lt.u32.totalorder %s16644_s30, %s22007_s7 }
  0x32   :  { %p16650_p10 = pnand %p16648_p9, %p16645_p8 }
  0x34   :  { %16653 = shalt.err (!%p16650_p10)
}
  0x35   :  { %s16654_s26 = scalar_lea.vmem %s81_s27, 8192  ;;  %p16659_p12 = scmp.lt.s32.totalorder %s81_s27, %s81_s27 }
  0x36   :  { %p16655_p11 = scmp.ne.s32.totalorder %s81_s27, %s16654_s26  ;;  %p16660_p13 = scmp.lt.s32.totalorder %s16654_s26, %s16654_s26 }
  0x38   :  { %p16661_p0 = por %p16660_p13, %p16659_p12 }
  0x3a   :  { %p16662_p1 = pnand %p16661_p0, %p16655_p11 }
  0x3c   :  { %16665 = shalt.err (!%p16662_p1)
}
  0x3d   :  { %s16813_s6 = smov 128   ;;  %s16814_s4 = smov 8  }
  0x3e   :  { %86 = dma.hbm_to_vmem [thread:$0]  %s22007_s7, 8192, %s81_s27, [#allocation9], %s16813_s6, %s16813_s6, %s16814_s4  }
  0x3f   :  { %s16666_s5 = scalar_lea.hbm %s21873_s15, 512 }
  0x40   :  { %p16667_p2 = scmp.ne.s32.totalorder %s21873_s15, %s16666_s5  ;;  %p16670_p3 = scmp.lt.u32.totalorder %s16666_s5, %s21873_s15 }
  0x42   :  { %p16672_p4 = pnand %p16670_p3, %p16667_p2 }
  0x44   :  { %16675 = shalt.err (!%p16672_p4)
}
  0x45   :  { %s16676_s3 = scalar_lea.vmem %s121_s2, 512  ;;  %p16681_p6 = scmp.lt.s32.totalorder %s121_s2, %s121_s2 }
  0x46   :  { %p16677_p5 = scmp.ne.s32.totalorder %s121_s2, %s16676_s3  ;;  %p16682_p7 = scmp.lt.s32.totalorder %s16676_s3, %s16676_s3 }
  0x48   :  { %p16683_p8 = por %p16682_p7, %p16681_p6 }
  0x4a   :  { %p16684_p9 = pnand %p16683_p8, %p16677_p5 }
  0x4c   :  { %16687 = shalt.err (!%p16684_p9)
}
  0x4d   :  { %126 = dma.hbm_to_vmem [thread:$0]  %s21873_s15, 512, %s121_s2, [#allocation12], %s16813_s6, %s16813_s6, %s16814_s4  }
  0x4e   :  { %s16815_s26 = smov [#allocation3]   ;;  %s16816_s1 = smov [#allocation7]  }
  0x4f   :  { %s42_s23 = sshll.u32 %s16815_s26, 4  ;;  %s68_s19 = sshll.u32 %s16816_s1, 4  ;;  %s43_s23 = int_to_ptr.vmem [resolvable:$true] %s42_s23  ;;  %s69_s19 = int_to_ptr.vmem [resolvable:$true] %s68_s19 }
  0x50   :  { %s22008_s28 = sld [smem:[#allocation104_spill]] }
  0x56   :  { %s16688_s29 = scalar_lea.hbm %s22008_s28, 576 }
  0x57   :  { %p16689_p10 = scmp.ne.s32.totalorder %s22008_s28, %s16688_s29  ;;  %p16692_p11 = scmp.lt.u32.totalorder %s16688_s29, %s22008_s28 }
  0x59   :  { %p16694_p12 = pnand %p16692_p11, %p16689_p10 }
  0x5b   :  { %16697 = shalt.err (!%p16694_p12)
}
  0x5c   :  { %s16698_s15 = scalar_lea.vmem %s43_s23, 576  ;;  %p16703_p0 = scmp.lt.s32.totalorder %s43_s23, %s43_s23 }
  0x5d   :  { %p16699_p13 = scmp.ne.s32.totalorder %s43_s23, %s16698_s15  ;;  %p16704_p1 = scmp.lt.s32.totalorder %s16698_s15, %s16698_s15 }
  0x5f   :  { %p16705_p2 = por %p16704_p1, %p16703_p0 }
  0x61   :  { %p16706_p3 = pnand %p16705_p2, %p16699_p13 }
  0x63   :  { %16709 = shalt.err (!%p16706_p3)
}
  0x64   :  { %s22009_s2 = smov 64   ;;  %s22010_s1 = sld [smem:[#allocation107_spill]] }
  0x65   :  { %48 = dma.hbm_to_vmem [thread:$0]  %s22008_s28, 576, %s43_s23, [#allocation4], %s22009_s2, %s22009_s2, %s16810_s8  }
  0x6a   :  { %s16710_s22 = scalar_lea.hbm %s22010_s1, 256 }
  0x6b   :  { %p16711_p4 = scmp.ne.s32.totalorder %s22010_s1, %s16710_s22  ;;  %p16714_p5 = scmp.lt.u32.totalorder %s16710_s22, %s22010_s1 }
  0x6d   :  { %p16716_p6 = pnand %p16714_p5, %p16711_p4 }
  0x6f   :  { %16719 = shalt.err (!%p16716_p6)
}
  0x70   :  { %s16720_s3 = scalar_lea.vmem %s69_s19, 256  ;;  %p16725_p8 = scmp.lt.s32.totalorder %s69_s19, %s69_s19 }
  0x71   :  { %p16721_p7 = scmp.ne.s32.totalorder %s69_s19, %s16720_s3  ;;  %p16726_p9 = scmp.lt.s32.totalorder %s16720_s3, %s16720_s3 }
  0x73   :  { %p16727_p10 = por %p16726_p9, %p16725_p8 }
  0x75   :  { %p16728_p11 = pnand %p16727_p10, %p16721_p7 }
  0x77   :  { %16731 = shalt.err (!%p16728_p11)
}
  0x78   :  { %74 = dma.hbm_to_vmem [thread:$0]  %s22010_s1, 256, %s69_s19, [#allocation6], %s16813_s6, %s16813_s6, %s16814_s4  }
  0x79   :  { %s16817_s15 = smov [#allocation10]   ;;  %s16818_s7 = smov [#allocation13]  }
  0x7a   :  { %s108_s27 = sshll.u32 %s16817_s15, 4  ;;  %s140_s26 = sshll.u32 %s16818_s7, 4  ;;  %s109_s27 = int_to_ptr.vmem [resolvable:$true] %s108_s27  ;;  %s141_s26 = int_to_ptr.vmem [resolvable:$true] %s140_s26 }
  0x7b   :  { %s16732_s5 = scalar_lea.hbm %s21872_s14, 2048 }
  0x7c   :  { %p16733_p12 = scmp.ne.s32.totalorder %s21872_s14, %s16732_s5  ;;  %p16736_p13 = scmp.lt.u32.totalorder %s16732_s5, %s21872_s14 }
  0x7e   :  { %p16738_p0 = pnand %p16736_p13, %p16733_p12 }
  0x80   :  { %16741 = shalt.err (!%p16738_p0)
}
  0x81   :  { %s16742_s19 = scalar_lea.vmem %s109_s27, 2048  ;;  %p16747_p2 = scmp.lt.s32.totalorder %s109_s27, %s109_s27 }
  0x82   :  { %p16743_p1 = scmp.ne.s32.totalorder %s109_s27, %s16742_s19  ;;  %p16748_p3 = scmp.lt.s32.totalorder %s16742_s19, %s16742_s19 }
  0x84   :  { %p16749_p4 = por %p16748_p3, %p16747_p2 }
  0x86   :  { %p16750_p5 = pnand %p16749_p4, %p16743_p1 }
  0x88   :  { %16753 = shalt.err (!%p16750_p5)
}
  0x89   :  { %114 = dma.hbm_to_vmem [thread:$0]  %s21872_s14, 2048, %s109_s27, [#allocation9], %s16813_s6, %s16813_s6, %s16814_s4  }
  0x8a   :  { %s16754_s7 = scalar_lea.hbm %s21878_s20, 8192 }
  0x8b   :  { %p16755_p6 = scmp.ne.s32.totalorder %s21878_s20, %s16754_s7  ;;  %p16758_p7 = scmp.lt.u32.totalorder %s16754_s7, %s21878_s20 }
  0x8d   :  { %p16760_p8 = pnand %p16758_p7, %p16755_p6 }
  0x8f   :  { %16763 = shalt.err (!%p16760_p8)
}
  0x90   :  { %s16764_s0 = scalar_lea.vmem %s141_s26, 8192  ;;  %p16769_p10 = scmp.lt.s32.totalorder %s141_s26, %s141_s26 }
  0x91   :  { %p16765_p9 = scmp.ne.s32.totalorder %s141_s26, %s16764_s0  ;;  %p16770_p11 = scmp.lt.s32.totalorder %s16764_s0, %s16764_s0 }
  0x93   :  { %p16771_p12 = por %p16770_p11, %p16769_p10 }
  0x95   :  { %p16772_p13 = pnand %p16771_p12, %p16765_p9 }
  0x97   :  { %16775 = shalt.err (!%p16772_p13)
}
  0x98   :  { %s16819_s14 = smov 512   ;;  %s16820_s6 = smov 32  }
  0x99   :  { %146 = dma.hbm_to_vmem [thread:$0]  %s21878_s20, 8192, %s141_s26, [#allocation12], %s16819_s14, %s16819_s14, %s16820_s6  }
  0x9a   :  { %s16821_s30 = smov [#allocation14]   ;;  %s16776_s23 = scalar_lea.hbm %s21879_s21, 576 }
  0x9b   :  { %s152_s3 = sshll.u32 %s16821_s30, 4  ;;  %p16777_p0 = scmp.ne.s32.totalorder %s21879_s21, %s16776_s23  ;;  %s153_s3 = int_to_ptr.vmem [resolvable:$true] %s152_s3 }
  0x9c   :  { %p16780_p1 = scmp.lt.u32.totalorder %s16776_s23, %s21879_s21 }
  0x9e   :  { %p16782_p2 = pnand %p16780_p1, %p16777_p0 }
  0xa0   :  { %16785 = shalt.err (!%p16782_p2)
}
  0xa1   :  { %s16786_s22 = scalar_lea.vmem %s153_s3, 576  ;;  %p16791_p4 = scmp.lt.s32.totalorder %s153_s3, %s153_s3 }
  0xa2   :  { %p16787_p3 = scmp.ne.s32.totalorder %s153_s3, %s16786_s22  ;;  %p16792_p5 = scmp.lt.s32.totalorder %s16786_s22, %s16786_s22 }
  0xa4   :  { %p16793_p6 = por %p16792_p5, %p16791_p4 }
  0xa6   :  { %p16794_p7 = pnand %p16793_p6, %p16787_p3 }
  0xa8   :  { %16797 = shalt.err (!%p16794_p7)
}
  0xa9   :  { %158 = dma.hbm_to_vmem [thread:$0]  %s21879_s21, 576, %s153_s3, [#allocation15], %s22009_s2, %s22009_s2, %s16810_s8  }
  0xaa   :  { %16798 = dma.done.wait [#allocation4], 576  }
  0xab   :  { %16799 = vsyncadd [#allocation4], 4294966720 }
  0xac   :  { %16800 = dma.done.wait [#allocation6], 1408  }
  0xad   :  { %16801 = vsyncadd [#allocation6], 4294965888 }
  0xae   :  { %16802 = dma.done.wait [#allocation9], 10240  }
  0xaf   :  { %16803 = vsyncadd [#allocation9], 4294957056 }
  0xb0   :  { %16804 = dma.done.wait [#allocation12], 8704  }
  0xb1   :  { %16805 = vsyncadd [#allocation12], 4294958592 }
  0xb2   :  { %16806 = dma.done.wait [#allocation15], 576  }
  0xb3   :  { %16807 = vsyncadd [#allocation15], 4294966720  ;;  %s22011_s0 = sld [smem:[#allocation103_spill]]  ;;  %s16822_s4 = smov 16   ;;  %v21896_v24 = vmov 0   ;;  %v234_v25 = vlaneseq  ;;  %vm349_vm9 = vcmask 130048  }
  0xb4   :  { %385 = vmatprep.mubr.bf16.mxu0 %v21896_v24  ;;  %428 = vmatprep.mubr.bf16.mxu1 %v21896_v24  ;;  %s16825_s1 = smov 15   ;;  %s16826_s23 = smov 1   ;;  %v307_v29 = vld [vmem:[#allocation3 + $0x4] sm:$0xf]  ;;  %v245_v63 = vld [vmem:[#allocation3] sm:$0xf] }
  0xb5   :  { %16463 = vset.pattern.permute.xlu0 %v21896_v24  ;;  %16464 = vset.pattern.permute.xlu1 %v21896_v24  ;;  %s16827_s28 = smov 127   ;;  %s16828_s15 = smov 113   ;;  %v248_v26 = vshrl.u32 %v234_v25, 7  ;;  %v17304_v27 = vand.u32 127, %v234_v25 }
  0xb6   :  { %s16829_s7 = smov 112   ;;  %s16830_s25 = smov 111  }
  0xb7   :  { %v17310_v28 = vsub.s32 1, %v248_v26  ;;  %vm297_vm8 = vcmp.lt.s32.totalorder %v17304_v27, 16  ;;  %v17318_v33 = vsub.s32 0, %v248_v26  ;;  %v17324_v38 = vsub.s32 3, %v248_v26  ;;  %s22012_s29 = sld [smem:[#allocation106_spill]]  ;;  %s22013_s2 = sld [smem:[#allocation111_spill]] }
  0xb8   :  { %v17331_v42 = vsub.s32 2, %v248_v26  ;;  %vm236_vm10 = vcmp.lt.s32.totalorder %v17304_v27, 17  ;;  %vm549_vm11 = vcmp.lt.s32.totalorder %v17304_v27, 15  ;;  %vm714_vm12 = vcmp.lt.s32.totalorder %v17304_v27, 1  ;;  %s22014_s22 = sld [smem:[#allocation109_spill]]  ;;  %s22015_s8 = sld [smem:[#allocation110_spill]] }
  0xb9   :  { %v17077_v0 = vld [vmem:[%s22011_s0 + $0x8] sm:$0xff]  ;;  %v17082_v1 = vld [vmem:[%s22011_s0] sm:$0xff]  ;;  %v17115_v7 = vld [vmem:[%s22011_s0 + $0x38] sm:$0xff]  ;;  %v316_v32 = vrot.slane %v307_v29, %v17310_v28  ;;  %v312_v41 = vrot.slane %v307_v29, %v17318_v33  ;;  %v324_v48 = vrot.slane %v307_v29, %v17324_v38  ;;  %vm1019_vm13 = vcmp.lt.s32.totalorder %v17304_v27, 127  ;;  %s22016_s5 = sld [smem:[#allocation112_spill]]  ;;  %s22204_s30 = sld [smem:[#allocation114_spill]] }
  0xba   :  { %v17087_v2 = vld [vmem:[%s22011_s0 + $0x28] sm:$0xff]  ;;  %vm195_vm0 = vcmp.ge.f32.partialorder %v17077_v0, 0.0  ;;  %v203_v3 = vmul.f32 0.01, %v17077_v0  ;;  %10211 = vst [vmem:[%s21882_s24 + $0x48] sm:$0xff] %v17077_v0  ;;  %vm194_vm1 = vcmp.ge.f32.partialorder %v17082_v1, 0.0  ;;  %v320_v51 = vrot.slane %v307_v29, %v17331_v42 }
  0xbb   :  { %v202_v4 = vmul.f32 0.01, %v17082_v1  ;;  %10210 = vst [vmem:[%s21882_s24 + $0x40] sm:$0xff] %v17082_v1  ;;  %10215 = vst [vmem:[%s21882_s24 + $0x68] sm:$0xff] %v17087_v2  ;;  %vm199_vm2 = vcmp.ge.f32.partialorder %v17087_v2, 0.0  ;;  %v17110_v6 = vld [vmem:[%s22011_s0 + $0x20] sm:$0xff] }
  0xbc   :  { %v207_v5 = vmul.f32 0.01, %v17087_v2  ;;  %v17120_v8 = vld [vmem:[%s22011_s0 + $0x18] sm:$0xff]  ;;  %v17123_v9 = vsel %vm195_vm0, %v17077_v0, %v203_v3  ;;  %vm198_vm3 = vcmp.ge.f32.partialorder %v17110_v6, 0.0  ;;  %v206_v11 = vmul.f32 0.01, %v17110_v6 }
  0xbd   :  { %v17126_v10 = vsel %vm194_vm1, %v17082_v1, %v202_v4  ;;  %10214 = vst [vmem:[%s21882_s24 + $0x60] sm:$0xff] %v17110_v6  ;;  %10217 = vst [vmem:[%s21882_s24 + $0x78] sm:$0xff] %v17115_v7  ;;  %v17145_v12 = vld [vmem:[%s22011_s0 + $0x30] sm:$0xff]  ;;  %285 = vrot.lane.b32.xlu1 %v17123_v9, %s16822_s4  ;;  %v209_v16 = vmul.f32 0.01, %v17115_v7  ;;  %vm201_vm4 = vcmp.ge.f32.partialorder %v17115_v7, 0.0 }
  0xbe   :  { %10213 = vst [vmem:[%s21882_s24 + $0x58] sm:$0xff] %v17120_v8  ;;  %v17150_v13 = vld [vmem:[%s22011_s0 + $0x10] sm:$0xff]  ;;  %281 = vrot.lane.b32.xlu0 %v17126_v10, %s16822_s4  ;;  %10216 = vst [vmem:[%s21882_s24 + $0x70] sm:$0xff] %v17145_v12  ;;  %v17167_v14 = vsel %vm199_vm2, %v17087_v2, %v207_v5  ;;  %v17170_v15 = vsel %vm198_vm3, %v17110_v6, %v206_v11  ;;  %v205_v17 = vmul.f32 0.01, %v17120_v8  ;;  %vm197_vm5 = vcmp.ge.f32.partialorder %v17120_v8, 0.0 }
  0xbf   :  { %10212 = vst [vmem:[%s21882_s24 + $0x50] sm:$0xff] %v17150_v13  ;;  %v208_v18 = vmul.f32 0.01, %v17145_v12  ;;  %v17182_v19 = vsel %vm201_vm4, %v17115_v7, %v209_v16  ;;  %v204_v21 = vmul.f32 0.01, %v17150_v13  ;;  %vm200_vm6 = vcmp.ge.f32.partialorder %v17145_v12, 0.0 }
  0xc0   :  { %v17185_v20 = vsel %vm197_vm5, %v17120_v8, %v205_v17  ;;  %vm196_vm7 = vcmp.ge.f32.partialorder %v17150_v13, 0.0  ;;  %s16823_s0 = smov 17   ;;  %v16465_v3 = vld [vmem:[#allocation5 + $0x8] sm:$0xff]   ;;  %v254_v17 = vrot.slane %v245_v63, %v17310_v28  ;;  %vm1184_vm14 = vcmp.lt.s32.totalorder %v17304_v27, 113 }
  0xc1   :  { %287 = vrot.lane.b32.xlu1 %v17167_v14, %s16822_s4  ;;  %v17195_v22 = vsel %vm200_vm6, %v17145_v12, %v208_v18  ;;  %v17198_v23 = vsel %vm196_vm7, %v17150_v13, %v204_v21  ;;  %vm1349_vm15 = vcmp.lt.s32.totalorder %v17304_v27, 112  ;;  %vm1514_vm0 = vcmp.lt.s32.totalorder %v17304_v27, 111 }
  0xc2   :  { %283 = vrot.lane.b32.xlu0 %v17170_v15, %s16822_s4  ;;  %vm3894_vm3 = vcmask 261120  }
  0xc5   :  { %295 = vrot.lane.b32.xlu1 %v17182_v19, %s16822_s4 }
  0xc6   :  { %293 = vrot.lane.b32.xlu0 %v17185_v20, %s16822_s4 }
  0xc9   :  { %291 = vrot.lane.b32.xlu1 %v17195_v22, %s16822_s4 }
  0xca   :  { %289 = vrot.lane.b32.xlu0 %v17198_v23, %s16822_s4 }
  0xcd   :  { %220 = vrot.lane.b32.xlu1 %v17170_v15, %s16823_s0 }
  0xce   :  { %218 = vrot.lane.b32.xlu0 %v17126_v10, %s16823_s0 }
  0xd1   :  { %224 = vrot.lane.b32.xlu1 %v17167_v14, %s16823_s0 }
  0xd2   :  { %222 = vrot.lane.b32.xlu0 %v17123_v9, %s16823_s0 }
  0xd5   :  { %232 = vrot.lane.b32.xlu1 %v17182_v19, %s16823_s0 }
  0xd6   :  { %230 = vrot.lane.b32.xlu0 %v17185_v20, %s16823_s0 }
  0xd9   :  { %228 = vrot.lane.b32.xlu1 %v17195_v22, %s16823_s0 }
  0xda   :  { %226 = vrot.lane.b32.xlu0 %v17198_v23, %s16823_s0 }
  0xdd   :  { %535 = vrot.lane.b32.xlu1 %v17170_v15, %s16825_s1 }
  0xde   :  { %533 = vrot.lane.b32.xlu0 %v17126_v10, %s16825_s1 }
  0xe1   :  { %539 = vrot.lane.b32.xlu1 %v17167_v14, %s16825_s1 }
  0xe2   :  { %537 = vrot.lane.b32.xlu0 %v17123_v9, %s16825_s1 }
  0xe5   :  { %547 = vrot.lane.b32.xlu1 %v17182_v19, %s16825_s1 }
  0xe6   :  { %545 = vrot.lane.b32.xlu0 %v17185_v20, %s16825_s1 }
  0xe9   :  { %543 = vrot.lane.b32.xlu1 %v17195_v22, %s16825_s1 }
  0xea   :  { %541 = vrot.lane.b32.xlu0 %v17198_v23, %s16825_s1 }
  0xed   :  { %700 = vrot.lane.b32.xlu1 %v17170_v15, %s16826_s23 }
  0xee   :  { %698 = vrot.lane.b32.xlu0 %v17126_v10, %s16826_s23 }
  0xf1   :  { %704 = vrot.lane.b32.xlu1 %v17167_v14, %s16826_s23 }
  0xf2   :  { %702 = vrot.lane.b32.xlu0 %v17123_v9, %s16826_s23 }
  0xf5   :  { %712 = vrot.lane.b32.xlu1 %v17182_v19, %s16826_s23 }
  0xf6   :  { %710 = vrot.lane.b32.xlu0 %v17185_v20, %s16826_s23 }
  0xf9   :  { %708 = vrot.lane.b32.xlu1 %v17195_v22, %s16826_s23 }
  0xfa   :  { %706 = vrot.lane.b32.xlu0 %v17198_v23, %s16826_s23 }
  0xfd   :  { %1009 = vrot.lane.b32.xlu1 %v17167_v14, %s16827_s28 }
  0xfe   :  { %1007 = vrot.lane.b32.xlu0 %v17123_v9, %s16827_s28 }
 0x101   :  { %1013 = vrot.lane.b32.xlu1 %v17195_v22, %s16827_s28 }
 0x102   :  { %1011 = vrot.lane.b32.xlu0 %v17198_v23, %s16827_s28 }
 0x105   :  { %1005 = vrot.lane.b32.xlu1 %v17170_v15, %s16827_s28 }
 0x106   :  { %1003 = vrot.lane.b32.xlu0 %v17126_v10, %s16827_s28 }
 0x109   :  { %1017 = vrot.lane.b32.xlu1 %v17182_v19, %s16827_s28 }
 0x10a   :  { %1015 = vrot.lane.b32.xlu0 %v17185_v20, %s16827_s28 }
 0x10d   :  { %1174 = vrot.lane.b32.xlu1 %v17167_v14, %s16828_s15 }
 0x10e   :  { %1172 = vrot.lane.b32.xlu0 %v17123_v9, %s16828_s15 }
 0x111   :  { %1178 = vrot.lane.b32.xlu1 %v17195_v22, %s16828_s15 }
 0x112   :  { %1176 = vrot.lane.b32.xlu0 %v17198_v23, %s16828_s15 }
 0x115   :  { %1170 = vrot.lane.b32.xlu1 %v17170_v15, %s16828_s15 }
 0x116   :  { %1168 = vrot.lane.b32.xlu0 %v17126_v10, %s16828_s15 }
 0x119   :  { %1182 = vrot.lane.b32.xlu1 %v17182_v19, %s16828_s15 }
 0x11a   :  { %1180 = vrot.lane.b32.xlu0 %v17185_v20, %s16828_s15 }
 0x11d   :  { %1339 = vrot.lane.b32.xlu1 %v17167_v14, %s16829_s7 }
 0x11e   :  { %1337 = vrot.lane.b32.xlu0 %v17123_v9, %s16829_s7 }
 0x121   :  { %1343 = vrot.lane.b32.xlu1 %v17195_v22, %s16829_s7 }
 0x122   :  { %1341 = vrot.lane.b32.xlu0 %v17198_v23, %s16829_s7 }
 0x125   :  { %1335 = vrot.lane.b32.xlu1 %v17170_v15, %s16829_s7 }
 0x126   :  { %1333 = vrot.lane.b32.xlu0 %v17126_v10, %s16829_s7 }
 0x129   :  { %1347 = vrot.lane.b32.xlu1 %v17182_v19, %s16829_s7 }
 0x12a   :  { %1345 = vrot.lane.b32.xlu0 %v17185_v20, %s16829_s7 }
 0x12d   :  { %1504 = vrot.lane.b32.xlu1 %v17167_v14, %s16830_s25 }
 0x12e   :  { %1502 = vrot.lane.b32.xlu0 %v17123_v9, %s16830_s25 }
 0x12f   :  { %v286_v30 = vpop.permute.xlu1 %285 }
 0x130   :  { %v282_v31 = vpop.permute.xlu0 %281 }
 0x131   :  { %1508 = vrot.lane.b32.xlu1 %v17195_v22, %s16830_s25  ;;  %v302_v34 = vsel %vm297_vm8, %v282_v31, %v286_v30 }
 0x132   :  { %1506 = vrot.lane.b32.xlu0 %v17198_v23, %s16830_s25  ;;  %v330_v39 = vmul.f32 %v316_v32, %v302_v34 }
 0x133   :  { %v288_v35 = vpop.permute.xlu1 %287 }
 0x134   :  { %v284_v36 = vpop.permute.xlu0 %283 }
 0x135   :  { %v303_v37 = vsel %vm297_vm8, %v284_v36, %v288_v35  ;;  %1500 = vrot.lane.b32.xlu1 %v17170_v15, %s16830_s25 }
 0x136   :  { %1498 = vrot.lane.b32.xlu0 %v17126_v10, %s16830_s25  ;;  %v334_v40 = vmul.f32 %v316_v32, %v303_v37 }
 0x137   :  { %v296_v43 = vpop.permute.xlu1 %295 }
 0x138   :  { %v294_v44 = vpop.permute.xlu0 %293  ;;  %v341_v45 = vpack.c.bf16 %v334_v40, %v330_v39  ;;  %v305_v46 = vsel %vm297_vm8, %v296_v43, %v284_v36  ;;  %v258_v39 = vrot.slane %v245_v63, %v17331_v42 }
 0x139   :  { %v304_v47 = vsel %vm297_vm8, %v294_v44, %v282_v31  ;;  %1512 = vrot.lane.b32.xlu1 %v17182_v19, %s16830_s25  ;;  %v333_v50 = vmul.f32 %v312_v41, %v305_v46  ;;  %v250_v31 = vrot.slane %v245_v63, %v17318_v33 }
 0x13a   :  { %1510 = vrot.lane.b32.xlu0 %v17185_v20, %s16830_s25  ;;  %v329_v49 = vmul.f32 %v312_v41, %v304_v47  ;;  %353 = vmatprep.subr.bf16.mxu0 %v341_v45 }
 0x13b   :  { %v292_v52 = vpop.permute.xlu1 %291 }
 0x13c   :  { %v290_v53 = vpop.permute.xlu0 %289  ;;  %v340_v54 = vpack.c.bf16 %v333_v50, %v329_v49  ;;  %v301_v55 = vsel %vm297_vm8, %v288_v35, %v292_v52  ;;  %v299_v58 = vsel %vm297_vm8, %v292_v52, %v296_v43  ;;  %v262_v43 = vrot.slane %v245_v63, %v17324_v38 }
 0x13d   :  { %v300_v56 = vsel %vm297_vm8, %v286_v30, %v290_v53  ;;  %v298_v57 = vsel %vm297_vm8, %v290_v53, %v294_v44  ;;  %1669 = vrot.lane.b32.xlu1 %v17087_v2, %s16827_s28  ;;  %v336_v60 = vmul.f32 %v324_v48, %v299_v58  ;;  %v335_v62 = vmul.f32 %v320_v51, %v301_v55  ;;  %v559_v55 = vld [vmem:[#allocation3 + $0x8] sm:$0xf] }
 0x13e   :  { %1667 = vrot.lane.b32.xlu0 %v17077_v0, %s16827_s28  ;;  %v332_v59 = vmul.f32 %v324_v48, %v298_v57  ;;  %v331_v61 = vmul.f32 %v320_v51, %v300_v56  ;;  %354 = vmatpush1.bf16.msra.mxu0 %v340_v54 }
 0x13f   :  { %v221_v4 = vpop.permute.xlu1 %220 }
 0x140   :  { %v219_v5 = vpop.permute.xlu0 %218  ;;  %v343_v11 = vpack.c.bf16 %v336_v60, %v332_v59  ;;  %v342_v16 = vpack.c.bf16 %v335_v62, %v331_v61  ;;  %v16466_v60 = vld [vmem:[#allocation5] sm:$0xff]   ;;  %v568_v61 = vrot.slane %v559_v55, %v17310_v28 }
 0x141   :  { %1673 = vrot.lane.b32.xlu1 %v17145_v12, %s16827_s28  ;;  %11874 = vmatmul.mubr.msk.bf16.vlgmr.msra.gmra.mrb[0].mxu0 %vm349_vm9, %v16465_v3 }
 0x142   :  { %1671 = vrot.lane.b32.xlu0 %v17150_v13, %s16827_s28  ;;  %396 = vmatprep.subr.bf16.mxu1 %v343_v11 }
 0x143   :  { %397 = vmatpush1.bf16.msra.mxu1 %v342_v16  ;;  %v225_v18 = vpop.permute.xlu1 %224  ;;  %479 = vmatprep.mubr.bf16.mxu0 %v21896_v24 }
 0x144   :  { %v223_v21 = vpop.permute.xlu0 %222  ;;  %v242_v25 = vsel %vm236_vm10, %v221_v4, %v225_v18 }
 0x145   :  { %v241_v26 = vsel %vm236_vm10, %v219_v5, %v223_v21  ;;  %v272_v29 = vmul.f32 %v254_v17, %v242_v25  ;;  %1665 = vrot.lane.b32.xlu1 %v17110_v6, %s16827_s28 }
 0x146   :  { %v268_v30 = vmul.f32 %v254_v17, %v241_v26  ;;  %1663 = vrot.lane.b32.xlu0 %v17082_v1, %s16827_s28  ;;  %11875 = vmatmul.mubr.msk.bf16.vlgmr.msra.gmra.mrb[0].mxu1 %vm349_vm9, %v16465_v3 }
 0x147   :  { %v233_v32 = vpop.permute.xlu1 %232  ;;  %522 = vmatprep.mubr.bf16.mxu1 %v21896_v24 }
 0x148   :  { %v231_v34 = vpop.permute.xlu0 %230  ;;  %v278_v35 = vpack.c.bf16 %v272_v29, %v268_v30  ;;  %v244_v36 = vsel %vm236_vm10, %v233_v32, %v221_v4 }
 0x149   :  { %v243_v37 = vsel %vm236_vm10, %v231_v34, %v219_v5  ;;  %v271_v40 = vmul.f32 %v250_v31, %v244_v36  ;;  %1677 = vrot.lane.b32.xlu1 %v17115_v7, %s16827_s28 }
 0x14a   :  { %v267_v41 = vmul.f32 %v250_v31, %v243_v37  ;;  %1675 = vrot.lane.b32.xlu0 %v17120_v8, %s16827_s28  ;;  %447 = vmatprep.subr.bf16.mxu0 %v278_v35 }
 0x14b   :  { %v229_v45 = vpop.permute.xlu1 %228 }
 0x14c   :  { %v277_v44 = vpack.c.bf16 %v271_v40, %v267_v41  ;;  %v227_v46 = vpop.permute.xlu0 %226  ;;  %v238_v47 = vsel %vm236_vm10, %v229_v45, %v233_v32  ;;  %v240_v48 = vsel %vm236_vm10, %v225_v18, %v229_v45  ;;  %v724_v40 = vld [vmem:[#allocation3 + $0xc] sm:$0xf] }
 0x14d   :  { %v237_v49 = vsel %vm236_vm10, %v227_v46, %v231_v34  ;;  %v239_v50 = vsel %vm236_vm10, %v223_v21, %v227_v46  ;;  %v273_v51 = vmul.f32 %v258_v39, %v240_v48  ;;  %v274_v52 = vmul.f32 %v262_v43, %v238_v47  ;;  %1701 = vrot.lane.b32.xlu1 %v17087_v2, %s16829_s7  ;;  %v16467_v46 = vld [vmem:[#allocation5 + $0x10] sm:$0xff]   ;;  %v864_v47 = vld [vmem:[#allocation3 + $0x10] sm:$0xf] }
 0x14e   :  { %v269_v53 = vmul.f32 %v258_v39, %v239_v50  ;;  %v270_v54 = vmul.f32 %v262_v43, %v237_v49  ;;  %1699 = vrot.lane.b32.xlu0 %v17077_v0, %s16829_s7  ;;  %448 = vmatpush1.bf16.msra.mxu0 %v277_v44  ;;  %v17443_v39 = vld [vmem:[%s21882_s24 + $0x48] sm:$0xff]  ;;  %v17450_v48 = vld [vmem:[%s21882_s24 + $0x70] sm:$0xff]  ;;  %v733_v49 = vrot.slane %v724_v40, %v17310_v28 }
 0x14f   :  { %v536_v57 = vpop.permute.xlu1 %535  ;;  %v17459_v50 = vld [vmem:[%s21882_s24 + $0x50] sm:$0xff] }
 0x150   :  { %v279_v56 = vpack.c.bf16 %v273_v51, %v269_v53  ;;  %v534_v58 = vpop.permute.xlu0 %533  ;;  %v280_v59 = vpack.c.bf16 %v274_v52, %v270_v54  ;;  %v873_v51 = vrot.slane %v864_v47, %v17310_v28  ;;  %v869_v54 = vrot.slane %v864_v47, %v17318_v33 }
 0x151   :  { %1705 = vrot.lane.b32.xlu1 %v17145_v12, %s16829_s7  ;;  %11877 = vmatmul.mubr.msk.bf16.vlgmr.msra.gmra.mrb[0].mxu0 %vm349_vm9, %v16466_v60 }
 0x152   :  { %490 = vmatprep.subr.bf16.mxu1 %v280_v59  ;;  %1703 = vrot.lane.b32.xlu0 %v17150_v13, %s16829_s7  ;;  %v564_v13 = vrot.slane %v559_v55, %v17318_v33  ;;  %v17474_v59 = vld [vmem:[%s21882_s24 + $0x60] sm:$0xff] }
 0x153   :  { %491 = vmatpush1.bf16.msra.mxu1 %v279_v56  ;;  %v540_v0 = vpop.permute.xlu1 %539  ;;  %636 = vmatprep.mubr.bf16.mxu0 %v21896_v24 }
 0x154   :  { %v538_v2 = vpop.permute.xlu0 %537  ;;  %v555_v62 = vsel %vm549_vm11, %v536_v57, %v540_v0 }
 0x155   :  { %v554_v63 = vsel %vm549_vm11, %v534_v58, %v538_v2  ;;  %v586_v12 = vmul.f32 %v568_v61, %v555_v62  ;;  %1697 = vrot.lane.b32.xlu1 %v17110_v6, %s16829_s7  ;;  %v572_v6 = vrot.slane %v559_v55, %v17331_v42 }
 0x156   :  { %v582_v3 = vmul.f32 %v568_v61, %v554_v63  ;;  %11878 = vmatmul.mubr.msk.bf16.vlgmr.msra.gmra.mrb[0].mxu1 %vm349_vm9, %v16466_v60  ;;  %1695 = vrot.lane.b32.xlu0 %v17082_v1, %s16829_s7  ;;  %v576_v1 = vrot.slane %v559_v55, %v17324_v38  ;;  %v729_v60 = vrot.slane %v724_v40, %v17318_v33  ;;  %v17483_v61 = vld [vmem:[%s21882_s24 + $0x40] sm:$0xff] }
 0x157   :  { %679 = vmatprep.mubr.bf16.mxu1 %v21896_v24  ;;  %v548_v4 = vpop.permute.xlu1 %547 }
 0x158   :  { %v546_v5 = vpop.permute.xlu0 %545  ;;  %v593_v11 = vpack.c.bf16 %v586_v12, %v582_v3  ;;  %v557_v16 = vsel %vm549_vm11, %v548_v4, %v536_v57  ;;  %v886_v3 = vmul.f32 %v869_v54, %v17126_v10  ;;  %v741_v10 = vrot.slane %v724_v40, %v17324_v38 }
 0x159   :  { %v556_v17 = vsel %vm549_vm11, %v546_v5, %v534_v58  ;;  %v585_v18 = vmul.f32 %v564_v13, %v557_v16  ;;  %1709 = vrot.lane.b32.xlu1 %v17115_v7, %s16829_s7  ;;  %v737_v16 = vrot.slane %v724_v40, %v17331_v42 }
 0x15a   :  { %v581_v21 = vmul.f32 %v564_v13, %v556_v17  ;;  %604 = vmatprep.subr.bf16.mxu0 %v593_v11  ;;  %1707 = vrot.lane.b32.xlu0 %v17120_v8, %s16829_s7  ;;  %v17436_v8 = vld [vmem:[%s21882_s24 + $0x68] sm:$0xff]  ;;  %v890_v13 = vmul.f32 %v869_v54, %v17170_v15  ;;  %v17509_v15 = vld [vmem:[%s21882_s24 + $0x58] sm:$0xff] }
 0x15b   :  { %v544_v26 = vpop.permute.xlu1 %543 }
 0x15c   :  { %v592_v25 = vpack.c.bf16 %v585_v18, %v581_v21  ;;  %v542_v29 = vpop.permute.xlu0 %541  ;;  %v551_v30 = vsel %vm549_vm11, %v544_v26, %v548_v4  ;;  %v553_v31 = vsel %vm549_vm11, %v540_v0, %v544_v26  ;;  %v887_v0 = vmul.f32 %v873_v51, %v17123_v9 }
 0x15d   :  { %v550_v32 = vsel %vm549_vm11, %v542_v29, %v546_v5  ;;  %v552_v7 = vsel %vm549_vm11, %v538_v2, %v542_v29  ;;  %v587_v34 = vmul.f32 %v572_v6, %v553_v31  ;;  %v588_v35 = vmul.f32 %v576_v1, %v551_v30  ;;  %1733 = vrot.lane.b32.xlu1 %v17436_v8, %s16830_s25 }
 0x15e   :  { %v583_v36 = vmul.f32 %v572_v6, %v552_v7  ;;  %v584_v37 = vmul.f32 %v576_v1, %v550_v32  ;;  %1731 = vrot.lane.b32.xlu0 %v17443_v39, %s16830_s25  ;;  %605 = vmatpush1.bf16.msra.mxu0 %v592_v25  ;;  %v891_v2 = vmul.f32 %v873_v51, %v17167_v14  ;;  %v17501_v14 = vld [vmem:[%s21882_s24 + $0x78] sm:$0xff] }
 0x15f   :  { %v701_v43 = vpop.permute.xlu1 %700  ;;  %v881_v4 = vrot.slane %v864_v47, %v17324_v38  ;;  %v877_v18 = vrot.slane %v864_v47, %v17331_v42  ;;  %v897_v26 = vpack.c.bf16 %v890_v13, %v886_v3 }
 0x160   :  { %v594_v41 = vpack.c.bf16 %v587_v34, %v583_v36  ;;  %v699_v44 = vpop.permute.xlu0 %698  ;;  %v595_v45 = vpack.c.bf16 %v588_v35, %v584_v37  ;;  %v898_v6 = vpack.c.bf16 %v891_v2, %v887_v0  ;;  %v16468_v35 = vld [vmem:[#allocation5 + $0x18] sm:$0xff]  }
 0x161   :  { %1737 = vrot.lane.b32.xlu1 %v17450_v48, %s16830_s25  ;;  %11880 = vmatmul.mubr.msk.bf16.vlgmr.msra.gmra.mrb[0].mxu0 %vm349_vm9, %v16467_v46  ;;  %v889_v29 = vmul.f32 %v881_v4, %v17185_v20  ;;  %v893_v30 = vmul.f32 %v881_v4, %v17182_v19  ;;  %v1029_v20 = vld [vmem:[#allocation3 + $0x14] sm:$0xf]  ;;  %v888_v19 = vmul.f32 %v877_v18, %v17198_v23 }
 0x162   :  { %647 = vmatprep.subr.bf16.mxu1 %v595_v45  ;;  %1735 = vrot.lane.b32.xlu0 %v17459_v50, %s16830_s25  ;;  %v1038_v51 = vrot.slane %v1029_v20, %v17310_v28  ;;  %v1042_v13 = vrot.slane %v1029_v20, %v17331_v42  ;;  %v1046_v4 = vrot.slane %v1029_v20, %v17324_v38 }
 0x163   :  { %648 = vmatpush1.bf16.msra.mxu1 %v594_v41  ;;  %v705_v52 = vpop.permute.xlu1 %704  ;;  %801 = vmatprep.mubr.bf16.mxu0 %v21896_v24 }
 0x164   :  { %v703_v53 = vpop.permute.xlu0 %702  ;;  %v720_v55 = vsel %vm714_vm12, %v701_v43, %v705_v52 }
 0x165   :  { %v719_v56 = vsel %vm714_vm12, %v699_v44, %v703_v53  ;;  %v751_v57 = vmul.f32 %v733_v49, %v720_v55  ;;  %1729 = vrot.lane.b32.xlu1 %v17474_v59, %s16830_s25 }
 0x166   :  { %v747_v58 = vmul.f32 %v733_v49, %v719_v56  ;;  %11881 = vmatmul.mubr.msk.bf16.vlgmr.msra.gmra.mrb[0].mxu1 %vm349_vm9, %v16467_v46  ;;  %1727 = vrot.lane.b32.xlu0 %v17483_v61, %s16830_s25  ;;  %v900_v49 = vpack.c.bf16 %v893_v30, %v889_v29 }
 0x167   :  { %844 = vmatprep.mubr.bf16.mxu1 %v21896_v24  ;;  %v713_v62 = vpop.permute.xlu1 %712 }
 0x168   :  { %v711_v63 = vpop.permute.xlu0 %710  ;;  %v758_v12 = vpack.c.bf16 %v751_v57, %v747_v58  ;;  %v722_v5 = vsel %vm714_vm12, %v713_v62, %v701_v43  ;;  %v892_v43 = vmul.f32 %v877_v18, %v17195_v22  ;;  %v1034_v57 = vrot.slane %v1029_v20, %v17318_v33 }
 0x169   :  { %v721_v11 = vsel %vm714_vm12, %v711_v63, %v699_v44  ;;  %v750_v9 = vmul.f32 %v729_v60, %v722_v5  ;;  %1741 = vrot.lane.b32.xlu1 %v17501_v14, %s16830_s25 }
 0x16a   :  { %v746_v17 = vmul.f32 %v729_v60, %v721_v11  ;;  %769 = vmatprep.subr.bf16.mxu0 %v758_v12  ;;  %1739 = vrot.lane.b32.xlu0 %v17509_v15, %s16830_s25 }
 0x16b   :  { %v709_v1 = vpop.permute.xlu1 %708 }
 0x16c   :  { %v757_v21 = vpack.c.bf16 %v750_v9, %v746_v17  ;;  %v707_v25 = vpop.permute.xlu0 %706  ;;  %v716_v31 = vsel %vm714_vm12, %v709_v1, %v713_v62  ;;  %v718_v32 = vsel %vm714_vm12, %v705_v52, %v709_v1  ;;  %v899_v52 = vpack.c.bf16 %v892_v43, %v888_v19 }
 0x16d   :  { %v715_v7 = vsel %vm714_vm12, %v707_v25, %v711_v63  ;;  %v717_v34 = vsel %vm714_vm12, %v703_v53, %v707_v25  ;;  %v752_v36 = vmul.f32 %v737_v16, %v718_v32  ;;  %v753_v37 = vmul.f32 %v741_v10, %v716_v31  ;;  %v16469_v63 = vld [vmem:[#allocation5 + $0x20] sm:$0xff]  }
 0x16e   :  { %v748_v40 = vmul.f32 %v737_v16, %v717_v34  ;;  %v749_v41 = vmul.f32 %v741_v10, %v715_v7  ;;  %770 = vmatpush1.bf16.msra.mxu0 %v757_v21 }
 0x16f   :  { %909 = vmatprep.subr.bf16.mxu0 %v898_v6  ;;  %v1010_v45 = vpop.permute.xlu1 %1009 }
 0x170   :  { %v759_v44 = vpack.c.bf16 %v752_v36, %v748_v40  ;;  %v1008_v46 = vpop.permute.xlu0 %1007  ;;  %v760_v47 = vpack.c.bf16 %v753_v37, %v749_v41  ;;  %v16470_v40 = vld [vmem:[#allocation5 + $0x28] sm:$0xff]  }
 0x171   :  { %11883 = vmatmul.mubr.msk.bf16.vlgmr.msra.gmra.mrb[0].mxu0 %vm349_vm9, %v16468_v35 }
 0x172   :  { %812 = vmatprep.subr.bf16.mxu1 %v760_v47  ;;  %910 = vmatpush1.bf16.msra.mxu0 %v897_v26  ;;  %v1194_v26 = vld [vmem:[#allocation3 + $0x18] sm:$0xf] }
 0x173   :  { %813 = vmatpush1.bf16.msra.mxu1 %v759_v44  ;;  %941 = vmatprep.mubr.bf16.mxu0 %v21896_v24  ;;  %v1014_v23 = vpop.permute.xlu1 %1013  ;;  %v1203_v7 = vrot.slane %v1194_v26, %v17310_v28  ;;  %v1199_v19 = vrot.slane %v1194_v26, %v17318_v33 }
 0x174   :  { %v1012_v53 = vpop.permute.xlu0 %1011  ;;  %952 = vmatprep.subr.bf16.mxu1 %v900_v49  ;;  %v1023_v22 = vsel %vm1019_vm13, %v1010_v45, %v1014_v23  ;;  %v1207_v49 = vrot.slane %v1194_v26, %v17331_v42 }
 0x175   :  { %v1022_v54 = vsel %vm1019_vm13, %v1008_v46, %v1012_v53  ;;  %v1056_v55 = vmul.f32 %v1038_v51, %v1023_v22 }
 0x176   :  { %v1052_v56 = vmul.f32 %v1038_v51, %v1022_v54  ;;  %11884 = vmatmul.mubr.msk.bf16.vlgmr.msra.gmra.mrb[0].mxu1 %vm349_vm9, %v16468_v35 }
 0x177   :  { %953 = vmatpush1.bf16.msra.mxu1 %v899_v52  ;;  %984 = vmatprep.mubr.bf16.mxu1 %v21896_v24  ;;  %v1006_v58 = vpop.permute.xlu1 %1005 }
 0x178   :  { %v1004_v60 = vpop.permute.xlu0 %1003  ;;  %v1063_v0 = vpack.c.bf16 %v1056_v55, %v1052_v56  ;;  %v1025_v2 = vsel %vm1019_vm13, %v1006_v58, %v1010_v45 }
 0x179   :  { %v1024_v62 = vsel %vm1019_vm13, %v1004_v60, %v1008_v46  ;;  %v1055_v12 = vmul.f32 %v1034_v57, %v1025_v2 }
 0x17a   :  { %v1051_v3 = vmul.f32 %v1034_v57, %v1024_v62  ;;  %1074 = vmatprep.subr.bf16.mxu0 %v1063_v0 }
 0x17b   :  { %v1018_v11 = vpop.permute.xlu1 %1017 }
 0x17c   :  { %v1062_v5 = vpack.c.bf16 %v1055_v12, %v1051_v3  ;;  %v1016_v16 = vpop.permute.xlu0 %1015  ;;  %v1021_v9 = vsel %vm1019_vm13, %v1014_v23, %v1018_v11  ;;  %v1027_v17 = vsel %vm1019_vm13, %v1018_v11, %v1006_v58  ;;  %v1211_v23 = vrot.slane %v1194_v26, %v17324_v38 }
 0x17d   :  { %v1020_v10 = vsel %vm1019_vm13, %v1012_v53, %v1016_v16  ;;  %v1026_v6 = vsel %vm1019_vm13, %v1016_v16, %v1004_v60  ;;  %11886 = vmatmul.mubr.msk.bf16.vlgmr.msra.gmra.mrb[0].mxu0 %vm349_vm9, %v16469_v63  ;;  %v1057_v18 = vmul.f32 %v1042_v13, %v1021_v9  ;;  %v1058_v21 = vmul.f32 %v1046_v4, %v1027_v17 }
 0x17e   :  { %v1053_v1 = vmul.f32 %v1042_v13, %v1020_v10  ;;  %v1054_v25 = vmul.f32 %v1046_v4, %v1026_v6  ;;  %1075 = vmatpush1.bf16.msra.mxu0 %v1062_v5  ;;  %1106 = vmatprep.mubr.bf16.mxu0 %v21896_v24  ;;  %v16471_v5 = vld [vmem:[#allocation5 + $0x30] sm:$0xff]  }
 0x17f   :  { %v1175_v30 = vpop.permute.xlu1 %1174 }
 0x180   :  { %v1064_v29 = vpack.c.bf16 %v1057_v18, %v1053_v1  ;;  %v1173_v31 = vpop.permute.xlu0 %1172  ;;  %v1065_v32 = vpack.c.bf16 %v1058_v21, %v1054_v25 }
 0x182   :  { %1117 = vmatprep.subr.bf16.mxu1 %v1065_v32  ;;  %11887 = vmatmul.mubr.msk.bf16.vlgmr.msra.gmra.mrb[0].mxu1 %vm349_vm9, %v16469_v63  ;;  %v1359_v63 = vld [vmem:[#allocation3 + $0x1c] sm:$0xf] }
 0x183   :  { %1118 = vmatpush1.bf16.msra.mxu1 %v1064_v29  ;;  %1149 = vmatprep.mubr.bf16.mxu1 %v21896_v24  ;;  %v1179_v34 = vpop.permute.xlu1 %1178  ;;  %v1368_v11 = vrot.slane %v1359_v63, %v17310_v28  ;;  %v1364_v21 = vrot.slane %v1359_v63, %v17318_v33 }
 0x184   :  { %v1177_v35 = vpop.permute.xlu0 %1176  ;;  %v1188_v36 = vsel %vm1184_vm14, %v1175_v30, %v1179_v34 }
 0x185   :  { %v1187_v37 = vsel %vm1184_vm14, %v1173_v31, %v1177_v35  ;;  %v1221_v41 = vmul.f32 %v1203_v7, %v1188_v36 }
 0x186   :  { %v1217_v20 = vmul.f32 %v1203_v7, %v1187_v37  ;;  %v1372_v7 = vrot.slane %v1359_v63, %v17331_v42 }
 0x187   :  { %v1171_v43 = vpop.permute.xlu1 %1170 }
 0x188   :  { %v1169_v44 = vpop.permute.xlu0 %1168  ;;  %v1228_v45 = vpack.c.bf16 %v1221_v41, %v1217_v20  ;;  %v1190_v46 = vsel %vm1184_vm14, %v1171_v43, %v1175_v30 }
 0x189   :  { %v1189_v47 = vsel %vm1184_vm14, %v1169_v44, %v1173_v31  ;;  %11889 = vmatmul.mubr.msk.bf16.vlgmr.msra.gmra.mrb[0].mxu0 %vm349_vm9, %v16470_v40  ;;  %v1220_v51 = vmul.f32 %v1199_v19, %v1190_v46 }
 0x18a   :  { %v1216_v52 = vmul.f32 %v1199_v19, %v1189_v47  ;;  %1239 = vmatprep.subr.bf16.mxu0 %v1228_v45  ;;  %1271 = vmatprep.mubr.bf16.mxu0 %v21896_v24 }
 0x18b   :  { %v1183_v22 = vpop.permute.xlu1 %1182 }
 0x18c   :  { %v1227_v53 = vpack.c.bf16 %v1220_v51, %v1216_v52  ;;  %v1181_v54 = vpop.permute.xlu0 %1180  ;;  %v1186_v55 = vsel %vm1184_vm14, %v1179_v34, %v1183_v22  ;;  %v1192_v56 = vsel %vm1184_vm14, %v1183_v22, %v1171_v43  ;;  %v1376_v34 = vrot.slane %v1359_v63, %v17324_v38  ;;  %v16472_v43 = vld [vmem:[#allocation5 + $0x38] sm:$0xff]  }
 0x18d   :  { %v1185_v57 = vsel %vm1184_vm14, %v1177_v35, %v1181_v54  ;;  %v1191_v58 = vsel %vm1184_vm14, %v1181_v54, %v1169_v44  ;;  %v1222_v60 = vmul.f32 %v1207_v49, %v1186_v55  ;;  %v1223_v0 = vmul.f32 %v1211_v23, %v1192_v56 }
 0x18e   :  { %v1218_v2 = vmul.f32 %v1207_v49, %v1185_v57  ;;  %v1219_v62 = vmul.f32 %v1211_v23, %v1191_v58  ;;  %1240 = vmatpush1.bf16.msra.mxu0 %v1227_v53  ;;  %11890 = vmatmul.mubr.msk.bf16.vlgmr.msra.gmra.mrb[0].mxu1 %vm349_vm9, %v16470_v40  ;;  %v1524_v49 = vld [vmem:[#allocation3 + $0x20] sm:$0xf] }
 0x18f   :  { %v1340_v3 = vpop.permute.xlu1 %1339  ;;  %1314 = vmatprep.mubr.bf16.mxu1 %v21896_v24  ;;  %v1533_v22 = vrot.slane %v1524_v49, %v17310_v28 }
 0x190   :  { %v1229_v12 = vpack.c.bf16 %v1222_v60, %v1218_v2  ;;  %v1338_v13 = vpop.permute.xlu0 %1337  ;;  %v1230_v4 = vpack.c.bf16 %v1223_v0, %v1219_v62  ;;  %v1529_v0 = vrot.slane %v1524_v49, %v17318_v33 }
 0x192   :  { %1282 = vmatprep.subr.bf16.mxu1 %v1230_v4 }
 0x193   :  { %1283 = vmatpush1.bf16.msra.mxu1 %v1229_v12  ;;  %v1344_v16 = vpop.permute.xlu1 %1343 }
 0x194   :  { %v1342_v9 = vpop.permute.xlu0 %1341  ;;  %v1353_v17 = vsel %vm1349_vm15, %v1340_v3, %v1344_v16 }
 0x195   :  { %v1352_v10 = vsel %vm1349_vm15, %v1338_v13, %v1342_v9  ;;  %11892 = vmatmul.mubr.msk.bf16.vlgmr.msra.gmra.mrb[0].mxu0 %vm349_vm9, %v16471_v5  ;;  %v1386_v6 = vmul.f32 %v1368_v11, %v1353_v17 }
 0x196   :  { %v1382_v18 = vmul.f32 %v1368_v11, %v1352_v10  ;;  %1436 = vmatprep.mubr.bf16.mxu0 %v21896_v24  ;;  %v1541_v11 = vrot.slane %v1524_v49, %v17324_v38 }
 0x197   :  { %v1336_v1 = vpop.permute.xlu1 %1335 }
 0x198   :  { %v1334_v25 = vpop.permute.xlu0 %1333  ;;  %v1393_v26 = vpack.c.bf16 %v1386_v6, %v1382_v18  ;;  %v1355_v29 = vsel %vm1349_vm15, %v1336_v1, %v1340_v3 }
 0x199   :  { %v1354_v30 = vsel %vm1349_vm15, %v1334_v25, %v1338_v13  ;;  %v1385_v31 = vmul.f32 %v1364_v21, %v1355_v29 }
 0x19a   :  { %v1381_v32 = vmul.f32 %v1364_v21, %v1354_v30  ;;  %1404 = vmatprep.subr.bf16.mxu0 %v1393_v26  ;;  %11893 = vmatmul.mubr.msk.bf16.vlgmr.msra.gmra.mrb[0].mxu1 %vm349_vm9, %v16471_v5  ;;  %v1537_v5 = vrot.slane %v1524_v49, %v17331_v42 }
 0x19b   :  { %v1348_v36 = vpop.permute.xlu1 %1347  ;;  %1479 = vmatprep.mubr.bf16.mxu1 %v21896_v24 }
 0x19c   :  { %v1392_v35 = vpack.c.bf16 %v1385_v31, %v1381_v32  ;;  %v1346_v37 = vpop.permute.xlu0 %1345  ;;  %v1351_v40 = vsel %vm1349_vm15, %v1344_v16, %v1348_v36  ;;  %v1357_v41 = vsel %vm1349_vm15, %v1348_v36, %v1336_v1  ;;  %v16473_v1 = vld [vmem:[#allocation5 + $0x40] sm:$0xff]  }
 0x19d   :  { %v1350_v20 = vsel %vm1349_vm15, %v1342_v9, %v1346_v37  ;;  %v1356_v19 = vsel %vm1349_vm15, %v1346_v37, %v1334_v25  ;;  %v1387_v44 = vmul.f32 %v1372_v7, %v1351_v40  ;;  %v1388_v45 = vmul.f32 %v1376_v34, %v1357_v41 }
 0x19e   :  { %v1383_v46 = vmul.f32 %v1372_v7, %v1350_v20  ;;  %v1384_v47 = vmul.f32 %v1376_v34, %v1356_v19  ;;  %1405 = vmatpush1.bf16.msra.mxu0 %v1392_v35  ;;  %v16831_v35 = vmov 0.0  }
 0x19f   :  { %v1505_v52 = vpop.permute.xlu1 %1504 }
 0x1a0   :  { %v1394_v51 = vpack.c.bf16 %v1387_v44, %v1383_v46  ;;  %v1503_v23 = vpop.permute.xlu0 %1502  ;;  %v1395_v53 = vpack.c.bf16 %v1388_v45, %v1384_v47 }
 0x1a1   :  { %11895 = vmatmul.mubr.msk.bf16.vlgmr.msra.gmra.mrb[0].mxu0 %vm349_vm9, %v16472_v43 }
 0x1a2   :  { %1447 = vmatprep.subr.bf16.mxu1 %v1395_v53  ;;  %1601 = vmatprep.mubr.bf16.mxu0 %v21896_v24 }
 0x1a3   :  { %1448 = vmatpush1.bf16.msra.mxu1 %v1394_v51  ;;  %v1509_v54 = vpop.permute.xlu1 %1508 }
 0x1a4   :  { %v1507_v55 = vpop.permute.xlu0 %1506  ;;  %v1518_v56 = vsel %vm1514_vm0, %v1505_v52, %v1509_v54 }
 0x1a5   :  { %v1517_v57 = vsel %vm1514_vm0, %v1503_v23, %v1507_v55  ;;  %v1551_v58 = vmul.f32 %v1533_v22, %v1518_v56 }
 0x1a6   :  { %v1547_v60 = vmul.f32 %v1533_v22, %v1517_v57  ;;  %11896 = vmatmul.mubr.msk.bf16.vlgmr.msra.gmra.mrb[0].mxu1 %vm349_vm9, %v16472_v43 }
 0x1a7   :  { %v1501_v2 = vpop.permute.xlu1 %1500  ;;  %1644 = vmatprep.mubr.bf16.mxu1 %v21896_v24 }
 0x1a8   :  { %v1499_v62 = vpop.permute.xlu0 %1498  ;;  %v1558_v63 = vpack.c.bf16 %v1551_v58, %v1547_v60  ;;  %v1520_v12 = vsel %vm1514_vm0, %v1501_v2, %v1505_v52 }
 0x1a9   :  { %v1519_v3 = vsel %vm1514_vm0, %v1499_v62, %v1503_v23  ;;  %v1550_v13 = vmul.f32 %v1529_v0, %v1520_v12 }
 0x1aa   :  { %v1546_v4 = vmul.f32 %v1529_v0, %v1519_v3  ;;  %1569 = vmatprep.subr.bf16.mxu0 %v1558_v63 }
 0x1ab   :  { %v1513_v9 = vpop.permute.xlu1 %1512 }
 0x1ac   :  { %v1557_v16 = vpack.c.bf16 %v1550_v13, %v1546_v4  ;;  %v1511_v17 = vpop.permute.xlu0 %1510  ;;  %v1516_v10 = vsel %vm1514_vm0, %v1509_v54, %v1513_v9  ;;  %v1522_v6 = vsel %vm1514_vm0, %v1513_v9, %v1501_v2 }
 0x1ad   :  { %v1515_v18 = vsel %vm1514_vm0, %v1507_v55, %v1511_v17  ;;  %v1521_v21 = vsel %vm1514_vm0, %v1511_v17, %v1499_v62  ;;  %v1552_v25 = vmul.f32 %v1537_v5, %v1516_v10  ;;  %v1553_v26 = vmul.f32 %v1541_v11, %v1522_v6 }
 0x1ae   :  { %v1548_v29 = vmul.f32 %v1537_v5, %v1515_v18  ;;  %v1549_v30 = vmul.f32 %v1541_v11, %v1521_v21  ;;  %1570 = vmatpush1.bf16.msra.mxu0 %v1557_v16 }
 0x1af   :  { %v1670_v32 = vpop.permute.xlu1 %1669 }
 0x1b0   :  { %v1559_v31 = vpack.c.bf16 %v1552_v25, %v1548_v29  ;;  %v1668_v7 = vpop.permute.xlu0 %1667  ;;  %v1560_v34 = vpack.c.bf16 %v1553_v26, %v1549_v30 }
 0x1b1   :  { %11898 = vmatmul.mubr.msk.bf16.vlgmr.msra.gmra.mrb[0].mxu0 %vm349_vm9, %v16473_v1 }
 0x1b2   :  { %1612 = vmatprep.subr.bf16.mxu1 %v1560_v34  ;;  %1831 = vmatprep.mubr.f32.mxu0 %v16831_v35 }
 0x1b3   :  { %1613 = vmatpush1.bf16.msra.mxu1 %v1559_v31  ;;  %v1674_v36 = vpop.permute.xlu1 %1673 }
 0x1b4   :  { %v1672_v37 = vpop.permute.xlu0 %1671  ;;  %v1682_v23 = vsel %vm1019_vm13, %v1670_v32, %v1674_v36 }
 0x1b5   :  { %v1681_v53 = vsel %vm1019_vm13, %v1668_v7, %v1672_v37  ;;  %v1692_v56 = vadd.f32 %v17436_v8, %v1682_v23 }
 0x1b6   :  { %11899 = vmatmul.mubr.msk.bf16.vlgmr.msra.gmra.mrb[0].mxu1 %vm349_vm9, %v16473_v1  ;;  %v1688_v58 = vadd.f32 %v17443_v39, %v1681_v53  ;;  %v1759_v53 = vld [vmem:[#allocation7] sm:$0xff] }
 0x1b7   :  { %1908 = vmatprep.mubr.f32.mxu1 %v16831_v35  ;;  %v1666_v40 = vpop.permute.xlu1 %1665 }
 0x1b8   :  { %v1664_v41 = vpop.permute.xlu0 %1663  ;;  %v1684_v60 = vsel %vm1019_vm13, %v1666_v40, %v1670_v32 }
 0x1b9   :  { %v1683_v0 = vsel %vm1019_vm13, %v1664_v41, %v1668_v7  ;;  %v1691_v5 = vadd.f32 %v17474_v59, %v1684_v60 }
 0x1ba   :  { %v1687_v11 = vadd.f32 %v17483_v61, %v1683_v0  ;;  %v1930_v0 = vld [vmem:[#allocation8 + $0x8] sm:$0xff] }
 0x1bb   :  { %v1678_v20 = vpop.permute.xlu1 %1677 }
 0x1bc   :  { %v1676_v19 = vpop.permute.xlu0 %1675  ;;  %v1680_v2 = vsel %vm1019_vm13, %v1674_v36, %v1678_v20  ;;  %v1686_v62 = vsel %vm1019_vm13, %v1678_v20, %v1666_v40 }
 0x1bd   :  { %v1693_v17 = vadd.f32 %v17450_v48, %v1680_v2  ;;  %v1679_v10 = vsel %vm1019_vm13, %v1672_v37, %v1676_v19  ;;  %v1685_v6 = vsel %vm1019_vm13, %v1676_v19, %v1664_v41  ;;  %v1694_v21 = vadd.f32 %v17501_v14, %v1686_v62  ;;  %v1947_v2 = vld [vmem:[#allocation8 + $0x90] sm:$0xff]  ;;  %v1948_v62 = vld [vmem:[#allocation8 + $0x98] sm:$0xff] }
 0x1be   :  { %v1689_v32 = vadd.f32 %v17459_v50, %v1679_v10  ;;  %v1690_v36 = vadd.f32 %v17509_v15, %v1685_v6  ;;  %v1950_v10 = vld [vmem:[#allocation8 + $0xa8] sm:$0xff]  ;;  %v1933_v6 = vld [vmem:[#allocation8 + $0x20] sm:$0xff] }
 0x1bf   :  { %v1702_v43 = vpop.permute.xlu1 %1701 }
 0x1c0   :  { %v1700_v44 = vpop.permute.xlu0 %1699 }
 0x1c3   :  { %v1706_v45 = vpop.permute.xlu1 %1705 }
 0x1c4   :  { %v1704_v46 = vpop.permute.xlu0 %1703  ;;  %v1714_v54 = vsel %vm1349_vm15, %v1702_v43, %v1706_v45 }
 0x1c5   :  { %v1713_v57 = vsel %vm1349_vm15, %v1700_v44, %v1704_v46  ;;  %v1724_v63 = vadd.f32 %v1714_v54, %v1692_v56  ;;  %v1945_v56 = vld [vmem:[#allocation8 + $0x80] sm:$0xff] }
 0x1c6   :  { %v1720_v8 = vadd.f32 %v1713_v57, %v1688_v58  ;;  %v1946_v57 = vld [vmem:[#allocation8 + $0x88] sm:$0xff]  ;;  %v1929_v58 = vld [vmem:[#allocation8] sm:$0xff] }
 0x1c7   :  { %v1698_v47 = vpop.permute.xlu1 %1697  ;;  %v14983_v60 = vpack.c.bf16 %v1946_v57, %v1945_v56  ;;  %v1939_v57 = vld [vmem:[#allocation8 + $0x50] sm:$0xff] }
 0x1c8   :  { %v1696_v49 = vpop.permute.xlu0 %1695  ;;  %v1716_v3 = vsel %vm1349_vm15, %v1698_v47, %v1702_v43 }
 0x1c9   :  { %v1715_v39 = vsel %vm1349_vm15, %v1696_v49, %v1700_v44  ;;  %v1723_v1 = vadd.f32 %v1716_v3, %v1691_v5  ;;  %v1932_v3 = vld [vmem:[#allocation8 + $0x18] sm:$0xff]  ;;  %v1962_v5 = vld [vmem:[#allocation8 + $0x108] sm:$0xff] }
 0x1ca   :  { %v1719_v25 = vadd.f32 %v1715_v39, %v1687_v11  ;;  %v1977_v39 = vld [vmem:[#allocation8 + $0x180] sm:$0xff] }
 0x1cb   :  { %v1710_v51 = vpop.permute.xlu1 %1709 }
 0x1cc   :  { %v1708_v52 = vpop.permute.xlu0 %1707  ;;  %v1712_v59 = vsel %vm1349_vm15, %v1706_v45, %v1710_v51  ;;  %v1718_v26 = vsel %vm1349_vm15, %v1710_v51, %v1698_v47 }
 0x1cd   :  { %v1711_v48 = vsel %vm1349_vm15, %v1704_v46, %v1708_v52  ;;  %v1717_v14 = vsel %vm1349_vm15, %v1708_v52, %v1696_v49  ;;  %v1725_v40 = vadd.f32 %v1712_v59, %v1693_v17  ;;  %v1726_v41 = vadd.f32 %v1718_v26, %v1694_v21  ;;  %v1949_v17 = vld [vmem:[#allocation8 + $0xa0] sm:$0xff]  ;;  %v1934_v21 = vld [vmem:[#allocation8 + $0x28] sm:$0xff]  ;;  %v1964_v26 = vld [vmem:[#allocation8 + $0x118] sm:$0xff] }
 0x1ce   :  { %v1721_v20 = vadd.f32 %v1711_v48, %v1689_v32  ;;  %v1722_v43 = vadd.f32 %v1717_v14, %v1690_v36  ;;  %v1951_v48 = vld [vmem:[#allocation8 + $0xb0] sm:$0xff]  ;;  %v1981_v32 = vld [vmem:[#allocation8 + $0x1a0] sm:$0xff]  ;;  %v1982_v14 = vld [vmem:[#allocation8 + $0x1a8] sm:$0xff] }
 0x1cf   :  { %v1734_v22 = vpop.permute.xlu1 %1733  ;;  %v1935_v36 = vld [vmem:[#allocation8 + $0x30] sm:$0xff] }
 0x1d0   :  { %v1732_v55 = vpop.permute.xlu0 %1731 }
 0x1d3   :  { %v1738_v12 = vpop.permute.xlu1 %1737 }
 0x1d4   :  { %v1746_v13 = vsel %vm1514_vm0, %v1734_v22, %v1738_v12  ;;  %v1736_v4 = vpop.permute.xlu0 %1735 }
 0x1d5   :  { %v1756_v16 = vadd.f32 %v1746_v13, %v1724_v63  ;;  %v1745_v9 = vsel %vm1514_vm0, %v1732_v55, %v1736_v4  ;;  %v14985_v63 = vpack.c.bf16 %v1930_v0, %v1929_v58  ;;  %v1978_v13 = vld [vmem:[#allocation8 + $0x188] sm:$0xff] }
 0x1d6   :  { %v1752_v18 = vadd.f32 %v1745_v9, %v1720_v8  ;;  %v1931_v8 = vld [vmem:[#allocation8 + $0x10] sm:$0xff]  ;;  %v1970_v0 = vld [vmem:[#allocation8 + $0x148] sm:$0xff] }
 0x1d7   :  { %v1730_v61 = vpop.permute.xlu1 %1729  ;;  %v14989_v11 = vpack.c.bf16 %v1932_v3, %v1931_v8  ;;  %v1957_v8 = vld [vmem:[#allocation8 + $0xe0] sm:$0xff]  ;;  %v1958_v3 = vld [vmem:[#allocation8 + $0xe8] sm:$0xff] }
 0x1d8   :  { %v1748_v29 = vsel %vm1514_vm0, %v1730_v61, %v1734_v22  ;;  %v1728_v30 = vpop.permute.xlu0 %1727  ;;  %v14975_v31 = vpack.c.bf16 %v1756_v16, %v1752_v18  ;;  %v15015_v16 = vpack.c.bf16 %v1978_v13, %v1977_v39  ;;  %v14991_v18 = vpack.c.bf16 %v1950_v10, %v1949_v17  ;;  %v1942_v17 = vld [vmem:[#allocation8 + $0x68] sm:$0xff] }
 0x1d9   :  { %v1755_v7 = vadd.f32 %v1748_v29, %v1723_v1  ;;  %v1747_v34 = vsel %vm1514_vm0, %v1728_v30, %v1732_v55  ;;  %v1760_v55 = vld [vmem:[#allocation7 + $0x8] sm:$0xff]  ;;  %v1979_v1 = vld [vmem:[#allocation8 + $0x190] sm:$0xff] }
 0x1da   :  { %v1751_v37 = vadd.f32 %v1747_v34, %v1719_v25  ;;  %14976 = vmatprep.subr.bf16.mxu0 %v14975_v31  ;;  %v1980_v25 = vld [vmem:[#allocation8 + $0x198] sm:$0xff]  ;;  %v14993_v31 = vpack.c.bf16 %v1934_v21, %v1933_v6 }
 0x1db   :  { %v1742_v19 = vpop.permute.xlu1 %1741  ;;  %v15019_v59 = vpack.c.bf16 %v1980_v25, %v1979_v1  ;;  %v1960_v21 = vld [vmem:[#allocation8 + $0xf8] sm:$0xff]  ;;  %v1943_v25 = vld [vmem:[#allocation8 + $0x70] sm:$0xff] }
 0x1dc   :  { %v14977_v44 = vpack.c.bf16 %v1755_v7, %v1751_v37  ;;  %v1744_v50 = vsel %vm1514_vm0, %v1738_v12, %v1742_v19  ;;  %v1750_v45 = vsel %vm1514_vm0, %v1742_v19, %v1730_v61  ;;  %v1740_v46 = vpop.permute.xlu0 %1739  ;;  %v14987_v12 = vpack.c.bf16 %v1948_v62, %v1947_v2  ;;  %v1963_v61 = vld [vmem:[#allocation8 + $0x110] sm:$0xff]  ;;  %v1965_v7 = vld [vmem:[#allocation8 + $0x120] sm:$0xff]  ;;  %v1936_v37 = vld [vmem:[#allocation8 + $0x38] sm:$0xff] }
 0x1dd   :  { %v1757_v47 = vadd.f32 %v1744_v50, %v1725_v40  ;;  %v1758_v49 = vadd.f32 %v1750_v45, %v1726_v41  ;;  %v1743_v15 = vsel %vm1514_vm0, %v1736_v4, %v1740_v46  ;;  %v1749_v51 = vsel %vm1514_vm0, %v1740_v46, %v1728_v30  ;;  %v1961_v4 = vld [vmem:[#allocation8 + $0x100] sm:$0xff]  ;;  %v1952_v30 = vld [vmem:[#allocation8 + $0xb8] sm:$0xff]  ;;  %v1966_v41 = vld [vmem:[#allocation8 + $0x128] sm:$0xff] }
 0x1de   :  { %v1753_v52 = vadd.f32 %v1743_v15, %v1721_v20  ;;  %v1754_v23 = vadd.f32 %v1749_v51, %v1722_v43  ;;  %14978 = vmatpush1.bf16.msra.mxu0 %v14977_v44  ;;  %v15017_v9 = vpack.c.bf16 %v1962_v5, %v1961_v4  ;;  %v15021_v29 = vpack.c.bf16 %v1964_v26, %v1963_v61  ;;  %v1953_v20 = vld [vmem:[#allocation8 + $0xc0] sm:$0xff]  ;;  %v1954_v19 = vld [vmem:[#allocation8 + $0xc8] sm:$0xff]  ;;  %v1983_v43 = vld [vmem:[#allocation8 + $0x1b0] sm:$0xff] }
 0x1df   :  { %14984 = vmatprep.subr.bf16.mxu0 %v14983_v60  ;;  %v14995_v34 = vpack.c.bf16 %v1952_v30, %v1951_v48  ;;  %v15023_v40 = vpack.c.bf16 %v1982_v14, %v1981_v32  ;;  %v15025_v44 = vpack.c.bf16 %v1966_v41, %v1965_v7  ;;  %v1984_v50 = vld [vmem:[#allocation8 + $0x1b8] sm:$0xff]  ;;  %v14997_v45 = vpack.c.bf16 %v1936_v37, %v1935_v36  ;;  %v1937_v46 = vld [vmem:[#allocation8 + $0x40] sm:$0xff]  ;;  %v1971_v5 = vld [vmem:[#allocation8 + $0x150] sm:$0xff] }
 0x1e0   :  { %v14981_v22 = vpack.c.bf16 %v1757_v47, %v1753_v52  ;;  %v14979_v54 = vpack.c.bf16 %v1758_v49, %v1754_v23  ;;  %v15027_v47 = vpack.c.bf16 %v1984_v50, %v1983_v43  ;;  %v1967_v49 = vld [vmem:[#allocation8 + $0x130] sm:$0xff]  ;;  %v1968_v15 = vld [vmem:[#allocation8 + $0x138] sm:$0xff]  ;;  %v14999_v51 = vpack.c.bf16 %v1954_v19, %v1953_v20  ;;  %v1938_v52 = vld [vmem:[#allocation8 + $0x48] sm:$0xff] }
 0x1e1   :  { %11900 = vmatmul.mubr.msk.f32.vlgmr.msra.gmra.mrb[4].mxu0 %vm349_vm9, %v1759_v53  ;;  %v1985_v23 = vld [vmem:[#allocation8 + $0x1c0] sm:$0xff]  ;;  %v15001_v56 = vpack.c.bf16 %v1938_v52, %v1937_v46  ;;  %v1940_v62 = vld [vmem:[#allocation8 + $0x58] sm:$0xff]  ;;  %v1990_v48 = vld [vmem:[#allocation8 + $0x1e8] sm:$0xff] }
 0x1e2   :  { %14980 = vmatprep.subr.bf16.mxu1 %v14979_v54  ;;  %1837 = vmatprep.mubr.f32.mxu0 %v16831_v35  ;;  %v1956_v54 = vld [vmem:[#allocation8 + $0xd8] sm:$0xff]  ;;  %v1969_v60 = vld [vmem:[#allocation8 + $0x140] sm:$0xff]  ;;  %v15005_v13 = vpack.c.bf16 %v1940_v62, %v1939_v57  ;;  %v1974_v30 = vld [vmem:[#allocation8 + $0x168] sm:$0xff] }
 0x1e3   :  { %14982 = vmatpush1.bf16.msra.mxu1 %v14981_v22  ;;  %14986 = vmatpush3.bf16.msra.mxu0 %v14985_v63  ;;  %v1955_v22 = vld [vmem:[#allocation8 + $0xd0] sm:$0xff]  ;;  %v15033_v39 = vpack.c.bf16 %v1970_v0, %v1969_v60  ;;  %v1989_v61 = vld [vmem:[#allocation8 + $0x1e0] sm:$0xff]  ;;  %v1992_v7 = vld [vmem:[#allocation8 + $0x1f8] sm:$0xff] }
 0x1e4   :  { %14988 = vmatprep.subr.bf16.mxu0 %v14987_v12  ;;  %15016 = vmatprep.subr.bf16.mxu1 %v15015_v16  ;;  %v15003_v2 = vpack.c.bf16 %v1956_v54, %v1955_v22  ;;  %v1987_v63 = vld [vmem:[#allocation8 + $0x1d0] sm:$0xff]  ;;  %v1988_v12 = vld [vmem:[#allocation8 + $0x1d8] sm:$0xff]  ;;  %v15007_v16 = vpack.c.bf16 %v1958_v3, %v1957_v8  ;;  %v1993_v41 = vld [vmem:[%s22012_s29] sm:$0xff] }
 0x1e5   :  { %11901 = vmatmul.mubr.msk.f32.gmra.mrb[6].mxu0 %vm349_vm9, %v1760_v55  ;;  %v15035_v4 = vpack.c.bf16 %v1988_v12, %v1987_v63  ;;  %v1991_v14 = vld [vmem:[#allocation8 + $0x1f0] sm:$0xff]  ;;  %v1976_v37 = vld [vmem:[#allocation8 + $0x178] sm:$0xff]  ;;  %1997 = vperm.xlu0 %16463, %v1993_v41   ;;  %v3850_v43 = vld [vmem:[%s22013_s2] sm:$0xff] }
 0x1e6   :  { %11902 = vmatmul.mubr.msk.f32.vlgmr.msra.gmra.mrb[4].mxu1 %vm349_vm9, %v1759_v53  ;;  %v1986_v53 = vld [vmem:[#allocation8 + $0x1c8] sm:$0xff]  ;;  %v1975_v36 = vld [vmem:[#allocation8 + $0x170] sm:$0xff]  ;;  %v2164_v3 = vld [vmem:[%s22014_s22 + $0x18] sm:$0xff] }
 0x1e7   :  { %1914 = vmatprep.mubr.f32.mxu1 %v16831_v35  ;;  %15018 = vmatpush3.bf16.msra.mxu1 %v15017_v9  ;;  %v15031_v58 = vpack.c.bf16 %v1986_v53, %v1985_v23  ;;  %v1941_v9 = vld [vmem:[#allocation8 + $0x60] sm:$0xff]  ;;  %v1994_v20 = vld [vmem:[%s22012_s29 + $0x8] sm:$0xff]  ;;  %v6860_v22 = vld [vmem:[%s21871_s13 + $0x10] sm:$0xff] }
 0x1e8   :  { %14990 = vmatpush3.bf16.msra.mxu0 %v14989_v11  ;;  %15020 = vmatprep.subr.bf16.mxu1 %v15019_v59  ;;  %v1972_v11 = vld [vmem:[#allocation8 + $0x158] sm:$0xff]  ;;  %v15009_v6 = vpack.c.bf16 %v1942_v17, %v1941_v9  ;;  %v3851_v19 = vld [vmem:[%s22013_s2 + $0x8] sm:$0xff]  ;;  %v6858_v23 = vld [vmem:[%s21871_s13] sm:$0xff] }
 0x1e9   :  { %14992 = vmatprep.subr.bf16.mxu0 %v14991_v18  ;;  %v15037_v10 = vpack.c.bf16 %v1972_v11, %v1971_v5  ;;  %v1959_v18 = vld [vmem:[#allocation8 + $0xf0] sm:$0xff]  ;;  %v1944_v59 = vld [vmem:[#allocation8 + $0x78] sm:$0xff]  ;;  %2002 = vperm.xlu1 %16464, %v1994_v20  }
 0x1ea   :  { %11903 = vmatmul.mubr.msk.f32.gmra.mrb[6].mxu1 %vm349_vm9, %v1760_v55  ;;  %v15029_v55 = vpack.c.bf16 %v1968_v15, %v1967_v49  ;;  %v15011_v1 = vpack.c.bf16 %v1960_v21, %v1959_v18  ;;  %v15013_v26 = vpack.c.bf16 %v1944_v59, %v1943_v25  ;;  %v2162_v50 = vld [vmem:[%s22014_s22 + $0x8] sm:$0xff]  ;;  %3861 = vperm.xlu0 %16463, %v3851_v19   ;;  %v3853_v49 = vld [vmem:[%s22013_s2 + $0x18] sm:$0xff]  ;;  %v3852_v15 = vld [vmem:[%s22013_s2 + $0x10] sm:$0xff] }
 0x1eb   :  { %15022 = vmatpush3.bf16.msra.mxu1 %v15021_v29  ;;  %v1973_v29 = vld [vmem:[#allocation8 + $0x160] sm:$0xff]  ;;  %v6859_v52 = vld [vmem:[%s21871_s13 + $0x8] sm:$0xff]  ;;  %v2163_v8 = vld [vmem:[%s22014_s22 + $0x10] sm:$0xff] }
 0x1ec   :  { %14994 = vmatpush3.bf16.msra.mxu0 %v14993_v31  ;;  %15024 = vmatprep.subr.bf16.mxu1 %v15023_v40  ;;  %v15039_v31 = vpack.c.bf16 %v1990_v48, %v1989_v61  ;;  %v15041_v32 = vpack.c.bf16 %v1974_v30, %v1973_v29  ;;  %v15045_v40 = vpack.c.bf16 %v1976_v37, %v1975_v36  ;;  %v6861_v53 = vld [vmem:[%s21871_s13 + $0x18] sm:$0xff]  ;;  %v9957_v54 = vld [vmem:[%s21876_s18 + $0x8] sm:$0xff]  ;;  %v11906_v18 = vld [vmem:[%s22014_s22 + $0x90] sm:$0xff] }
 0x1ed   :  { %14996 = vmatprep.subr.bf16.mxu0 %v14995_v34  ;;  %v15043_v34 = vpack.c.bf16 %v1992_v7, %v1991_v14  ;;  %3856 = vperm.xlu1 %16464, %v3850_v43   ;;  %v15051_v5 = vpack.c.bf16 %v2164_v3, %v2163_v8  ;;  %v2166_v9 = vld [vmem:[%s22014_s22 + $0x28] sm:$0xff]  ;;  %v11907_v21 = vld [vmem:[%s22014_s22 + $0x98] sm:$0xff]  ;;  %v2167_v29 = vld [vmem:[%s22014_s22 + $0x30] sm:$0xff] }
 0x1ee   :  { %3871 = vperm.xlu0 %16463, %v3853_v49   ;;  %v15083_v48 = vpack.c.bf16 %v11907_v21, %v11906_v18  ;;  %v2168_v30 = vld [vmem:[%s22014_s22 + $0x38] sm:$0xff]  ;;  %v11909_v14 = vld [vmem:[%s22014_s22 + $0xa8] sm:$0xff]  ;;  %v11910_v41 = vld [vmem:[%s22014_s22 + $0xb0] sm:$0xff] }
 0x1ef   :  { %15026 = vmatpush3.bf16.msra.mxu1 %v15025_v44  ;;  %v2161_v44 = vld [vmem:[%s22014_s22] sm:$0xff]  ;;  %v15059_v37 = vpack.c.bf16 %v2168_v30, %v2167_v29  ;;  %v11911_v20 = vld [vmem:[%s22014_s22 + $0xb8] sm:$0xff]  ;;  %v2171_v49 = vld [vmem:[%s22014_s22 + $0x50] sm:$0xff] }
 0x1f0   :  { %14998 = vmatpush3.bf16.msra.mxu0 %v14997_v45  ;;  %15028 = vmatprep.subr.bf16.mxu1 %v15027_v47  ;;  %v11904_v45 = vld [vmem:[%s22014_s22 + $0x80] sm:$0xff]  ;;  %v15047_v46 = vpack.c.bf16 %v2162_v50, %v2161_v44  ;;  %v11905_v47 = vld [vmem:[%s22014_s22 + $0x88] sm:$0xff]  ;;  %v15091_v19 = vpack.c.bf16 %v11911_v20, %v11910_v41 }
 0x1f1   :  { %15000 = vmatprep.subr.bf16.mxu0 %v14999_v51  ;;  %v17726_v51 = vpack.c.bf16 %v11905_v47, %v11904_v45  ;;  %3866 = vperm.xlu1 %16464, %v3852_v15   ;;  %v2169_v43 = vld [vmem:[%s22014_s22 + $0x40] sm:$0xff]  ;;  %v2170_v44 = vld [vmem:[%s22014_s22 + $0x48] sm:$0xff]  ;;  %v2172_v15 = vld [vmem:[%s22014_s22 + $0x58] sm:$0xff] }
 0x1f2   :  { %6869 = vperm.xlu0 %16463, %v6859_v52   ;;  %v11912_v50 = vld [vmem:[%s22014_s22 + $0xc0] sm:$0xff]  ;;  %v15063_v45 = vpack.c.bf16 %v2170_v44, %v2169_v43  ;;  %v15067_v52 = vpack.c.bf16 %v2172_v15, %v2171_v49  ;;  %v11935_v43 = vld [vmem:[%s22014_s22 + $0x118] sm:$0xff]  ;;  %v11938_v49 = vld [vmem:[%s22014_s22 + $0x130] sm:$0xff] }
 0x1f3   :  { %15030 = vmatpush3.bf16.msra.mxu1 %v15029_v55  ;;  %v9956_v55 = vld [vmem:[%s21876_s18] sm:$0xff]  ;;  %v16475_v44 = vld [vmem:[%s22015_s8 + $0x18] sm:$0xff]  }
 0x1f4   :  { %15002 = vmatpush3.bf16.msra.mxu0 %v15001_v56  ;;  %15032 = vmatprep.subr.bf16.mxu1 %v15031_v58  ;;  %v11939_v15 = vld [vmem:[%s22014_s22 + $0x138] sm:$0xff] }
 0x1f5   :  { %15004 = vmatprep.subr.bf16.mxu0 %v15003_v2  ;;  %6864 = vperm.xlu1 %16464, %v6858_v23   ;;  %v11915_v23 = vld [vmem:[%s22014_s22 + $0xd8] sm:$0xff] }
 0x1f6   :  { %6879 = vperm.xlu0 %16463, %v6861_v53  }
 0x1f7   :  { %15034 = vmatpush3.bf16.msra.mxu1 %v15033_v39 }
 0x1f8   :  { %15006 = vmatpush3.bf16.msra.mxu0 %v15005_v13  ;;  %15036 = vmatprep.subr.bf16.mxu1 %v15035_v4 }
 0x1f9   :  { %15008 = vmatprep.subr.bf16.mxu0 %v15007_v16  ;;  %6874 = vperm.xlu1 %16464, %v6860_v22   ;;  %v2165_v16 = vld [vmem:[%s22014_s22 + $0x20] sm:$0xff] }
 0x1fa   :  { %9965 = vperm.xlu0 %16463, %v9957_v54   ;;  %v2173_v22 = vld [vmem:[%s22014_s22 + $0x60] sm:$0xff]  ;;  %v2174_v54 = vld [vmem:[%s22014_s22 + $0x68] sm:$0xff] }
 0x1fb   :  { %15038 = vmatpush3.bf16.msra.mxu1 %v15037_v10 }
 0x1fc   :  { %15010 = vmatpush3.bf16.msra.mxu0 %v15009_v6  ;;  %15040 = vmatprep.subr.bf16.mxu1 %v15039_v31 }
 0x1fd   :  { %15012 = vmatprep.subr.bf16.mxu0 %v15011_v1  ;;  %9960 = vperm.xlu1 %16464, %v9956_v55   ;;  %v11916_v55 = vld [vmem:[%s22014_s22 + $0xe0] sm:$0xff] }
 0x1ff   :  { %15042 = vmatpush3.bf16.msra.mxu1 %v15041_v32  ;;  %v11908_v32 = vld [vmem:[%s22014_s22 + $0xa0] sm:$0xff] }
 0x200   :  { %15014 = vmatpush3.bf16.msra.mxu0 %v15013_v26  ;;  %15044 = vmatprep.subr.bf16.mxu1 %v15043_v34  ;;  %v15055_v26 = vpack.c.bf16 %v2166_v9, %v2165_v16 }
 0x201   :  { %15048 = vmatprep.subr.bf16.mxu0 %v15047_v46 }
 0x203   :  { %15046 = vmatpush3.bf16.msra.mxu1 %v15045_v40  ;;  %v15087_v40 = vpack.c.bf16 %v11909_v14, %v11908_v32  ;;  %v11932_v32 = vld [vmem:[%s22014_s22 + $0x100] sm:$0xff]  ;;  %v11933_v14 = vld [vmem:[%s22014_s22 + $0x108] sm:$0xff] }
 0x204   :  { %15080 = vmatprep.subr.bf16.mxu1 %v17726_v51  ;;  %v15111_v20 = vpack.c.bf16 %v11933_v14, %v11932_v32  ;;  %v11995_v32 = vld [vmem:[%s22014_s22 + $0x278] sm:$0xff] }
 0x268   :  { %v2003_v21 = vpop.permute.xlu1 %2002 }
 0x284   :  { %v1603_v56 = vpop.f32.mrb[0].mxu0 }
 0x285   :  { %v1605_v57 = vpop.f32.mrb[1].mxu0 }
 0x286   :  { %v1607_v58 = vpop.f32.mrb[2].mxu0 }
 0x287   :  { %v1609_v60 = vpop.f32.mrb[3].mxu0 }
 0x289   :  { %v1646_v0 = vpop.f32.mrb[0].mxu1 }
 0x28a   :  { %v1648_v2 = vpop.f32.mrb[1].mxu1 }
 0x28b   :  { %v1650_v62 = vpop.f32.mrb[2].mxu1 }
 0x28c   :  { %v1652_v63 = vpop.f32.mrb[3].mxu1 }
 0x2b4   :  { %v1833_v12 = vpop.f32.mrb[4].mxu0 }
 0x2b5   :  { %v1921_v39 = vadd.f32 %v1833_v12, %v1603_v56  ;;  %v1835_v13 = vpop.f32.mrb[5].mxu0  ;;  %v15071_v56 = vpack.c.bf16 %v2174_v54, %v2173_v22  ;;  %v11942_v22 = vld [vmem:[%s22014_s22 + $0x150] sm:$0xff]  ;;  %v11943_v54 = vld [vmem:[%s22014_s22 + $0x158] sm:$0xff] }
 0x2b6   :  { %v1922_v4 = vadd.f32 %v1835_v13, %v1605_v57  ;;  %v11917_v57 = vld [vmem:[%s22014_s22 + $0xe8] sm:$0xff] }
 0x2b8   :  { %v1839_v11 = vpop.f32.mrb[6].mxu0  ;;  %2069 = vmatprep.mubr.f32.mxu0 %v1922_v4 }
 0x2b9   :  { %v1925_v17 = vadd.f32 %v1839_v11, %v1607_v58  ;;  %v1841_v10 = vpop.f32.mrb[7].mxu0  ;;  %v1910_v6 = vpop.f32.mrb[4].mxu1  ;;  %2070 = vmatmul.mubr.f32.vlgmr.msra.gmra.mrb[8].mxu0 %v1921_v39  ;;  %v15103_v58 = vpack.c.bf16 %v11917_v57, %v11916_v55  ;;  %v15131_v55 = vpack.c.bf16 %v11943_v54, %v11942_v22  ;;  %v11945_v57 = vld [vmem:[%s22014_s22 + $0x168] sm:$0xff]  ;;  %v12042_v54 = vld [vmem:[%s22014_s22 + $0x370] sm:$0xff] }
 0x2ba   :  { %v1926_v1 = vadd.f32 %v1841_v10, %v1609_v60  ;;  %v1923_v25 = vadd.f32 %v1910_v6, %v1646_v0  ;;  %v1912_v59 = vpop.f32.mrb[5].mxu1  ;;  %15050 = vmatpush3.bf16.msra.mxu0 %v15047_v46  ;;  %v11913_v46 = vld [vmem:[%s22014_s22 + $0xc8] sm:$0xff]  ;;  %v2175_v60 = vld [vmem:[%s22014_s22 + $0x70] sm:$0xff]  ;;  %v2176_v0 = vld [vmem:[%s22014_s22 + $0x78] sm:$0xff]  ;;  %v1998_v11 = vpop.permute.xlu0 %1997 }
 0x2bb   :  { %v1924_v61 = vadd.f32 %v1912_v59, %v1648_v2  ;;  %15052 = vmatprep.subr.bf16.mxu0 %v15051_v5  ;;  %v15095_v47 = vpack.c.bf16 %v11913_v46, %v11912_v50  ;;  %v11918_v2 = vld [vmem:[%s22014_s22 + $0xf0] sm:$0xff]  ;;  %v11937_v46 = vld [vmem:[%s22014_s22 + $0x128] sm:$0xff] }
 0x2bc   :  { %2074 = vmatprep.mubr.f32.mxu0 %v1926_v1 }
 0x2bd   :  { %v1916_v31 = vpop.f32.mrb[6].mxu1  ;;  %2075 = vmatmul.mubr.f32.gmra.mrb[10].mxu0 %v1925_v17  ;;  %2144 = vmatprep.mubr.f32.mxu1 %v1924_v61 }
 0x2be   :  { %v1927_v7 = vadd.f32 %v1916_v31, %v1650_v62  ;;  %v1918_v34 = vpop.f32.mrb[7].mxu1  ;;  %2145 = vmatmul.mubr.f32.vlgmr.msra.gmra.mrb[8].mxu1 %v1923_v25  ;;  %15054 = vmatpush3.bf16.msra.mxu0 %v15051_v5  ;;  %v15075_v62 = vpack.c.bf16 %v2176_v0, %v2175_v60  ;;  %v16474_v31 = vld [vmem:[%s22015_s8 + $0x10] sm:$0xff]   ;;  %v11947_v0 = vld [vmem:[%s22014_s22 + $0x178] sm:$0xff] }
 0x2bf   :  { %v1928_v36 = vadd.f32 %v1918_v34, %v1652_v63  ;;  %15082 = vmatpush3.bf16.msra.mxu1 %v17726_v51  ;;  %15056 = vmatprep.subr.bf16.mxu0 %v15055_v26  ;;  %v11914_v51 = vld [vmem:[%s22014_s22 + $0xd0] sm:$0xff]  ;;  %v11919_v63 = vld [vmem:[%s22014_s22 + $0xf8] sm:$0xff] }
 0x2c0   :  { %15084 = vmatprep.subr.bf16.mxu1 %v15083_v48  ;;  %v15099_v53 = vpack.c.bf16 %v11915_v23, %v11914_v51  ;;  %v15107_v12 = vpack.c.bf16 %v11919_v63, %v11918_v2  ;;  %v15123_v51 = vpack.c.bf16 %v11939_v15, %v11938_v49  ;;  %v11941_v23 = vld [vmem:[%s22014_s22 + $0x148] sm:$0xff]  ;;  %v11946_v60 = vld [vmem:[%s22014_s22 + $0x170] sm:$0xff] }
 0x2c1   :  { %2149 = vmatprep.mubr.f32.mxu1 %v1928_v36  ;;  %v15139_v2 = vpack.c.bf16 %v11947_v0, %v11946_v60  ;;  %v11981_v63 = vld [vmem:[%s22014_s22 + $0x208] sm:$0xff]  ;;  %v12038_v15 = vld [vmem:[%s22014_s22 + $0x350] sm:$0xff]  ;;  %v12052_v60 = vld [vmem:[%s22014_s22 + $0x380] sm:$0xff] }
 0x2c2   :  { %2150 = vmatmul.mubr.f32.gmra.mrb[10].mxu1 %v1927_v7  ;;  %15058 = vmatpush3.bf16.msra.mxu0 %v15055_v26  ;;  %v12053_v0 = vld [vmem:[%s22014_s22 + $0x388] sm:$0xff] }
 0x2c3   :  { %15086 = vmatpush3.bf16.msra.mxu1 %v15083_v48  ;;  %15060 = vmatprep.subr.bf16.mxu0 %v15059_v37 }
 0x2c4   :  { %15088 = vmatprep.subr.bf16.mxu1 %v15087_v40 }
 0x2c6   :  { %15062 = vmatpush3.bf16.msra.mxu0 %v15059_v37 }
 0x2c7   :  { %15090 = vmatpush3.bf16.msra.mxu1 %v15087_v40  ;;  %15064 = vmatprep.subr.bf16.mxu0 %v15063_v45 }
 0x2c8   :  { %15092 = vmatprep.subr.bf16.mxu1 %v15091_v19 }
 0x2ca   :  { %15066 = vmatpush3.bf16.msra.mxu0 %v15063_v45  ;;  %v11936_v45 = vld [vmem:[%s22014_s22 + $0x120] sm:$0xff] }
 0x2cb   :  { %15094 = vmatpush3.bf16.msra.mxu1 %v15091_v19  ;;  %15068 = vmatprep.subr.bf16.mxu0 %v15067_v52  ;;  %v11934_v19 = vld [vmem:[%s22014_s22 + $0x110] sm:$0xff] }
 0x2cc   :  { %15096 = vmatprep.subr.bf16.mxu1 %v15095_v47  ;;  %v15115_v50 = vpack.c.bf16 %v11935_v43, %v11934_v19  ;;  %v12033_v19 = vld [vmem:[%s22014_s22 + $0x328] sm:$0xff] }
 0x2ce   :  { %15070 = vmatpush3.bf16.msra.mxu0 %v15067_v52  ;;  %v11940_v52 = vld [vmem:[%s22014_s22 + $0x140] sm:$0xff] }
 0x2cf   :  { %15098 = vmatpush3.bf16.msra.mxu1 %v15095_v47  ;;  %15072 = vmatprep.subr.bf16.mxu0 %v15071_v56  ;;  %v15119_v47 = vpack.c.bf16 %v11937_v46, %v11936_v45  ;;  %v12036_v46 = vld [vmem:[%s22014_s22 + $0x340] sm:$0xff] }
 0x2d0   :  { %15100 = vmatprep.subr.bf16.mxu1 %v15099_v53 }
 0x2d2   :  { %15074 = vmatpush3.bf16.msra.mxu0 %v15071_v56  ;;  %v11944_v56 = vld [vmem:[%s22014_s22 + $0x160] sm:$0xff] }
 0x2d3   :  { %15102 = vmatpush3.bf16.msra.mxu1 %v15099_v53  ;;  %15076 = vmatprep.subr.bf16.mxu0 %v15075_v62  ;;  %v15127_v53 = vpack.c.bf16 %v11941_v23, %v11940_v52  ;;  %v12040_v23 = vld [vmem:[%s22014_s22 + $0x360] sm:$0xff] }
 0x2d4   :  { %15104 = vmatprep.subr.bf16.mxu1 %v15103_v58 }
 0x2d6   :  { %15078 = vmatpush3.bf16.msra.mxu0 %v15075_v62  ;;  %v11980_v62 = vld [vmem:[%s22014_s22 + $0x200] sm:$0xff] }
 0x2d7   :  { %15106 = vmatpush3.bf16.msra.mxu1 %v15103_v58  ;;  %v15135_v58 = vpack.c.bf16 %v11945_v57, %v11944_v56  ;;  %v16476_v57 = vld [vmem:[%s22015_s8] sm:$0xff]  }
 0x2d8   :  { %15108 = vmatprep.subr.bf16.mxu1 %v15107_v12 }
 0x2db   :  { %15110 = vmatpush3.bf16.msra.mxu1 %v15107_v12  ;;  %v15175_v12 = vpack.c.bf16 %v11981_v63, %v11980_v62  ;;  %v12054_v62 = vld [vmem:[%s22014_s22 + $0x390] sm:$0xff]  ;;  %v12055_v63 = vld [vmem:[%s22014_s22 + $0x398] sm:$0xff] }
 0x38c   :  { %v12970_v8 = vpop.f32.mrb[8].mxu0 }
 0x38d   :  { %v12971_v3 = vpop.f32.mrb[9].mxu0 }
 0x38e   :  { %v12972_v39 = vadd.f32 %v12971_v3, %v12970_v8  ;;  %v11982_v8 = vld [vmem:[%s22014_s22 + $0x210] sm:$0xff]  ;;  %v11983_v3 = vld [vmem:[%s22014_s22 + $0x218] sm:$0xff] }
 0x390   :  { %v12973_v13 = vpop.f32.mrb[10].mxu0  ;;  %v2072_v17 = vadd.f32 %v12972_v39, %v1998_v11  ;;  %v15179_v39 = vpack.c.bf16 %v11983_v3, %v11982_v8  ;;  %v11986_v11 = vld [vmem:[%s22014_s22 + $0x230] sm:$0xff]  ;;  %v12056_v8 = vld [vmem:[%s22014_s22 + $0x3a0] sm:$0xff]  ;;  %v12057_v3 = vld [vmem:[%s22014_s22 + $0x3a8] sm:$0xff] }
 0x391   :  { %v13008_v4 = vpop.f32.mrb[8].mxu1  ;;  %v12974_v5 = vpop.f32.mrb[11].mxu0 }
 0x392   :  { %v12975_v16 = vadd.f32 %v12974_v5, %v12973_v13  ;;  %v13009_v9 = vpop.f32.mrb[9].mxu1  ;;  %v11984_v13 = vld [vmem:[%s22014_s22 + $0x220] sm:$0xff] }
 0x393   :  { %v13010_v10 = vadd.f32 %v13009_v9, %v13008_v4  ;;  %v11985_v4 = vld [vmem:[%s22014_s22 + $0x228] sm:$0xff] }
 0x394   :  { %v2077_v25 = vadd.f32 %v12975_v16, %v2003_v21  ;;  %v15183_v5 = vpack.c.bf16 %v11985_v4, %v11984_v13  ;;  %v11987_v16 = vld [vmem:[%s22014_s22 + $0x238] sm:$0xff]  ;;  %v11990_v21 = vld [vmem:[%s22014_s22 + $0x250] sm:$0xff] }
 0x395   :  { %v17832_v6 = vadd.f32 %v13010_v10, %v2072_v17  ;;  %v13011_v18 = vpop.f32.mrb[10].mxu1  ;;  %v15187_v9 = vpack.c.bf16 %v11987_v16, %v11986_v11  ;;  %v11988_v17 = vld [vmem:[%s22014_s22 + $0x240] sm:$0xff]  ;;  %v11989_v10 = vld [vmem:[%s22014_s22 + $0x248] sm:$0xff]  ;;  %v12058_v13 = vld [vmem:[%s22014_s22 + $0x3b0] sm:$0xff] }
 0x396   :  { %v13012_v1 = vpop.f32.mrb[11].mxu1  ;;  %v12059_v4 = vld [vmem:[%s22014_s22 + $0x3b8] sm:$0xff]  ;;  %v12060_v11 = vld [vmem:[%s22014_s22 + $0x3c0] sm:$0xff]  ;;  %v12061_v16 = vld [vmem:[%s22014_s22 + $0x3c8] sm:$0xff] }
 0x397   :  { %vm2155_vm1 = vcmp.ge.f32.partialorder %v17832_v6, 0.0  ;;  %v2157_v59 = vmul.f32 0.01, %v17832_v6  ;;  %v13013_v61 = vadd.f32 %v13012_v1, %v13011_v18  ;;  %v15191_v18 = vpack.c.bf16 %v11989_v10, %v11988_v17  ;;  %v11991_v1 = vld [vmem:[%s22014_s22 + $0x258] sm:$0xff]  ;;  %v12062_v17 = vld [vmem:[%s22014_s22 + $0x3d0] sm:$0xff] }
 0x398   :  { %v12063_v10 = vld [vmem:[%s22014_s22 + $0x3d8] sm:$0xff] }
 0x399   :  { %v17837_v26 = vsel %vm2155_vm1, %v17832_v6, %v2157_v59  ;;  %v17839_v48 = vadd.f32 %v13013_v61, %v2077_v25  ;;  %v15195_v25 = vpack.c.bf16 %v11991_v1, %v11990_v21  ;;  %v11992_v59 = vld [vmem:[%s22014_s22 + $0x260] sm:$0xff]  ;;  %v11993_v61 = vld [vmem:[%s22014_s22 + $0x268] sm:$0xff] }
 0x39a   :  { %13722 = vmatprep.mubr.f32.mxu0 %v17837_v26  ;;  %13757 = vmatprep.mubr.f32.mxu1 %v17837_v26  ;;  %v12064_v21 = vld [vmem:[%s22014_s22 + $0x3e0] sm:$0xff]  ;;  %v12065_v1 = vld [vmem:[%s22014_s22 + $0x3e8] sm:$0xff] }
 0x39b   :  { %vm2156_vm2 = vcmp.ge.f32.partialorder %v17839_v48, 0.0  ;;  %v2158_v29 = vmul.f32 0.01, %v17839_v48 }
 0x39d   :  { %v17846_v30 = vsel %vm2156_vm2, %v17839_v48, %v2158_v29  ;;  %v15199_v29 = vpack.c.bf16 %v11993_v61, %v11992_v59  ;;  %v12066_v59 = vld [vmem:[%s22014_s22 + $0x3f0] sm:$0xff]  ;;  %v12067_v61 = vld [vmem:[%s22014_s22 + $0x3f8] sm:$0xff] }
 0x39e   :  { %13723 = vmatmul.mubr.f32.vlgmr.msra.gmra.mrb[12].mxu0 %v17846_v30  ;;  %13758 = vmatmul.mubr.f32.vlgmr.msra.gmra.mrb[12].mxu1 %v17846_v30 }
 0x39f   :  { %13762 = vmatprep.mubr.msk.bf16.mxu1 %vm349_vm9, %v16474_v31  ;;  %v11994_v31 = vld [vmem:[%s22014_s22 + $0x270] sm:$0xff]  ;;  %13768 = vmatprep.mubr.msk.bf16.mxu0 %vm349_vm9, %v16476_v57 }
 0x3a0   :  { %v15203_v14 = vpack.c.bf16 %v11995_v32, %v11994_v31  ;;  %v3654_v31 = vld [vmem:[%s21867_s9] sm:$0xff]  ;;  %v3655_v32 = vld [vmem:[%s21867_s9 + $0x8] sm:$0xff] }
 0x471   :  { %v13724_v7 = vpop.f32.mrb[12].mxu0  ;;  %v13759_v34 = vpop.f32.mrb[12].mxu1 }
 0x472   :  { %v2243_v36 = vpop.f32.mrb[13].mxu0  ;;  %v2340_v37 = vpop.f32.mrb[13].mxu1 }
 0x473   :  { %v2256_v40 = vpack.c.bf16 %v13724_v7, %v2243_v36  ;;  %v2354_v41 = vpack.c.bf16 %v13759_v34, %v2340_v37  ;;  %v12028_v7 = vld [vmem:[%s22014_s22 + $0x300] sm:$0xff]  ;;  %v12029_v34 = vld [vmem:[%s22014_s22 + $0x308] sm:$0xff]  ;;  %v12030_v37 = vld [vmem:[%s22014_s22 + $0x310] sm:$0xff] }
 0x474   :  { %v15239_v36 = vpack.c.bf16 %v12029_v34, %v12028_v7  ;;  %v15335_v7 = vpack.c.bf16 %v3655_v32, %v3654_v31  ;;  %v3656_v34 = vld [vmem:[%s21867_s9 + $0x10] sm:$0xff]  ;;  %v11971_v31 = vld [vmem:[%s22014_s22 + $0x1f8] sm:$0xff] }
 0x475   :  { %13760 = vmatprep.subr.bf16.mxu1 %v2354_v41  ;;  %13766 = vmatprep.subr.bf16.mxu0 %v2256_v40 }
 0x476   :  { %13761 = vmatpush3.bf16.msra.mxu1 %v2354_v41  ;;  %13767 = vmatpush3.bf16.msra.mxu0 %v2256_v40  ;;  %v12031_v40 = vld [vmem:[%s22014_s22 + $0x318] sm:$0xff] }
 0x477   :  { %15112 = vmatprep.subr.bf16.mxu1 %v15111_v20  ;;  %v15243_v41 = vpack.c.bf16 %v12031_v40, %v12030_v37  ;;  %v3658_v40 = vld [vmem:[%s21867_s9 + $0x20] sm:$0xff] }
 0x479   :  { %13763 = vmatmul.mubr.msk.bf16.vlgmr.msra.gmra.mrb[16].mxu1 %vm349_vm9, %v16475_v44  ;;  %v12034_v44 = vld [vmem:[%s22014_s22 + $0x330] sm:$0xff] }
 0x47a   :  { %15114 = vmatpush3.bf16.msra.mxu1 %v15111_v20  ;;  %13804 = vmatprep.mubr.f32.mxu1 %v17837_v26  ;;  %v12032_v20 = vld [vmem:[%s22014_s22 + $0x320] sm:$0xff] }
 0x47b   :  { %15116 = vmatprep.subr.bf16.mxu1 %v15115_v50  ;;  %v15247_v43 = vpack.c.bf16 %v12033_v19, %v12032_v20  ;;  %v3660_v19 = vld [vmem:[%s21867_s9 + $0x30] sm:$0xff] }
 0x47e   :  { %15118 = vmatpush3.bf16.msra.mxu1 %v15115_v50  ;;  %v12035_v50 = vld [vmem:[%s22014_s22 + $0x338] sm:$0xff] }
 0x47f   :  { %15120 = vmatprep.subr.bf16.mxu1 %v15119_v47  ;;  %v15251_v45 = vpack.c.bf16 %v12035_v50, %v12034_v44  ;;  %v3662_v50 = vld [vmem:[%s21867_s9 + $0x40] sm:$0xff] }
 0x482   :  { %15122 = vmatpush3.bf16.msra.mxu1 %v15119_v47  ;;  %v12037_v47 = vld [vmem:[%s22014_s22 + $0x348] sm:$0xff] }
 0x483   :  { %15124 = vmatprep.subr.bf16.mxu1 %v15123_v51  ;;  %v15255_v49 = vpack.c.bf16 %v12037_v47, %v12036_v46  ;;  %v3664_v46 = vld [vmem:[%s21867_s9 + $0x50] sm:$0xff]  ;;  %v3665_v47 = vld [vmem:[%s21867_s9 + $0x58] sm:$0xff] }
 0x486   :  { %15126 = vmatpush3.bf16.msra.mxu1 %v15123_v51  ;;  %v12039_v51 = vld [vmem:[%s22014_s22 + $0x358] sm:$0xff] }
 0x487   :  { %15128 = vmatprep.subr.bf16.mxu1 %v15127_v53  ;;  %v15259_v52 = vpack.c.bf16 %v12039_v51, %v12038_v15  ;;  %v3666_v15 = vld [vmem:[%s21867_s9 + $0x60] sm:$0xff]  ;;  %v3667_v51 = vld [vmem:[%s21867_s9 + $0x68] sm:$0xff] }
 0x48a   :  { %15130 = vmatpush3.bf16.msra.mxu1 %v15127_v53  ;;  %v12041_v53 = vld [vmem:[%s22014_s22 + $0x368] sm:$0xff] }
 0x48b   :  { %15132 = vmatprep.subr.bf16.mxu1 %v15131_v55  ;;  %v15263_v22 = vpack.c.bf16 %v12041_v53, %v12040_v23  ;;  %v3668_v23 = vld [vmem:[%s21867_s9 + $0x70] sm:$0xff]  ;;  %v3669_v53 = vld [vmem:[%s21867_s9 + $0x78] sm:$0xff] }
 0x48e   :  { %15134 = vmatpush3.bf16.msra.mxu1 %v15131_v55  ;;  %v12043_v55 = vld [vmem:[%s22014_s22 + $0x378] sm:$0xff] }
 0x48f   :  { %15136 = vmatprep.subr.bf16.mxu1 %v15135_v58  ;;  %v15267_v56 = vpack.c.bf16 %v12043_v55, %v12042_v54 }
 0x492   :  { %15138 = vmatpush3.bf16.msra.mxu1 %v15135_v58  ;;  %v16477_v58 = vld [vmem:[%s22015_s8 + $0x8] sm:$0xff]  }
 0x493   :  { %15140 = vmatprep.subr.bf16.mxu1 %v15139_v2  ;;  %13769 = vmatmul.mubr.msk.bf16.vlgmr.msra.gmra.mrb[16].mxu0 %vm349_vm9, %v16477_v58  ;;  %v11956_v58 = vld [vmem:[%s22014_s22 + $0x180] sm:$0xff] }
 0x496   :  { %15142 = vmatpush3.bf16.msra.mxu1 %v15139_v2  ;;  %v15271_v2 = vpack.c.bf16 %v12053_v0, %v12052_v60  ;;  %v11957_v60 = vld [vmem:[%s22014_s22 + $0x188] sm:$0xff] }
 0x497   :  { %15176 = vmatprep.subr.bf16.mxu1 %v15175_v12 }
 0x499   :  { %13805 = vmatmul.mubr.f32.vlgmr.msra.gmra.mrb[14].mxu1 %v17846_v30 }
 0x49a   :  { %15178 = vmatpush3.bf16.msra.mxu1 %v15175_v12  ;;  %13886 = vmatprep.mubr.f32.mxu1 %v17837_v26  ;;  %v15275_v12 = vpack.c.bf16 %v12055_v63, %v12054_v62  ;;  %v11958_v63 = vld [vmem:[%s22014_s22 + $0x190] sm:$0xff] }
 0x49b   :  { %15180 = vmatprep.subr.bf16.mxu1 %v15179_v39 }
 0x49e   :  { %15182 = vmatpush3.bf16.msra.mxu1 %v15179_v39  ;;  %v15279_v39 = vpack.c.bf16 %v12057_v3, %v12056_v8  ;;  %v16479_v8 = vld [vmem:[%s22015_s8 + $0x28] sm:$0xff]  }
 0x49f   :  { %15184 = vmatprep.subr.bf16.mxu1 %v15183_v5 }
 0x4a2   :  { %15186 = vmatpush3.bf16.msra.mxu1 %v15183_v5  ;;  %v15283_v5 = vpack.c.bf16 %v12059_v4, %v12058_v13  ;;  %v11961_v13 = vld [vmem:[%s22014_s22 + $0x1a8] sm:$0xff] }
 0x4a3   :  { %15188 = vmatprep.subr.bf16.mxu1 %v15187_v9 }
 0x4a6   :  { %15190 = vmatpush3.bf16.msra.mxu1 %v15187_v9  ;;  %v15287_v9 = vpack.c.bf16 %v12061_v16, %v12060_v11  ;;  %v11963_v11 = vld [vmem:[%s22014_s22 + $0x1b8] sm:$0xff] }
 0x4a7   :  { %15192 = vmatprep.subr.bf16.mxu1 %v15191_v18 }
 0x4aa   :  { %15194 = vmatpush3.bf16.msra.mxu1 %v15191_v18  ;;  %v15291_v18 = vpack.c.bf16 %v12063_v10, %v12062_v17  ;;  %v11965_v17 = vld [vmem:[%s22014_s22 + $0x1c8] sm:$0xff] }
 0x4ab   :  { %15196 = vmatprep.subr.bf16.mxu1 %v15195_v25 }
 0x4ae   :  { %15198 = vmatpush3.bf16.msra.mxu1 %v15195_v25  ;;  %v15295_v25 = vpack.c.bf16 %v12065_v1, %v12064_v21  ;;  %v11967_v21 = vld [vmem:[%s22014_s22 + $0x1d8] sm:$0xff] }
 0x4af   :  { %15200 = vmatprep.subr.bf16.mxu1 %v15199_v29 }
 0x4b2   :  { %15202 = vmatpush3.bf16.msra.mxu1 %v15199_v29  ;;  %v15299_v29 = vpack.c.bf16 %v12067_v61, %v12066_v59  ;;  %v11969_v59 = vld [vmem:[%s22014_s22 + $0x1e8] sm:$0xff] }
 0x4b3   :  { %15204 = vmatprep.subr.bf16.mxu1 %v15203_v14 }
 0x4b6   :  { %15206 = vmatpush3.bf16.msra.mxu1 %v15203_v14  ;;  %v16478_v14 = vld [vmem:[%s22015_s8 + $0x20] sm:$0xff]  }
 0x4b7   :  { %15240 = vmatprep.subr.bf16.mxu1 %v15239_v36  ;;  %13809 = vmatprep.mubr.msk.bf16.mxu0 %vm349_vm9, %v16478_v14 }
 0x4b9   :  { %13887 = vmatmul.mubr.f32.vlgmr.msra.gmra.mrb[20].mxu1 %v17846_v30 }
 0x4ba   :  { %15242 = vmatpush3.bf16.msra.mxu1 %v15239_v36  ;;  %13968 = vmatprep.mubr.f32.mxu1 %v17837_v26  ;;  %v3657_v36 = vld [vmem:[%s21867_s9 + $0x18] sm:$0xff] }
 0x4bb   :  { %15244 = vmatprep.subr.bf16.mxu1 %v15243_v41  ;;  %v15339_v37 = vpack.c.bf16 %v3657_v36, %v3656_v34 }
 0x4be   :  { %15246 = vmatpush3.bf16.msra.mxu1 %v15243_v41  ;;  %v3659_v41 = vld [vmem:[%s21867_s9 + $0x28] sm:$0xff] }
 0x4bf   :  { %15248 = vmatprep.subr.bf16.mxu1 %v15247_v43  ;;  %v15343_v20 = vpack.c.bf16 %v3659_v41, %v3658_v40 }
 0x4c2   :  { %15250 = vmatpush3.bf16.msra.mxu1 %v15247_v43  ;;  %v3661_v43 = vld [vmem:[%s21867_s9 + $0x38] sm:$0xff] }
 0x4c3   :  { %15252 = vmatprep.subr.bf16.mxu1 %v15251_v45  ;;  %v15347_v44 = vpack.c.bf16 %v3661_v43, %v3660_v19 }
 0x4c6   :  { %15254 = vmatpush3.bf16.msra.mxu1 %v15251_v45 }
 0x4c7   :  { %15256 = vmatprep.subr.bf16.mxu1 %v15255_v49 }
 0x4ca   :  { %15258 = vmatpush3.bf16.msra.mxu1 %v15255_v49  ;;  %v15355_v49 = vpack.c.bf16 %v3665_v47, %v3664_v46 }
 0x4cb   :  { %15260 = vmatprep.subr.bf16.mxu1 %v15259_v52 }
 0x4ce   :  { %15262 = vmatpush3.bf16.msra.mxu1 %v15259_v52  ;;  %v15359_v52 = vpack.c.bf16 %v3667_v51, %v3666_v15  ;;  %v12005_v15 = vld [vmem:[%s22014_s22 + $0x288] sm:$0xff]  ;;  %v16481_v51 = vld [vmem:[%s22015_s8 + $0x38] sm:$0xff]  }
 0x4cf   :  { %15264 = vmatprep.subr.bf16.mxu1 %v15263_v22 }
 0x4d2   :  { %15266 = vmatpush3.bf16.msra.mxu1 %v15263_v22  ;;  %v15363_v22 = vpack.c.bf16 %v3669_v53, %v3668_v23  ;;  %v12006_v53 = vld [vmem:[%s22014_s22 + $0x290] sm:$0xff] }
 0x4d3   :  { %15268 = vmatprep.subr.bf16.mxu1 %v15267_v56 }
 0x4d6   :  { %15270 = vmatpush3.bf16.msra.mxu1 %v15267_v56 }
 0x4d7   :  { %15272 = vmatprep.subr.bf16.mxu1 %v15271_v2 }
 0x4d9   :  { %13969 = vmatmul.mubr.f32.vlgmr.msra.gmra.mrb[22].mxu1 %v17846_v30 }
 0x4da   :  { %15274 = vmatpush3.bf16.msra.mxu1 %v15271_v2  ;;  %14009 = vmatprep.mubr.f32.mxu1 %v17837_v26 }
 0x4db   :  { %15276 = vmatprep.subr.bf16.mxu1 %v15275_v12 }
 0x4de   :  { %15278 = vmatpush3.bf16.msra.mxu1 %v15275_v12  ;;  %v11959_v12 = vld [vmem:[%s22014_s22 + $0x198] sm:$0xff] }
 0x4df   :  { %15280 = vmatprep.subr.bf16.mxu1 %v15279_v39  ;;  %v15147_v3 = vpack.c.bf16 %v11959_v12, %v11958_v63  ;;  %v12011_v63 = vld [vmem:[%s22014_s22 + $0x2b8] sm:$0xff] }
 0x4e2   :  { %15282 = vmatpush3.bf16.msra.mxu1 %v15279_v39  ;;  %v11960_v39 = vld [vmem:[%s22014_s22 + $0x1a0] sm:$0xff] }
 0x4e3   :  { %15284 = vmatprep.subr.bf16.mxu1 %v15283_v5  ;;  %v15151_v4 = vpack.c.bf16 %v11961_v13, %v11960_v39  ;;  %v12014_v13 = vld [vmem:[%s22014_s22 + $0x2d0] sm:$0xff] }
 0x4e6   :  { %15286 = vmatpush3.bf16.msra.mxu1 %v15283_v5  ;;  %v11962_v5 = vld [vmem:[%s22014_s22 + $0x1b0] sm:$0xff] }
 0x4e7   :  { %15288 = vmatprep.subr.bf16.mxu1 %v15287_v9  ;;  %v15155_v16 = vpack.c.bf16 %v11963_v11, %v11962_v5  ;;  %v12016_v11 = vld [vmem:[%s22014_s22 + $0x2e0] sm:$0xff] }
 0x4ea   :  { %15290 = vmatpush3.bf16.msra.mxu1 %v15287_v9  ;;  %v11964_v9 = vld [vmem:[%s22014_s22 + $0x1c0] sm:$0xff] }
 0x4eb   :  { %15292 = vmatprep.subr.bf16.mxu1 %v15291_v18  ;;  %v15159_v10 = vpack.c.bf16 %v11965_v17, %v11964_v9  ;;  %v12018_v17 = vld [vmem:[%s22014_s22 + $0x2f0] sm:$0xff] }
 0x4ee   :  { %15294 = vmatpush3.bf16.msra.mxu1 %v15291_v18  ;;  %v11966_v18 = vld [vmem:[%s22014_s22 + $0x1d0] sm:$0xff] }
 0x4ef   :  { %15296 = vmatprep.subr.bf16.mxu1 %v15295_v25  ;;  %v15163_v1 = vpack.c.bf16 %v11967_v21, %v11966_v18  ;;  %v16484_v21 = vld [vmem:[%s22015_s8 + $0x50] sm:$0xff]  }
 0x4f2   :  { %15298 = vmatpush3.bf16.msra.mxu1 %v15295_v25  ;;  %v11968_v25 = vld [vmem:[%s22014_s22 + $0x1e0] sm:$0xff] }
 0x4f3   :  { %15300 = vmatprep.subr.bf16.mxu1 %v15299_v29  ;;  %v15167_v61 = vpack.c.bf16 %v11969_v59, %v11968_v25 }
 0x4f6   :  { %15302 = vmatpush3.bf16.msra.mxu1 %v15299_v29  ;;  %v11970_v29 = vld [vmem:[%s22014_s22 + $0x1f0] sm:$0xff] }
 0x4f7   :  { %15336 = vmatprep.subr.bf16.mxu1 %v15335_v7  ;;  %v15171_v32 = vpack.c.bf16 %v11971_v31, %v11970_v29  ;;  %v16486_v29 = vld [vmem:[%s22015_s8 + $0x60] sm:$0xff]  }
 0x4f8   :  { %v12076_v31 = vld [vmem:[%s22014_s22 + $0x400] sm:$0xff] }
 0x4f9   :  { %14010 = vmatmul.mubr.f32.vlgmr.msra.gmra.mrb[24].mxu1 %v17846_v30 }
 0x4fa   :  { %15338 = vmatpush3.bf16.msra.mxu1 %v15335_v7  ;;  %14091 = vmatprep.mubr.f32.mxu1 %v17832_v6  ;;  %v3663_v6 = vld [vmem:[%s21867_s9 + $0x48] sm:$0xff] }
 0x4fb   :  { %15340 = vmatprep.subr.bf16.mxu1 %v15339_v37  ;;  %v15351_v45 = vpack.c.bf16 %v3663_v6, %v3662_v50 }
 0x4fe   :  { %15342 = vmatpush3.bf16.msra.mxu1 %v15339_v37 }
 0x4ff   :  { %15344 = vmatprep.subr.bf16.mxu1 %v15343_v20 }
 0x502   :  { %15346 = vmatpush3.bf16.msra.mxu1 %v15343_v20 }
 0x503   :  { %15348 = vmatprep.subr.bf16.mxu1 %v15347_v44 }
 0x506   :  { %15350 = vmatpush3.bf16.msra.mxu1 %v15347_v44  ;;  %v16480_v44 = vld [vmem:[%s22015_s8 + $0x30] sm:$0xff]  }
 0x507   :  { %15352 = vmatprep.subr.bf16.mxu1 %v15351_v45 }
 0x50a   :  { %15354 = vmatpush3.bf16.msra.mxu1 %v15351_v45 }
 0x50b   :  { %15356 = vmatprep.subr.bf16.mxu1 %v15355_v49 }
 0x50e   :  { %15358 = vmatpush3.bf16.msra.mxu1 %v15355_v49  ;;  %v12004_v49 = vld [vmem:[%s22014_s22 + $0x280] sm:$0xff] }
 0x50f   :  { %15360 = vmatprep.subr.bf16.mxu1 %v15359_v52  ;;  %v15207_v23 = vpack.c.bf16 %v12005_v15, %v12004_v49  ;;  %v12086_v15 = vld [vmem:[%s22014_s22 + $0x450] sm:$0xff] }
 0x512   :  { %15362 = vmatpush3.bf16.msra.mxu1 %v15359_v52  ;;  %v16482_v52 = vld [vmem:[%s22015_s8 + $0x40] sm:$0xff]  }
 0x513   :  { %15364 = vmatprep.subr.bf16.mxu1 %v15363_v22 }
 0x516   :  { %15366 = vmatpush3.bf16.msra.mxu1 %v15363_v22  ;;  %v12007_v22 = vld [vmem:[%s22014_s22 + $0x298] sm:$0xff] }
 0x519   :  { %14092 = vmatmul.mubr.f32.vlgmr.msra.gmra.mrb[26].mxu1 %v17839_v48  ;;  %v15143_v48 = vpack.c.bf16 %v11957_v60, %v11956_v58  ;;  %v16483_v58 = vld [vmem:[%s22015_s8 + $0x48] sm:$0xff]   ;;  %v15211_v60 = vpack.c.bf16 %v12007_v22, %v12006_v53 }
 0x51a   :  { %v12089_v53 = vld [vmem:[%s22014_s22 + $0x468] sm:$0xff] }
 0x54c   :  { %v18120_v54 = vpop.f32.mrb[16].mxu1 }
 0x54d   :  { %v18122_v55 = vpop.f32.mrb[17].mxu1 }
 0x54e   :  { %v18124_v56 = vpop.f32.mrb[18].mxu1 }
 0x54f   :  { %v18126_v57 = vpop.f32.mrb[19].mxu1 }
 0x56c   :  { %v13806_v0 = vpop.f32.mrb[14].mxu1 }
 0x56d   :  { %v2568_v2 = vpop.f32.mrb[15].mxu1 }
 0x56e   :  { %v2582_v62 = vpack.c.bf16 %v13806_v0, %v2568_v2  ;;  %v12008_v0 = vld [vmem:[%s22014_s22 + $0x2a0] sm:$0xff]  ;;  %v12009_v2 = vld [vmem:[%s22014_s22 + $0x2a8] sm:$0xff] }
 0x570   :  { %13807 = vmatprep.subr.bf16.mxu0 %v2582_v62 }
 0x571   :  { %13808 = vmatpush3.bf16.msra.mxu0 %v2582_v62  ;;  %v15215_v62 = vpack.c.bf16 %v12009_v2, %v12008_v0  ;;  %v16490_v2 = vld [vmem:[%s22015_s8 + $0x80] sm:$0xff]  }
 0x572   :  { %15144 = vmatprep.subr.bf16.mxu0 %v15143_v48 }
 0x574   :  { %13810 = vmatmul.mubr.msk.bf16.vlgmr.msra.gmra.mrb[16].mxu0 %vm349_vm9, %v16479_v8  ;;  %v12012_v8 = vld [vmem:[%s22014_s22 + $0x2c0] sm:$0xff] }
 0x575   :  { %15146 = vmatpush3.bf16.msra.mxu0 %v15143_v48  ;;  %13845 = vmatprep.mubr.f32.mxu0 %v17837_v26  ;;  %v12010_v48 = vld [vmem:[%s22014_s22 + $0x2b0] sm:$0xff] }
 0x576   :  { %15148 = vmatprep.subr.bf16.mxu0 %v15147_v3  ;;  %v15219_v12 = vpack.c.bf16 %v12011_v63, %v12010_v48 }
 0x579   :  { %15150 = vmatpush3.bf16.msra.mxu0 %v15147_v3  ;;  %v12013_v3 = vld [vmem:[%s22014_s22 + $0x2c8] sm:$0xff] }
 0x57a   :  { %15152 = vmatprep.subr.bf16.mxu0 %v15151_v4  ;;  %v15223_v39 = vpack.c.bf16 %v12013_v3, %v12012_v8  ;;  %v3745_v8 = vld [vmem:[%s21868_s10] sm:$0xff]  ;;  %v3746_v3 = vld [vmem:[%s21868_s10 + $0x8] sm:$0xff] }
 0x57d   :  { %15154 = vmatpush3.bf16.msra.mxu0 %v15151_v4  ;;  %v12015_v4 = vld [vmem:[%s22014_s22 + $0x2d8] sm:$0xff] }
 0x57e   :  { %15156 = vmatprep.subr.bf16.mxu0 %v15155_v16  ;;  %v15227_v5 = vpack.c.bf16 %v12015_v4, %v12014_v13  ;;  %v3748_v13 = vld [vmem:[%s21868_s10 + $0x18] sm:$0xff]  ;;  %v3891_v4 = vld [vmem:[%s21869_s11 + $0x8] sm:$0xff] }
 0x581   :  { %15158 = vmatpush3.bf16.msra.mxu0 %v15155_v16  ;;  %v12017_v16 = vld [vmem:[%s22014_s22 + $0x2e8] sm:$0xff] }
 0x582   :  { %15160 = vmatprep.subr.bf16.mxu0 %v15159_v10  ;;  %v15231_v9 = vpack.c.bf16 %v12017_v16, %v12016_v11  ;;  %v12109_v16 = vld [vmem:[%s21869_s11 + $0x28] sm:$0xff] }
 0x585   :  { %15162 = vmatpush3.bf16.msra.mxu0 %v15159_v10  ;;  %v12019_v10 = vld [vmem:[%s22014_s22 + $0x2f8] sm:$0xff] }
 0x586   :  { %15164 = vmatprep.subr.bf16.mxu0 %v15163_v1  ;;  %v15235_v18 = vpack.c.bf16 %v12019_v10, %v12018_v17  ;;  %v3892_v17 = vld [vmem:[%s21869_s11 + $0x10] sm:$0xff]  ;;  %v3893_v10 = vld [vmem:[%s21869_s11 + $0x18] sm:$0xff] }
 0x589   :  { %15166 = vmatpush3.bf16.msra.mxu0 %v15163_v1 }
 0x58a   :  { %15168 = vmatprep.subr.bf16.mxu0 %v15167_v61 }
 0x58c   :  { %v13888_v14 = vpop.f32.mrb[20].mxu1 }
 0x58d   :  { %15170 = vmatpush3.bf16.msra.mxu0 %v15167_v61  ;;  %v2902_v7 = vpop.f32.mrb[21].mxu1  ;;  %v16485_v61 = vld [vmem:[%s22015_s8 + $0x58] sm:$0xff]  }
 0x58e   :  { %v2916_v34 = vpack.c.bf16 %v13888_v14, %v2902_v7  ;;  %15172 = vmatprep.subr.bf16.mxu0 %v15171_v32  ;;  %v16487_v14 = vld [vmem:[%s22015_s8 + $0x68] sm:$0xff]   ;;  %v16488_v7 = vld [vmem:[%s22015_s8 + $0x70] sm:$0xff]  }
 0x591   :  { %15174 = vmatpush3.bf16.msra.mxu0 %v15171_v32  ;;  %v12077_v32 = vld [vmem:[%s22014_s22 + $0x408] sm:$0xff] }
 0x594   :  { %13846 = vmatmul.mubr.f32.vlgmr.msra.gmra.mrb[14].mxu0 %v17846_v30 }
 0x595   :  { %13850 = vmatprep.mubr.msk.bf16.mxu0 %vm349_vm9, %v16480_v44  ;;  %v12082_v44 = vld [vmem:[%s22014_s22 + $0x430] sm:$0xff] }
 0x5ac   :  { %v13970_v36 = vpop.f32.mrb[22].mxu1 }
 0x5ad   :  { %v3236_v37 = vpop.f32.mrb[23].mxu1 }
 0x5ae   :  { %v18182_v40 = vpack.c.bf16 %v13970_v36, %v3236_v37  ;;  %v12078_v36 = vld [vmem:[%s22014_s22 + $0x410] sm:$0xff]  ;;  %v12079_v37 = vld [vmem:[%s22014_s22 + $0x418] sm:$0xff] }
 0x5cc   :  { %v14011_v41 = vpop.f32.mrb[24].mxu1 }
 0x5cd   :  { %v3403_v20 = vpop.f32.mrb[25].mxu1 }
 0x5ce   :  { %v18184_v19 = vpack.c.bf16 %v14011_v41, %v3403_v20  ;;  %v15307_v41 = vpack.c.bf16 %v12079_v37, %v12078_v36  ;;  %v12080_v20 = vld [vmem:[%s22014_s22 + $0x420] sm:$0xff] }
 0x5ec   :  { %v14093_v43 = vpop.f32.mrb[26].mxu1 }
 0x5ed   :  { %v3736_v50 = vpop.f32.mrb[27].mxu1 }
 0x5ee   :  { %v18189_v6 = vpack.c.bf16 %v14093_v43, %v3736_v50  ;;  %v12083_v50 = vld [vmem:[%s22014_s22 + $0x438] sm:$0xff] }
 0x667   :  { %v13847_v45 = vpop.f32.mrb[14].mxu0 }
 0x668   :  { %v2735_v46 = vpop.f32.mrb[15].mxu0 }
 0x669   :  { %v2749_v47 = vpack.c.bf16 %v13847_v45, %v2735_v46  ;;  %v15315_v45 = vpack.c.bf16 %v12083_v50, %v12082_v44  ;;  %v12084_v46 = vld [vmem:[%s22014_s22 + $0x440] sm:$0xff] }
 0x66b   :  { %13848 = vmatprep.subr.bf16.mxu0 %v2749_v47 }
 0x66c   :  { %13849 = vmatpush3.bf16.msra.mxu0 %v2749_v47  ;;  %v12085_v47 = vld [vmem:[%s22014_s22 + $0x448] sm:$0xff] }
 0x66d   :  { %13889 = vmatprep.subr.bf16.mxu0 %v2916_v34  ;;  %v15319_v49 = vpack.c.bf16 %v12085_v47, %v12084_v46 }
 0x66f   :  { %13851 = vmatmul.mubr.msk.bf16.vlgmr.msra.gmra.mrb[16].mxu0 %vm349_vm9, %v16481_v51  ;;  %v12087_v51 = vld [vmem:[%s22014_s22 + $0x458] sm:$0xff] }
 0x670   :  { %13890 = vmatpush3.bf16.msra.mxu0 %v2916_v34  ;;  %13891 = vmatprep.mubr.msk.bf16.mxu0 %vm349_vm9, %v16482_v52  ;;  %v15303_v34 = vpack.c.bf16 %v12077_v32, %v12076_v31  ;;  %v15323_v52 = vpack.c.bf16 %v12087_v51, %v12086_v15 }
 0x671   :  { %15208 = vmatprep.subr.bf16.mxu0 %v15207_v23 }
 0x67b   :  { %13892 = vmatmul.mubr.msk.bf16.vlgmr.msra.gmra.mrb[16].mxu0 %vm349_vm9, %v16483_v58  ;;  %v12090_v58 = vld [vmem:[%s22014_s22 + $0x470] sm:$0xff] }
 0x67c   :  { %15210 = vmatpush3.bf16.msra.mxu0 %v15207_v23  ;;  %13927 = vmatprep.mubr.f32.mxu0 %v17837_v26  ;;  %v12088_v23 = vld [vmem:[%s22014_s22 + $0x460] sm:$0xff] }
 0x67d   :  { %15212 = vmatprep.subr.bf16.mxu0 %v15211_v60  ;;  %v15327_v22 = vpack.c.bf16 %v12089_v53, %v12088_v23 }
 0x680   :  { %15214 = vmatpush3.bf16.msra.mxu0 %v15211_v60  ;;  %v12091_v60 = vld [vmem:[%s22014_s22 + $0x478] sm:$0xff] }
 0x681   :  { %15216 = vmatprep.subr.bf16.mxu0 %v15215_v62  ;;  %v15331_v0 = vpack.c.bf16 %v12091_v60, %v12090_v58 }
 0x684   :  { %15218 = vmatpush3.bf16.msra.mxu0 %v15215_v62 }
 0x685   :  { %15220 = vmatprep.subr.bf16.mxu0 %v15219_v12 }
 0x688   :  { %15222 = vmatpush3.bf16.msra.mxu0 %v15219_v12  ;;  %v16491_v12 = vld [vmem:[%s22015_s8 + $0x88] sm:$0xff]  }
 0x689   :  { %15224 = vmatprep.subr.bf16.mxu0 %v15223_v39 }
 0x68c   :  { %15226 = vmatpush3.bf16.msra.mxu0 %v15223_v39  ;;  %v3747_v39 = vld [vmem:[%s21868_s10 + $0x10] sm:$0xff] }
 0x68d   :  { %15228 = vmatprep.subr.bf16.mxu0 %v15227_v5 }
 0x690   :  { %15230 = vmatpush3.bf16.msra.mxu0 %v15227_v5  ;;  %v12108_v5 = vld [vmem:[%s21869_s11 + $0x20] sm:$0xff] }
 0x691   :  { %15232 = vmatprep.subr.bf16.mxu0 %v15231_v9 }
 0x694   :  { %15234 = vmatpush3.bf16.msra.mxu0 %v15231_v9  ;;  %v15379_v9 = vpack.c.bf16 %v12109_v16, %v12108_v5  ;;  %v12245_v5 = vld [vmem:[%s21869_s11 + $0x88] sm:$0xff]  ;;  %v12246_v16 = vld [vmem:[%s21869_s11 + $0x90] sm:$0xff] }
 0x695   :  { %15236 = vmatprep.subr.bf16.mxu0 %v15235_v18 }
 0x696   :  { %15380 = vmatprep.subr.bf16.mxu1 %v15379_v9 }
 0x697   :  { %15382 = vmatpush3.bf16.msra.mxu1 %v15379_v9  ;;  %v12247_v9 = vld [vmem:[%s21869_s11 + $0x98] sm:$0xff] }
 0x698   :  { %15238 = vmatpush3.bf16.msra.mxu0 %v15235_v18  ;;  %v12110_v18 = vld [vmem:[%s21869_s11 + $0x30] sm:$0xff] }
 0x69b   :  { %13928 = vmatmul.mubr.f32.vlgmr.msra.gmra.mrb[20].mxu0 %v17846_v30 }
 0x69c   :  { %13932 = vmatprep.mubr.msk.bf16.mxu0 %vm349_vm9, %v16484_v21  ;;  %v15375_v21 = vpack.c.bf16 %v3893_v10, %v3892_v17  ;;  %v15407_v17 = vpack.c.bf16 %v12247_v9, %v12246_v16  ;;  %v12284_v10 = vld [vmem:[%s21869_s11 + $0xa0] sm:$0xff] }
 0x69d   :  { %v16496_v16 = vld [vmem:[%s21870_s12 + $0x60] sm:$0xff]  }
 0x76e   :  { %v13929_v1 = vpop.f32.mrb[20].mxu0 }
 0x76f   :  { %v3069_v25 = vpop.f32.mrb[21].mxu0 }
 0x770   :  { %v3083_v59 = vpack.c.bf16 %v13929_v1, %v3069_v25  ;;  %v12111_v1 = vld [vmem:[%s21869_s11 + $0x38] sm:$0xff] }
 0x771   :  { %v15383_v25 = vpack.c.bf16 %v12111_v1, %v12110_v18  ;;  %v12285_v18 = vld [vmem:[%s21869_s11 + $0xa8] sm:$0xff]  ;;  %v12286_v1 = vld [vmem:[%s21869_s11 + $0xb0] sm:$0xff] }
 0x772   :  { %13930 = vmatprep.subr.bf16.mxu0 %v3083_v59 }
 0x773   :  { %13931 = vmatpush3.bf16.msra.mxu0 %v3083_v59  ;;  %15384 = vmatprep.subr.bf16.mxu1 %v15383_v25  ;;  %v12164_v59 = vld [vmem:[%s21869_s11 + $0x40] sm:$0xff] }
 0x774   :  { %13971 = vmatprep.subr.bf16.mxu0 %v18182_v40  ;;  %15386 = vmatpush3.bf16.msra.mxu1 %v15383_v25  ;;  %v12287_v25 = vld [vmem:[%s21869_s11 + $0xb8] sm:$0xff] }
 0x776   :  { %13933 = vmatmul.mubr.msk.bf16.vlgmr.msra.gmra.mrb[16].mxu0 %vm349_vm9, %v16485_v61  ;;  %v12165_v61 = vld [vmem:[%s21869_s11 + $0x48] sm:$0xff] }
 0x777   :  { %13972 = vmatpush3.bf16.msra.mxu0 %v18182_v40  ;;  %13973 = vmatprep.mubr.msk.bf16.mxu0 %vm349_vm9, %v16486_v29  ;;  %v16489_v40 = vld [vmem:[%s22015_s8 + $0x78] sm:$0xff]   ;;  %v15387_v29 = vpack.c.bf16 %v12165_v61, %v12164_v59  ;;  %v15415_v59 = vpack.c.bf16 %v12287_v25, %v12286_v1  ;;  %v12324_v61 = vld [vmem:[%s21869_s11 + $0xc0] sm:$0xff]  ;;  %v16497_v1 = vld [vmem:[%s21870_s12 + $0x68] sm:$0xff]  }
 0x778   :  { %14012 = vmatprep.subr.bf16.mxu0 %v18184_v19 }
 0x779   :  { %15388 = vmatprep.subr.bf16.mxu1 %v15387_v29 }
 0x782   :  { %13974 = vmatmul.mubr.msk.bf16.vlgmr.msra.gmra.mrb[16].mxu0 %vm349_vm9, %v16487_v14 }
 0x783   :  { %14013 = vmatpush3.bf16.msra.mxu0 %v18184_v19  ;;  %14014 = vmatprep.mubr.msk.bf16.mxu0 %vm349_vm9, %v16488_v7  ;;  %v12081_v19 = vld [vmem:[%s22014_s22 + $0x428] sm:$0xff] }
 0x784   :  { %15304 = vmatprep.subr.bf16.mxu0 %v15303_v34  ;;  %v15311_v43 = vpack.c.bf16 %v12081_v19, %v12080_v20  ;;  %v3857_v19 = vpop.permute.xlu1 %3856 }
 0x788   :  { %v3867_v23 = vpop.permute.xlu1 %3866 }
 0x78e   :  { %14015 = vmatmul.mubr.msk.bf16.vlgmr.msra.gmra.mrb[16].mxu0 %vm349_vm9, %v16489_v40 }
 0x78f   :  { %15306 = vmatpush3.bf16.msra.mxu0 %v15303_v34  ;;  %14050 = vmatprep.mubr.f32.mxu0 %v17837_v26 }
 0x790   :  { %15308 = vmatprep.subr.bf16.mxu0 %v15307_v41 }
 0x793   :  { %15310 = vmatpush3.bf16.msra.mxu0 %v15307_v41  ;;  %v3862_v41 = vpop.permute.xlu0 %3861 }
 0x794   :  { %15312 = vmatprep.subr.bf16.mxu0 %v15311_v43 }
 0x797   :  { %15314 = vmatpush3.bf16.msra.mxu0 %v15311_v43  ;;  %v3872_v15 = vpop.permute.xlu0 %3871 }
 0x798   :  { %15316 = vmatprep.subr.bf16.mxu0 %v15315_v45 }
 0x79b   :  { %15318 = vmatpush3.bf16.msra.mxu0 %v15315_v45 }
 0x79c   :  { %15320 = vmatprep.subr.bf16.mxu0 %v15319_v49 }
 0x79f   :  { %15322 = vmatpush3.bf16.msra.mxu0 %v15319_v49 }
 0x7a0   :  { %15324 = vmatprep.subr.bf16.mxu0 %v15323_v52 }
 0x7a3   :  { %15326 = vmatpush3.bf16.msra.mxu0 %v15323_v52 }
 0x7a4   :  { %15328 = vmatprep.subr.bf16.mxu0 %v15327_v22 }
 0x7a7   :  { %15330 = vmatpush3.bf16.msra.mxu0 %v15327_v22 }
 0x7a8   :  { %15332 = vmatprep.subr.bf16.mxu0 %v15331_v0 }
 0x7ab   :  { %15334 = vmatpush3.bf16.msra.mxu0 %v15331_v0 }
 0x7ae   :  { %14051 = vmatmul.mubr.f32.vlgmr.msra.gmra.mrb[22].mxu0 %v17846_v30 }
 0x7af   :  { %14055 = vmatprep.mubr.msk.bf16.mxu0 %vm349_vm9, %v16490_v2 }
 0x881   :  { %v14052_v62 = vpop.f32.mrb[22].mxu0 }
 0x882   :  { %v3570_v48 = vpop.f32.mrb[23].mxu0 }
 0x883   :  { %v3584_v63 = vpack.c.bf16 %v14052_v62, %v3570_v48  ;;  %v12204_v62 = vld [vmem:[%s21869_s11 + $0x60] sm:$0xff]  ;;  %v12205_v48 = vld [vmem:[%s21869_s11 + $0x68] sm:$0xff] }
 0x885   :  { %14053 = vmatprep.subr.bf16.mxu0 %v3584_v63 }
 0x886   :  { %14054 = vmatpush3.bf16.msra.mxu0 %v3584_v63 }
 0x887   :  { %15368 = vmatprep.subr.bf16.mxu0 %v18189_v6 }
 0x889   :  { %14056 = vmatmul.mubr.msk.bf16.vlgmr.msra.gmra.mrb[16].mxu0 %vm349_vm9, %v16491_v12 }
 0x88a   :  { %15370 = vmatpush3.bf16.msra.mxu0 %v18189_v6  ;;  %14098 = vmatprep.mubr.msk.f32.mxu0 %vm349_vm9, %v3745_v8  ;;  %v3890_v6 = vld [vmem:[%s21869_s11] sm:$0xff]  ;;  %v15395_v8 = vpack.c.bf16 %v12205_v48, %v12204_v62 }
 0x88b   :  { %v15371_v11 = vpack.c.bf16 %v3891_v4, %v3890_v6  ;;  %v12244_v4 = vld [vmem:[%s21869_s11 + $0x80] sm:$0xff] }
 0x88d   :  { %15372 = vmatprep.subr.bf16.mxu0 %v15371_v11 }
 0x891   :  { %14099 = vmatmul.mubr.msk.f32.vlgmr.msra.gmra.mrb[24].mxu0 %vm349_vm9, %v3746_v3 }
 0x892   :  { %14101 = vmatprep.mubr.msk.f32.mxu0 %vm349_vm9, %v3747_v39  ;;  %15374 = vmatpush3.bf16.msra.mxu0 %v15371_v11  ;;  %v12206_v39 = vld [vmem:[%s21869_s11 + $0x70] sm:$0xff]  ;;  %v15403_v11 = vpack.c.bf16 %v12245_v5, %v12244_v4  ;;  %v16495_v5 = vld [vmem:[%s21870_s12 + $0x58] sm:$0xff]  }
 0x893   :  { %15376 = vmatprep.subr.bf16.mxu0 %v15375_v21 }
 0x895   :  { %14102 = vmatmul.mubr.msk.f32.gmra.mrb[26].mxu0 %vm349_vm9, %v3748_v13  ;;  %v12207_v13 = vld [vmem:[%s21869_s11 + $0x78] sm:$0xff] }
 0x896   :  { %15378 = vmatpush3.bf16.msra.mxu0 %v15375_v21  ;;  %v15399_v6 = vpack.c.bf16 %v12207_v13, %v12206_v39  ;;  %v15411_v21 = vpack.c.bf16 %v12285_v18, %v12284_v10 }
 0x95c   :  { %v14057_v31 = vpop.f32.mrb[16].mxu0 }
 0x95d   :  { %v16091_v32 = vadd.f32 %v14057_v31, %v18120_v54  ;;  %v3635_v14 = vpop.f32.mrb[17].mxu0 }
 0x95e   :  { %v16092_v7 = vadd.f32 %v3635_v14, %v18122_v55  ;;  %v14058_v34 = vpop.f32.mrb[18].mxu0  ;;  %v12327_v14 = vld [vmem:[%s21869_s11 + $0xd8] sm:$0xff] }
 0x95f   :  { %v16093_v36 = vadd.f32 %v14058_v34, %v18124_v56  ;;  %v3638_v37 = vpop.f32.mrb[19].mxu0  ;;  %v12166_v56 = vld [vmem:[%s21869_s11 + $0x50] sm:$0xff]  ;;  %v12364_v34 = vld [vmem:[%s21869_s11 + $0xe0] sm:$0xff] }
 0x960   :  { %v16094_v40 = vadd.f32 %v3638_v37, %v18126_v57  ;;  %v12167_v57 = vld [vmem:[%s21869_s11 + $0x58] sm:$0xff] }
 0x961   :  { %v15391_v60 = vpack.c.bf16 %v12167_v57, %v12166_v56 }
 0x964   :  { %v14100_v20 = vpop.f32.mrb[24].mxu0 }
 0x965   :  { %v3847_v43 = vadd.f32 %v16094_v40, %v14100_v20  ;;  %v3827_v44 = vpop.f32.mrb[25].mxu0  ;;  %v12366_v40 = vld [vmem:[%s21869_s11 + $0xf0] sm:$0xff] }
 0x966   :  { %v3846_v50 = vadd.f32 %v16092_v7, %v3827_v44 }
 0x967   :  { %v18392_v45 = vadd.f32 %v3862_v41, %v3847_v43  ;;  %v12367_v41 = vld [vmem:[%s21869_s11 + $0xf8] sm:$0xff]  ;;  %v12405_v43 = vld [vmem:[%s21869_s11 + $0x108] sm:$0xff] }
 0x968   :  { %v18394_v46 = vadd.f32 %v3857_v19, %v3846_v50  ;;  %v14103_v54 = vpop.f32.mrb[26].mxu0  ;;  %v15431_v20 = vpack.c.bf16 %v12367_v41, %v12366_v40  ;;  %v12404_v19 = vld [vmem:[%s21869_s11 + $0x100] sm:$0xff]  ;;  %v12406_v50 = vld [vmem:[%s21869_s11 + $0x110] sm:$0xff] }
 0x969   :  { %v3883_v47 = vmul.f32 0.01, %v18392_v45  ;;  %v3849_v55 = vadd.f32 %v16093_v36, %v14103_v54  ;;  %v3837_v49 = vpop.f32.mrb[27].mxu0  ;;  %vm3879_vm4 = vcmp.ge.f32.partialorder %v18392_v45, 0.0  ;;  %v12365_v36 = vld [vmem:[%s21869_s11 + $0xe8] sm:$0xff]  ;;  %v15435_v44 = vpack.c.bf16 %v12405_v43, %v12404_v19  ;;  %v12407_v54 = vld [vmem:[%s21869_s11 + $0x118] sm:$0xff] }
 0x96a   :  { %vm3878_vm5 = vcmp.ge.f32.partialorder %v18394_v46, 0.0  ;;  %v3882_v51 = vmul.f32 0.01, %v18394_v46  ;;  %v3848_v52 = vadd.f32 %v16091_v32, %v3837_v49  ;;  %v12326_v32 = vld [vmem:[%s21869_s11 + $0xd0] sm:$0xff]  ;;  %v15427_v37 = vpack.c.bf16 %v12365_v36, %v12364_v34  ;;  %v16500_v36 = vld [vmem:[%s21870_s12] sm:$0xff]   ;;  %v16501_v43 = vld [vmem:[%s21870_s12 + $0x8] sm:$0xff]  }
 0x96b   :  { %v18406_v53 = vadd.f32 %v3872_v15, %v3849_v55  ;;  %v18414_v0 = vsel %vm3879_vm4, %v18392_v45, %v3883_v47  ;;  %v15423_v7 = vpack.c.bf16 %v12327_v14, %v12326_v32  ;;  %v15439_v47 = vpack.c.bf16 %v12407_v54, %v12406_v50  ;;  %v16492_v55 = vld [vmem:[%s21870_s12 + $0x40] sm:$0xff]   ;;  %v16502_v50 = vld [vmem:[%s21870_s12 + $0x10] sm:$0xff]  }
 0x96c   :  { %v18409_v22 = vsel %vm3878_vm5, %v18394_v46, %v3882_v51  ;;  %v18411_v58 = vadd.f32 %v3867_v23, %v3848_v52  ;;  %vm7287_vm5 = vcmask 392192  }
 0x96d   :  { %v3885_v2 = vmul.f32 0.01, %v18406_v53  ;;  %14112 = vmatprep.mubr.msk.f32.mxu0 %vm3894_vm3, %v18409_v22  ;;  %14126 = vmatprep.mubr.msk.f32.mxu1 %vm3894_vm3, %v18409_v22  ;;  %vm3881_vm6 = vcmp.ge.f32.partialorder %v18406_v53, 0.0 }
 0x96e   :  { %vm3880_vm7 = vcmp.ge.f32.partialorder %v18411_v58, 0.0  ;;  %v3884_v63 = vmul.f32 0.01, %v18411_v58  ;;  %14113 = vmatmul.mubr.msk.f32.vlgmr.msra.gmra.mrb[28].mxu0 %vm3894_vm3, %v18414_v0  ;;  %14127 = vmatmul.mubr.msk.f32.vlgmr.msra.gmra.mrb[28].mxu1 %vm3894_vm3, %v18414_v0 }
 0x96f   :  { %15390 = vmatpush3.bf16.msra.mxu1 %v15387_v29  ;;  %v18438_v3 = vsel %vm3881_vm6, %v18406_v53, %v3885_v2  ;;  %v12325_v29 = vld [vmem:[%s21869_s11 + $0xc8] sm:$0xff] }
 0x970   :  { %v18435_v12 = vsel %vm3880_vm7, %v18411_v58, %v3884_v63  ;;  %15392 = vmatprep.subr.bf16.mxu1 %v15391_v60  ;;  %v15419_v31 = vpack.c.bf16 %v12325_v29, %v12324_v61  ;;  %v16493_v63 = vld [vmem:[%s21870_s12 + $0x48] sm:$0xff]  }
 0x971   :  { %14115 = vmatprep.mubr.msk.f32.mxu0 %vm3894_vm3, %v18435_v12  ;;  %14129 = vmatprep.mubr.msk.f32.mxu1 %vm3894_vm3, %v18435_v12 }
 0x972   :  { %14116 = vmatmul.mubr.msk.f32.gmra.mrb[30].mxu0 %vm3894_vm3, %v18438_v3  ;;  %14130 = vmatmul.mubr.msk.f32.gmra.mrb[30].mxu1 %vm3894_vm3, %v18438_v3 }
 0x973   :  { %15394 = vmatpush3.bf16.msra.mxu1 %v15391_v60  ;;  %14180 = vmatprep.mubr.msk.f32.mxu1 %vm3894_vm3, %v18409_v22 }
 0x974   :  { %15396 = vmatprep.subr.bf16.mxu1 %v15395_v8  ;;  %14136 = vmatprep.mubr.msk.bf16.mxu0 %vm3894_vm3, %v16492_v55 }
 0x976   :  { %14181 = vmatmul.mubr.msk.f32.vlgmr.msra.gmra.mrb[32].mxu1 %vm3894_vm3, %v18414_v0 }
 0x977   :  { %14183 = vmatprep.mubr.msk.f32.mxu1 %vm3894_vm3, %v18435_v12  ;;  %15398 = vmatpush3.bf16.msra.mxu1 %v15395_v8  ;;  %v16494_v8 = vld [vmem:[%s21870_s12 + $0x50] sm:$0xff]  }
 0x978   :  { %15400 = vmatprep.subr.bf16.mxu1 %v15399_v6 }
 0x97a   :  { %14184 = vmatmul.mubr.msk.f32.gmra.mrb[34].mxu1 %vm3894_vm3, %v18438_v3 }
 0x97b   :  { %15402 = vmatpush3.bf16.msra.mxu1 %v15399_v6  ;;  %14214 = vmatprep.mubr.msk.f32.mxu1 %vm3894_vm3, %v18409_v22 }
 0x97c   :  { %15404 = vmatprep.subr.bf16.mxu1 %v15403_v11 }
 0x97e   :  { %14215 = vmatmul.mubr.msk.f32.vlgmr.msra.gmra.mrb[36].mxu1 %vm3894_vm3, %v18414_v0 }
 0x97f   :  { %14217 = vmatprep.mubr.msk.f32.mxu1 %vm3894_vm3, %v18435_v12  ;;  %15406 = vmatpush3.bf16.msra.mxu1 %v15403_v11 }
 0x980   :  { %15408 = vmatprep.subr.bf16.mxu1 %v15407_v17 }
 0x982   :  { %14218 = vmatmul.mubr.msk.f32.gmra.mrb[38].mxu1 %vm3894_vm3, %v18438_v3 }
 0x983   :  { %15410 = vmatpush3.bf16.msra.mxu1 %v15407_v17  ;;  %14248 = vmatprep.mubr.msk.f32.mxu1 %vm3894_vm3, %v18409_v22 }
 0x984   :  { %15412 = vmatprep.subr.bf16.mxu1 %v15411_v21 }
 0x986   :  { %14249 = vmatmul.mubr.msk.f32.vlgmr.msra.gmra.mrb[40].mxu1 %vm3894_vm3, %v18414_v0 }
 0x987   :  { %14251 = vmatprep.mubr.msk.f32.mxu1 %vm3894_vm3, %v18435_v12  ;;  %15414 = vmatpush3.bf16.msra.mxu1 %v15411_v21 }
 0x988   :  { %15416 = vmatprep.subr.bf16.mxu1 %v15415_v59 }
 0x98a   :  { %14252 = vmatmul.mubr.msk.f32.gmra.mrb[42].mxu1 %vm3894_vm3, %v18438_v3 }
 0x98b   :  { %15418 = vmatpush3.bf16.msra.mxu1 %v15415_v59  ;;  %14282 = vmatprep.mubr.msk.f32.mxu1 %vm3894_vm3, %v18409_v22  ;;  %v16498_v59 = vld [vmem:[%s21870_s12 + $0x70] sm:$0xff]  }
 0x98c   :  { %15420 = vmatprep.subr.bf16.mxu1 %v15419_v31 }
 0x98e   :  { %14283 = vmatmul.mubr.msk.f32.vlgmr.msra.gmra.mrb[44].mxu1 %vm3894_vm3, %v18414_v0 }
 0x98f   :  { %14285 = vmatprep.mubr.msk.f32.mxu1 %vm3894_vm3, %v18435_v12  ;;  %15422 = vmatpush3.bf16.msra.mxu1 %v15419_v31 }
 0x990   :  { %15424 = vmatprep.subr.bf16.mxu1 %v15423_v7 }
 0x992   :  { %14286 = vmatmul.mubr.msk.f32.gmra.mrb[46].mxu1 %vm3894_vm3, %v18438_v3 }
 0x993   :  { %15426 = vmatpush3.bf16.msra.mxu1 %v15423_v7  ;;  %14316 = vmatprep.mubr.msk.f32.mxu1 %vm3894_vm3, %v18409_v22  ;;  %v16499_v7 = vld [vmem:[%s21870_s12 + $0x78] sm:$0xff]  }
 0x994   :  { %15428 = vmatprep.subr.bf16.mxu1 %v15427_v37 }
 0x996   :  { %14317 = vmatmul.mubr.msk.f32.vlgmr.msra.gmra.mrb[48].mxu1 %vm3894_vm3, %v18414_v0 }
 0x997   :  { %14319 = vmatprep.mubr.msk.f32.mxu1 %vm3894_vm3, %v18435_v12  ;;  %15430 = vmatpush3.bf16.msra.mxu1 %v15427_v37 }
 0x998   :  { %15432 = vmatprep.subr.bf16.mxu1 %v15431_v20 }
 0x99a   :  { %14320 = vmatmul.mubr.msk.f32.gmra.mrb[50].mxu1 %vm3894_vm3, %v18438_v3 }
 0x99b   :  { %15434 = vmatpush3.bf16.msra.mxu1 %v15431_v20  ;;  %14350 = vmatprep.mubr.msk.f32.mxu1 %vm3894_vm3, %v18409_v22 }
 0x99c   :  { %15436 = vmatprep.subr.bf16.mxu1 %v15435_v44 }
 0x99e   :  { %14351 = vmatmul.mubr.msk.f32.vlgmr.msra.gmra.mrb[52].mxu1 %vm3894_vm3, %v18414_v0 }
 0x99f   :  { %14353 = vmatprep.mubr.msk.f32.mxu1 %vm3894_vm3, %v18435_v12  ;;  %15438 = vmatpush3.bf16.msra.mxu1 %v15435_v44 }
 0x9a0   :  { %15440 = vmatprep.subr.bf16.mxu1 %v15439_v47 }
 0x9a2   :  { %14354 = vmatmul.mubr.msk.f32.gmra.mrb[54].mxu1 %vm3894_vm3, %v18438_v3 }
 0x9a3   :  { %15442 = vmatpush3.bf16.msra.mxu1 %v15439_v47  ;;  %14384 = vmatprep.mubr.msk.f32.mxu1 %vm3894_vm3, %v18409_v22 }
 0x9a6   :  { %14385 = vmatmul.mubr.msk.f32.vlgmr.msra.gmra.mrb[56].mxu1 %vm3894_vm3, %v18414_v0 }
 0x9a7   :  { %14387 = vmatprep.mubr.msk.f32.mxu1 %vm3894_vm3, %v18435_v12 }
 0x9aa   :  { %14388 = vmatmul.mubr.msk.f32.gmra.mrb[58].mxu1 %vm3894_vm3, %v18438_v3 }
 0xa41   :  { %v14114_v49 = vpop.f32.mrb[28].mxu0  ;;  %v14128_v56 = vpop.f32.mrb[28].mxu1 }
 0xa42   :  { %v3973_v57 = vpop.f32.mrb[29].mxu0  ;;  %v4081_v15 = vpop.f32.mrb[29].mxu1 }
 0xa43   :  { %v4008_v51 = vpack.c.bf16 %v14114_v49, %v3973_v57  ;;  %v4117_v52 = vpack.c.bf16 %v14128_v56, %v4081_v15  ;;  %v16503_v57 = vld [vmem:[%s21870_s12 + $0x18] sm:$0xff]  }
 0xa45   :  { %v14117_v23 = vpop.f32.mrb[30].mxu0  ;;  %v14131_v22 = vpop.f32.mrb[30].mxu1  ;;  %14132 = vmatprep.subr.bf16.mxu0 %v4117_v52 }
 0xa46   :  { %v3983_v60 = vpop.f32.mrb[31].mxu0  ;;  %v4091_v0 = vpop.f32.mrb[31].mxu1  ;;  %14133 = vmatpush3.bf16.msra.mxu0 %v4117_v52 }
 0xa47   :  { %v4009_v2 = vpack.c.bf16 %v14117_v23, %v3983_v60  ;;  %v4118_v62 = vpack.c.bf16 %v14131_v22, %v4091_v0 }
 0xa49   :  { %14134 = vmatprep.subr.bf16.mxu0 %v4118_v62  ;;  %v14182_v48 = vpop.f32.mrb[32].mxu1 }
 0xa4a   :  { %14135 = vmatpush3.bf16.msra.mxu0 %v4118_v62  ;;  %v4512_v12 = vpop.f32.mrb[33].mxu1 }
 0xa4b   :  { %v4548_v3 = vpack.c.bf16 %v14182_v48, %v4512_v12  ;;  %14152 = vmatprep.subr.bf16.mxu0 %v4008_v51  ;;  %v16506_v48 = vld [vmem:[%s21870_s12 + $0x30] sm:$0xff]  }
 0xa4d   :  { %14137 = vmatmul.mubr.msk.bf16.vlgmr.msra.gmra.mrb[32].mxu0 %vm3894_vm3, %v16493_v63  ;;  %v14185_v39 = vpop.f32.mrb[34].mxu1 }
 0xa4e   :  { %14153 = vmatpush3.bf16.msra.mxu0 %v4008_v51  ;;  %v4522_v13 = vpop.f32.mrb[35].mxu1  ;;  %14140 = vmatprep.mubr.msk.bf16.mxu0 %vm3894_vm3, %v16494_v8  ;;  %v16504_v51 = vld [vmem:[%s21870_s12 + $0x20] sm:$0xff]  }
 0xa4f   :  { %v4549_v6 = vpack.c.bf16 %v14185_v39, %v4522_v13  ;;  %14154 = vmatprep.subr.bf16.mxu0 %v4009_v2  ;;  %v16507_v39 = vld [vmem:[%s21870_s12 + $0x38] sm:$0xff]   ;;  %v16508_v13 = vld [vmem:[%s21870_s12 + $0x80] sm:$0xff]  }
 0xa51   :  { %v14216_v4 = vpop.f32.mrb[36].mxu1 }
 0xa52   :  { %14155 = vmatpush3.bf16.msra.mxu0 %v4009_v2  ;;  %v4798_v11 = vpop.f32.mrb[37].mxu1  ;;  %v16505_v2 = vld [vmem:[%s21870_s12 + $0x28] sm:$0xff]  }
 0xa53   :  { %v18588_v9 = vpack.c.bf16 %v14216_v4, %v4798_v11  ;;  %14186 = vmatprep.subr.bf16.mxu0 %v4548_v3  ;;  %v16510_v4 = vld [vmem:[%s21870_s12 + $0x90] sm:$0xff]   ;;  %v16512_v11 = vld [vmem:[%s21870_s12 + $0xa0] sm:$0xff]  }
 0xa55   :  { %14141 = vmatmul.mubr.msk.bf16.gmra.mrb[36].mxu0 %vm3894_vm3, %v16495_v5  ;;  %v14219_v17 = vpop.f32.mrb[38].mxu1  ;;  %v16511_v5 = vld [vmem:[%s21870_s12 + $0x98] sm:$0xff]  }
 0xa56   :  { %v4808_v10 = vpop.f32.mrb[39].mxu1  ;;  %14144 = vmatprep.mubr.msk.bf16.mxu0 %vm3894_vm3, %v16496_v16  ;;  %v16513_v16 = vld [vmem:[%s21870_s12 + $0xa8] sm:$0xff]  }
 0xa57   :  { %v18592_v18 = vpack.c.bf16 %v14219_v17, %v4808_v10  ;;  %v16515_v17 = vld [vmem:[%s21870_s12 + $0xb8] sm:$0xff]   ;;  %v16516_v10 = vld [vmem:[%s21870_s12 + $0xc0] sm:$0xff]  }
 0xa59   :  { %v14250_v21 = vpop.f32.mrb[40].mxu1 }
 0xa5a   :  { %v5084_v25 = vpop.f32.mrb[41].mxu1 }
 0xa5b   :  { %v18600_v61 = vpack.c.bf16 %v14250_v21, %v5084_v25  ;;  %v16518_v21 = vld [vmem:[%s21870_s12 + $0xd0] sm:$0xff]   ;;  %v16520_v25 = vld [vmem:[%s21870_s12 + $0xe0] sm:$0xff]  }
 0xa5d   :  { %14145 = vmatmul.mubr.msk.bf16.gmra.mrb[40].mxu0 %vm3894_vm3, %v16497_v1  ;;  %v14253_v29 = vpop.f32.mrb[42].mxu1  ;;  %v16519_v1 = vld [vmem:[%s21870_s12 + $0xd8] sm:$0xff]  }
 0xa5e   :  { %v5094_v31 = vpop.f32.mrb[43].mxu1  ;;  %14148 = vmatprep.mubr.msk.bf16.mxu0 %vm3894_vm3, %v16498_v59  ;;  %v16521_v59 = vld [vmem:[%s21870_s12 + $0xe8] sm:$0xff]  }
 0xa5f   :  { %v18604_v32 = vpack.c.bf16 %v14253_v29, %v5094_v31  ;;  %v16523_v29 = vld [vmem:[%s21870_s12 + $0xf8] sm:$0xff]   ;;  %v16524_v31 = vld [vmem:[%s21870_s12 + $0x100] sm:$0xff]  }
 0xa61   :  { %v14284_v14 = vpop.f32.mrb[44].mxu1 }
 0xa62   :  { %v5370_v34 = vpop.f32.mrb[45].mxu1 }
 0xa63   :  { %v18612_v37 = vpack.c.bf16 %v14284_v14, %v5370_v34  ;;  %v16526_v14 = vld [vmem:[%s21870_s12 + $0x110] sm:$0xff]   ;;  %v16528_v34 = vld [vmem:[%s21870_s12 + $0x120] sm:$0xff]  }
 0xa65   :  { %14149 = vmatmul.mubr.msk.bf16.gmra.mrb[44].mxu0 %vm3894_vm3, %v16499_v7  ;;  %v14287_v40 = vpop.f32.mrb[46].mxu1  ;;  %v16527_v7 = vld [vmem:[%s21870_s12 + $0x118] sm:$0xff]  }
 0xa66   :  { %v5380_v41 = vpop.f32.mrb[47].mxu1  ;;  %14156 = vmatprep.mubr.msk.bf16.mxu0 %vm3894_vm3, %v16500_v36  ;;  %v16529_v36 = vld [vmem:[%s21870_s12 + $0x128] sm:$0xff]  }
 0xa67   :  { %v18616_v20 = vpack.c.bf16 %v14287_v40, %v5380_v41  ;;  %v16531_v40 = vld [vmem:[%s21870_s12 + $0x138] sm:$0xff]   ;;  %v16532_v41 = vld [vmem:[%s21870_s12 + $0x140] sm:$0xff]  }
 0xa69   :  { %v14318_v19 = vpop.f32.mrb[48].mxu1 }
 0xa6a   :  { %v5656_v44 = vpop.f32.mrb[49].mxu1 }
 0xa6b   :  { %v18624_v54 = vpack.c.bf16 %v14318_v19, %v5656_v44  ;;  %v16534_v19 = vld [vmem:[%s21870_s12 + $0x150] sm:$0xff]   ;;  %v16536_v44 = vld [vmem:[%s21870_s12 + $0x160] sm:$0xff]  }
 0xa6d   :  { %14157 = vmatmul.mubr.msk.bf16.vlgmr.msra.gmra.mrb[32].mxu0 %vm3894_vm3, %v16501_v43  ;;  %v14321_v47 = vpop.f32.mrb[50].mxu1  ;;  %v16535_v43 = vld [vmem:[%s21870_s12 + $0x158] sm:$0xff]  }
 0xa6e   :  { %14187 = vmatpush3.bf16.msra.mxu0 %v4548_v3  ;;  %v5666_v55 = vpop.f32.mrb[51].mxu1  ;;  %14160 = vmatprep.mubr.msk.bf16.mxu0 %vm3894_vm3, %v16502_v50  ;;  %v16537_v50 = vld [vmem:[%s21870_s12 + $0x168] sm:$0xff]  }
 0xa6f   :  { %14188 = vmatprep.subr.bf16.mxu0 %v4549_v6  ;;  %v18628_v49 = vpack.c.bf16 %v14321_v47, %v5666_v55  ;;  %v16539_v47 = vld [vmem:[%s21870_s12 + $0x178] sm:$0xff]   ;;  %v16540_v55 = vld [vmem:[%s21870_s12 + $0x180] sm:$0xff]  }
 0xa71   :  { %v14352_v56 = vpop.f32.mrb[52].mxu1 }
 0xa72   :  { %14189 = vmatpush3.bf16.msra.mxu0 %v4549_v6  ;;  %v5942_v15 = vpop.f32.mrb[53].mxu1  ;;  %v16509_v6 = vld [vmem:[%s21870_s12 + $0x88] sm:$0xff]  }
 0xa73   :  { %14220 = vmatprep.subr.bf16.mxu0 %v18588_v9  ;;  %v18637_v52 = vpack.c.bf16 %v14352_v56, %v5942_v15  ;;  %v16542_v56 = vld [vmem:[%s21870_s12 + $0x190] sm:$0xff]   ;;  %v16544_v15 = vld [vmem:[%s21870_s12 + $0x1a0] sm:$0xff]  }
 0xa75   :  { %14161 = vmatmul.mubr.msk.bf16.gmra.mrb[36].mxu0 %vm3894_vm3, %v16503_v57  ;;  %v14355_v23 = vpop.f32.mrb[54].mxu1  ;;  %v16543_v57 = vld [vmem:[%s21870_s12 + $0x198] sm:$0xff]  }
 0xa76   :  { %v5952_v22 = vpop.f32.mrb[55].mxu1  ;;  %14164 = vmatprep.mubr.msk.bf16.mxu0 %vm3894_vm3, %v16504_v51  ;;  %v16545_v51 = vld [vmem:[%s21870_s12 + $0x1a8] sm:$0xff]  }
 0xa77   :  { %v18641_v60 = vpack.c.bf16 %v14355_v23, %v5952_v22  ;;  %v16547_v23 = vld [vmem:[%s21870_s12 + $0x1b8] sm:$0xff]   ;;  %v16548_v22 = vld [vmem:[%s21870_s12 + $0x1c0] sm:$0xff]  }
 0xa79   :  { %v14386_v0 = vpop.f32.mrb[56].mxu1 }
 0xa7a   :  { %v6228_v62 = vpop.f32.mrb[57].mxu1 }
 0xa7b   :  { %v18649_v63 = vpack.c.bf16 %v14386_v0, %v6228_v62  ;;  %v16550_v0 = vld [vmem:[%s21870_s12 + $0x1d0] sm:$0xff]   ;;  %v16552_v62 = vld [vmem:[%s21870_s12 + $0x1e0] sm:$0xff]  }
 0xa7d   :  { %14165 = vmatmul.mubr.msk.bf16.gmra.mrb[40].mxu0 %vm3894_vm3, %v16505_v2  ;;  %v14389_v12 = vpop.f32.mrb[58].mxu1  ;;  %v16551_v2 = vld [vmem:[%s21870_s12 + $0x1d8] sm:$0xff]  }
 0xa7e   :  { %v6238_v8 = vpop.f32.mrb[59].mxu1  ;;  %14168 = vmatprep.mubr.msk.bf16.mxu0 %vm3894_vm3, %v16506_v48  ;;  %v16553_v48 = vld [vmem:[%s21870_s12 + $0x1e8] sm:$0xff]  }
 0xa7f   :  { %v18653_v3 = vpack.c.bf16 %v14389_v12, %v6238_v8  ;;  %v16555_v12 = vld [vmem:[%s21870_s12 + $0x1f8] sm:$0xff]   ;;  %v16556_v8 = vld [vmem:[%s21870_s12 + $0x200] sm:$0xff]  }
 0xa85   :  { %14169 = vmatmul.mubr.msk.bf16.gmra.mrb[44].mxu0 %vm3894_vm3, %v16507_v39  ;;  %v16558_v39 = vld [vmem:[%s21870_s12 + $0x210] sm:$0xff]  }
 0xa86   :  { %14190 = vmatprep.mubr.msk.bf16.mxu0 %vm3894_vm3, %v16508_v13  ;;  %v16559_v13 = vld [vmem:[%s21870_s12 + $0x218] sm:$0xff]  }
 0xa8d   :  { %14191 = vmatmul.mubr.msk.bf16.vlgmr.msra.gmra.mrb[32].mxu0 %vm3894_vm3, %v16509_v6  ;;  %v16560_v6 = vld [vmem:[%s21870_s12 + $0x220] sm:$0xff]  }
 0xa8e   :  { %14221 = vmatpush3.bf16.msra.mxu0 %v18588_v9  ;;  %14194 = vmatprep.mubr.msk.bf16.mxu0 %vm3894_vm3, %v16510_v4  ;;  %v16514_v9 = vld [vmem:[%s21870_s12 + $0xb0] sm:$0xff]   ;;  %v16561_v4 = vld [vmem:[%s21870_s12 + $0x228] sm:$0xff]  }
 0xa8f   :  { %14222 = vmatprep.subr.bf16.mxu0 %v18592_v18 }
 0xa92   :  { %14223 = vmatpush3.bf16.msra.mxu0 %v18592_v18  ;;  %v16517_v18 = vld [vmem:[%s21870_s12 + $0xc8] sm:$0xff]  }
 0xa93   :  { %14254 = vmatprep.subr.bf16.mxu0 %v18600_v61 }
 0xa95   :  { %14195 = vmatmul.mubr.msk.bf16.gmra.mrb[36].mxu0 %vm3894_vm3, %v16511_v5  ;;  %v16562_v5 = vld [vmem:[%s21870_s12 + $0x230] sm:$0xff]  }
 0xa96   :  { %14198 = vmatprep.mubr.msk.bf16.mxu0 %vm3894_vm3, %v16512_v11  ;;  %v16563_v11 = vld [vmem:[%s21870_s12 + $0x238] sm:$0xff]  }
 0xa9d   :  { %14199 = vmatmul.mubr.msk.bf16.gmra.mrb[40].mxu0 %vm3894_vm3, %v16513_v16  ;;  %v6448_v16 = vld [vmem:[#allocation10 + $0x20] sm:$0xff] }
 0xa9e   :  { %14202 = vmatprep.mubr.msk.bf16.mxu0 %vm3894_vm3, %v16514_v9  ;;  %v6449_v9 = vld [vmem:[#allocation10 + $0x28] sm:$0xff] }
 0xaa5   :  { %14203 = vmatmul.mubr.msk.bf16.gmra.mrb[44].mxu0 %vm3894_vm3, %v16515_v17  ;;  %v15443_v17 = vpack.c.bf16 %v6449_v9, %v6448_v16  ;;  %v6753_v16 = vld [vmem:[#allocation10 + $0x60] sm:$0xff]  ;;  %v6754_v9 = vld [vmem:[#allocation10 + $0x68] sm:$0xff] }
 0xaa6   :  { %14224 = vmatprep.mubr.msk.bf16.mxu0 %vm3894_vm3, %v16516_v10  ;;  %v6450_v10 = vld [vmem:[#allocation10 + $0x30] sm:$0xff] }
 0xaa7   :  { %15444 = vmatprep.subr.bf16.mxu1 %v15443_v17 }
 0xaa8   :  { %15446 = vmatpush3.bf16.msra.mxu1 %v15443_v17  ;;  %v15467_v17 = vpack.c.bf16 %v6754_v9, %v6753_v16  ;;  %v12466_v16 = vld [vmem:[%s21874_s16 + $0x90] sm:$0xff] }
 0xaad   :  { %14225 = vmatmul.mubr.msk.bf16.vlgmr.msra.gmra.mrb[32].mxu0 %vm3894_vm3, %v16517_v18  ;;  %v6451_v18 = vld [vmem:[#allocation10 + $0x38] sm:$0xff] }
 0xaae   :  { %14255 = vmatpush3.bf16.msra.mxu0 %v18600_v61  ;;  %14228 = vmatprep.mubr.msk.bf16.mxu0 %vm3894_vm3, %v16518_v21  ;;  %v16522_v61 = vld [vmem:[%s21870_s12 + $0xf0] sm:$0xff]   ;;  %v15447_v21 = vpack.c.bf16 %v6451_v18, %v6450_v10 }
 0xaaf   :  { %14256 = vmatprep.subr.bf16.mxu0 %v18604_v32  ;;  %v6755_v10 = vld [vmem:[#allocation10 + $0x70] sm:$0xff]  ;;  %v6756_v18 = vld [vmem:[#allocation10 + $0x78] sm:$0xff] }
 0xab0   :  { %15448 = vmatprep.subr.bf16.mxu1 %v15447_v21 }
 0xab1   :  { %15450 = vmatpush3.bf16.msra.mxu1 %v15447_v21 }
 0xab2   :  { %14257 = vmatpush3.bf16.msra.mxu0 %v18604_v32  ;;  %v16525_v32 = vld [vmem:[%s21870_s12 + $0x108] sm:$0xff]  }
 0xab3   :  { %14288 = vmatprep.subr.bf16.mxu0 %v18612_v37 }
 0xab5   :  { %14229 = vmatmul.mubr.msk.bf16.gmra.mrb[36].mxu0 %vm3894_vm3, %v16519_v1  ;;  %v6443_v1 = vld [vmem:[#allocation10] sm:$0xff] }
 0xab6   :  { %14232 = vmatprep.mubr.msk.bf16.mxu0 %vm3894_vm3, %v16520_v25  ;;  %v6444_v25 = vld [vmem:[#allocation10 + $0x8] sm:$0xff] }
 0xabd   :  { %14233 = vmatmul.mubr.msk.bf16.gmra.mrb[40].mxu0 %vm3894_vm3, %v16521_v59  ;;  %v15451_v59 = vpack.c.bf16 %v6444_v25, %v6443_v1 }
 0xabe   :  { %14236 = vmatprep.mubr.msk.bf16.mxu0 %vm3894_vm3, %v16522_v61  ;;  %v12568_v61 = vld [vmem:[%s21874_s16 + $0x200] sm:$0xff] }
 0xabf   :  { %15452 = vmatprep.subr.bf16.mxu1 %v15451_v59 }
 0xac5   :  { %14237 = vmatmul.mubr.msk.bf16.gmra.mrb[44].mxu0 %vm3894_vm3, %v16523_v29  ;;  %v12569_v29 = vld [vmem:[%s21874_s16 + $0x208] sm:$0xff] }
 0xac6   :  { %14258 = vmatprep.mubr.msk.bf16.mxu0 %vm3894_vm3, %v16524_v31  ;;  %v15611_v31 = vpack.c.bf16 %v12569_v29, %v12568_v61  ;;  %v6886_v29 = vld [vmem:[#allocation11] sm:$0xff] }
 0xacd   :  { %14259 = vmatmul.mubr.msk.bf16.vlgmr.msra.gmra.mrb[32].mxu0 %vm3894_vm3, %v16525_v32  ;;  %v12570_v32 = vld [vmem:[%s21874_s16 + $0x210] sm:$0xff] }
 0xace   :  { %14289 = vmatpush3.bf16.msra.mxu0 %v18612_v37  ;;  %14262 = vmatprep.mubr.msk.bf16.mxu0 %vm3894_vm3, %v16526_v14  ;;  %v16530_v37 = vld [vmem:[%s21870_s12 + $0x130] sm:$0xff]   ;;  %v12571_v14 = vld [vmem:[%s21874_s16 + $0x218] sm:$0xff] }
 0xacf   :  { %14290 = vmatprep.subr.bf16.mxu0 %v18616_v20 }
 0xad2   :  { %14291 = vmatpush3.bf16.msra.mxu0 %v18616_v20  ;;  %v16533_v20 = vld [vmem:[%s21870_s12 + $0x148] sm:$0xff]  }
 0xad3   :  { %14322 = vmatprep.subr.bf16.mxu0 %v18624_v54 }
 0xad5   :  { %14263 = vmatmul.mubr.msk.bf16.gmra.mrb[36].mxu0 %vm3894_vm3, %v16527_v7  ;;  %v15615_v7 = vpack.c.bf16 %v12571_v14, %v12570_v32  ;;  %v6888_v14 = vld [vmem:[#allocation11 + $0x10] sm:$0xff] }
 0xad6   :  { %14266 = vmatprep.mubr.msk.bf16.mxu0 %vm3894_vm3, %v16528_v34  ;;  %v12572_v34 = vld [vmem:[%s21874_s16 + $0x220] sm:$0xff] }
 0xadd   :  { %14267 = vmatmul.mubr.msk.bf16.gmra.mrb[40].mxu0 %vm3894_vm3, %v16529_v36  ;;  %v12573_v36 = vld [vmem:[%s21874_s16 + $0x228] sm:$0xff] }
 0xade   :  { %14270 = vmatprep.mubr.msk.bf16.mxu0 %vm3894_vm3, %v16530_v37  ;;  %v15619_v37 = vpack.c.bf16 %v12573_v36, %v12572_v34  ;;  %v7021_v36 = vld [vmem:[%s21874_s16] sm:$0xff] }
 0xae5   :  { %14271 = vmatmul.mubr.msk.bf16.gmra.mrb[44].mxu0 %vm3894_vm3, %v16531_v40  ;;  %v12574_v40 = vld [vmem:[%s21874_s16 + $0x230] sm:$0xff] }
 0xae6   :  { %14292 = vmatprep.mubr.msk.bf16.mxu0 %vm3894_vm3, %v16532_v41  ;;  %v12575_v41 = vld [vmem:[%s21874_s16 + $0x238] sm:$0xff] }
 0xaed   :  { %14293 = vmatmul.mubr.msk.bf16.vlgmr.msra.gmra.mrb[32].mxu0 %vm3894_vm3, %v16533_v20  ;;  %v15623_v20 = vpack.c.bf16 %v12575_v41, %v12574_v40  ;;  %v7023_v41 = vld [vmem:[%s21874_s16 + $0x10] sm:$0xff] }
 0xaee   :  { %14323 = vmatpush3.bf16.msra.mxu0 %v18624_v54  ;;  %14296 = vmatprep.mubr.msk.bf16.mxu0 %vm3894_vm3, %v16534_v19  ;;  %v16538_v54 = vld [vmem:[%s21870_s12 + $0x170] sm:$0xff]   ;;  %v12576_v19 = vld [vmem:[%s21874_s16 + $0x240] sm:$0xff] }
 0xaef   :  { %14324 = vmatprep.subr.bf16.mxu0 %v18628_v49 }
 0xaf2   :  { %14325 = vmatpush3.bf16.msra.mxu0 %v18628_v49  ;;  %v16541_v49 = vld [vmem:[%s21870_s12 + $0x188] sm:$0xff]  }
 0xaf3   :  { %14356 = vmatprep.subr.bf16.mxu0 %v18637_v52 }
 0xaf5   :  { %14297 = vmatmul.mubr.msk.bf16.gmra.mrb[36].mxu0 %vm3894_vm3, %v16535_v43  ;;  %v12577_v43 = vld [vmem:[%s21874_s16 + $0x248] sm:$0xff] }
 0xaf6   :  { %14300 = vmatprep.mubr.msk.bf16.mxu0 %vm3894_vm3, %v16536_v44  ;;  %v15627_v44 = vpack.c.bf16 %v12577_v43, %v12576_v19  ;;  %v7025_v43 = vld [vmem:[%s21874_s16 + $0x20] sm:$0xff] }
 0xafd   :  { %14301 = vmatmul.mubr.msk.bf16.gmra.mrb[40].mxu0 %vm3894_vm3, %v16537_v50  ;;  %v12578_v50 = vld [vmem:[%s21874_s16 + $0x250] sm:$0xff] }
 0xafe   :  { %14304 = vmatprep.mubr.msk.bf16.mxu0 %vm3894_vm3, %v16538_v54  ;;  %v12579_v54 = vld [vmem:[%s21874_s16 + $0x258] sm:$0xff] }
 0xb05   :  { %14305 = vmatmul.mubr.msk.bf16.gmra.mrb[44].mxu0 %vm3894_vm3, %v16539_v47  ;;  %v15631_v47 = vpack.c.bf16 %v12579_v54, %v12578_v50  ;;  %v7028_v54 = vld [vmem:[%s21874_s16 + $0x38] sm:$0xff] }
 0xb06   :  { %14326 = vmatprep.mubr.msk.bf16.mxu0 %vm3894_vm3, %v16540_v55  ;;  %v12580_v55 = vld [vmem:[%s21874_s16 + $0x260] sm:$0xff] }
 0xb0d   :  { %14327 = vmatmul.mubr.msk.bf16.vlgmr.msra.gmra.mrb[32].mxu0 %vm3894_vm3, %v16541_v49  ;;  %v12581_v49 = vld [vmem:[%s21874_s16 + $0x268] sm:$0xff] }
 0xb0e   :  { %14357 = vmatpush3.bf16.msra.mxu0 %v18637_v52  ;;  %14330 = vmatprep.mubr.msk.bf16.mxu0 %vm3894_vm3, %v16542_v56  ;;  %v16546_v52 = vld [vmem:[%s21870_s12 + $0x1b0] sm:$0xff]   ;;  %v15635_v56 = vpack.c.bf16 %v12581_v49, %v12580_v55 }
 0xb0f   :  { %14358 = vmatprep.subr.bf16.mxu0 %v18641_v60  ;;  %v7031_v49 = vld [vmem:[%s21874_s16 + $0x50] sm:$0xff] }
 0xb12   :  { %14359 = vmatpush3.bf16.msra.mxu0 %v18641_v60  ;;  %v16549_v60 = vld [vmem:[%s21870_s12 + $0x1c8] sm:$0xff]  }
 0xb13   :  { %14390 = vmatprep.subr.bf16.mxu0 %v18649_v63 }
 0xb15   :  { %14331 = vmatmul.mubr.msk.bf16.gmra.mrb[36].mxu0 %vm3894_vm3, %v16543_v57 }
 0xb16   :  { %14334 = vmatprep.mubr.msk.bf16.mxu0 %vm3894_vm3, %v16544_v15 }
 0xb1d   :  { %14335 = vmatmul.mubr.msk.bf16.gmra.mrb[40].mxu0 %vm3894_vm3, %v16545_v51 }
 0xb1e   :  { %14338 = vmatprep.mubr.msk.bf16.mxu0 %vm3894_vm3, %v16546_v52 }
 0xb25   :  { %14339 = vmatmul.mubr.msk.bf16.gmra.mrb[44].mxu0 %vm3894_vm3, %v16547_v23  ;;  %v6445_v23 = vld [vmem:[#allocation10 + $0x10] sm:$0xff] }
 0xb26   :  { %14360 = vmatprep.mubr.msk.bf16.mxu0 %vm3894_vm3, %v16548_v22  ;;  %v6446_v22 = vld [vmem:[#allocation10 + $0x18] sm:$0xff] }
 0xb2d   :  { %14361 = vmatmul.mubr.msk.bf16.vlgmr.msra.gmra.mrb[32].mxu0 %vm3894_vm3, %v16549_v60 }
 0xb2e   :  { %14391 = vmatpush3.bf16.msra.mxu0 %v18649_v63  ;;  %14364 = vmatprep.mubr.msk.bf16.mxu0 %vm3894_vm3, %v16550_v0  ;;  %v16554_v63 = vld [vmem:[%s21870_s12 + $0x1f0] sm:$0xff]  }
 0xb2f   :  { %14392 = vmatprep.subr.bf16.mxu0 %v18653_v3 }
 0xb32   :  { %14393 = vmatpush3.bf16.msra.mxu0 %v18653_v3  ;;  %v16557_v3 = vld [vmem:[%s21870_s12 + $0x208] sm:$0xff]  }
 0xb33   :  { %15612 = vmatprep.subr.bf16.mxu0 %v15611_v31 }
 0xb35   :  { %14365 = vmatmul.mubr.msk.bf16.gmra.mrb[36].mxu0 %vm3894_vm3, %v16551_v2 }
 0xb36   :  { %14368 = vmatprep.mubr.msk.bf16.mxu0 %vm3894_vm3, %v16552_v62  ;;  %v15455_v62 = vpack.c.bf16 %v6446_v22, %v6445_v23  ;;  %v7036_v23 = vld [vmem:[%s21874_s16 + $0x78] sm:$0xff]  ;;  %v12582_v22 = vld [vmem:[%s21874_s16 + $0x270] sm:$0xff] }
 0xb3d   :  { %14369 = vmatmul.mubr.msk.bf16.gmra.mrb[40].mxu0 %vm3894_vm3, %v16553_v48 }
 0xb3e   :  { %14372 = vmatprep.mubr.msk.bf16.mxu0 %vm3894_vm3, %v16554_v63  ;;  %v6647_v63 = vld [vmem:[#allocation10 + $0x40] sm:$0xff] }
 0xb45   :  { %14373 = vmatmul.mubr.msk.bf16.gmra.mrb[44].mxu0 %vm3894_vm3, %v16555_v12  ;;  %v6648_v12 = vld [vmem:[#allocation10 + $0x48] sm:$0xff] }
 0xb46   :  { %14394 = vmatprep.mubr.msk.bf16.mxu0 %vm3894_vm3, %v16556_v8  ;;  %v15459_v8 = vpack.c.bf16 %v6648_v12, %v6647_v63  ;;  %v12632_v63 = vld [vmem:[%s21874_s16 + $0x300] sm:$0xff] }
 0xb4d   :  { %14395 = vmatmul.mubr.msk.bf16.vlgmr.msra.gmra.mrb[32].mxu0 %vm3894_vm3, %v16557_v3  ;;  %v6649_v3 = vld [vmem:[#allocation10 + $0x50] sm:$0xff] }
 0xb4e   :  { %14398 = vmatprep.mubr.msk.bf16.mxu0 %vm3894_vm3, %v16558_v39  ;;  %15614 = vmatpush3.bf16.msra.mxu0 %v15611_v31  ;;  %v6650_v39 = vld [vmem:[#allocation10 + $0x58] sm:$0xff]  ;;  %v6887_v31 = vld [vmem:[#allocation11 + $0x8] sm:$0xff] }
 0xb4f   :  { %15616 = vmatprep.subr.bf16.mxu0 %v15615_v7  ;;  %v15475_v32 = vpack.c.bf16 %v6887_v31, %v6886_v29 }
 0xb52   :  { %15618 = vmatpush3.bf16.msra.mxu0 %v15615_v7  ;;  %v6889_v7 = vld [vmem:[#allocation11 + $0x18] sm:$0xff] }
 0xb53   :  { %15620 = vmatprep.subr.bf16.mxu0 %v15619_v37  ;;  %v15479_v34 = vpack.c.bf16 %v6889_v7, %v6888_v14 }
 0xb55   :  { %14399 = vmatmul.mubr.msk.bf16.gmra.mrb[36].mxu0 %vm3894_vm3, %v16559_v13 }
 0xb56   :  { %14402 = vmatprep.mubr.msk.bf16.mxu0 %vm3894_vm3, %v16560_v6  ;;  %15622 = vmatpush3.bf16.msra.mxu0 %v15619_v37  ;;  %v7022_v37 = vld [vmem:[%s21874_s16 + $0x8] sm:$0xff] }
 0xb57   :  { %15624 = vmatprep.subr.bf16.mxu0 %v15623_v20  ;;  %v15483_v40 = vpack.c.bf16 %v7022_v37, %v7021_v36  ;;  %v12468_v37 = vld [vmem:[%s21874_s16 + $0xa0] sm:$0xff] }
 0xb5a   :  { %15626 = vmatpush3.bf16.msra.mxu0 %v15623_v20  ;;  %v7024_v20 = vld [vmem:[%s21874_s16 + $0x18] sm:$0xff] }
 0xb5b   :  { %15628 = vmatprep.subr.bf16.mxu0 %v15627_v44  ;;  %v15487_v19 = vpack.c.bf16 %v7024_v20, %v7023_v41  ;;  %v12636_v20 = vld [vmem:[%s21874_s16 + $0x320] sm:$0xff] }
 0xb5d   :  { %14403 = vmatmul.mubr.msk.bf16.gmra.mrb[40].mxu0 %vm3894_vm3, %v16561_v4 }
 0xb5e   :  { %14406 = vmatprep.mubr.msk.bf16.mxu0 %vm3894_vm3, %v16562_v5  ;;  %15630 = vmatpush3.bf16.msra.mxu0 %v15627_v44  ;;  %v15463_v5 = vpack.c.bf16 %v6650_v39, %v6649_v3  ;;  %v7026_v44 = vld [vmem:[%s21874_s16 + $0x28] sm:$0xff]  ;;  %v6870_v39 = vpop.permute.xlu0 %6869 }
 0xb5f   :  { %15632 = vmatprep.subr.bf16.mxu0 %v15631_v47  ;;  %v15491_v50 = vpack.c.bf16 %v7026_v44, %v7025_v43 }
 0xb62   :  { %15634 = vmatpush3.bf16.msra.mxu0 %v15631_v47  ;;  %v7030_v47 = vld [vmem:[%s21874_s16 + $0x48] sm:$0xff] }
 0xb63   :  { %15636 = vmatprep.subr.bf16.mxu0 %v15635_v56 }
 0xb65   :  { %14407 = vmatmul.mubr.msk.bf16.gmra.mrb[44].mxu0 %vm3894_vm3, %v16563_v11 }
 0xb66   :  { %15638 = vmatpush3.bf16.msra.mxu0 %v15635_v56 }
 0xc20   :  { %v14396_v57 = vpop.f32.mrb[32].mxu0 }
 0xc21   :  { %v6364_v15 = vpop.f32.mrb[33].mxu0 }
 0xc22   :  { %v14397_v51 = vpop.f32.mrb[34].mxu0 }
 0xc23   :  { %v6367_v52 = vpop.f32.mrb[35].mxu0 }
 0xc28   :  { %v14400_v60 = vpop.f32.mrb[36].mxu0 }
 0xc29   :  { %v6380_v0 = vpop.f32.mrb[37].mxu0 }
 0xc2a   :  { %v14401_v2 = vpop.f32.mrb[38].mxu0  ;;  %14418 = vmatprep.mubr.msk.f32.mxu1 %vm3894_vm3, %v6380_v0  ;;  %v12583_v0 = vld [vmem:[%s21874_s16 + $0x278] sm:$0xff] }
 0xc2b   :  { %v6383_v48 = vpop.f32.mrb[39].mxu0 }
 0xc2c   :  { %14419 = vmatmul.mubr.msk.f32.vlgmr.msra.gmra.mrb[60].mxu1 %vm3894_vm3, %v6383_v48  ;;  %v12465_v48 = vld [vmem:[%s21874_s16 + $0x88] sm:$0xff] }
 0xc2d   :  { %14421 = vmatprep.mubr.msk.f32.mxu1 %vm3894_vm3, %v14400_v60  ;;  %15454 = vmatpush3.bf16.msra.mxu1 %v15451_v59  ;;  %v15471_v59 = vpack.c.bf16 %v6756_v18, %v6755_v10  ;;  %v12634_v10 = vld [vmem:[%s21874_s16 + $0x310] sm:$0xff]  ;;  %v12635_v18 = vld [vmem:[%s21874_s16 + $0x318] sm:$0xff] }
 0xc2e   :  { %15456 = vmatprep.subr.bf16.mxu1 %v15455_v62  ;;  %v15679_v7 = vpack.c.bf16 %v12635_v18, %v12634_v10  ;;  %v12664_v10 = vld [vmem:[%s21874_s16 + $0x380] sm:$0xff]  ;;  %v12665_v18 = vld [vmem:[%s21874_s16 + $0x388] sm:$0xff] }
 0xc30   :  { %v14404_v13 = vpop.f32.mrb[40].mxu0  ;;  %14422 = vmatmul.mubr.msk.f32.gmra.mrb[62].mxu1 %vm3894_vm3, %v14401_v2  ;;  %v15639_v2 = vpack.c.bf16 %v12583_v0, %v12582_v22  ;;  %v12475_v22 = vld [vmem:[%s21874_s16 + $0xd8] sm:$0xff] }
 0xc31   :  { %v6396_v6 = vpop.f32.mrb[41].mxu0  ;;  %15458 = vmatpush3.bf16.msra.mxu1 %v15455_v62  ;;  %14432 = vmatprep.mubr.msk.f32.mxu1 %vm3894_vm3, %v6364_v15  ;;  %v7034_v15 = vld [vmem:[%s21874_s16 + $0x68] sm:$0xff]  ;;  %v12464_v62 = vld [vmem:[%s21874_s16 + $0x80] sm:$0xff]  ;;  %v12643_v0 = vld [vmem:[%s21874_s16 + $0x358] sm:$0xff] }
 0xc32   :  { %v14405_v4 = vpop.f32.mrb[42].mxu0  ;;  %15460 = vmatprep.subr.bf16.mxu1 %v15459_v8  ;;  %15640 = vmatprep.subr.bf16.mxu0 %v15639_v2  ;;  %v15515_v12 = vpack.c.bf16 %v12465_v48, %v12464_v62  ;;  %v12476_v48 = vld [vmem:[%s21874_s16 + $0xe0] sm:$0xff] }
 0xc33   :  { %v6399_v11 = vpop.f32.mrb[43].mxu0  ;;  %15642 = vmatpush3.bf16.msra.mxu0 %v15639_v2 }
 0xc34   :  { %14433 = vmatmul.mubr.msk.f32.vlgmr.msra.gmra.mrb[60].mxu1 %vm3894_vm3, %v6367_v52  ;;  %v7035_v52 = vld [vmem:[%s21874_s16 + $0x70] sm:$0xff] }
 0xc35   :  { %14435 = vmatprep.mubr.msk.f32.mxu1 %vm3894_vm3, %v14396_v57  ;;  %15462 = vmatpush3.bf16.msra.mxu1 %v15459_v8  ;;  %v7033_v57 = vld [vmem:[%s21874_s16 + $0x60] sm:$0xff]  ;;  %v15511_v60 = vpack.c.bf16 %v7036_v23, %v7035_v52  ;;  %v12633_v8 = vld [vmem:[%s21874_s16 + $0x308] sm:$0xff]  ;;  %v12474_v23 = vld [vmem:[%s21874_s16 + $0xd0] sm:$0xff] }
 0xc36   :  { %15464 = vmatprep.subr.bf16.mxu1 %v15463_v5  ;;  %v15675_v3 = vpack.c.bf16 %v12633_v8, %v12632_v63  ;;  %v15535_v2 = vpack.c.bf16 %v12475_v22, %v12474_v23  ;;  %v12477_v63 = vld [vmem:[%s21874_s16 + $0xe8] sm:$0xff] }
 0xc37   :  { %v12645_v8 = vld [vmem:[%s21874_s16 + $0x368] sm:$0xff] }
 0xc38   :  { %v14408_v21 = vpop.f32.mrb[44].mxu0  ;;  %14436 = vmatmul.mubr.msk.f32.gmra.mrb[62].mxu1 %vm3894_vm3, %v14397_v51  ;;  %v15507_v51 = vpack.c.bf16 %v7034_v15, %v7033_v57  ;;  %15676 = vmatprep.subr.bf16.mxu0 %v15675_v3  ;;  %v12640_v57 = vld [vmem:[%s21874_s16 + $0x340] sm:$0xff]  ;;  %v12641_v15 = vld [vmem:[%s21874_s16 + $0x348] sm:$0xff] }
 0xc39   :  { %v6412_v1 = vpop.f32.mrb[45].mxu0  ;;  %15466 = vmatpush3.bf16.msra.mxu1 %v15463_v5  ;;  %14446 = vmatprep.mubr.msk.f32.mxu1 %vm3894_vm3, %v6396_v6  ;;  %v15691_v52 = vpack.c.bf16 %v12641_v15, %v12640_v57  ;;  %v12698_v57 = vld [vmem:[%s21874_s16 + $0x410] sm:$0xff]  ;;  %v12699_v15 = vld [vmem:[%s21874_s16 + $0x418] sm:$0xff]  ;;  %v12701_v23 = vld [vmem:[%s21874_s16 + $0x428] sm:$0xff] }
 0xc3a   :  { %v14409_v25 = vpop.f32.mrb[46].mxu0  ;;  %15468 = vmatprep.subr.bf16.mxu1 %v15467_v17 }
 0xc3b   :  { %v6415_v61 = vpop.f32.mrb[47].mxu0 }
 0xc3c   :  { %14447 = vmatmul.mubr.msk.f32.vlgmr.msra.gmra.mrb[60].mxu1 %vm3894_vm3, %v6399_v11 }
 0xc3d   :  { %14449 = vmatprep.mubr.msk.f32.mxu1 %vm3894_vm3, %v14404_v13  ;;  %15470 = vmatpush3.bf16.msra.mxu1 %v15467_v17  ;;  %v6865_v13 = vpop.permute.xlu1 %6864  ;;  %v12467_v17 = vld [vmem:[%s21874_s16 + $0x98] sm:$0xff] }
 0xc3e   :  { %15472 = vmatprep.subr.bf16.mxu1 %v15471_v59  ;;  %v15519_v14 = vpack.c.bf16 %v12467_v17, %v12466_v16  ;;  %v12647_v16 = vld [vmem:[%s21874_s16 + $0x378] sm:$0xff] }
 0xc40   :  { %14450 = vmatmul.mubr.msk.f32.gmra.mrb[62].mxu1 %vm3894_vm3, %v14405_v4 }
 0xc41   :  { %15474 = vmatpush3.bf16.msra.mxu1 %v15471_v59  ;;  %14460 = vmatprep.mubr.msk.f32.mxu1 %vm3894_vm3, %v6412_v1  ;;  %v6875_v59 = vpop.permute.xlu1 %6874 }
 0xc42   :  { %15476 = vmatprep.subr.bf16.mxu1 %v15475_v32 }
 0xc44   :  { %14461 = vmatmul.mubr.msk.f32.vlgmr.msra.gmra.mrb[60].mxu1 %vm3894_vm3, %v6415_v61 }
 0xc45   :  { %14463 = vmatprep.mubr.msk.f32.mxu1 %vm3894_vm3, %v14408_v21  ;;  %15478 = vmatpush3.bf16.msra.mxu1 %v15475_v32  ;;  %v6880_v21 = vpop.permute.xlu0 %6879 }
 0xc46   :  { %15480 = vmatprep.subr.bf16.mxu1 %v15479_v34 }
 0xc48   :  { %14464 = vmatmul.mubr.msk.f32.gmra.mrb[62].mxu1 %vm3894_vm3, %v14409_v25 }
 0xc49   :  { %15482 = vmatpush3.bf16.msra.mxu1 %v15479_v34  ;;  %14474 = vmatprep.mubr.msk.f32.mxu1 %vm3894_vm3, %v18394_v46  ;;  %v7027_v46 = vld [vmem:[%s21874_s16 + $0x30] sm:$0xff] }
 0xc4a   :  { %15484 = vmatprep.subr.bf16.mxu1 %v15483_v40 }
 0xc4c   :  { %14475 = vmatmul.mubr.msk.f32.vlgmr.msra.gmra.mrb[60].mxu1 %vm3894_vm3, %v18392_v45  ;;  %v15495_v45 = vpack.c.bf16 %v7028_v54, %v7027_v46  ;;  %v12470_v54 = vld [vmem:[%s21874_s16 + $0xb0] sm:$0xff] }
 0xc4d   :  { %14477 = vmatprep.mubr.msk.f32.mxu1 %vm3894_vm3, %v18411_v58  ;;  %15486 = vmatpush3.bf16.msra.mxu1 %v15483_v40  ;;  %v7029_v58 = vld [vmem:[%s21874_s16 + $0x40] sm:$0xff]  ;;  %v12469_v40 = vld [vmem:[%s21874_s16 + $0xa8] sm:$0xff] }
 0xc4e   :  { %15488 = vmatprep.subr.bf16.mxu1 %v15487_v19  ;;  %v15499_v55 = vpack.c.bf16 %v7030_v47, %v7029_v58  ;;  %v12638_v58 = vld [vmem:[%s21874_s16 + $0x330] sm:$0xff]  ;;  %v12639_v47 = vld [vmem:[%s21874_s16 + $0x338] sm:$0xff] }
 0xc50   :  { %14478 = vmatmul.mubr.msk.f32.gmra.mrb[62].mxu1 %vm3894_vm3, %v18406_v53  ;;  %v7032_v53 = vld [vmem:[%s21874_s16 + $0x58] sm:$0xff] }
 0xc51   :  { %15490 = vmatpush3.bf16.msra.mxu1 %v15487_v19  ;;  %v15503_v56 = vpack.c.bf16 %v7032_v53, %v7031_v49  ;;  %v12637_v19 = vld [vmem:[%s21874_s16 + $0x328] sm:$0xff]  ;;  %v15687_v53 = vpack.c.bf16 %v12639_v47, %v12638_v58  ;;  %v12678_v58 = vld [vmem:[%s21874_s16 + $0x3f0] sm:$0xff]  ;;  %v12679_v47 = vld [vmem:[%s21874_s16 + $0x3f8] sm:$0xff] }
 0xc52   :  { %15492 = vmatprep.subr.bf16.mxu1 %v15491_v50  ;;  %v15683_v46 = vpack.c.bf16 %v12637_v19, %v12636_v20  ;;  %v12674_v20 = vld [vmem:[%s21874_s16 + $0x3d0] sm:$0xff]  ;;  %v12675_v19 = vld [vmem:[%s21874_s16 + $0x3d8] sm:$0xff] }
 0xc55   :  { %15494 = vmatpush3.bf16.msra.mxu1 %v15491_v50  ;;  %v15523_v50 = vpack.c.bf16 %v12469_v40, %v12468_v37  ;;  %v12672_v37 = vld [vmem:[%s21874_s16 + $0x3c0] sm:$0xff]  ;;  %v12673_v40 = vld [vmem:[%s21874_s16 + $0x3c8] sm:$0xff] }
 0xc56   :  { %15496 = vmatprep.subr.bf16.mxu1 %v15495_v45 }
 0xc59   :  { %15498 = vmatpush3.bf16.msra.mxu1 %v15495_v45  ;;  %v12471_v45 = vld [vmem:[%s21874_s16 + $0xb8] sm:$0xff] }
 0xc5a   :  { %15500 = vmatprep.subr.bf16.mxu1 %v15499_v55  ;;  %v15527_v49 = vpack.c.bf16 %v12471_v45, %v12470_v54  ;;  %v12677_v54 = vld [vmem:[%s21874_s16 + $0x3e8] sm:$0xff] }
 0xc5d   :  { %15502 = vmatpush3.bf16.msra.mxu1 %v15499_v55  ;;  %v12472_v55 = vld [vmem:[%s21874_s16 + $0xc0] sm:$0xff] }
 0xc5e   :  { %15504 = vmatprep.subr.bf16.mxu1 %v15503_v56 }
 0xc61   :  { %15506 = vmatpush3.bf16.msra.mxu1 %v15503_v56  ;;  %v12473_v56 = vld [vmem:[%s21874_s16 + $0xc8] sm:$0xff] }
 0xc62   :  { %15508 = vmatprep.subr.bf16.mxu1 %v15507_v51 }
 0xc65   :  { %15510 = vmatpush3.bf16.msra.mxu1 %v15507_v51  ;;  %v15531_v51 = vpack.c.bf16 %v12473_v56, %v12472_v55  ;;  %v15735_v55 = vpack.c.bf16 %v12679_v47, %v12678_v58 }
 0xc66   :  { %15512 = vmatprep.subr.bf16.mxu1 %v15511_v60 }
 0xc69   :  { %15514 = vmatpush3.bf16.msra.mxu1 %v15511_v60  ;;  %v12642_v60 = vld [vmem:[%s21874_s16 + $0x350] sm:$0xff] }
 0xc6a   :  { %15516 = vmatprep.subr.bf16.mxu1 %v15515_v12  ;;  %v15695_v62 = vpack.c.bf16 %v12643_v0, %v12642_v60  ;;  %v12702_v60 = vld [vmem:[%s21874_s16 + $0x430] sm:$0xff]  ;;  %v12703_v0 = vld [vmem:[%s21874_s16 + $0x438] sm:$0xff] }
 0xd1f   :  { %v14476_v6 = vpop.f32.mrb[60].mxu1 }
 0xd20   :  { %v19038_v4 = vadd.f32 %v14476_v6, %v6870_v39  ;;  %v6968_v5 = vpop.f32.mrb[61].mxu1  ;;  %v12479_v6 = vld [vmem:[%s21874_s16 + $0xf8] sm:$0xff] }
 0xd21   :  { %v19040_v11 = vadd.f32 %v6968_v5, %v6865_v13  ;;  %v12478_v13 = vld [vmem:[%s21874_s16 + $0xf0] sm:$0xff] }
 0xd22   :  { %v7010_v9 = vmul.f32 0.01, %v19038_v4  ;;  %vm7004_vm9 = vcmp.ge.f32.partialorder %v19038_v4, 0.0  ;;  %v12646_v5 = vld [vmem:[%s21874_s16 + $0x370] sm:$0xff] }
 0xd23   :  { %vm7003_vm1 = vcmp.ge.f32.partialorder %v19040_v11, 0.0  ;;  %v7009_v1 = vmul.f32 0.01, %v19040_v11  ;;  %v14479_v25 = vpop.f32.mrb[62].mxu1  ;;  %v15703_v17 = vpack.c.bf16 %v12647_v16, %v12646_v5  ;;  %v12710_v5 = vld [vmem:[%s21874_s16 + $0x470] sm:$0xff]  ;;  %v12711_v16 = vld [vmem:[%s21874_s16 + $0x478] sm:$0xff] }
 0xd24   :  { %v16097_v61 = vadd.f32 %v14479_v25, %v6880_v21  ;;  %v6978_v29 = vpop.f32.mrb[63].mxu1  ;;  %v19062_v34 = vsel %vm7004_vm9, %v19038_v4, %v7010_v9  ;;  %v15543_v9 = vpack.c.bf16 %v12479_v6, %v12478_v13  ;;  %v15707_v21 = vpack.c.bf16 %v12665_v18, %v12664_v10  ;;  %v12667_v25 = vld [vmem:[%s21874_s16 + $0x398] sm:$0xff]  ;;  %v12709_v13 = vld [vmem:[%s21874_s16 + $0x468] sm:$0xff] }
 0xd25   :  { %v19059_v31 = vsel %vm7003_vm1, %v19040_v11, %v7009_v1  ;;  %v16098_v32 = vadd.f32 %v6978_v29, %v6875_v59  ;;  %v12666_v1 = vld [vmem:[%s21874_s16 + $0x390] sm:$0xff]  ;;  %v12669_v29 = vld [vmem:[%s21874_s16 + $0x3a8] sm:$0xff] }
 0xd26   :  { %v7012_v36 = vmul.f32 0.01, %v16097_v61  ;;  %14512 = vmatprep.mubr.f32.mxu1 %v19059_v31  ;;  %14732 = vmatprep.mubr.f32.mxu0 %v19059_v31  ;;  %vm7006_vm2 = vcmp.ge.f32.partialorder %v16097_v61, 0.0  ;;  %v15711_v59 = vpack.c.bf16 %v12667_v25, %v12666_v1 }
 0xd27   :  { %vm7005_vm4 = vcmp.ge.f32.partialorder %v16098_v32, 0.0  ;;  %v7011_v41 = vmul.f32 0.01, %v16098_v32  ;;  %14513 = vmatmul.mubr.f32.vlgmr.msra.gmra.mrb[64].mxu1 %v19062_v34  ;;  %14733 = vmatmul.mubr.f32.vlgmr.msra.gmra.mrb[48].mxu0 %v19062_v34 }
 0xd28   :  { %15518 = vmatpush3.bf16.msra.mxu1 %v15515_v12  ;;  %15678 = vmatpush3.bf16.msra.mxu0 %v15675_v3  ;;  %v19082_v44 = vsel %vm7006_vm2, %v16097_v61, %v7012_v36  ;;  %v12644_v12 = vld [vmem:[%s21874_s16 + $0x360] sm:$0xff]  ;;  %v15539_v3 = vpack.c.bf16 %v12477_v63, %v12476_v48  ;;  %v12705_v48 = vld [vmem:[%s21874_s16 + $0x448] sm:$0xff] }
 0xd29   :  { %v19080_v43 = vsel %vm7005_vm4, %v16098_v32, %v7011_v41  ;;  %15520 = vmatprep.subr.bf16.mxu1 %v15519_v14  ;;  %15680 = vmatprep.subr.bf16.mxu0 %v15679_v7  ;;  %v15699_v39 = vpack.c.bf16 %v12645_v8, %v12644_v12  ;;  %v12668_v61 = vld [vmem:[%s21874_s16 + $0x3a0] sm:$0xff]  ;;  %v15723_v41 = vpack.c.bf16 %v12673_v40, %v12672_v37  ;;  %v12706_v12 = vld [vmem:[%s21874_s16 + $0x450] sm:$0xff]  ;;  %v12707_v8 = vld [vmem:[%s21874_s16 + $0x458] sm:$0xff] }
 0xd2a   :  { %14515 = vmatprep.mubr.f32.mxu1 %v19080_v43  ;;  %14735 = vmatprep.mubr.f32.mxu0 %v19080_v43  ;;  %v15715_v32 = vpack.c.bf16 %v12669_v29, %v12668_v61 }
 0xd2b   :  { %14516 = vmatmul.mubr.f32.gmra.mrb[66].mxu1 %v19082_v44  ;;  %14736 = vmatmul.mubr.f32.gmra.mrb[50].mxu0 %v19082_v44 }
 0xd2c   :  { %15522 = vmatpush3.bf16.msra.mxu1 %v15519_v14  ;;  %15682 = vmatpush3.bf16.msra.mxu0 %v15679_v7  ;;  %v12670_v14 = vld [vmem:[%s21874_s16 + $0x3b0] sm:$0xff]  ;;  %v12671_v7 = vld [vmem:[%s21874_s16 + $0x3b8] sm:$0xff] }
 0xd2d   :  { %14518 = vmatprep.mubr.f32.mxu1 %v17837_v26  ;;  %14738 = vmatprep.mubr.f32.mxu0 %v17837_v26  ;;  %v15719_v36 = vpack.c.bf16 %v12671_v7, %v12670_v14 }
 0xd2e   :  { %15524 = vmatprep.subr.bf16.mxu1 %v15523_v50  ;;  %15684 = vmatprep.subr.bf16.mxu0 %v15683_v46 }
 0xd2f   :  { %14519 = vmatmul.mubr.f32.gmra.mrb[68].mxu1 %v17846_v30  ;;  %14739 = vmatmul.mubr.f32.gmra.mrb[52].mxu0 %v17846_v30 }
 0xd30   :  { %15526 = vmatpush3.bf16.msra.mxu1 %v15523_v50  ;;  %15686 = vmatpush3.bf16.msra.mxu0 %v15683_v46  ;;  %v15727_v50 = vpack.c.bf16 %v12675_v19, %v12674_v20  ;;  %v12676_v46 = vld [vmem:[%s21874_s16 + $0x3e0] sm:$0xff] }
 0xd31   :  { %14553 = vmatprep.mubr.f32.mxu1 %v19059_v31  ;;  %14842 = vmatprep.mubr.f32.mxu0 %v19059_v31  ;;  %v15731_v45 = vpack.c.bf16 %v12677_v54, %v12676_v46 }
 0xd32   :  { %15528 = vmatprep.subr.bf16.mxu1 %v15527_v49  ;;  %15688 = vmatprep.subr.bf16.mxu0 %v15687_v53 }
 0xd34   :  { %15530 = vmatpush3.bf16.msra.mxu1 %v15527_v49  ;;  %15690 = vmatpush3.bf16.msra.mxu0 %v15687_v53  ;;  %v12696_v49 = vld [vmem:[%s21874_s16 + $0x400] sm:$0xff]  ;;  %v12697_v53 = vld [vmem:[%s21874_s16 + $0x408] sm:$0xff] }
 0xd35   :  { %15532 = vmatprep.subr.bf16.mxu1 %v15531_v51  ;;  %15692 = vmatprep.subr.bf16.mxu0 %v15691_v52  ;;  %v15739_v56 = vpack.c.bf16 %v12697_v53, %v12696_v49 }
 0xd38   :  { %15534 = vmatpush3.bf16.msra.mxu1 %v15531_v51  ;;  %15694 = vmatpush3.bf16.msra.mxu0 %v15691_v52  ;;  %v15743_v51 = vpack.c.bf16 %v12699_v15, %v12698_v57  ;;  %v12700_v52 = vld [vmem:[%s21874_s16 + $0x420] sm:$0xff] }
 0xd39   :  { %15536 = vmatprep.subr.bf16.mxu1 %v15535_v2  ;;  %15696 = vmatprep.subr.bf16.mxu0 %v15695_v62  ;;  %v15747_v22 = vpack.c.bf16 %v12701_v23, %v12700_v52 }
 0xd3c   :  { %15538 = vmatpush3.bf16.msra.mxu1 %v15535_v2  ;;  %15698 = vmatpush3.bf16.msra.mxu0 %v15695_v62  ;;  %v15751_v2 = vpack.c.bf16 %v12703_v0, %v12702_v60  ;;  %v12704_v62 = vld [vmem:[%s21874_s16 + $0x440] sm:$0xff] }
 0xd3d   :  { %15540 = vmatprep.subr.bf16.mxu1 %v15539_v3  ;;  %15700 = vmatprep.subr.bf16.mxu0 %v15699_v39  ;;  %v15755_v63 = vpack.c.bf16 %v12705_v48, %v12704_v62  ;;  %v16565_v62 = vld [vmem:[%s21875_s17 + $0x28] sm:$0xff]   ;;  %v16566_v48 = vld [vmem:[%s21875_s17 + $0x30] sm:$0xff]  }
 0xd40   :  { %15542 = vmatpush3.bf16.msra.mxu1 %v15539_v3  ;;  %15702 = vmatpush3.bf16.msra.mxu0 %v15699_v39  ;;  %v15759_v3 = vpack.c.bf16 %v12707_v8, %v12706_v12  ;;  %v12708_v39 = vld [vmem:[%s21874_s16 + $0x460] sm:$0xff]  ;;  %v12505_v12 = vld [vmem:[%s21874_s16 + $0x108] sm:$0xff]  ;;  %v16567_v8 = vld [vmem:[%s21875_s17 + $0x38] sm:$0xff]  }
 0xd41   :  { %15544 = vmatprep.subr.bf16.mxu1 %v15543_v9  ;;  %15704 = vmatprep.subr.bf16.mxu0 %v15703_v17  ;;  %v15763_v6 = vpack.c.bf16 %v12709_v13, %v12708_v39  ;;  %v12506_v13 = vld [vmem:[%s21874_s16 + $0x110] sm:$0xff] }
 0xd44   :  { %15546 = vmatpush3.bf16.msra.mxu1 %v15543_v9  ;;  %15706 = vmatpush3.bf16.msra.mxu0 %v15703_v17  ;;  %v15767_v9 = vpack.c.bf16 %v12711_v16, %v12710_v5  ;;  %v16564_v17 = vld [vmem:[%s21875_s17 + $0x20] sm:$0xff]   ;;  %v16569_v5 = vld [vmem:[%s21875_s17 + $0x8] sm:$0xff]   ;;  %v16570_v16 = vld [vmem:[%s21875_s17 + $0x10] sm:$0xff]  }
 0xd45   :  { %15708 = vmatprep.subr.bf16.mxu0 %v15707_v21 }
 0xd47   :  { %14554 = vmatmul.mubr.f32.vlgmr.msra.gmra.mrb[70].mxu1 %v19062_v34  ;;  %14843 = vmatmul.mubr.f32.vlgmr.msra.gmra.mrb[54].mxu0 %v19062_v34 }
 0xd48   :  { %14556 = vmatprep.mubr.f32.mxu1 %v19080_v43  ;;  %14845 = vmatprep.mubr.f32.mxu0 %v19080_v43 }
 0xd49   :  { %15710 = vmatpush3.bf16.msra.mxu0 %v15707_v21 }
 0xd4a   :  { %15712 = vmatprep.subr.bf16.mxu0 %v15711_v59 }
 0xd4b   :  { %14557 = vmatmul.mubr.f32.gmra.mrb[72].mxu1 %v19082_v44  ;;  %14846 = vmatmul.mubr.f32.gmra.mrb[56].mxu0 %v19082_v44 }
 0xd4c   :  { %14559 = vmatprep.mubr.f32.mxu1 %v17837_v26  ;;  %14848 = vmatprep.mubr.f32.mxu0 %v17837_v26 }
 0xd4d   :  { %15714 = vmatpush3.bf16.msra.mxu0 %v15711_v59 }
 0xd4e   :  { %15716 = vmatprep.subr.bf16.mxu0 %v15715_v32 }
 0xd4f   :  { %14560 = vmatmul.mubr.f32.gmra.mrb[74].mxu1 %v17846_v30  ;;  %14849 = vmatmul.mubr.f32.gmra.mrb[58].mxu0 %v17846_v30 }
 0xd50   :  { %14897 = vmatprep.mubr.f32.mxu0 %v19059_v31  ;;  %14568 = vmatprep.mubr.msk.bf16.mxu1 %vm7287_vm5, %v16564_v17  ;;  %v12508_v17 = vld [vmem:[%s21874_s16 + $0x120] sm:$0xff] }
 0xd51   :  { %15718 = vmatpush3.bf16.msra.mxu0 %v15715_v32 }
 0xd52   :  { %15720 = vmatprep.subr.bf16.mxu0 %v15719_v36 }
 0xd55   :  { %15722 = vmatpush3.bf16.msra.mxu0 %v15719_v36 }
 0xd56   :  { %15724 = vmatprep.subr.bf16.mxu0 %v15723_v41 }
 0xd59   :  { %15726 = vmatpush3.bf16.msra.mxu0 %v15723_v41 }
 0xd5a   :  { %15728 = vmatprep.subr.bf16.mxu0 %v15727_v50 }
 0xd5d   :  { %15730 = vmatpush3.bf16.msra.mxu0 %v15727_v50 }
 0xd5e   :  { %15732 = vmatprep.subr.bf16.mxu0 %v15731_v45 }
 0xd61   :  { %15734 = vmatpush3.bf16.msra.mxu0 %v15731_v45 }
 0xd62   :  { %15736 = vmatprep.subr.bf16.mxu0 %v15735_v55 }
 0xd65   :  { %15738 = vmatpush3.bf16.msra.mxu0 %v15735_v55 }
 0xd66   :  { %15740 = vmatprep.subr.bf16.mxu0 %v15739_v56 }
 0xd68   :  { %14898 = vmatmul.mubr.f32.vlgmr.msra.gmra.mrb[60].mxu0 %v19062_v34 }
 0xd69   :  { %14900 = vmatprep.mubr.f32.mxu0 %v19080_v43  ;;  %15742 = vmatpush3.bf16.msra.mxu0 %v15739_v56 }
 0xd6a   :  { %15744 = vmatprep.subr.bf16.mxu0 %v15743_v51 }
 0xd6c   :  { %14901 = vmatmul.mubr.f32.gmra.mrb[62].mxu0 %v19082_v44 }
 0xd6d   :  { %14903 = vmatprep.mubr.f32.mxu0 %v17837_v26  ;;  %15746 = vmatpush3.bf16.msra.mxu0 %v15743_v51 }
 0xd6e   :  { %15748 = vmatprep.subr.bf16.mxu0 %v15747_v22 }
 0xd70   :  { %14904 = vmatmul.mubr.f32.gmra.mrb[64].mxu0 %v17846_v30 }
 0xd71   :  { %15750 = vmatpush3.bf16.msra.mxu0 %v15747_v22  ;;  %14952 = vmatprep.mubr.f32.mxu0 %v19059_v31 }
 0xd72   :  { %15752 = vmatprep.subr.bf16.mxu0 %v15751_v2 }
 0xd75   :  { %15754 = vmatpush3.bf16.msra.mxu0 %v15751_v2 }
 0xd76   :  { %15756 = vmatprep.subr.bf16.mxu0 %v15755_v63 }
 0xd79   :  { %15758 = vmatpush3.bf16.msra.mxu0 %v15755_v63  ;;  %v12504_v63 = vld [vmem:[%s21874_s16 + $0x100] sm:$0xff] }
 0xd7a   :  { %15760 = vmatprep.subr.bf16.mxu0 %v15759_v3  ;;  %v15547_v39 = vpack.c.bf16 %v12505_v12, %v12504_v63 }
 0xd7d   :  { %15762 = vmatpush3.bf16.msra.mxu0 %v15759_v3  ;;  %v16568_v3 = vld [vmem:[%s21875_s17] sm:$0xff]  }
 0xd7e   :  { %15764 = vmatprep.subr.bf16.mxu0 %v15763_v6 }
 0xd81   :  { %15766 = vmatpush3.bf16.msra.mxu0 %v15763_v6  ;;  %v12507_v6 = vld [vmem:[%s21874_s16 + $0x118] sm:$0xff] }
 0xd82   :  { %15768 = vmatprep.subr.bf16.mxu0 %v15767_v9 }
 0xd85   :  { %15770 = vmatpush3.bf16.msra.mxu0 %v15767_v9  ;;  %v15551_v9 = vpack.c.bf16 %v12507_v6, %v12506_v13 }
 0xd88   :  { %14953 = vmatmul.mubr.f32.vlgmr.msra.gmra.mrb[66].mxu0 %v19062_v34 }
 0xd89   :  { %14955 = vmatprep.mubr.f32.mxu0 %v19080_v43 }
 0xd8c   :  { %14956 = vmatmul.mubr.f32.gmra.mrb[68].mxu0 %v19082_v44 }
 0xd8d   :  { %14958 = vmatprep.mubr.f32.mxu0 %v17837_v26 }
 0xd90   :  { %14959 = vmatmul.mubr.f32.gmra.mrb[70].mxu0 %v17846_v30 }
 0xd91   :  { %9335 = vmatprep.mubr.f32.mxu0 %v16831_v35 }
 0xdfa   :  { %v14514_v10 = vpop.f32.mrb[64].mxu1  ;;  %v14734_v18 = vpop.f32.mrb[48].mxu0 }
 0xdfb   :  { %v7103_v21 = vpop.f32.mrb[65].mxu1  ;;  %v8003_v1 = vpop.f32.mrb[49].mxu0 }
 0xdfc   :  { %v7140_v25 = vpack.c.bf16 %v14514_v10, %v7103_v21  ;;  %v19277_v59 = vpack.c.bf16 %v14734_v18, %v8003_v1  ;;  %v12509_v10 = vld [vmem:[%s21874_s16 + $0x128] sm:$0xff] }
 0xdfd   :  { %v15555_v1 = vpack.c.bf16 %v12509_v10, %v12508_v17  ;;  %v12536_v10 = vld [vmem:[%s21874_s16 + $0x180] sm:$0xff] }
 0xdfe   :  { %v14517_v61 = vpop.f32.mrb[66].mxu1  ;;  %v14737_v29 = vpop.f32.mrb[50].mxu0 }
 0xdff   :  { %v7113_v32 = vpop.f32.mrb[67].mxu1  ;;  %v8013_v14 = vpop.f32.mrb[51].mxu0 }
 0xe00   :  { %v7141_v7 = vpack.c.bf16 %v14517_v61, %v7113_v32  ;;  %v19279_v36 = vpack.c.bf16 %v14737_v29, %v8013_v14  ;;  %v12510_v61 = vld [vmem:[%s21874_s16 + $0x130] sm:$0xff]  ;;  %v12511_v29 = vld [vmem:[%s21874_s16 + $0x138] sm:$0xff] }
 0xe01   :  { %v16571_v32 = vld [vmem:[%s21875_s17 + $0x18] sm:$0xff]  }
 0xe02   :  { %v14520_v37 = vpop.f32.mrb[68].mxu1  ;;  %v14740_v40 = vpop.f32.mrb[52].mxu0 }
 0xe03   :  { %v7123_v41 = vpop.f32.mrb[69].mxu1  ;;  %v8023_v20 = vpop.f32.mrb[53].mxu0 }
 0xe04   :  { %v7142_v19 = vpack.c.bf16 %v14520_v37, %v7123_v41  ;;  %v19281_v50 = vpack.c.bf16 %v14740_v40, %v8023_v20  ;;  %v15559_v37 = vpack.c.bf16 %v12511_v29, %v12510_v61  ;;  %v12512_v41 = vld [vmem:[%s21874_s16 + $0x140] sm:$0xff]  ;;  %v12513_v20 = vld [vmem:[%s21874_s16 + $0x148] sm:$0xff] }
 0xe1a   :  { %v14555_v46 = vpop.f32.mrb[70].mxu1  ;;  %v14844_v54 = vpop.f32.mrb[54].mxu0 }
 0xe1b   :  { %v7226_v45 = vpop.f32.mrb[71].mxu1  ;;  %v8461_v58 = vpop.f32.mrb[55].mxu0 }
 0xe1c   :  { %v7264_v47 = vpack.c.bf16 %v14555_v46, %v7226_v45  ;;  %v19283_v55 = vpack.c.bf16 %v14844_v54, %v8461_v58  ;;  %v15563_v54 = vpack.c.bf16 %v12513_v20, %v12512_v41  ;;  %v12514_v58 = vld [vmem:[%s21874_s16 + $0x150] sm:$0xff]  ;;  %v12540_v20 = vld [vmem:[%s21874_s16 + $0x1a0] sm:$0xff] }
 0xe1e   :  { %v14558_v49 = vpop.f32.mrb[72].mxu1  ;;  %14562 = vmatprep.subr.bf16.mxu1 %v7264_v47  ;;  %v14847_v53 = vpop.f32.mrb[56].mxu0 }
 0xe1f   :  { %v7236_v56 = vpop.f32.mrb[73].mxu1  ;;  %14563 = vmatpush3.bf16.msra.mxu1 %v7264_v47  ;;  %v8471_v57 = vpop.f32.mrb[57].mxu0  ;;  %v12515_v47 = vld [vmem:[%s21874_s16 + $0x158] sm:$0xff] }
 0xe20   :  { %v7265_v15 = vpack.c.bf16 %v14558_v49, %v7236_v56  ;;  %v19285_v51 = vpack.c.bf16 %v14847_v53, %v8471_v57  ;;  %v15567_v49 = vpack.c.bf16 %v12515_v47, %v12514_v58  ;;  %v12516_v53 = vld [vmem:[%s21874_s16 + $0x160] sm:$0xff]  ;;  %v12517_v56 = vld [vmem:[%s21874_s16 + $0x168] sm:$0xff]  ;;  %v12543_v58 = vld [vmem:[%s21874_s16 + $0x1b8] sm:$0xff] }
 0xe21   :  { %v15571_v57 = vpack.c.bf16 %v12517_v56, %v12516_v53  ;;  %v16575_v47 = vld [vmem:[%s21875_s17 + $0x58] sm:$0xff]   ;;  %v12544_v53 = vld [vmem:[%s21874_s16 + $0x1c0] sm:$0xff]  ;;  %v12545_v56 = vld [vmem:[%s21874_s16 + $0x1c8] sm:$0xff] }
 0xe22   :  { %v14561_v52 = vpop.f32.mrb[74].mxu1  ;;  %14564 = vmatprep.subr.bf16.mxu1 %v7265_v15  ;;  %v14850_v23 = vpop.f32.mrb[58].mxu0 }
 0xe23   :  { %v7246_v22 = vpop.f32.mrb[75].mxu1  ;;  %14565 = vmatpush3.bf16.msra.mxu1 %v7265_v15  ;;  %v8481_v60 = vpop.f32.mrb[59].mxu0  ;;  %v12518_v15 = vld [vmem:[%s21874_s16 + $0x170] sm:$0xff] }
 0xe24   :  { %v7266_v0 = vpack.c.bf16 %v14561_v52, %v7246_v22  ;;  %v19287_v2 = vpack.c.bf16 %v14850_v23, %v8481_v60  ;;  %v12519_v52 = vld [vmem:[%s21874_s16 + $0x178] sm:$0xff] }
 0xe25   :  { %v15575_v23 = vpack.c.bf16 %v12519_v52, %v12518_v15  ;;  %v12546_v15 = vld [vmem:[%s21874_s16 + $0x1d0] sm:$0xff]  ;;  %v12547_v52 = vld [vmem:[%s21874_s16 + $0x1d8] sm:$0xff] }
 0xe26   :  { %14566 = vmatprep.subr.bf16.mxu1 %v7266_v0 }
 0xe27   :  { %14567 = vmatpush3.bf16.msra.mxu1 %v7266_v0 }
 0xe28   :  { %14576 = vmatprep.subr.bf16.mxu1 %v7140_v25 }
 0xe2a   :  { %14569 = vmatmul.mubr.msk.bf16.vlgmr.msra.gmra.mrb[76].mxu1 %vm7287_vm5, %v16565_v62 }
 0xe2b   :  { %14577 = vmatpush3.bf16.msra.mxu1 %v7140_v25  ;;  %14572 = vmatprep.mubr.msk.bf16.mxu1 %vm7287_vm5, %v16566_v48 }
 0xe2c   :  { %14578 = vmatprep.subr.bf16.mxu1 %v7141_v7 }
 0xe2f   :  { %14579 = vmatpush3.bf16.msra.mxu1 %v7141_v7 }
 0xe30   :  { %14580 = vmatprep.subr.bf16.mxu1 %v7142_v19 }
 0xe32   :  { %14573 = vmatmul.mubr.msk.bf16.gmra.mrb[80].mxu1 %vm7287_vm5, %v16567_v8 }
 0xe33   :  { %14581 = vmatpush3.bf16.msra.mxu1 %v7142_v19  ;;  %14582 = vmatprep.mubr.msk.bf16.mxu1 %vm7287_vm5, %v16568_v3 }
 0xe34   :  { %15548 = vmatprep.subr.bf16.mxu1 %v15547_v39 }
 0xe3a   :  { %14583 = vmatmul.mubr.msk.bf16.vlgmr.msra.gmra.mrb[76].mxu1 %vm7287_vm5, %v16569_v5 }
 0xe3b   :  { %15550 = vmatpush3.bf16.msra.mxu1 %v15547_v39  ;;  %v14899_v18 = vpop.f32.mrb[60].mxu0  ;;  %14586 = vmatprep.mubr.msk.bf16.mxu1 %vm7287_vm5, %v16570_v16  ;;  %v16572_v39 = vld [vmem:[%s21875_s17 + $0x40] sm:$0xff]  }
 0xe3c   :  { %v8690_v21 = vpop.f32.mrb[61].mxu0  ;;  %15552 = vmatprep.subr.bf16.mxu1 %v15551_v9 }
 0xe3d   :  { %v19331_v25 = vpack.c.bf16 %v14899_v18, %v8690_v21  ;;  %v12537_v18 = vld [vmem:[%s21874_s16 + $0x188] sm:$0xff] }
 0xe3e   :  { %v15579_v29 = vpack.c.bf16 %v12537_v18, %v12536_v10 }
 0xe3f   :  { %15554 = vmatpush3.bf16.msra.mxu1 %v15551_v9  ;;  %v14902_v14 = vpop.f32.mrb[62].mxu0 }
 0xe40   :  { %v8700_v7 = vpop.f32.mrb[63].mxu0  ;;  %15556 = vmatprep.subr.bf16.mxu1 %v15555_v1 }
 0xe41   :  { %v19342_v40 = vpack.c.bf16 %v14902_v14, %v8700_v7  ;;  %v12539_v14 = vld [vmem:[%s21874_s16 + $0x198] sm:$0xff]  ;;  %v16573_v7 = vld [vmem:[%s21875_s17 + $0x48] sm:$0xff]  }
 0xe42   :  { %14587 = vmatmul.mubr.msk.bf16.gmra.mrb[80].mxu1 %vm7287_vm5, %v16571_v32  ;;  %v12538_v32 = vld [vmem:[%s21874_s16 + $0x190] sm:$0xff] }
 0xe43   :  { %15558 = vmatpush3.bf16.msra.mxu1 %v15555_v1  ;;  %v14905_v19 = vpop.f32.mrb[64].mxu0  ;;  %14622 = vmatprep.mubr.f32.mxu1 %v19059_v31  ;;  %v15583_v41 = vpack.c.bf16 %v12539_v14, %v12538_v32  ;;  %v12601_v32 = vld [vmem:[%s21874_s16 + $0x288] sm:$0xff]  ;;  %v16579_v14 = vld [vmem:[%s21875_s17 + $0x78] sm:$0xff]  }
 0xe44   :  { %v8710_v46 = vpop.f32.mrb[65].mxu0  ;;  %15560 = vmatprep.subr.bf16.mxu1 %v15559_v37 }
 0xe45   :  { %v19352_v45 = vpack.c.bf16 %v14905_v19, %v8710_v46  ;;  %v12541_v19 = vld [vmem:[%s21874_s16 + $0x1a8] sm:$0xff] }
 0xe46   :  { %v15587_v46 = vpack.c.bf16 %v12541_v19, %v12540_v20  ;;  %v16582_v20 = vld [vmem:[%s21875_s17 + $0x90] sm:$0xff]   ;;  %v12604_v19 = vld [vmem:[%s21874_s16 + $0x2a0] sm:$0xff] }
 0xe47   :  { %15562 = vmatpush3.bf16.msra.mxu1 %v15559_v37  ;;  %v16574_v37 = vld [vmem:[%s21875_s17 + $0x50] sm:$0xff]  }
 0xe48   :  { %15564 = vmatprep.subr.bf16.mxu1 %v15563_v54 }
 0xe4b   :  { %15566 = vmatpush3.bf16.msra.mxu1 %v15563_v54  ;;  %v12542_v54 = vld [vmem:[%s21874_s16 + $0x1b0] sm:$0xff] }
 0xe4c   :  { %15568 = vmatprep.subr.bf16.mxu1 %v15567_v49 }
 0xe4f   :  { %15570 = vmatpush3.bf16.msra.mxu1 %v15567_v49  ;;  %v15591_v49 = vpack.c.bf16 %v12543_v58, %v12542_v54  ;;  %v12606_v58 = vld [vmem:[%s21874_s16 + $0x2b0] sm:$0xff] }
 0xe50   :  { %15572 = vmatprep.subr.bf16.mxu1 %v15571_v57 }
 0xe53   :  { %15574 = vmatpush3.bf16.msra.mxu1 %v15571_v57  ;;  %v15595_v57 = vpack.c.bf16 %v12545_v56, %v12544_v53  ;;  %v12608_v56 = vld [vmem:[%s21874_s16 + $0x2c0] sm:$0xff] }
 0xe54   :  { %15576 = vmatprep.subr.bf16.mxu1 %v15575_v23 }
 0xe57   :  { %15578 = vmatpush3.bf16.msra.mxu1 %v15575_v23  ;;  %v15599_v23 = vpack.c.bf16 %v12547_v52, %v12546_v15  ;;  %v12610_v52 = vld [vmem:[%s21874_s16 + $0x2d0] sm:$0xff] }
 0xe5a   :  { %14623 = vmatmul.mubr.f32.vlgmr.msra.gmra.mrb[84].mxu1 %v19062_v34 }
 0xe5b   :  { %14625 = vmatprep.mubr.f32.mxu1 %v19080_v43  ;;  %v14954_v22 = vpop.f32.mrb[66].mxu0 }
 0xe5c   :  { %v8919_v60 = vpop.f32.mrb[67].mxu0 }
 0xe5d   :  { %v19374_v0 = vpack.c.bf16 %v14954_v22, %v8919_v60  ;;  %v12548_v22 = vld [vmem:[%s21874_s16 + $0x1e0] sm:$0xff]  ;;  %v12549_v60 = vld [vmem:[%s21874_s16 + $0x1e8] sm:$0xff] }
 0xe5e   :  { %14626 = vmatmul.mubr.f32.gmra.mrb[86].mxu1 %v19082_v44 }
 0xe5f   :  { %14628 = vmatprep.mubr.f32.mxu1 %v17837_v26  ;;  %v14957_v62 = vpop.f32.mrb[68].mxu0 }
 0xe60   :  { %v8929_v48 = vpop.f32.mrb[69].mxu0 }
 0xe61   :  { %v19378_v63 = vpack.c.bf16 %v14957_v62, %v8929_v48  ;;  %v15603_v62 = vpack.c.bf16 %v12549_v60, %v12548_v22  ;;  %v12550_v48 = vld [vmem:[%s21874_s16 + $0x1f0] sm:$0xff]  ;;  %v12612_v60 = vld [vmem:[%s21874_s16 + $0x2e0] sm:$0xff] }
 0xe62   :  { %14629 = vmatmul.mubr.f32.gmra.mrb[88].mxu1 %v17846_v30 }
 0xe63   :  { %v14960_v12 = vpop.f32.mrb[70].mxu0  ;;  %14637 = vmatprep.mubr.msk.bf16.mxu1 %vm7287_vm5, %v16572_v39  ;;  %v16576_v39 = vld [vmem:[%s21875_s17 + $0x60] sm:$0xff]  }
 0xe64   :  { %v8939_v8 = vpop.f32.mrb[71].mxu0 }
 0xe65   :  { %v19381_v3 = vpack.c.bf16 %v14960_v12, %v8939_v8  ;;  %v12551_v12 = vld [vmem:[%s21874_s16 + $0x1f8] sm:$0xff] }
 0xe66   :  { %v15607_v8 = vpack.c.bf16 %v12551_v12, %v12550_v48  ;;  %v12614_v48 = vld [vmem:[%s21874_s16 + $0x2f0] sm:$0xff]  ;;  %v12615_v12 = vld [vmem:[%s21874_s16 + $0x2f8] sm:$0xff] }
 0xf2d   :  { %v14624_v13 = vpop.f32.mrb[84].mxu1 }
 0xf2e   :  { %v7545_v6 = vpop.f32.mrb[85].mxu1 }
 0xf2f   :  { %v7583_v5 = vpack.c.bf16 %v14624_v13, %v7545_v6 }
 0xf31   :  { %v14627_v16 = vpop.f32.mrb[86].mxu1  ;;  %14631 = vmatprep.subr.bf16.mxu1 %v7583_v5 }
 0xf32   :  { %v7555_v9 = vpop.f32.mrb[87].mxu1  ;;  %14632 = vmatpush3.bf16.msra.mxu1 %v7583_v5 }
 0xf33   :  { %v7584_v17 = vpack.c.bf16 %v14627_v16, %v7555_v9 }
 0xf35   :  { %v14630_v21 = vpop.f32.mrb[88].mxu1  ;;  %14633 = vmatprep.subr.bf16.mxu1 %v7584_v17 }
 0xf36   :  { %v7565_v1 = vpop.f32.mrb[89].mxu1  ;;  %14634 = vmatpush3.bf16.msra.mxu1 %v7584_v17 }
 0xf37   :  { %v7585_v61 = vpack.c.bf16 %v14630_v21, %v7565_v1  ;;  %v16577_v1 = vld [vmem:[%s21875_s17 + $0x68] sm:$0xff]  }
 0xf39   :  { %14635 = vmatprep.subr.bf16.mxu1 %v7585_v61 }
 0xf3a   :  { %14636 = vmatpush3.bf16.msra.mxu1 %v7585_v61  ;;  %v16578_v61 = vld [vmem:[%s21875_s17 + $0x70] sm:$0xff]  }
 0xf3b   :  { %15580 = vmatprep.subr.bf16.mxu1 %v15579_v29 }
 0xf3d   :  { %14638 = vmatmul.mubr.msk.bf16.vlgmr.msra.gmra.mrb[76].mxu1 %vm7287_vm5, %v16573_v7 }
 0xf3e   :  { %15582 = vmatpush3.bf16.msra.mxu1 %v15579_v29  ;;  %14641 = vmatprep.mubr.msk.bf16.mxu1 %vm7287_vm5, %v16574_v37  ;;  %v12600_v29 = vld [vmem:[%s21874_s16 + $0x280] sm:$0xff]  ;;  %v12602_v37 = vld [vmem:[%s21874_s16 + $0x290] sm:$0xff] }
 0xf3f   :  { %15584 = vmatprep.subr.bf16.mxu1 %v15583_v41  ;;  %v15643_v7 = vpack.c.bf16 %v12601_v32, %v12600_v29  ;;  %v12750_v29 = vld [vmem:[%s22016_s5 + $0x2b0] sm:$0xff]  ;;  %v12755_v32 = vld [vmem:[%s22016_s5 + $0x2d8] sm:$0xff] }
 0xf42   :  { %15586 = vmatpush3.bf16.msra.mxu1 %v15583_v41  ;;  %v16581_v41 = vld [vmem:[%s21875_s17 + $0x88] sm:$0xff]  }
 0xf43   :  { %15588 = vmatprep.subr.bf16.mxu1 %v15587_v46 }
 0xf45   :  { %14642 = vmatmul.mubr.msk.bf16.gmra.mrb[80].mxu1 %vm7287_vm5, %v16575_v47  ;;  %v12607_v47 = vld [vmem:[%s21874_s16 + $0x2b8] sm:$0xff] }
 0xf46   :  { %15590 = vmatpush3.bf16.msra.mxu1 %v15587_v46  ;;  %14677 = vmatprep.mubr.f32.mxu1 %v19059_v31  ;;  %v12605_v46 = vld [vmem:[%s21874_s16 + $0x2a8] sm:$0xff]  ;;  %v15655_v53 = vpack.c.bf16 %v12607_v47, %v12606_v58  ;;  %v12771_v58 = vld [vmem:[%s22016_s5 + $0x358] sm:$0xff] }
 0xf47   :  { %15592 = vmatprep.subr.bf16.mxu1 %v15591_v49  ;;  %v15651_v54 = vpack.c.bf16 %v12605_v46, %v12604_v19  ;;  %v12762_v46 = vld [vmem:[%s22016_s5 + $0x310] sm:$0xff]  ;;  %v12775_v47 = vld [vmem:[%s22016_s5 + $0x378] sm:$0xff] }
 0xf4a   :  { %15594 = vmatpush3.bf16.msra.mxu1 %v15591_v49  ;;  %v16583_v49 = vld [vmem:[%s21875_s17 + $0x98] sm:$0xff]  }
 0xf4b   :  { %15596 = vmatprep.subr.bf16.mxu1 %v15595_v57 }
 0xf4e   :  { %15598 = vmatpush3.bf16.msra.mxu1 %v15595_v57  ;;  %v12609_v57 = vld [vmem:[%s21874_s16 + $0x2c8] sm:$0xff] }
 0xf4f   :  { %15600 = vmatprep.subr.bf16.mxu1 %v15599_v23  ;;  %v15659_v15 = vpack.c.bf16 %v12609_v57, %v12608_v56  ;;  %v12770_v56 = vld [vmem:[%s22016_s5 + $0x350] sm:$0xff] }
 0xf50   :  { %v12774_v57 = vld [vmem:[%s22016_s5 + $0x370] sm:$0xff] }
 0xf52   :  { %15602 = vmatpush3.bf16.msra.mxu1 %v15599_v23  ;;  %v12611_v23 = vld [vmem:[%s21874_s16 + $0x2d8] sm:$0xff] }
 0xf53   :  { %15604 = vmatprep.subr.bf16.mxu1 %v15603_v62  ;;  %v15663_v22 = vpack.c.bf16 %v12611_v23, %v12610_v52  ;;  %v12783_v52 = vld [vmem:[%s22016_s5 + $0x3b8] sm:$0xff]  ;;  %v15825_v23 = vpack.c.bf16 %v12774_v57, %v12770_v56  ;;  %v12753_v56 = vld [vmem:[%s22016_s5 + $0x2c8] sm:$0xff] }
 0xf54   :  { %v12757_v57 = vld [vmem:[%s22016_s5 + $0x2e8] sm:$0xff] }
 0xf56   :  { %15606 = vmatpush3.bf16.msra.mxu1 %v15603_v62 }
 0xf57   :  { %15608 = vmatprep.subr.bf16.mxu1 %v15607_v8 }
 0xf5a   :  { %15610 = vmatpush3.bf16.msra.mxu1 %v15607_v8  ;;  %v15671_v8 = vpack.c.bf16 %v12615_v12, %v12614_v48  ;;  %v12791_v48 = vld [vmem:[%s22016_s5 + $0x3f8] sm:$0xff] }
 0xf5d   :  { %14678 = vmatmul.mubr.f32.vlgmr.msra.gmra.mrb[90].mxu1 %v19062_v34 }
 0xf5e   :  { %14680 = vmatprep.mubr.f32.mxu1 %v19080_v43 }
 0xf61   :  { %14681 = vmatmul.mubr.f32.gmra.mrb[92].mxu1 %v19082_v44 }
 0xf62   :  { %14683 = vmatprep.mubr.f32.mxu1 %v17837_v26 }
 0xf65   :  { %14684 = vmatmul.mubr.f32.gmra.mrb[94].mxu1 %v17846_v30 }
 0xf66   :  { %14692 = vmatprep.mubr.msk.bf16.mxu1 %vm7287_vm5, %v16576_v39  ;;  %v16584_v39 = vld [vmem:[%s21875_s17 + $0xa0] sm:$0xff]  }
0x1030   :  { %v14679_v13 = vpop.f32.mrb[90].mxu1 }
0x1031   :  { %v7774_v6 = vpop.f32.mrb[91].mxu1 }
0x1032   :  { %v7812_v5 = vpack.c.bf16 %v14679_v13, %v7774_v6  ;;  %v12731_v13 = vld [vmem:[%s22016_s5 + $0x218] sm:$0xff] }
0x1033   :  { %v12739_v6 = vld [vmem:[%s22016_s5 + $0x258] sm:$0xff] }
0x1034   :  { %v14682_v16 = vpop.f32.mrb[92].mxu1  ;;  %14686 = vmatprep.subr.bf16.mxu1 %v7812_v5 }
0x1035   :  { %v7784_v9 = vpop.f32.mrb[93].mxu1  ;;  %14687 = vmatpush3.bf16.msra.mxu1 %v7812_v5  ;;  %v12743_v5 = vld [vmem:[%s22016_s5 + $0x278] sm:$0xff] }
0x1036   :  { %v7813_v17 = vpack.c.bf16 %v14682_v16, %v7784_v9  ;;  %v15807_v16 = vpack.c.bf16 %v12743_v5, %v12739_v6  ;;  %v12738_v9 = vld [vmem:[%s22016_s5 + $0x250] sm:$0xff] }
0x1038   :  { %v14685_v10 = vpop.f32.mrb[94].mxu1  ;;  %14688 = vmatprep.subr.bf16.mxu1 %v7813_v17 }
0x1039   :  { %v7794_v18 = vpop.f32.mrb[95].mxu1  ;;  %14689 = vmatpush3.bf16.msra.mxu1 %v7813_v17  ;;  %v12742_v17 = vld [vmem:[%s22016_s5 + $0x270] sm:$0xff] }
0x103a   :  { %v7814_v21 = vpack.c.bf16 %v14685_v10, %v7794_v18  ;;  %v15809_v10 = vpack.c.bf16 %v12742_v17, %v12738_v9  ;;  %v12747_v18 = vld [vmem:[%s22016_s5 + $0x298] sm:$0xff] }
0x103c   :  { %14690 = vmatprep.subr.bf16.mxu1 %v7814_v21 }
0x103d   :  { %14691 = vmatpush3.bf16.msra.mxu1 %v7814_v21  ;;  %v12751_v21 = vld [vmem:[%s22016_s5 + $0x2b8] sm:$0xff] }
0x103e   :  { %14741 = vmatprep.subr.bf16.mxu1 %v19277_v59 }
0x1040   :  { %14693 = vmatmul.mubr.msk.bf16.vlgmr.msra.gmra.mrb[76].mxu1 %vm7287_vm5, %v16577_v1  ;;  %v15811_v1 = vpack.c.bf16 %v12751_v21, %v12747_v18  ;;  %v16586_v18 = vld [vmem:[%s21875_s17 + $0xb0] sm:$0xff]   ;;  %v16587_v21 = vld [vmem:[%s21875_s17 + $0xb8] sm:$0xff]  }
0x1041   :  { %14742 = vmatpush3.bf16.msra.mxu1 %v19277_v59  ;;  %14696 = vmatprep.mubr.msk.bf16.mxu1 %vm7287_vm5, %v16578_v61  ;;  %v16580_v59 = vld [vmem:[%s21875_s17 + $0x80] sm:$0xff]   ;;  %v12746_v61 = vld [vmem:[%s22016_s5 + $0x290] sm:$0xff] }
0x1042   :  { %14743 = vmatprep.subr.bf16.mxu1 %v19279_v36 }
0x1045   :  { %14744 = vmatpush3.bf16.msra.mxu1 %v19279_v36  ;;  %v12603_v36 = vld [vmem:[%s21874_s16 + $0x298] sm:$0xff] }
0x1046   :  { %14745 = vmatprep.subr.bf16.mxu1 %v19281_v50 }
0x1048   :  { %14697 = vmatmul.mubr.msk.bf16.gmra.mrb[80].mxu1 %vm7287_vm5, %v16579_v14  ;;  %v15813_v14 = vpack.c.bf16 %v12750_v29, %v12746_v61  ;;  %v16592_v61 = vld [vmem:[%s21875_s17 + $0xe0] sm:$0xff]   ;;  %v12733_v29 = vld [vmem:[%s22016_s5 + $0x228] sm:$0xff] }
0x1049   :  { %14746 = vmatpush3.bf16.msra.mxu1 %v19281_v50  ;;  %14747 = vmatprep.mubr.msk.bf16.mxu1 %vm7287_vm5, %v16580_v59  ;;  %v15647_v50 = vpack.c.bf16 %v12603_v36, %v12602_v37  ;;  %v12759_v59 = vld [vmem:[%s22016_s5 + $0x2f8] sm:$0xff]  ;;  %v12754_v37 = vld [vmem:[%s22016_s5 + $0x2d0] sm:$0xff] }
0x104a   :  { %15644 = vmatprep.subr.bf16.mxu1 %v15643_v7  ;;  %v12758_v36 = vld [vmem:[%s22016_s5 + $0x2f0] sm:$0xff] }
0x1050   :  { %14748 = vmatmul.mubr.msk.bf16.vlgmr.msra.gmra.mrb[76].mxu1 %vm7287_vm5, %v16581_v41  ;;  %v12763_v41 = vld [vmem:[%s22016_s5 + $0x318] sm:$0xff] }
0x1051   :  { %15646 = vmatpush3.bf16.msra.mxu1 %v15643_v7  ;;  %14751 = vmatprep.mubr.msk.bf16.mxu1 %vm7287_vm5, %v16582_v20  ;;  %v15815_v7 = vpack.c.bf16 %v12759_v59, %v12755_v32  ;;  %v12767_v20 = vld [vmem:[%s22016_s5 + $0x338] sm:$0xff]  ;;  %v12728_v59 = vld [vmem:[%s22016_s5 + $0x200] sm:$0xff] }
0x1052   :  { %15648 = vmatprep.subr.bf16.mxu1 %v15647_v50  ;;  %v15819_v19 = vpack.c.bf16 %v12767_v20, %v12763_v41  ;;  %v16595_v32 = vld [vmem:[%s21875_s17 + $0xf8] sm:$0xff]  }
0x1055   :  { %15650 = vmatpush3.bf16.msra.mxu1 %v15647_v50  ;;  %v15817_v50 = vpack.c.bf16 %v12758_v36, %v12754_v37  ;;  %v12741_v37 = vld [vmem:[%s22016_s5 + $0x268] sm:$0xff]  ;;  %v16598_v36 = vld [vmem:[%s21875_s17 + $0x110] sm:$0xff]  }
0x1056   :  { %15652 = vmatprep.subr.bf16.mxu1 %v15651_v54 }
0x1058   :  { %14752 = vmatmul.mubr.msk.bf16.gmra.mrb[80].mxu1 %vm7287_vm5, %v16583_v49 }
0x1059   :  { %15654 = vmatpush3.bf16.msra.mxu1 %v15651_v54  ;;  %14787 = vmatprep.mubr.f32.mxu1 %v19059_v31  ;;  %v12613_v31 = vld [vmem:[%s21874_s16 + $0x2e8] sm:$0xff]  ;;  %v12766_v54 = vld [vmem:[%s22016_s5 + $0x330] sm:$0xff] }
0x105a   :  { %15656 = vmatprep.subr.bf16.mxu1 %v15655_v53  ;;  %v15667_v62 = vpack.c.bf16 %v12613_v31, %v12612_v60  ;;  %v15821_v49 = vpack.c.bf16 %v12766_v54, %v12762_v46  ;;  %v12778_v60 = vld [vmem:[%s22016_s5 + $0x390] sm:$0xff]  ;;  %v12745_v46 = vld [vmem:[%s22016_s5 + $0x288] sm:$0xff] }
0x105b   :  { %v12782_v31 = vld [vmem:[%s22016_s5 + $0x3b0] sm:$0xff]  ;;  %v12749_v54 = vld [vmem:[%s22016_s5 + $0x2a8] sm:$0xff] }
0x105c   :  { %v15829_v12 = vpack.c.bf16 %v12782_v31, %v12778_v60  ;;  %v12756_v60 = vld [vmem:[%s22016_s5 + $0x2e0] sm:$0xff]  ;;  %v12761_v31 = vld [vmem:[%s22016_s5 + $0x308] sm:$0xff] }
0x105d   :  { %15658 = vmatpush3.bf16.msra.mxu1 %v15655_v53  ;;  %v15823_v53 = vpack.c.bf16 %v12775_v47, %v12771_v58  ;;  %v15779_v47 = vpack.c.bf16 %v12749_v54, %v12745_v46  ;;  %v9077_v46 = vld [vmem:[%s22016_s5 + $0x60] sm:$0xff]  ;;  %v9075_v54 = vld [vmem:[%s22016_s5 + $0x50] sm:$0xff] }
0x105e   :  { %15660 = vmatprep.subr.bf16.mxu1 %v15659_v15 }
0x1061   :  { %15662 = vmatpush3.bf16.msra.mxu1 %v15659_v15  ;;  %v12779_v15 = vld [vmem:[%s22016_s5 + $0x398] sm:$0xff] }
0x1062   :  { %15664 = vmatprep.subr.bf16.mxu1 %v15663_v22 }
0x1065   :  { %15666 = vmatpush3.bf16.msra.mxu1 %v15663_v22  ;;  %v15827_v22 = vpack.c.bf16 %v12783_v52, %v12779_v15  ;;  %v16599_v15 = vld [vmem:[%s21875_s17 + $0x118] sm:$0xff]  }
0x1066   :  { %15668 = vmatprep.subr.bf16.mxu1 %v15667_v62 }
0x1069   :  { %15670 = vmatpush3.bf16.msra.mxu1 %v15667_v62  ;;  %v12787_v62 = vld [vmem:[%s22016_s5 + $0x3d8] sm:$0xff] }
0x106a   :  { %15672 = vmatprep.subr.bf16.mxu1 %v15671_v8 }
0x106d   :  { %15674 = vmatpush3.bf16.msra.mxu1 %v15671_v8  ;;  %v15831_v8 = vpack.c.bf16 %v12791_v48, %v12787_v62  ;;  %v12765_v62 = vld [vmem:[%s22016_s5 + $0x328] sm:$0xff] }
0x1070   :  { %14788 = vmatmul.mubr.f32.vlgmr.msra.gmra.mrb[96].mxu1 %v19062_v34  ;;  %v12735_v34 = vld [vmem:[%s22016_s5 + $0x238] sm:$0xff] }
0x1071   :  { %14790 = vmatprep.mubr.f32.mxu1 %v19080_v43  ;;  %v15803_v43 = vpack.c.bf16 %v12735_v34, %v12731_v13  ;;  %v12790_v13 = vld [vmem:[%s22016_s5 + $0x3f0] sm:$0xff] }
0x1073   :  { %15804 = vmatprep.subr.bf16.mxu0 %v15803_v43 }
0x1074   :  { %14791 = vmatmul.mubr.f32.gmra.mrb[98].mxu1 %v19082_v44 }
0x1075   :  { %14793 = vmatprep.mubr.f32.mxu1 %v17837_v26  ;;  %v12730_v26 = vld [vmem:[%s22016_s5 + $0x210] sm:$0xff] }
0x1078   :  { %14794 = vmatmul.mubr.f32.gmra.mrb[100].mxu1 %v17846_v30  ;;  %v12734_v30 = vld [vmem:[%s22016_s5 + $0x230] sm:$0xff] }
0x1079   :  { %14802 = vmatprep.mubr.msk.bf16.mxu1 %vm7287_vm5, %v16584_v39  ;;  %v15805_v44 = vpack.c.bf16 %v12734_v30, %v12730_v26  ;;  %v12786_v39 = vld [vmem:[%s22016_s5 + $0x3d0] sm:$0xff] }
0x107a   :  { %v15833_v34 = vpack.c.bf16 %v12790_v13, %v12786_v39  ;;  %v12764_v39 = vld [vmem:[%s22016_s5 + $0x320] sm:$0xff]  ;;  %v12769_v13 = vld [vmem:[%s22016_s5 + $0x348] sm:$0xff] }
0x107b   :  { %15806 = vmatpush1.bf16.msra.mxu0 %v15805_v44 }
0x107c   :  { %15808 = vmatprep.subr.bf16.mxu0 %v15807_v16 }
0x107f   :  { %15810 = vmatpush1.bf16.msra.mxu0 %v15809_v10  ;;  %v16585_v10 = vld [vmem:[%s21875_s17 + $0xa8] sm:$0xff]  }
0x1080   :  { %15812 = vmatprep.subr.bf16.mxu0 %v15811_v1  ;;  %v16588_v1 = vld [vmem:[%s21875_s17 + $0xc0] sm:$0xff]  }
0x1083   :  { %15814 = vmatpush1.bf16.msra.mxu0 %v15813_v14 }
0x1084   :  { %15816 = vmatprep.subr.bf16.mxu0 %v15815_v7  ;;  %v12737_v7 = vld [vmem:[%s22016_s5 + $0x248] sm:$0xff] }
0x1085   :  { %v15775_v20 = vpack.c.bf16 %v12741_v37, %v12737_v7  ;;  %v9071_v7 = vld [vmem:[%s22016_s5 + $0x30] sm:$0xff]  ;;  %v9074_v37 = vld [vmem:[%s22016_s5 + $0x48] sm:$0xff] }
0x1087   :  { %15818 = vmatpush1.bf16.msra.mxu0 %v15817_v50  ;;  %v12736_v50 = vld [vmem:[%s22016_s5 + $0x240] sm:$0xff] }
0x1088   :  { %15820 = vmatprep.subr.bf16.mxu0 %v15819_v19  ;;  %v12740_v19 = vld [vmem:[%s22016_s5 + $0x260] sm:$0xff] }
0x1089   :  { %v15777_v58 = vpack.c.bf16 %v12740_v19, %v12736_v50  ;;  %v9073_v19 = vld [vmem:[%s22016_s5 + $0x40] sm:$0xff] }
0x108b   :  { %15822 = vmatpush1.bf16.msra.mxu0 %v15821_v49  ;;  %v12744_v49 = vld [vmem:[%s22016_s5 + $0x280] sm:$0xff] }
0x108c   :  { %15824 = vmatprep.subr.bf16.mxu0 %v15823_v53  ;;  %v12748_v53 = vld [vmem:[%s22016_s5 + $0x2a0] sm:$0xff] }
0x108d   :  { %v15781_v52 = vpack.c.bf16 %v12748_v53, %v12744_v49 }
0x108f   :  { %15826 = vmatpush1.bf16.msra.mxu0 %v15825_v23  ;;  %v15783_v23 = vpack.c.bf16 %v12757_v57, %v12753_v56  ;;  %v9086_v57 = vld [vmem:[%s22016_s5 + $0xa8] sm:$0xff] }
0x1090   :  { %15828 = vmatprep.subr.bf16.mxu0 %v15827_v22  ;;  %v12752_v22 = vld [vmem:[%s22016_s5 + $0x2c0] sm:$0xff] }
0x1091   :  { %v15785_v48 = vpack.c.bf16 %v12756_v60, %v12752_v22  ;;  %v15841_v60 = vpack.c.bf16 %v9077_v46, %v9073_v19  ;;  %v9110_v19 = vld [vmem:[%s22016_s5 + $0x168] sm:$0xff]  ;;  %v9108_v46 = vld [vmem:[%s22016_s5 + $0x158] sm:$0xff] }
0x1093   :  { %15830 = vmatpush1.bf16.msra.mxu0 %v15829_v12  ;;  %v15787_v12 = vpack.c.bf16 %v12765_v62, %v12761_v31  ;;  %v9081_v62 = vld [vmem:[%s22016_s5 + $0x80] sm:$0xff] }
0x1094   :  { %15832 = vmatprep.subr.bf16.mxu0 %v15831_v8  ;;  %v12760_v8 = vld [vmem:[%s22016_s5 + $0x300] sm:$0xff] }
0x1097   :  { %15834 = vmatpush1.bf16.msra.mxu0 %v15833_v34  ;;  %v12773_v34 = vld [vmem:[%s22016_s5 + $0x368] sm:$0xff] }
0x1143   :  { %v14789_v43 = vpop.f32.mrb[96].mxu1 }
0x1144   :  { %v8232_v26 = vpop.f32.mrb[97].mxu1 }
0x1145   :  { %v8270_v30 = vpack.c.bf16 %v14789_v43, %v8232_v26  ;;  %v15789_v43 = vpack.c.bf16 %v12764_v39, %v12760_v8  ;;  %v15791_v26 = vpack.c.bf16 %v12773_v34, %v12769_v13  ;;  %v9083_v13 = vld [vmem:[%s22016_s5 + $0x90] sm:$0xff] }
0x1146   :  { %v9087_v34 = vld [vmem:[%s22016_s5 + $0xb0] sm:$0xff] }
0x1147   :  { %v14792_v44 = vpop.f32.mrb[98].mxu1  ;;  %14796 = vmatprep.subr.bf16.mxu1 %v8270_v30 }
0x1148   :  { %v8242_v6 = vpop.f32.mrb[99].mxu1  ;;  %14797 = vmatpush3.bf16.msra.mxu1 %v8270_v30  ;;  %v12768_v30 = vld [vmem:[%s22016_s5 + $0x340] sm:$0xff] }
0x1149   :  { %v8271_v5 = vpack.c.bf16 %v14792_v44, %v8242_v6  ;;  %v12772_v44 = vld [vmem:[%s22016_s5 + $0x360] sm:$0xff]  ;;  %v12777_v6 = vld [vmem:[%s22016_s5 + $0x388] sm:$0xff] }
0x114b   :  { %v14795_v16 = vpop.f32.mrb[100].mxu1  ;;  %14798 = vmatprep.subr.bf16.mxu1 %v8271_v5 }
0x114c   :  { %v8252_v9 = vpop.f32.mrb[101].mxu1  ;;  %14799 = vmatpush3.bf16.msra.mxu1 %v8271_v5  ;;  %v12781_v5 = vld [vmem:[%s22016_s5 + $0x3a8] sm:$0xff] }
0x114d   :  { %v8272_v17 = vpack.c.bf16 %v14795_v16, %v8252_v9  ;;  %v15793_v16 = vpack.c.bf16 %v12772_v44, %v12768_v30  ;;  %v15795_v9 = vpack.c.bf16 %v12781_v5, %v12777_v6  ;;  %v9092_v30 = vld [vmem:[%s22016_s5 + $0xd8] sm:$0xff]  ;;  %v9089_v6 = vld [vmem:[%s22016_s5 + $0xc0] sm:$0xff] }
0x114e   :  { %v9096_v44 = vld [vmem:[%s22016_s5 + $0xf8] sm:$0xff] }
0x114f   :  { %14800 = vmatprep.subr.bf16.mxu1 %v8272_v17 }
0x1150   :  { %14801 = vmatpush3.bf16.msra.mxu1 %v8272_v17  ;;  %v12776_v17 = vld [vmem:[%s22016_s5 + $0x380] sm:$0xff] }
0x1151   :  { %14851 = vmatprep.subr.bf16.mxu1 %v19283_v55 }
0x1153   :  { %14803 = vmatmul.mubr.msk.bf16.vlgmr.msra.gmra.mrb[76].mxu1 %vm7287_vm5, %v16585_v10  ;;  %v12780_v10 = vld [vmem:[%s22016_s5 + $0x3a0] sm:$0xff] }
0x1154   :  { %14852 = vmatpush3.bf16.msra.mxu1 %v19283_v55  ;;  %14806 = vmatprep.mubr.msk.bf16.mxu1 %vm7287_vm5, %v16586_v18  ;;  %v16589_v55 = vld [vmem:[%s21875_s17 + $0xc8] sm:$0xff]  }
0x1155   :  { %14853 = vmatprep.subr.bf16.mxu1 %v19285_v51  ;;  %v12785_v18 = vld [vmem:[%s22016_s5 + $0x3c8] sm:$0xff] }
0x1158   :  { %14854 = vmatpush3.bf16.msra.mxu1 %v19285_v51  ;;  %v16590_v51 = vld [vmem:[%s21875_s17 + $0xd0] sm:$0xff]  }
0x1159   :  { %14855 = vmatprep.subr.bf16.mxu1 %v19287_v2 }
0x115b   :  { %14807 = vmatmul.mubr.msk.bf16.gmra.mrb[80].mxu1 %vm7287_vm5, %v16587_v21  ;;  %v12789_v21 = vld [vmem:[%s22016_s5 + $0x3e8] sm:$0xff] }
0x115c   :  { %14856 = vmatpush3.bf16.msra.mxu1 %v19287_v2  ;;  %14857 = vmatprep.mubr.msk.bf16.mxu1 %vm7287_vm5, %v16588_v1  ;;  %v16591_v2 = vld [vmem:[%s21875_s17 + $0xd8] sm:$0xff]   ;;  %v15797_v1 = vpack.c.bf16 %v12780_v10, %v12776_v17  ;;  %v19919_v17 = vld [vmem:[%s21882_s24 + $0x40] sm:$0xff] }
0x115d   :  { %14906 = vmatprep.subr.bf16.mxu1 %v19331_v25  ;;  %v19924_v10 = vld [vmem:[%s21882_s24 + $0x60] sm:$0xff]  ;;  %10333 = vrot.lane.b32.xlu1 %v19919_v17, %s16822_s4 }
0x115e   :  { %10335 = vrot.lane.b32.xlu0 %v19924_v10, %s16822_s4 }
0x1163   :  { %14858 = vmatmul.mubr.msk.bf16.vlgmr.msra.gmra.mrb[76].mxu1 %vm7287_vm5, %v16589_v55  ;;  %v15799_v55 = vpack.c.bf16 %v12789_v21, %v12785_v18  ;;  %v15879_v21 = vpack.c.bf16 %v9096_v44, %v9092_v30  ;;  %v20048_v30 = vld [vmem:[%s21882_s24 + $0x78] sm:$0xff] }
0x1164   :  { %14907 = vmatpush3.bf16.msra.mxu1 %v19331_v25  ;;  %14861 = vmatprep.mubr.msk.bf16.mxu1 %vm7287_vm5, %v16590_v51  ;;  %v16593_v25 = vld [vmem:[%s21875_s17 + $0xe8] sm:$0xff]   ;;  %v12784_v51 = vld [vmem:[%s22016_s5 + $0x3c0] sm:$0xff] }
0x1165   :  { %14908 = vmatprep.subr.bf16.mxu1 %v19342_v40 }
0x1168   :  { %14909 = vmatpush3.bf16.msra.mxu1 %v19342_v40  ;;  %v16594_v40 = vld [vmem:[%s21875_s17 + $0xf0] sm:$0xff]  }
0x1169   :  { %14910 = vmatprep.subr.bf16.mxu1 %v19352_v45 }
0x116b   :  { %14862 = vmatmul.mubr.msk.bf16.gmra.mrb[80].mxu1 %vm7287_vm5, %v16591_v2  ;;  %v12788_v2 = vld [vmem:[%s22016_s5 + $0x3e0] sm:$0xff] }
0x116c   :  { %14911 = vmatpush3.bf16.msra.mxu1 %v19352_v45  ;;  %14912 = vmatprep.mubr.msk.bf16.mxu1 %vm7287_vm5, %v16592_v61  ;;  %v12729_v45 = vld [vmem:[%s22016_s5 + $0x208] sm:$0xff]  ;;  %v15801_v61 = vpack.c.bf16 %v12788_v2, %v12784_v51 }
0x116d   :  { %14961 = vmatprep.subr.bf16.mxu1 %v19374_v0  ;;  %v15771_v14 = vpack.c.bf16 %v12733_v29, %v12729_v45  ;;  %v9068_v45 = vld [vmem:[%s22016_s5 + $0x18] sm:$0xff]  ;;  %v9098_v51 = vld [vmem:[%s22016_s5 + $0x108] sm:$0xff] }
0x1173   :  { %14913 = vmatmul.mubr.msk.bf16.vlgmr.msra.gmra.mrb[76].mxu1 %vm7287_vm5, %v16593_v25  ;;  %v9066_v25 = vld [vmem:[%s22016_s5 + $0x8] sm:$0xff] }
0x1174   :  { %14962 = vmatpush3.bf16.msra.mxu1 %v19374_v0  ;;  %14916 = vmatprep.mubr.msk.bf16.mxu1 %vm7287_vm5, %v16594_v40  ;;  %v16596_v0 = vld [vmem:[%s21875_s17 + $0x100] sm:$0xff]   ;;  %v9070_v40 = vld [vmem:[%s22016_s5 + $0x28] sm:$0xff] }
0x1175   :  { %14963 = vmatprep.subr.bf16.mxu1 %v19378_v63  ;;  %v15835_v29 = vpack.c.bf16 %v9070_v40, %v9066_v25  ;;  %v9100_v25 = vld [vmem:[%s22016_s5 + $0x118] sm:$0xff] }
0x1176   :  { %v9104_v40 = vld [vmem:[%s22016_s5 + $0x138] sm:$0xff] }
0x1178   :  { %14964 = vmatpush3.bf16.msra.mxu1 %v19378_v63  ;;  %v12732_v63 = vld [vmem:[%s22016_s5 + $0x220] sm:$0xff] }
0x1179   :  { %14965 = vmatprep.subr.bf16.mxu1 %v19381_v3  ;;  %v15773_v41 = vpack.c.bf16 %v12732_v63, %v12728_v59  ;;  %v9069_v59 = vld [vmem:[%s22016_s5 + $0x20] sm:$0xff]  ;;  %v9067_v63 = vld [vmem:[%s22016_s5 + $0x10] sm:$0xff] }
0x117a   :  { %v15869_v50 = vpack.c.bf16 %v9071_v7, %v9067_v63  ;;  %v19965_v63 = vld [vmem:[%s21882_s24 + $0x48] sm:$0xff] }
0x117b   :  { %14917 = vmatmul.mubr.msk.bf16.gmra.mrb[80].mxu1 %vm7287_vm5, %v16595_v32  ;;  %v9072_v32 = vld [vmem:[%s22016_s5 + $0x38] sm:$0xff]  ;;  %v19970_v7 = vld [vmem:[%s21882_s24 + $0x68] sm:$0xff]  ;;  %10341 = vrot.lane.b32.xlu1 %v19965_v63, %s16822_s4 }
0x117c   :  { %14966 = vmatpush3.bf16.msra.mxu1 %v19381_v3  ;;  %14967 = vmatprep.mubr.msk.bf16.mxu1 %vm7287_vm5, %v16596_v0  ;;  %v16597_v3 = vld [vmem:[%s21875_s17 + $0x108] sm:$0xff]   ;;  %v15867_v0 = vpack.c.bf16 %v9072_v32, %v9068_v45 }
0x117d   :  { %15772 = vmatprep.subr.bf16.mxu1 %v15771_v14  ;;  %v9065_v14 = vld [vmem:[%s22016_s5] sm:$0xff]  ;;  %10343 = vrot.lane.b32.xlu0 %v19970_v7, %s16822_s4 }
0x117e   :  { %15868 = vmatprep.subr.bf16.mxu0 %v15867_v0 }
0x1183   :  { %14968 = vmatmul.mubr.msk.bf16.vlgmr.msra.gmra.mrb[76].mxu1 %vm7287_vm5, %v16597_v3  ;;  %v9078_v3 = vld [vmem:[%s22016_s5 + $0x68] sm:$0xff] }
0x1184   :  { %14971 = vmatprep.mubr.msk.bf16.mxu1 %vm7287_vm5, %v16598_v36  ;;  %15774 = vmatpush1.bf16.msra.mxu1 %v15773_v41  ;;  %v9076_v36 = vld [vmem:[%s22016_s5 + $0x58] sm:$0xff]  ;;  %v15839_v53 = vpack.c.bf16 %v9078_v3, %v9074_v37 }
0x1185   :  { %15776 = vmatprep.subr.bf16.mxu1 %v15775_v20  ;;  %v9080_v41 = vld [vmem:[%s22016_s5 + $0x78] sm:$0xff]  ;;  %v15837_v20 = vpack.c.bf16 %v9069_v59, %v9065_v14  ;;  %v9101_v59 = vld [vmem:[%s22016_s5 + $0x120] sm:$0xff] }
0x1186   :  { %v15871_v56 = vpack.c.bf16 %v9080_v41, %v9076_v36  ;;  %v15883_v36 = vpack.c.bf16 %v9104_v40, %v9100_v25  ;;  %v9099_v41 = vld [vmem:[%s22016_s5 + $0x110] sm:$0xff]  ;;  %v9125_v25 = vld [vmem:[%s22016_s5 + $0x1e0] sm:$0xff] }
0x1188   :  { %15778 = vmatpush1.bf16.msra.mxu1 %v15777_v58  ;;  %v9079_v58 = vld [vmem:[%s22016_s5 + $0x70] sm:$0xff] }
0x1189   :  { %15780 = vmatprep.subr.bf16.mxu1 %v15779_v47  ;;  %v9082_v47 = vld [vmem:[%s22016_s5 + $0x88] sm:$0xff]  ;;  %v15873_v31 = vpack.c.bf16 %v9079_v58, %v9075_v54  ;;  %v9112_v54 = vld [vmem:[%s22016_s5 + $0x178] sm:$0xff]  ;;  %v9105_v58 = vld [vmem:[%s22016_s5 + $0x140] sm:$0xff] }
0x118a   :  { %v15843_v8 = vpack.c.bf16 %v9086_v57, %v9082_v47  ;;  %v20010_v57 = vld [vmem:[%s21882_s24 + $0x70] sm:$0xff] }
0x118b   :  { %14972 = vmatmul.mubr.msk.bf16.gmra.mrb[80].mxu1 %vm7287_vm5, %v16599_v15  ;;  %v9084_v15 = vld [vmem:[%s22016_s5 + $0x98] sm:$0xff]  ;;  %10351 = vrot.lane.b32.xlu0 %v20010_v57, %s16822_s4 }
0x118c   :  { %15782 = vmatpush1.bf16.msra.mxu1 %v15781_v52  ;;  %9258 = vmatprep.mubr.f32.mxu1 %v16831_v35  ;;  %v9088_v52 = vld [vmem:[%s22016_s5 + $0xb8] sm:$0xff] }
0x118d   :  { %15784 = vmatprep.subr.bf16.mxu1 %v15783_v23  ;;  %v15875_v39 = vpack.c.bf16 %v9088_v52, %v9084_v15  ;;  %v15887_v52 = vpack.c.bf16 %v9112_v54, %v9108_v46 }
0x118f   :  { %10359 = vrot.lane.b32.xlu0 %v20048_v30, %s16822_s4 }
0x1190   :  { %15786 = vmatpush1.bf16.msra.mxu1 %v15785_v48  ;;  %v9085_v48 = vld [vmem:[%s22016_s5 + $0xa0] sm:$0xff] }
0x1191   :  { %15788 = vmatprep.subr.bf16.mxu1 %v15787_v12  ;;  %v15845_v5 = vpack.c.bf16 %v9085_v48, %v9081_v62  ;;  %v9118_v62 = vld [vmem:[%s22016_s5 + $0x1a8] sm:$0xff]  ;;  %v9116_v48 = vld [vmem:[%s22016_s5 + $0x198] sm:$0xff] }
0x1193   :  { %10240 = vrot.lane.b32.xlu0 %v19924_v10, %s16823_s0 }
0x1194   :  { %15790 = vmatpush1.bf16.msra.mxu1 %v15789_v43  ;;  %v9090_v43 = vld [vmem:[%s22016_s5 + $0xc8] sm:$0xff] }
0x1195   :  { %15792 = vmatprep.subr.bf16.mxu1 %v15791_v26  ;;  %v9094_v26 = vld [vmem:[%s22016_s5 + $0xe8] sm:$0xff] }
0x1196   :  { %v15847_v18 = vpack.c.bf16 %v9094_v26, %v9090_v43  ;;  %v9117_v43 = vld [vmem:[%s22016_s5 + $0x1a0] sm:$0xff]  ;;  %v20043_v26 = vld [vmem:[%s21882_s24 + $0x58] sm:$0xff] }
0x1197   :  { %10248 = vrot.lane.b32.xlu0 %v19970_v7, %s16823_s0 }
0x1198   :  { %15794 = vmatpush1.bf16.msra.mxu1 %v15793_v16  ;;  %v15877_v16 = vpack.c.bf16 %v9087_v34, %v9083_v13 }
0x1199   :  { %15796 = vmatprep.subr.bf16.mxu1 %v15795_v9  ;;  %v9093_v9 = vld [vmem:[%s22016_s5 + $0xe0] sm:$0xff] }
0x119a   :  { %v15849_v0 = vpack.c.bf16 %v9093_v9, %v9089_v6  ;;  %v9122_v9 = vld [vmem:[%s22016_s5 + $0x1c8] sm:$0xff] }
0x119b   :  { %10256 = vrot.lane.b32.xlu0 %v20010_v57, %s16823_s0 }
0x119c   :  { %15798 = vmatpush1.bf16.msra.mxu1 %v15797_v1  ;;  %v9091_v1 = vld [vmem:[%s22016_s5 + $0xd0] sm:$0xff] }
0x119d   :  { %15800 = vmatprep.subr.bf16.mxu1 %v15799_v55  ;;  %v9095_v55 = vld [vmem:[%s22016_s5 + $0xf0] sm:$0xff] }
0x119e   :  { %v15881_v14 = vpack.c.bf16 %v9095_v55, %v9091_v1  ;;  %v9128_v1 = vld [vmem:[%s22016_s5 + $0x1f8] sm:$0xff] }
0x119f   :  { %10264 = vrot.lane.b32.xlu0 %v20048_v30, %s16823_s0 }
0x11a0   :  { %15802 = vmatpush1.bf16.msra.mxu1 %v15801_v61  ;;  %v9102_v61 = vld [vmem:[%s22016_s5 + $0x128] sm:$0xff] }
0x11a1   :  { %15836 = vmatprep.subr.bf16.mxu1 %v15835_v29  ;;  %v9097_v29 = vld [vmem:[%s22016_s5 + $0x100] sm:$0xff]  ;;  %v15851_v3 = vpack.c.bf16 %v9102_v61, %v9098_v51 }
0x11a2   :  { %v15853_v47 = vpack.c.bf16 %v9101_v59, %v9097_v29  ;;  %v9121_v61 = vld [vmem:[%s22016_s5 + $0x1c0] sm:$0xff]  ;;  %v12793_v59 = vld [vmem:[%s22016_s5 + $0x408] sm:$0xff] }
0x11a3   :  { %10601 = vrot.lane.b32.xlu0 %v19924_v10, %s16825_s1 }
0x11a7   :  { %10609 = vrot.lane.b32.xlu0 %v19970_v7, %s16825_s1 }
0x11ab   :  { %10617 = vrot.lane.b32.xlu0 %v20010_v57, %s16825_s1 }
0x11af   :  { %10625 = vrot.lane.b32.xlu0 %v20048_v30, %s16825_s1 }
0x11b3   :  { %10786 = vrot.lane.b32.xlu0 %v19924_v10, %s16826_s23 }
0x11b7   :  { %10794 = vrot.lane.b32.xlu0 %v19970_v7, %s16826_s23 }
0x11bb   :  { %10802 = vrot.lane.b32.xlu0 %v20010_v57, %s16826_s23 }
0x11bf   :  { %10810 = vrot.lane.b32.xlu0 %v20048_v30, %s16826_s23 }
0x11c3   :  { %11108 = vrot.lane.b32.xlu0 %v19924_v10, %s16827_s28 }
0x11c7   :  { %11116 = vrot.lane.b32.xlu0 %v19970_v7, %s16827_s28 }
0x11cb   :  { %11124 = vrot.lane.b32.xlu0 %v20010_v57, %s16827_s28 }
0x11cf   :  { %11132 = vrot.lane.b32.xlu0 %v20048_v30, %s16827_s28 }
0x11d3   :  { %11293 = vrot.lane.b32.xlu0 %v19924_v10, %s16828_s15 }
0x11d7   :  { %11301 = vrot.lane.b32.xlu0 %v19970_v7, %s16828_s15 }
0x11db   :  { %11309 = vrot.lane.b32.xlu0 %v20010_v57, %s16828_s15  ;;  %v16609_v57 = vld [vmem:[%s21882_s24 + $0x60] sm:$0xff] }
0x11df   :  { %11317 = vrot.lane.b32.xlu0 %v20048_v30, %s16828_s15 }
0x11e3   :  { %11478 = vrot.lane.b32.xlu0 %v16609_v57, %s16829_s7 }
0x1256   :  { %v14969_v49 = vpop.f32.mrb[76].mxu1 }
0x1257   :  { %v19880_v23 = vpop.f32.mrb[77].mxu1  ;;  %9259 = vmatmul.mubr.f32.vlgmr.msra.gmra.mrb[102].mxu1 %v14969_v49  ;;  %9336 = vmatmul.mubr.f32.vlgmr.msra.gmra.mrb[72].mxu0 %v14969_v49 }
0x1258   :  { %15838 = vmatpush1.bf16.msra.mxu1 %v15837_v20  ;;  %15870 = vmatpush1.bf16.msra.mxu0 %v15869_v50  ;;  %v14970_v22 = vpop.f32.mrb[78].mxu1  ;;  %v9103_v20 = vld [vmem:[%s22016_s5 + $0x130] sm:$0xff]  ;;  %v9106_v50 = vld [vmem:[%s22016_s5 + $0x148] sm:$0xff] }
0x1259   :  { %v19888_v12 = vpop.f32.mrb[79].mxu1  ;;  %9264 = vmatprep.mubr.f32.mxu1 %v16831_v35  ;;  %9341 = vmatprep.mubr.f32.mxu0 %v16831_v35  ;;  %v15885_v49 = vpack.c.bf16 %v9103_v20, %v9099_v41  ;;  %v15855_v15 = vpack.c.bf16 %v9110_v19, %v9106_v50  ;;  %v12799_v41 = vld [vmem:[%s22016_s5 + $0x438] sm:$0xff]  ;;  %v15865_v20 = vpack.c.bf16 %v9125_v25, %v9121_v61  ;;  %v12792_v19 = vld [vmem:[%s22016_s5 + $0x400] sm:$0xff]  ;;  %v12817_v61 = vld [vmem:[%s22016_s5 + $0x4c8] sm:$0xff] }
0x125a   :  { %15840 = vmatprep.subr.bf16.mxu1 %v15839_v53  ;;  %15872 = vmatprep.subr.bf16.mxu0 %v15871_v56  ;;  %v9109_v53 = vld [vmem:[%s22016_s5 + $0x160] sm:$0xff]  ;;  %v20005_v56 = vld [vmem:[%s21882_s24 + $0x50] sm:$0xff]  ;;  %v12821_v25 = vld [vmem:[%s22016_s5 + $0x4e8] sm:$0xff] }
0x125b   :  { %9265 = vmatmul.mubr.f32.gmra.mrb[104].mxu1 %v14970_v22  ;;  %9342 = vmatmul.mubr.f32.gmra.mrb[74].mxu0 %v14970_v22  ;;  %v9107_v22 = vld [vmem:[%s22016_s5 + $0x150] sm:$0xff]  ;;  %v15857_v13 = vpack.c.bf16 %v9109_v53, %v9105_v58  ;;  %v12796_v58 = vld [vmem:[%s22016_s5 + $0x420] sm:$0xff]  ;;  %v12801_v53 = vld [vmem:[%s22016_s5 + $0x448] sm:$0xff] }
0x125c   :  { %15842 = vmatpush1.bf16.msra.mxu1 %v15841_v60  ;;  %15874 = vmatpush1.bf16.msra.mxu0 %v15873_v31  ;;  %v9111_v60 = vld [vmem:[%s22016_s5 + $0x170] sm:$0xff]  ;;  %v9114_v31 = vld [vmem:[%s22016_s5 + $0x188] sm:$0xff] }
0x125d   :  { %15844 = vmatprep.subr.bf16.mxu1 %v15843_v8  ;;  %15876 = vmatprep.subr.bf16.mxu0 %v15875_v39  ;;  %v9120_v8 = vld [vmem:[%s22016_s5 + $0x1b8] sm:$0xff]  ;;  %v9113_v39 = vld [vmem:[%s22016_s5 + $0x180] sm:$0xff]  ;;  %v15889_v34 = vpack.c.bf16 %v9111_v60, %v9107_v22  ;;  %v15859_v44 = vpack.c.bf16 %v9118_v62, %v9114_v31  ;;  %v15901_v60 = vpack.c.bf16 %v12796_v58, %v12792_v19  ;;  %v12829_v19 = vld [vmem:[%s22016_s5 + $0x528] sm:$0xff] }
0x125e   :  { %v19935_v2 = vpop.f32.mrb[80].mxu1  ;;  %9412 = vmatprep.mubr.f32.mxu1 %v16831_v35  ;;  %9489 = vmatprep.mubr.f32.mxu0 %v16831_v35  ;;  %v15891_v6 = vpack.c.bf16 %v9120_v8, %v9116_v48  ;;  %v15861_v55 = vpack.c.bf16 %v9117_v43, %v9113_v39  ;;  %v12807_v22 = vld [vmem:[%s22016_s5 + $0x478] sm:$0xff]  ;;  %v12800_v62 = vld [vmem:[%s22016_s5 + $0x440] sm:$0xff]  ;;  %v12802_v8 = vld [vmem:[%s22016_s5 + $0x450] sm:$0xff] }
0x125f   :  { %v19948_v45 = vpop.f32.mrb[81].mxu1  ;;  %10349 = vrot.lane.b32.xlu1 %v20005_v56, %s16822_s4  ;;  %v12804_v48 = vld [vmem:[%s22016_s5 + $0x460] sm:$0xff]  ;;  %v12806_v39 = vld [vmem:[%s22016_s5 + $0x470] sm:$0xff] }
0x1260   :  { %15846 = vmatpush1.bf16.msra.mxu1 %v15845_v5  ;;  %15878 = vmatpush1.bf16.msra.mxu0 %v15877_v16  ;;  %v19957_v32 = vpop.f32.mrb[82].mxu1  ;;  %v9115_v5 = vld [vmem:[%s22016_s5 + $0x190] sm:$0xff] }
0x1261   :  { %v19972_v37 = vpop.f32.mrb[83].mxu1  ;;  %15848 = vmatprep.subr.bf16.mxu1 %v15847_v18  ;;  %15880 = vmatprep.subr.bf16.mxu0 %v15879_v21  ;;  %v9119_v16 = vld [vmem:[%s22016_s5 + $0x1b0] sm:$0xff]  ;;  %v9126_v18 = vld [vmem:[%s22016_s5 + $0x1e8] sm:$0xff]  ;;  %v9124_v21 = vld [vmem:[%s22016_s5 + $0x1d8] sm:$0xff] }
0x1262   :  { %v15893_v51 = vpack.c.bf16 %v9119_v16, %v9115_v5  ;;  %v15863_v40 = vpack.c.bf16 %v9126_v18, %v9122_v9  ;;  %v15895_v29 = vpack.c.bf16 %v9128_v1, %v9124_v21  ;;  %v12815_v5 = vld [vmem:[%s22016_s5 + $0x4b8] sm:$0xff]  ;;  %v15905_v16 = vpack.c.bf16 %v12804_v48, %v12800_v62  ;;  %v12808_v18 = vld [vmem:[%s22016_s5 + $0x480] sm:$0xff]  ;;  %v12837_v62 = vld [vmem:[%s22016_s5 + $0x568] sm:$0xff] }
0x1263   :  { %10357 = vrot.lane.b32.xlu1 %v20043_v26, %s16822_s4  ;;  %v15937_v9 = vpack.c.bf16 %v12806_v39, %v12802_v8  ;;  %v12812_v21 = vld [vmem:[%s22016_s5 + $0x4a0] sm:$0xff]  ;;  %v12835_v48 = vld [vmem:[%s22016_s5 + $0x558] sm:$0xff] }
0x1264   :  { %15850 = vmatpush1.bf16.msra.mxu1 %v15849_v0  ;;  %15882 = vmatpush1.bf16.msra.mxu0 %v15881_v14  ;;  %v9123_v0 = vld [vmem:[%s22016_s5 + $0x1d0] sm:$0xff]  ;;  %v12839_v8 = vld [vmem:[%s22016_s5 + $0x578] sm:$0xff] }
0x1265   :  { %15852 = vmatprep.subr.bf16.mxu1 %v15851_v3  ;;  %15884 = vmatprep.subr.bf16.mxu0 %v15883_v36  ;;  %v9127_v14 = vld [vmem:[%s22016_s5 + $0x1f0] sm:$0xff]  ;;  %v12797_v3 = vld [vmem:[%s22016_s5 + $0x428] sm:$0xff]  ;;  %v12795_v36 = vld [vmem:[%s22016_s5 + $0x418] sm:$0xff] }
0x1266   :  { %v15897_v50 = vpack.c.bf16 %v9127_v14, %v9123_v0  ;;  %v15899_v46 = vpack.c.bf16 %v12797_v3, %v12793_v59  ;;  %v15931_v54 = vpack.c.bf16 %v12799_v41, %v12795_v36  ;;  %v15909_v0 = vpack.c.bf16 %v12812_v21, %v12808_v18  ;;  %v12816_v59 = vld [vmem:[%s22016_s5 + $0x4c0] sm:$0xff]  ;;  %v12845_v18 = vld [vmem:[%s22016_s5 + $0x5a8] sm:$0xff]  ;;  %v12843_v21 = vld [vmem:[%s22016_s5 + $0x598] sm:$0xff] }
0x1267   :  { %10238 = vrot.lane.b32.xlu1 %v19919_v17, %s16823_s0  ;;  %v12820_v3 = vld [vmem:[%s22016_s5 + $0x4e0] sm:$0xff]  ;;  %v15911_v36 = vpack.c.bf16 %v12821_v25, %v12817_v61 }
0x1268   :  { %15854 = vmatpush1.bf16.msra.mxu1 %v15853_v47  ;;  %15886 = vmatpush1.bf16.msra.mxu0 %v15885_v49  ;;  %v12794_v47 = vld [vmem:[%s22016_s5 + $0x410] sm:$0xff]  ;;  %v15913_v58 = vpack.c.bf16 %v12820_v3, %v12816_v59  ;;  %v12844_v61 = vld [vmem:[%s22016_s5 + $0x5a0] sm:$0xff]  ;;  %v12853_v59 = vld [vmem:[%s22016_s5 + $0x5e8] sm:$0xff] }
0x1269   :  { %15856 = vmatprep.subr.bf16.mxu1 %v15855_v15  ;;  %15888 = vmatprep.subr.bf16.mxu0 %v15887_v52  ;;  %v12798_v49 = vld [vmem:[%s22016_s5 + $0x430] sm:$0xff]  ;;  %v12805_v15 = vld [vmem:[%s22016_s5 + $0x468] sm:$0xff]  ;;  %v12803_v52 = vld [vmem:[%s22016_s5 + $0x458] sm:$0xff] }
0x126a   :  { %v15933_v31 = vpack.c.bf16 %v12798_v49, %v12794_v47  ;;  %v15935_v43 = vpack.c.bf16 %v12807_v22, %v12803_v52  ;;  %v12824_v49 = vld [vmem:[%s22016_s5 + $0x500] sm:$0xff]  ;;  %v12826_v22 = vld [vmem:[%s22016_s5 + $0x510] sm:$0xff]  ;;  %v12851_v3 = vld [vmem:[%s22016_s5 + $0x5d8] sm:$0xff] }
0x126b   :  { %10246 = vrot.lane.b32.xlu1 %v19965_v63, %s16823_s0 }
0x126c   :  { %15858 = vmatpush1.bf16.msra.mxu1 %v15857_v13  ;;  %15890 = vmatpush1.bf16.msra.mxu0 %v15889_v34  ;;  %v12809_v13 = vld [vmem:[%s22016_s5 + $0x488] sm:$0xff]  ;;  %v15903_v34 = vpack.c.bf16 %v12805_v15, %v12801_v53  ;;  %v12828_v53 = vld [vmem:[%s22016_s5 + $0x520] sm:$0xff] }
0x126d   :  { %15860 = vmatprep.subr.bf16.mxu1 %v15859_v44  ;;  %15892 = vmatprep.subr.bf16.mxu0 %v15891_v6  ;;  %v12813_v44 = vld [vmem:[%s22016_s5 + $0x4a8] sm:$0xff]  ;;  %v12811_v6 = vld [vmem:[%s22016_s5 + $0x498] sm:$0xff]  ;;  %v15917_v39 = vpack.c.bf16 %v12828_v53, %v12824_v49 }
0x126e   :  { %v15907_v1 = vpack.c.bf16 %v12813_v44, %v12809_v13  ;;  %v12861_v49 = vld [vmem:[%s22016_s5 + $0x628] sm:$0xff]  ;;  %v12859_v53 = vld [vmem:[%s22016_s5 + $0x618] sm:$0xff] }
0x126f   :  { %10254 = vrot.lane.b32.xlu1 %v20005_v56, %s16823_s0 }
0x1270   :  { %15862 = vmatpush1.bf16.msra.mxu1 %v15861_v55  ;;  %15894 = vmatpush1.bf16.msra.mxu0 %v15893_v51  ;;  %v15939_v55 = vpack.c.bf16 %v12815_v5, %v12811_v6  ;;  %v12814_v51 = vld [vmem:[%s22016_s5 + $0x4b0] sm:$0xff]  ;;  %v15951_v6 = vpack.c.bf16 %v12839_v8, %v12835_v48  ;;  %v12860_v48 = vld [vmem:[%s22016_s5 + $0x620] sm:$0xff] }
0x1271   :  { %15864 = vmatprep.subr.bf16.mxu1 %v15863_v40  ;;  %15896 = vmatprep.subr.bf16.mxu0 %v15895_v29  ;;  %v12819_v40 = vld [vmem:[%s22016_s5 + $0x4d8] sm:$0xff]  ;;  %v12834_v5 = vld [vmem:[%s22016_s5 + $0x550] sm:$0xff] }
0x1272   :  { %v12823_v29 = vld [vmem:[%s22016_s5 + $0x4f8] sm:$0xff]  ;;  %v12858_v8 = vld [vmem:[%s22016_s5 + $0x610] sm:$0xff] }
0x1273   :  { %v15943_v41 = vpack.c.bf16 %v12823_v29, %v12819_v40  ;;  %10262 = vrot.lane.b32.xlu1 %v20043_v26, %s16823_s0  ;;  %v12842_v29 = vld [vmem:[%s22016_s5 + $0x590] sm:$0xff] }
0x1274   :  { %15866 = vmatpush1.bf16.msra.mxu1 %v15865_v20  ;;  %15898 = vmatpush1.bf16.msra.mxu0 %v15897_v50  ;;  %v12822_v20 = vld [vmem:[%s22016_s5 + $0x4f0] sm:$0xff]  ;;  %v12825_v50 = vld [vmem:[%s22016_s5 + $0x508] sm:$0xff] }
0x1275   :  { %15900 = vmatprep.subr.bf16.mxu1 %v15899_v46  ;;  %15932 = vmatprep.subr.bf16.mxu0 %v15931_v54  ;;  %v12827_v46 = vld [vmem:[%s22016_s5 + $0x518] sm:$0xff]  ;;  %v15915_v15 = vpack.c.bf16 %v12829_v19, %v12825_v50  ;;  %v12852_v50 = vld [vmem:[%s22016_s5 + $0x5e0] sm:$0xff] }
0x1276   :  { %v12831_v54 = vld [vmem:[%s22016_s5 + $0x538] sm:$0xff] }
0x1277   :  { %9413 = vmatmul.mubr.f32.vlgmr.msra.gmra.mrb[102].mxu1 %v19880_v23  ;;  %9490 = vmatmul.mubr.f32.vlgmr.msra.gmra.mrb[72].mxu0 %v19880_v23  ;;  %v12810_v23 = vld [vmem:[%s22016_s5 + $0x490] sm:$0xff]  ;;  %v15947_v52 = vpack.c.bf16 %v12831_v54, %v12827_v46 }
0x1278   :  { %15902 = vmatpush1.bf16.msra.mxu1 %v15901_v60  ;;  %15934 = vmatpush1.bf16.msra.mxu0 %v15933_v31  ;;  %v15941_v14 = vpack.c.bf16 %v12814_v51, %v12810_v23  ;;  %v12830_v60 = vld [vmem:[%s22016_s5 + $0x530] sm:$0xff]  ;;  %v12833_v31 = vld [vmem:[%s22016_s5 + $0x548] sm:$0xff]  ;;  %v12840_v51 = vld [vmem:[%s22016_s5 + $0x580] sm:$0xff] }
0x1279   :  { %9418 = vmatprep.mubr.f32.mxu1 %v16831_v35  ;;  %9495 = vmatprep.mubr.f32.mxu0 %v16831_v35  ;;  %v15949_v13 = vpack.c.bf16 %v12830_v60, %v12826_v22  ;;  %v15919_v44 = vpack.c.bf16 %v12837_v62, %v12833_v31  ;;  %v12850_v54 = vld [vmem:[%s22016_s5 + $0x5d0] sm:$0xff]  ;;  %v12856_v60 = vld [vmem:[%s22016_s5 + $0x600] sm:$0xff] }
0x127a   :  { %15904 = vmatprep.subr.bf16.mxu1 %v15903_v34  ;;  %15936 = vmatprep.subr.bf16.mxu0 %v15935_v43  ;;  %v12832_v34 = vld [vmem:[%s22016_s5 + $0x540] sm:$0xff] }
0x127b   :  { %9419 = vmatmul.mubr.f32.gmra.mrb[104].mxu1 %v19888_v12  ;;  %9496 = vmatmul.mubr.f32.gmra.mrb[74].mxu0 %v19888_v12  ;;  %v12818_v12 = vld [vmem:[%s22016_s5 + $0x4d0] sm:$0xff]  ;;  %v12836_v43 = vld [vmem:[%s22016_s5 + $0x560] sm:$0xff] }
0x127c   :  { %15906 = vmatpush1.bf16.msra.mxu1 %v15905_v16  ;;  %15938 = vmatpush1.bf16.msra.mxu0 %v15937_v9  ;;  %v15945_v47 = vpack.c.bf16 %v12822_v20, %v12818_v12  ;;  %v12838_v16 = vld [vmem:[%s22016_s5 + $0x570] sm:$0xff]  ;;  %v12841_v9 = vld [vmem:[%s22016_s5 + $0x588] sm:$0xff]  ;;  %v12848_v20 = vld [vmem:[%s22016_s5 + $0x5c0] sm:$0xff] }
0x127d   :  { %15908 = vmatprep.subr.bf16.mxu1 %v15907_v1  ;;  %15940 = vmatprep.subr.bf16.mxu0 %v15939_v55  ;;  %v12847_v1 = vld [vmem:[%s22016_s5 + $0x5b8] sm:$0xff]  ;;  %v15921_v55 = vpack.c.bf16 %v12836_v43, %v12832_v34  ;;  %v15953_v23 = vpack.c.bf16 %v12838_v16, %v12834_v5  ;;  %v15923_v25 = vpack.c.bf16 %v12845_v18, %v12841_v9  ;;  %v12869_v34 = vld [vmem:[%s22016_s5 + $0x668] sm:$0xff]  ;;  %v12864_v16 = vld [vmem:[%s22016_s5 + $0x640] sm:$0xff] }
0x127e   :  { %9631 = vmatprep.mubr.f32.mxu1 %v16831_v35  ;;  %9708 = vmatprep.mubr.f32.mxu0 %v16831_v35  ;;  %v15955_v40 = vpack.c.bf16 %v12847_v1, %v12843_v21  ;;  %v12867_v43 = vld [vmem:[%s22016_s5 + $0x658] sm:$0xff]  ;;  %v12868_v9 = vld [vmem:[%s22016_s5 + $0x660] sm:$0xff]  ;;  %v12866_v18 = vld [vmem:[%s22016_s5 + $0x650] sm:$0xff] }
0x127f   :  { %10599 = vrot.lane.b32.xlu1 %v19919_v17, %s16825_s1  ;;  %v12870_v21 = vld [vmem:[%s22016_s5 + $0x670] sm:$0xff]  ;;  %v12873_v1 = vld [vmem:[%s22016_s5 + $0x688] sm:$0xff] }
0x1280   :  { %15910 = vmatpush1.bf16.msra.mxu1 %v15909_v0  ;;  %15942 = vmatpush1.bf16.msra.mxu0 %v15941_v14  ;;  %v12846_v0 = vld [vmem:[%s22016_s5 + $0x5b0] sm:$0xff]  ;;  %v12849_v14 = vld [vmem:[%s22016_s5 + $0x5c8] sm:$0xff] }
0x1281   :  { %15912 = vmatprep.subr.bf16.mxu1 %v15911_v36  ;;  %15944 = vmatprep.subr.bf16.mxu0 %v15943_v41  ;;  %v12855_v36 = vld [vmem:[%s22016_s5 + $0x5f8] sm:$0xff]  ;;  %v15925_v41 = vpack.c.bf16 %v12844_v61, %v12840_v51  ;;  %v15957_v12 = vpack.c.bf16 %v12846_v0, %v12842_v29  ;;  %v15927_v19 = vpack.c.bf16 %v12853_v59, %v12849_v14  ;;  %v12877_v51 = vld [vmem:[%s22016_s5 + $0x6a8] sm:$0xff]  ;;  %v12872_v0 = vld [vmem:[%s22016_s5 + $0x680] sm:$0xff] }
0x1282   :  { %v15959_v46 = vpack.c.bf16 %v12855_v36, %v12851_v3  ;;  %v12875_v61 = vld [vmem:[%s22016_s5 + $0x698] sm:$0xff]  ;;  %v16001_v29 = vpack.c.bf16 %v12870_v21, %v12866_v18  ;;  %v12876_v14 = vld [vmem:[%s22016_s5 + $0x6a0] sm:$0xff]  ;;  %v15971_v59 = vpack.c.bf16 %v12877_v51, %v12873_v1  ;;  %v12878_v36 = vld [vmem:[%s22016_s5 + $0x6b0] sm:$0xff] }
0x1283   :  { %10607 = vrot.lane.b32.xlu1 %v19965_v63, %s16825_s1  ;;  %v12896_v21 = vld [vmem:[%s22016_s5 + $0x740] sm:$0xff]  ;;  %v12898_v51 = vld [vmem:[%s22016_s5 + $0x750] sm:$0xff] }
0x1284   :  { %15914 = vmatpush1.bf16.msra.mxu1 %v15913_v58  ;;  %15946 = vmatpush1.bf16.msra.mxu0 %v15945_v47  ;;  %v12854_v58 = vld [vmem:[%s22016_s5 + $0x5f0] sm:$0xff]  ;;  %v12857_v47 = vld [vmem:[%s22016_s5 + $0x608] sm:$0xff]  ;;  %v12900_v1 = vld [vmem:[%s22016_s5 + $0x760] sm:$0xff] }
0x1285   :  { %15916 = vmatprep.subr.bf16.mxu1 %v15915_v15  ;;  %15948 = vmatprep.subr.bf16.mxu0 %v15947_v52  ;;  %v12863_v15 = vld [vmem:[%s22016_s5 + $0x638] sm:$0xff]  ;;  %v15929_v52 = vpack.c.bf16 %v12852_v50, %v12848_v20  ;;  %v15961_v22 = vpack.c.bf16 %v12854_v58, %v12850_v54  ;;  %v15963_v31 = vpack.c.bf16 %v12861_v49, %v12857_v47  ;;  %v12880_v54 = vld [vmem:[%s22016_s5 + $0x6c0] sm:$0xff] }
0x1286   :  { %v15995_v62 = vpack.c.bf16 %v12863_v15, %v12859_v53  ;;  %v12883_v20 = vld [vmem:[%s22016_s5 + $0x6d8] sm:$0xff]  ;;  %v12884_v58 = vld [vmem:[%s22016_s5 + $0x6e0] sm:$0xff]  ;;  %v12886_v53 = vld [vmem:[%s22016_s5 + $0x6f0] sm:$0xff] }
0x1287   :  { %10615 = vrot.lane.b32.xlu1 %v20005_v56, %s16825_s1  ;;  %v12887_v50 = vld [vmem:[%s22016_s5 + $0x6f8] sm:$0xff]  ;;  %v12889_v15 = vld [vmem:[%s22016_s5 + $0x708] sm:$0xff] }
0x1288   :  { %15918 = vmatpush1.bf16.msra.mxu1 %v15917_v39  ;;  %15950 = vmatpush1.bf16.msra.mxu0 %v15949_v13  ;;  %v12862_v39 = vld [vmem:[%s22016_s5 + $0x630] sm:$0xff]  ;;  %v12865_v13 = vld [vmem:[%s22016_s5 + $0x648] sm:$0xff]  ;;  %v16007_v49 = vpack.c.bf16 %v12887_v50, %v12883_v20 }
0x1289   :  { %15920 = vmatprep.subr.bf16.mxu1 %v15919_v44  ;;  %15952 = vmatprep.subr.bf16.mxu0 %v15951_v6  ;;  %v12871_v44 = vld [vmem:[%s22016_s5 + $0x678] sm:$0xff]  ;;  %v15965_v6 = vpack.c.bf16 %v12860_v48, %v12856_v60  ;;  %v15997_v5 = vpack.c.bf16 %v12862_v39, %v12858_v8  ;;  %v12888_v48 = vld [vmem:[%s22016_s5 + $0x700] sm:$0xff]  ;;  %v12910_v20 = vld [vmem:[%s22016_s5 + $0x7b0] sm:$0xff] }
0x128a   :  { %v12895_v60 = vld [vmem:[%s22016_s5 + $0x738] sm:$0xff]  ;;  %v12892_v8 = vld [vmem:[%s22016_s5 + $0x720] sm:$0xff]  ;;  %v12913_v50 = vld [vmem:[%s22016_s5 + $0x7c8] sm:$0xff] }
0x128b   :  { %10623 = vrot.lane.b32.xlu1 %v20043_v26, %s16825_s1 }
0x128c   :  { %15922 = vmatpush1.bf16.msra.mxu1 %v15921_v55  ;;  %15954 = vmatpush1.bf16.msra.mxu0 %v15953_v23  ;;  %v15967_v55 = vpack.c.bf16 %v12869_v34, %v12865_v13  ;;  %v15999_v23 = vpack.c.bf16 %v12871_v44, %v12867_v43  ;;  %v12890_v34 = vld [vmem:[%s22016_s5 + $0x710] sm:$0xff]  ;;  %v12897_v44 = vld [vmem:[%s22016_s5 + $0x748] sm:$0xff] }
0x128d   :  { %15924 = vmatprep.subr.bf16.mxu1 %v15923_v25  ;;  %15956 = vmatprep.subr.bf16.mxu0 %v15955_v40  ;;  %v12879_v25 = vld [vmem:[%s22016_s5 + $0x6b8] sm:$0xff]  ;;  %v15969_v40 = vpack.c.bf16 %v12868_v9, %v12864_v16  ;;  %v12894_v43 = vld [vmem:[%s22016_s5 + $0x730] sm:$0xff]  ;;  %v15981_v9 = vpack.c.bf16 %v12892_v8, %v12888_v48 }
0x128e   :  { %v16003_v3 = vpack.c.bf16 %v12879_v25, %v12875_v61  ;;  %v12903_v16 = vld [vmem:[%s22016_s5 + $0x778] sm:$0xff]  ;;  %v16013_v18 = vpack.c.bf16 %v12894_v43, %v12890_v34  ;;  %v12902_v61 = vld [vmem:[%s22016_s5 + $0x770] sm:$0xff]  ;;  %v12905_v25 = vld [vmem:[%s22016_s5 + $0x788] sm:$0xff] }
0x128f   :  { %10784 = vrot.lane.b32.xlu1 %v19919_v17, %s16826_s23  ;;  %v9983_v48 = vld [vmem:[#allocation13 + $0x38] sm:$0xff] }
0x1290   :  { %15926 = vmatpush1.bf16.msra.mxu1 %v15925_v41  ;;  %15958 = vmatpush1.bf16.msra.mxu0 %v15957_v12  ;;  %v12881_v41 = vld [vmem:[%s22016_s5 + $0x6c8] sm:$0xff] }
0x1291   :  { %15928 = vmatprep.subr.bf16.mxu1 %v15927_v19  ;;  %15960 = vmatprep.subr.bf16.mxu0 %v15959_v46  ;;  %v12885_v12 = vld [vmem:[%s22016_s5 + $0x6e8] sm:$0xff]  ;;  %v15973_v19 = vpack.c.bf16 %v12876_v14, %v12872_v0  ;;  %v12911_v0 = vld [vmem:[%s22016_s5 + $0x7b8] sm:$0xff]  ;;  %v15985_v14 = vpack.c.bf16 %v12900_v1, %v12896_v21 }
0x1292   :  { %v15975_v47 = vpack.c.bf16 %v12885_v12, %v12881_v41  ;;  %v12906_v12 = vld [vmem:[%s22016_s5 + $0x790] sm:$0xff] }
0x1293   :  { %10792 = vrot.lane.b32.xlu1 %v19965_v63, %s16826_s23  ;;  %v9991_v21 = vld [vmem:[#allocation13 + $0x78] sm:$0xff] }
0x1294   :  { %15930 = vmatpush1.bf16.msra.mxu1 %v15929_v52  ;;  %15962 = vmatpush1.bf16.msra.mxu0 %v15961_v22  ;;  %v12893_v52 = vld [vmem:[%s22016_s5 + $0x728] sm:$0xff]  ;;  %v12891_v22 = vld [vmem:[%s22016_s5 + $0x718] sm:$0xff] }
0x1295   :  { %15964 = vmatprep.subr.bf16.mxu1 %v15963_v31  ;;  %15996 = vmatprep.subr.bf16.mxu0 %v15995_v62  ;;  %v15977_v31 = vpack.c.bf16 %v12884_v58, %v12880_v54  ;;  %v15979_v39 = vpack.c.bf16 %v12893_v52, %v12889_v15  ;;  %v16011_v13 = vpack.c.bf16 %v12895_v60, %v12891_v22  ;;  %v12919_v54 = vld [vmem:[%s22016_s5 + $0x7f8] sm:$0xff]  ;;  %v12914_v52 = vld [vmem:[%s22016_s5 + $0x7d0] sm:$0xff]  ;;  %v9977_v60 = vld [vmem:[#allocation13 + $0x8] sm:$0xff] }
0x1296   :  { %v12918_v22 = vld [vmem:[%s22016_s5 + $0x7f0] sm:$0xff] }
0x1297   :  { %9632 = vmatmul.mubr.f32.vlgmr.msra.gmra.mrb[102].mxu1 %v19948_v45  ;;  %9709 = vmatmul.mubr.f32.vlgmr.msra.gmra.mrb[72].mxu0 %v19948_v45  ;;  %v12874_v45 = vld [vmem:[%s22016_s5 + $0x690] sm:$0xff] }
0x1298   :  { %15966 = vmatpush1.bf16.msra.mxu1 %v15965_v6  ;;  %15998 = vmatpush1.bf16.msra.mxu0 %v15997_v5  ;;  %v16005_v46 = vpack.c.bf16 %v12878_v36, %v12874_v45  ;;  %v12901_v6 = vld [vmem:[%s22016_s5 + $0x768] sm:$0xff]  ;;  %v12899_v5 = vld [vmem:[%s22016_s5 + $0x758] sm:$0xff]  ;;  %v12908_v45 = vld [vmem:[%s22016_s5 + $0x7a0] sm:$0xff] }
0x1299   :  { %9637 = vmatprep.mubr.f32.mxu1 %v16831_v35  ;;  %9714 = vmatprep.mubr.f32.mxu0 %v16831_v35 }
0x129a   :  { %15968 = vmatprep.subr.bf16.mxu1 %v15967_v55  ;;  %16000 = vmatprep.subr.bf16.mxu0 %v15999_v23  ;;  %v15983_v55 = vpack.c.bf16 %v12901_v6, %v12897_v44  ;;  %v16015_v23 = vpack.c.bf16 %v12903_v16, %v12899_v5  ;;  %v9980_v44 = vld [vmem:[#allocation13 + $0x20] sm:$0xff]  ;;  %v9978_v6 = vld [vmem:[#allocation13 + $0x10] sm:$0xff]  ;;  %v9985_v16 = vld [vmem:[#allocation13 + $0x48] sm:$0xff] }
0x129b   :  { %9638 = vmatmul.mubr.f32.gmra.mrb[104].mxu1 %v19972_v37  ;;  %9715 = vmatmul.mubr.f32.gmra.mrb[74].mxu0 %v19972_v37  ;;  %v12882_v37 = vld [vmem:[%s22016_s5 + $0x6d0] sm:$0xff] }
0x129c   :  { %15970 = vmatpush1.bf16.msra.mxu1 %v15969_v40  ;;  %16002 = vmatpush1.bf16.msra.mxu0 %v16001_v29  ;;  %v16009_v62 = vpack.c.bf16 %v12886_v53, %v12882_v37  ;;  %v12909_v40 = vld [vmem:[%s22016_s5 + $0x7a8] sm:$0xff]  ;;  %v12907_v29 = vld [vmem:[%s22016_s5 + $0x798] sm:$0xff]  ;;  %v12916_v37 = vld [vmem:[%s22016_s5 + $0x7e0] sm:$0xff] }
0x129d   :  { %15972 = vmatprep.subr.bf16.mxu1 %v15971_v59  ;;  %16004 = vmatprep.subr.bf16.mxu0 %v16003_v3  ;;  %v16017_v59 = vpack.c.bf16 %v12902_v61, %v12898_v51  ;;  %v12904_v3 = vld [vmem:[%s22016_s5 + $0x780] sm:$0xff]  ;;  %v15987_v36 = vpack.c.bf16 %v12909_v40, %v12905_v25  ;;  %v16019_v41 = vpack.c.bf16 %v12911_v0, %v12907_v29  ;;  %v9982_v5 = vld [vmem:[#allocation13 + $0x30] sm:$0xff] }
0x129e   :  { %9858 = vmatprep.mubr.f32.mxu1 %v16831_v35  ;;  %9935 = vmatprep.mubr.f32.mxu0 %v16831_v35  ;;  %v15989_v58 = vpack.c.bf16 %v12908_v45, %v12904_v3  ;;  %v9988_v51 = vld [vmem:[#allocation13 + $0x60] sm:$0xff]  ;;  %v9986_v61 = vld [vmem:[#allocation13 + $0x50] sm:$0xff]  ;;  %v9993_v40 = vld [vmem:[#allocation13 + $0x88] sm:$0xff] }
0x129f   :  { %10800 = vrot.lane.b32.xlu1 %v20005_v56, %s16826_s23  ;;  %v9990_v25 = vld [vmem:[#allocation13 + $0x70] sm:$0xff]  ;;  %v9999_v3 = vld [vmem:[#allocation13 + $0xb8] sm:$0xff] }
0x12a0   :  { %15974 = vmatpush1.bf16.msra.mxu1 %v15973_v19  ;;  %16006 = vmatpush1.bf16.msra.mxu0 %v16005_v46  ;;  %v12917_v19 = vld [vmem:[%s22016_s5 + $0x7e8] sm:$0xff]  ;;  %v12915_v46 = vld [vmem:[%s22016_s5 + $0x7d8] sm:$0xff] }
0x12a1   :  { %15976 = vmatprep.subr.bf16.mxu1 %v15975_v47  ;;  %16008 = vmatprep.subr.bf16.mxu0 %v16007_v49  ;;  %v16021_v47 = vpack.c.bf16 %v12910_v20, %v12906_v12  ;;  %v12912_v49 = vld [vmem:[%s22016_s5 + $0x7c0] sm:$0xff]  ;;  %v15991_v53 = vpack.c.bf16 %v12917_v19, %v12913_v50  ;;  %v16023_v15 = vpack.c.bf16 %v12919_v54, %v12915_v46  ;;  %v9994_v19 = vld [vmem:[#allocation13 + $0x90] sm:$0xff] }
0x12a2   :  { %v15993_v8 = vpack.c.bf16 %v12916_v37, %v12912_v49  ;;  %v9996_v12 = vld [vmem:[#allocation13 + $0xa0] sm:$0xff]  ;;  %v9998_v46 = vld [vmem:[#allocation13 + $0xb0] sm:$0xff]  ;;  %v10001_v54 = vld [vmem:[#allocation13 + $0xc8] sm:$0xff] }
0x12a3   :  { %10808 = vrot.lane.b32.xlu1 %v20043_v26, %s16826_s23  ;;  %v16069_v37 = vpack.c.bf16 %v9998_v46, %v9994_v19  ;;  %v10026_v46 = vld [vmem:[#allocation13 + $0x190] sm:$0xff] }
0x12a4   :  { %15978 = vmatpush1.bf16.msra.mxu1 %v15977_v31  ;;  %16010 = vmatpush1.bf16.msra.mxu0 %v16009_v62  ;;  %v9981_v31 = vld [vmem:[#allocation13 + $0x28] sm:$0xff]  ;;  %v9979_v62 = vld [vmem:[#allocation13 + $0x18] sm:$0xff] }
0x12a5   :  { %15980 = vmatprep.subr.bf16.mxu1 %v15979_v39  ;;  %16012 = vmatprep.subr.bf16.mxu0 %v16011_v13  ;;  %v16025_v39 = vpack.c.bf16 %v12918_v22, %v12914_v52  ;;  %v9976_v13 = vld [vmem:[#allocation13] sm:$0xff]  ;;  %v16027_v34 = vpack.c.bf16 %v9981_v31, %v9977_v60  ;;  %v16059_v43 = vpack.c.bf16 %v9983_v48, %v9979_v62  ;;  %v10002_v60 = vld [vmem:[#allocation13 + $0xd0] sm:$0xff]  ;;  %v10009_v62 = vld [vmem:[#allocation13 + $0x108] sm:$0xff] }
0x12a6   :  { %v16029_v1 = vpack.c.bf16 %v9980_v44, %v9976_v13  ;;  %v10006_v31 = vld [vmem:[#allocation13 + $0xf0] sm:$0xff]  ;;  %v10013_v48 = vld [vmem:[#allocation13 + $0x128] sm:$0xff] }
0x12a7   :  { %11106 = vrot.lane.b32.xlu1 %v19919_v17, %s16827_s28  ;;  %v16073_v13 = vpack.c.bf16 %v10006_v31, %v10002_v60  ;;  %v16043_v44 = vpack.c.bf16 %v10013_v48, %v10009_v62  ;;  %v10038_v60 = vld [vmem:[#allocation13 + $0x1f0] sm:$0xff]  ;;  %v20622_v62 = vpop.permute.xlu0 %9965  ;;  %v20624_v48 = vpop.permute.xlu1 %9960 }
0x12a8   :  { %15982 = vmatpush1.bf16.msra.mxu1 %v15981_v9  ;;  %16014 = vmatpush1.bf16.msra.mxu0 %v16013_v18  ;;  %v9989_v9 = vld [vmem:[#allocation13 + $0x68] sm:$0xff]  ;;  %v9987_v18 = vld [vmem:[#allocation13 + $0x58] sm:$0xff] }
0x12a9   :  { %15984 = vmatprep.subr.bf16.mxu1 %v15983_v55  ;;  %16016 = vmatprep.subr.bf16.mxu0 %v16015_v23  ;;  %v16061_v55 = vpack.c.bf16 %v9982_v5, %v9978_v6  ;;  %v9984_v23 = vld [vmem:[#allocation13 + $0x40] sm:$0xff]  ;;  %v16031_v29 = vpack.c.bf16 %v9989_v9, %v9985_v16  ;;  %v16063_v0 = vpack.c.bf16 %v9991_v21, %v9987_v18  ;;  %v10010_v5 = vld [vmem:[#allocation13 + $0x110] sm:$0xff]  ;;  %v10017_v9 = vld [vmem:[#allocation13 + $0x148] sm:$0xff] }
0x12aa   :  { %v16033_v45 = vpack.c.bf16 %v9988_v51, %v9984_v23  ;;  %v10014_v16 = vld [vmem:[#allocation13 + $0x130] sm:$0xff]  ;;  %v10021_v18 = vld [vmem:[#allocation13 + $0x168] sm:$0xff]  ;;  %v10019_v21 = vld [vmem:[#allocation13 + $0x158] sm:$0xff] }
0x12ab   :  { %11114 = vrot.lane.b32.xlu1 %v19965_v63, %s16827_s28  ;;  %v16077_v23 = vpack.c.bf16 %v10014_v16, %v10010_v5  ;;  %v10016_v51 = vld [vmem:[#allocation13 + $0x140] sm:$0xff]  ;;  %v20612_v31 = vld [vmem:[%s21882_s24 + $0x70] sm:$0xff] }
0x12ac   :  { %15986 = vmatpush1.bf16.msra.mxu1 %v15985_v14  ;;  %16018 = vmatpush1.bf16.msra.mxu0 %v16017_v59  ;;  %v9997_v14 = vld [vmem:[#allocation13 + $0xa8] sm:$0xff]  ;;  %v9995_v59 = vld [vmem:[#allocation13 + $0x98] sm:$0xff] }
0x12ad   :  { %15988 = vmatprep.subr.bf16.mxu1 %v15987_v36  ;;  %16020 = vmatprep.subr.bf16.mxu0 %v16019_v41  ;;  %v16065_v36 = vpack.c.bf16 %v9990_v25, %v9986_v61  ;;  %v9992_v41 = vld [vmem:[#allocation13 + $0x80] sm:$0xff]  ;;  %v16035_v20 = vpack.c.bf16 %v9997_v14, %v9993_v40  ;;  %v16067_v50 = vpack.c.bf16 %v9999_v3, %v9995_v59  ;;  %v10025_v14 = vld [vmem:[#allocation13 + $0x188] sm:$0xff]  ;;  %v10027_v3 = vld [vmem:[#allocation13 + $0x198] sm:$0xff] }
0x12ae   :  { %v16037_v49 = vpack.c.bf16 %v9996_v12, %v9992_v41  ;;  %v10020_v61 = vld [vmem:[#allocation13 + $0x160] sm:$0xff]  ;;  %v16047_v25 = vpack.c.bf16 %v10021_v18, %v10017_v9  ;;  %v10029_v59 = vld [vmem:[#allocation13 + $0x1a8] sm:$0xff] }
0x12af   :  { %11122 = vrot.lane.b32.xlu1 %v20005_v56, %s16827_s28  ;;  %v10024_v12 = vld [vmem:[#allocation13 + $0x180] sm:$0xff] }
0x12b0   :  { %15990 = vmatpush1.bf16.msra.mxu1 %v15989_v58  ;;  %16022 = vmatpush1.bf16.msra.mxu0 %v16021_v47  ;;  %v10005_v58 = vld [vmem:[#allocation13 + $0xe8] sm:$0xff]  ;;  %v10003_v47 = vld [vmem:[#allocation13 + $0xd8] sm:$0xff] }
0x12b1   :  { %15992 = vmatprep.subr.bf16.mxu1 %v15991_v53  ;;  %16024 = vmatprep.subr.bf16.mxu0 %v16023_v15  ;;  %v10000_v53 = vld [vmem:[#allocation13 + $0xc0] sm:$0xff]  ;;  %v16039_v52 = vpack.c.bf16 %v10005_v58, %v10001_v54  ;;  %v10030_v54 = vld [vmem:[#allocation13 + $0x1b0] sm:$0xff]  ;;  %v10033_v58 = vld [vmem:[#allocation13 + $0x1c8] sm:$0xff] }
0x12b2   :  { %v10004_v15 = vld [vmem:[#allocation13 + $0xe0] sm:$0xff]  ;;  %v16085_v10 = vpack.c.bf16 %v10030_v54, %v10026_v46 }
0x12b3   :  { %11130 = vrot.lane.b32.xlu1 %v20043_v26, %s16827_s28 }
0x12b4   :  { %15994 = vmatpush1.bf16.msra.mxu1 %v15993_v8  ;;  %16026 = vmatpush1.bf16.msra.mxu0 %v16025_v39  ;;  %v10011_v8 = vld [vmem:[#allocation13 + $0x118] sm:$0xff] }
0x12b5   :  { %16028 = vmatprep.subr.bf16.mxu1 %v16027_v34  ;;  %16060 = vmatprep.subr.bf16.mxu0 %v16059_v43  ;;  %v10015_v39 = vld [vmem:[#allocation13 + $0x138] sm:$0xff]  ;;  %v10008_v34 = vld [vmem:[#allocation13 + $0x100] sm:$0xff] }
0x12b6   :  { %v10012_v43 = vld [vmem:[#allocation13 + $0x120] sm:$0xff]  ;;  %v16075_v6 = vpack.c.bf16 %v10015_v39, %v10011_v8  ;;  %v20626_v8 = vpop.permute.xlu1 %10333  ;;  %v20628_v39 = vpop.permute.xlu0 %10335 }
0x12b7   :  { %9859 = vmatmul.mubr.f32.vlgmr.msra.gmra.mrb[102].mxu1 %v19935_v2  ;;  %9936 = vmatmul.mubr.f32.vlgmr.msra.gmra.mrb[72].mxu0 %v19935_v2  ;;  %v10007_v2 = vld [vmem:[#allocation13 + $0xf8] sm:$0xff] }
0x12b8   :  { %16030 = vmatpush1.bf16.msra.mxu1 %v16029_v1  ;;  %16062 = vmatpush1.bf16.msra.mxu0 %v16061_v55  ;;  %v16071_v22 = vpack.c.bf16 %v10007_v2, %v10003_v47  ;;  %v10023_v1 = vld [vmem:[#allocation13 + $0x178] sm:$0xff]  ;;  %v16045_v55 = vpack.c.bf16 %v10012_v43, %v10008_v34  ;;  %v10037_v47 = vld [vmem:[#allocation13 + $0x1e8] sm:$0xff] }
0x12b9   :  { %9864 = vmatprep.mubr.f32.mxu1 %v16831_v35  ;;  %9941 = vmatprep.mubr.f32.mxu0 %v16831_v35  ;;  %v16079_v40 = vpack.c.bf16 %v10023_v1, %v10019_v21  ;;  %v10035_v2 = vld [vmem:[#allocation13 + $0x1d8] sm:$0xff] }
0x12ba   :  { %16032 = vmatprep.subr.bf16.mxu1 %v16031_v29  ;;  %16064 = vmatprep.subr.bf16.mxu0 %v16063_v0  ;;  %v10018_v29 = vld [vmem:[#allocation13 + $0x150] sm:$0xff] }
0x12bb   :  { %9865 = vmatmul.mubr.f32.gmra.mrb[104].mxu1 %v19957_v32  ;;  %9942 = vmatmul.mubr.f32.gmra.mrb[74].mxu0 %v19957_v32  ;;  %v16041_v32 = vpack.c.bf16 %v10004_v15, %v10000_v53  ;;  %v10022_v0 = vld [vmem:[#allocation13 + $0x170] sm:$0xff]  ;;  %v16055_v53 = vpack.c.bf16 %v10037_v47, %v10033_v58 }
0x12bc   :  { %16034 = vmatpush1.bf16.msra.mxu1 %v16033_v45  ;;  %16066 = vmatpush1.bf16.msra.mxu0 %v16065_v36  ;;  %v10031_v45 = vld [vmem:[#allocation13 + $0x1b8] sm:$0xff]  ;;  %v16049_v36 = vpack.c.bf16 %v10020_v61, %v10016_v51  ;;  %v16081_v41 = vpack.c.bf16 %v10022_v0, %v10018_v29 }
0x12bd   :  { %16036 = vmatprep.subr.bf16.mxu1 %v16035_v20  ;;  %16068 = vmatprep.subr.bf16.mxu0 %v16067_v50  ;;  %v10028_v20 = vld [vmem:[#allocation13 + $0x1a0] sm:$0xff]  ;;  %v16051_v50 = vpack.c.bf16 %v10029_v59, %v10025_v14  ;;  %v16083_v19 = vpack.c.bf16 %v10031_v45, %v10027_v3 }
0x12be   :  { %10104 = vmatprep.mubr.f32.mxu1 %v16831_v35  ;;  %10181 = vmatprep.mubr.f32.mxu0 %v16831_v35 }
0x12bf   :  { %11291 = vrot.lane.b32.xlu1 %v19919_v17, %s16828_s15  ;;  %v16053_v17 = vpack.c.bf16 %v10028_v20, %v10024_v12 }
0x12c0   :  { %16038 = vmatpush1.bf16.msra.mxu1 %v16037_v49  ;;  %16070 = vmatpush1.bf16.msra.mxu0 %v16069_v37  ;;  %v10039_v49 = vld [vmem:[#allocation13 + $0x1f8] sm:$0xff]  ;;  %v10032_v37 = vld [vmem:[#allocation13 + $0x1c0] sm:$0xff] }
0x12c1   :  { %16040 = vmatprep.subr.bf16.mxu1 %v16039_v52  ;;  %16072 = vmatprep.subr.bf16.mxu0 %v16071_v22  ;;  %v16087_v15 = vpack.c.bf16 %v10039_v49, %v10035_v2  ;;  %v10036_v52 = vld [vmem:[#allocation13 + $0x1e0] sm:$0xff]  ;;  %v10034_v22 = vld [vmem:[#allocation13 + $0x1d0] sm:$0xff]  ;;  %v11150_v2 = vld [vmem:[#allocation3 + $0x14] sm:$0xf] }
0x12c2   :  { %v16089_v7 = vpack.c.bf16 %v10038_v60, %v10034_v22 }
0x12c3   :  { %11299 = vrot.lane.b32.xlu1 %v19965_v63, %s16828_s15  ;;  %v16057_v63 = vpack.c.bf16 %v10036_v52, %v10032_v37  ;;  %v20698_v37 = vrot.slane %v11150_v2, %v17324_v38 }
0x12c4   :  { %16042 = vmatpush1.bf16.msra.mxu1 %v16041_v32  ;;  %16074 = vmatpush1.bf16.msra.mxu0 %v16073_v13  ;;  %v20630_v32 = vpop.permute.xlu1 %10341  ;;  %v20632_v13 = vpop.permute.xlu0 %10343 }
0x12c5   :  { %16044 = vmatprep.subr.bf16.mxu1 %v16043_v44  ;;  %16076 = vmatprep.subr.bf16.mxu0 %v16075_v6  ;;  %22022 = vst [vmem:[#allocation26_spill] sm:$0xff] %v20698_v37 }
0x12c7   :  { %11307 = vrot.lane.b32.xlu1 %v20005_v56, %s16828_s15  ;;  %v16608_v56 = vld [vmem:[%s21882_s24 + $0x40] sm:$0xff] }
0x12c8   :  { %16046 = vmatpush1.bf16.msra.mxu1 %v16045_v55  ;;  %16078 = vmatpush1.bf16.msra.mxu0 %v16077_v23  ;;  %v20636_v34 = vpop.permute.xlu0 %10351 }
0x12c9   :  { %16048 = vmatprep.subr.bf16.mxu1 %v16047_v25  ;;  %16080 = vmatprep.subr.bf16.mxu0 %v16079_v40 }
0x12cb   :  { %11315 = vrot.lane.b32.xlu1 %v20043_v26, %s16828_s15 }
0x12cc   :  { %16050 = vmatpush1.bf16.msra.mxu1 %v16049_v36  ;;  %16082 = vmatpush1.bf16.msra.mxu0 %v16081_v41  ;;  %v20640_v43 = vpop.permute.xlu0 %10359 }
0x12cd   :  { %16052 = vmatprep.subr.bf16.mxu1 %v16051_v50  ;;  %16084 = vmatprep.subr.bf16.mxu0 %v16083_v19 }
0x12cf   :  { %11476 = vrot.lane.b32.xlu1 %v16608_v56, %s16829_s7 }
0x12d0   :  { %16054 = vmatpush1.bf16.msra.mxu1 %v16053_v17  ;;  %16086 = vmatpush1.bf16.msra.mxu0 %v16085_v10  ;;  %v20644_v6 = vpop.permute.xlu0 %10240  ;;  %v20695_v10 = vrot.slane %v11150_v2, %v17318_v33 }
0x12d1   :  { %16056 = vmatprep.subr.bf16.mxu1 %v16055_v53  ;;  %16088 = vmatprep.subr.bf16.mxu0 %v16087_v15 }
0x12d2   :  { %22021 = vst [vmem:[#allocation25_spill] sm:$0xff] %v20695_v10 }
0x12d4   :  { %16058 = vmatpush1.bf16.msra.mxu1 %v16057_v63  ;;  %16090 = vmatpush1.bf16.msra.mxu0 %v16089_v7  ;;  %v20648_v16 = vpop.permute.xlu0 %10248  ;;  %v20711_v7 = vrot.slane %v11150_v2, %v17310_v28 }
0x12d6   :  { %22025 = vst [vmem:[#allocation29_spill] sm:$0xff] %v20711_v7 }
0x12d7   :  { %10105 = vmatmul.mubr.f32.vlgmr.msra.gmra.mrb[102].mxu1 %v19040_v11  ;;  %10182 = vmatmul.mubr.f32.vlgmr.msra.gmra.mrb[72].mxu0 %v19040_v11  ;;  %v20598_v11 = vld [vmem:[%s21882_s24 + $0x68] sm:$0xff] }
0x12d8   :  { %10110 = vmatprep.mubr.f32.mxu1 %v16831_v35  ;;  %10187 = vmatprep.mubr.f32.mxu0 %v16831_v35  ;;  %v20591_v35 = vld [vmem:[%s21882_s24 + $0x48] sm:$0xff]  ;;  %v20652_v18 = vpop.permute.xlu0 %10256 }
0x12d9   :  { %11484 = vrot.lane.b32.xlu1 %v20591_v35, %s16829_s7  ;;  %11486 = vrot.lane.b32.xlu0 %v20598_v11, %s16829_s7 }
0x12db   :  { %10111 = vmatmul.mubr.f32.gmra.mrb[104].mxu1 %v19038_v4  ;;  %10188 = vmatmul.mubr.f32.gmra.mrb[74].mxu0 %v19038_v4  ;;  %v20605_v4 = vld [vmem:[%s21882_s24 + $0x50] sm:$0xff] }
0x12dc   :  { %10460 = vmatprep.mubr.bf16.mxu1 %v21896_v24  ;;  %10501 = vmatprep.mubr.bf16.mxu0 %v21896_v24  ;;  %v20656_v1 = vpop.permute.xlu0 %10264 }
0x12dd   :  { %11492 = vrot.lane.b32.xlu1 %v20605_v4, %s16829_s7  ;;  %11494 = vrot.lane.b32.xlu0 %v20612_v31, %s16829_s7 }
0x12e0   :  { %v20660_v23 = vpop.permute.xlu0 %10601 }
0x12e1   :  { %11500 = vrot.lane.b32.xlu1 %v20043_v26, %s16829_s7  ;;  %11502 = vrot.lane.b32.xlu0 %v20048_v30, %s16829_s7  ;;  %v20634_v26 = vpop.permute.xlu1 %10349 }
0x12e4   :  { %v20664_v61 = vpop.permute.xlu0 %10609 }
0x12e5   :  { %11661 = vrot.lane.b32.xlu1 %v16608_v56, %s16830_s25  ;;  %11663 = vrot.lane.b32.xlu0 %v16609_v57, %s16830_s25  ;;  %v20638_v30 = vpop.permute.xlu1 %10357 }
0x12e8   :  { %v20668_v40 = vpop.permute.xlu0 %10617 }
0x12e9   :  { %v20642_v44 = vpop.permute.xlu1 %10238 }
0x12ec   :  { %v20672_v0 = vpop.permute.xlu0 %10625 }
0x12ed   :  { %v20646_v5 = vpop.permute.xlu1 %10246 }
0x12f0   :  { %v20676_v59 = vpop.permute.xlu0 %10786 }
0x12f1   :  { %v20650_v9 = vpop.permute.xlu1 %10254 }
0x12f4   :  { %v20680_v45 = vpop.permute.xlu0 %10794 }
0x12f5   :  { %v20654_v21 = vpop.permute.xlu1 %10262 }
0x12f8   :  { %v20684_v41 = vpop.permute.xlu0 %10802 }
0x12f9   :  { %v20658_v55 = vpop.permute.xlu1 %10599  ;;  %22018 = vst [vmem:[#allocation22_spill] sm:$0xff] %v20684_v41 }
0x12fc   :  { %v20688_v20 = vpop.permute.xlu0 %10810 }
0x12fd   :  { %v20662_v51 = vpop.permute.xlu1 %10607  ;;  %22020 = vst [vmem:[#allocation24_spill] sm:$0xff] %v20688_v20  ;;  %v10273_v20 = vsel %vm236_vm10, %v20648_v16, %v20652_v18 }
0x1300   :  { %v11109_v19 = vpop.permute.xlu0 %11108 }
0x1301   :  { %v20666_v25 = vpop.permute.xlu1 %10615 }
0x1304   :  { %v11117_v54 = vpop.permute.xlu0 %11116 }
0x1305   :  { %v20670_v29 = vpop.permute.xlu1 %10623  ;;  %v11145_v17 = vsel %vm1019_vm13, %v11109_v19, %v11117_v54 }
0x1306   :  { %v20704_v22 = vmul.f32 %v20695_v10, %v11145_v17 }
0x1308   :  { %v11125_v47 = vpop.permute.xlu0 %11124  ;;  %22024 = vst [vmem:[#allocation28_spill] sm:$0xff] %v20704_v22 }
0x1309   :  { %v20674_v14 = vpop.permute.xlu1 %10784  ;;  %v11141_v57 = vsel %vm1019_vm13, %v11117_v54, %v11125_v47 }
0x130a   :  { %v20729_v41 = vmul.f32 %v20711_v7, %v11141_v57 }
0x130c   :  { %v11133_v15 = vpop.permute.xlu0 %11132  ;;  %22029 = vst [vmem:[#allocation33_spill] sm:$0xff] %v20729_v41 }
0x130d   :  { %v20678_v3 = vpop.permute.xlu1 %10792  ;;  %v11149_v63 = vsel %vm1019_vm13, %v11133_v15, %v11109_v19 }
0x1310   :  { %v11294_v19 = vpop.permute.xlu0 %11293 }
0x1311   :  { %v20682_v36 = vpop.permute.xlu1 %10800 }
0x1312   :  { %22017 = vst [vmem:[#allocation21_spill] sm:$0xff] %v20682_v36 }
0x1315   :  { %v20686_v12 = vpop.permute.xlu1 %10808 }
0x1316   :  { %22019 = vst [vmem:[#allocation23_spill] sm:$0xff] %v20686_v12  ;;  %v10641_v12 = vsel %vm549_vm11, %v20670_v29, %v20658_v55 }
0x1319   :  { %v11107_v50 = vpop.permute.xlu1 %11106 }
0x131d   :  { %v11115_v46 = vpop.permute.xlu1 %11114 }
0x131e   :  { %v11144_v49 = vsel %vm1019_vm13, %v11107_v50, %v11115_v46 }
0x131f   :  { %v20701_v52 = vmul.f32 %v20695_v10, %v11144_v49 }
0x1321   :  { %v11123_v58 = vpop.permute.xlu1 %11122  ;;  %22023 = vst [vmem:[#allocation27_spill] sm:$0xff] %v20701_v52  ;;  %v11302_v52 = vpop.permute.xlu0 %11301 }
0x1322   :  { %v11140_v56 = vsel %vm1019_vm13, %v11115_v46, %v11123_v58  ;;  %v20732_v46 = vrot.slane %v11150_v2, %v17331_v42 }
0x1323   :  { %v20726_v10 = vmul.f32 %v20711_v7, %v11140_v56 }
0x1324   :  { %22030 = vst [vmem:[#allocation34_spill] sm:$0xff] %v20732_v46 }
0x1325   :  { %v11131_v53 = vpop.permute.xlu1 %11130  ;;  %22028 = vst [vmem:[#allocation32_spill] sm:$0xff] %v20726_v10  ;;  %v11310_v22 = vpop.permute.xlu0 %11309 }
0x1326   :  { %v11148_v60 = vsel %vm1019_vm13, %v11131_v53, %v11107_v50  ;;  %v20723_v50 = vmul.f32 %v20698_v37, %v11149_v63  ;;  %v11136_v54 = vsel %vm1019_vm13, %v11123_v58, %v11131_v53 }
0x1327   :  { %v20718_v49 = vmul.f32 %v20698_v37, %v11148_v60  ;;  %v11137_v60 = vsel %vm1019_vm13, %v11125_v47, %v11133_v15  ;;  %v20741_v17 = vmul.f32 %v20732_v46, %v11136_v54  ;;  %v11335_v47 = vld [vmem:[#allocation3 + $0x18] sm:$0xf]  ;;  %v11330_v54 = vsel %vm1184_vm14, %v11294_v19, %v11302_v52 }
0x1328   :  { %22027 = vst [vmem:[#allocation31_spill] sm:$0xff] %v20723_v50  ;;  %v20744_v56 = vmul.f32 %v20732_v46, %v11137_v60  ;;  %v20755_v60 = vrot.slane %v11335_v47, %v17318_v33  ;;  %v20758_v63 = vrot.slane %v11335_v47, %v17324_v38  ;;  %v20771_v10 = vrot.slane %v11335_v47, %v17310_v28 }
0x1329   :  { %22026 = vst [vmem:[#allocation30_spill] sm:$0xff] %v20718_v49  ;;  %22031 = vst [vmem:[#allocation35_spill] sm:$0xff] %v20741_v17  ;;  %v11318_v2 = vpop.permute.xlu0 %11317  ;;  %v11326_v46 = vsel %vm1184_vm14, %v11302_v52, %v11310_v22 }
0x132a   :  { %22032 = vst [vmem:[#allocation36_spill] sm:$0xff] %v20744_v56  ;;  %22033 = vst [vmem:[#allocation37_spill] sm:$0xff] %v20755_v60  ;;  %v20764_v58 = vmul.f32 %v20755_v60, %v11330_v54  ;;  %v11334_v50 = vsel %vm1184_vm14, %v11318_v2, %v11294_v19  ;;  %v20789_v7 = vmul.f32 %v20771_v10, %v11326_v46 }
0x132b   :  { %22034 = vst [vmem:[#allocation38_spill] sm:$0xff] %v20758_v63  ;;  %22037 = vst [vmem:[#allocation41_spill] sm:$0xff] %v20771_v10 }
0x132c   :  { %22036 = vst [vmem:[#allocation40_spill] sm:$0xff] %v20764_v58  ;;  %22041 = vst [vmem:[#allocation45_spill] sm:$0xff] %v20789_v7 }
0x132d   :  { %v11479_v19 = vpop.permute.xlu0 %11478 }
0x1331   :  { %v11292_v24 = vpop.permute.xlu1 %11291 }
0x1335   :  { %v11300_v57 = vpop.permute.xlu1 %11299 }
0x1336   :  { %v11329_v15 = vsel %vm1184_vm14, %v11292_v24, %v11300_v57 }
0x1337   :  { %v20761_v17 = vmul.f32 %v20755_v60, %v11329_v15 }
0x1339   :  { %v11308_v53 = vpop.permute.xlu1 %11307  ;;  %22035 = vst [vmem:[#allocation39_spill] sm:$0xff] %v20761_v17 }
0x133a   :  { %v11325_v41 = vsel %vm1184_vm14, %v11300_v57, %v11308_v53  ;;  %v20792_v57 = vrot.slane %v11335_v47, %v17331_v42 }
0x133b   :  { %v20786_v37 = vmul.f32 %v20771_v10, %v11325_v41 }
0x133c   :  { %22042 = vst [vmem:[#allocation46_spill] sm:$0xff] %v20792_v57 }
0x133d   :  { %v11316_v49 = vpop.permute.xlu1 %11315  ;;  %22040 = vst [vmem:[#allocation44_spill] sm:$0xff] %v20786_v37 }
0x133e   :  { %v11333_v56 = vsel %vm1184_vm14, %v11316_v49, %v11292_v24  ;;  %v20783_v24 = vmul.f32 %v20758_v63, %v11334_v50  ;;  %v11321_v52 = vsel %vm1184_vm14, %v11308_v53, %v11316_v49 }
0x133f   :  { %v20778_v15 = vmul.f32 %v20758_v63, %v11333_v56  ;;  %v11322_v56 = vsel %vm1184_vm14, %v11310_v22, %v11318_v2  ;;  %v20801_v54 = vmul.f32 %v20792_v57, %v11321_v52  ;;  %v11520_v22 = vld [vmem:[#allocation3 + $0x1c] sm:$0xf] }
0x1340   :  { %22039 = vst [vmem:[#allocation43_spill] sm:$0xff] %v20783_v24  ;;  %v20804_v41 = vmul.f32 %v20792_v57, %v11322_v56  ;;  %v20815_v56 = vrot.slane %v11520_v22, %v17318_v33  ;;  %v20818_v50 = vrot.slane %v11520_v22, %v17324_v38  ;;  %v20831_v37 = vrot.slane %v11520_v22, %v17310_v28  ;;  %v21087_v63 = vld [vmem:[%s21882_s24 + $0x78] sm:$0xff] }
0x1341   :  { %22038 = vst [vmem:[#allocation42_spill] sm:$0xff] %v20778_v15  ;;  %v11477_v60 = vpop.permute.xlu1 %11476  ;;  %22043 = vst [vmem:[#allocation47_spill] sm:$0xff] %v20801_v54 }
0x1342   :  { %22044 = vst [vmem:[#allocation48_spill] sm:$0xff] %v20804_v41  ;;  %22045 = vst [vmem:[#allocation49_spill] sm:$0xff] %v20815_v56 }
0x1343   :  { %22046 = vst [vmem:[#allocation50_spill] sm:$0xff] %v20818_v50  ;;  %22049 = vst [vmem:[#allocation53_spill] sm:$0xff] %v20831_v37 }
0x1344   :  { %22073 = vst [vmem:[#allocation76_spill] sm:$0xff] %v21087_v63 }
0x134b   :  { %v11485_v46 = vpop.permute.xlu1 %11484  ;;  %v11487_v17 = vpop.permute.xlu0 %11486 }
0x134c   :  { %v11514_v2 = vsel %vm1349_vm15, %v11477_v60, %v11485_v46  ;;  %v11515_v52 = vsel %vm1349_vm15, %v11479_v19, %v11487_v17 }
0x134d   :  { %v20821_v54 = vmul.f32 %v20815_v56, %v11514_v2  ;;  %v20824_v49 = vmul.f32 %v20815_v56, %v11515_v52 }
0x134f   :  { %v11493_v53 = vpop.permute.xlu1 %11492  ;;  %v11495_v58 = vpop.permute.xlu0 %11494  ;;  %22047 = vst [vmem:[#allocation51_spill] sm:$0xff] %v20821_v54  ;;  %22048 = vst [vmem:[#allocation52_spill] sm:$0xff] %v20824_v49  ;;  %v20870_v54 = vld [vmem:[#allocation3 + $0x10] sm:$0xf] }
0x1350   :  { %v11510_v7 = vsel %vm1349_vm15, %v11485_v46, %v11493_v53  ;;  %v11511_v57 = vsel %vm1349_vm15, %v11487_v17, %v11495_v58  ;;  %v20852_v46 = vrot.slane %v11520_v22, %v17331_v42  ;;  %22057 = vst [vmem:[#allocation61_spill] sm:$0xff] %v20870_v54 }
0x1351   :  { %v20849_v56 = vmul.f32 %v20831_v37, %v11511_v57  ;;  %v20882_v57 = vrot.slane %v20870_v54, %v17318_v33 }
0x1352   :  { %22054 = vst [vmem:[#allocation58_spill] sm:$0xff] %v20852_v46 }
0x1353   :  { %v11501_v15 = vpop.permute.xlu1 %11500  ;;  %v11503_v47 = vpop.permute.xlu0 %11502  ;;  %22053 = vst [vmem:[#allocation57_spill] sm:$0xff] %v20849_v56  ;;  %22060 = vst [vmem:[#allocation64_spill] sm:$0xff] %v20882_v57 }
0x1354   :  { %v11518_v41 = vsel %vm1349_vm15, %v11501_v15, %v11477_v60  ;;  %v11519_v24 = vsel %vm1349_vm15, %v11503_v47, %v11479_v19  ;;  %v20846_v19 = vmul.f32 %v20831_v37, %v11510_v7  ;;  %v11506_v17 = vsel %vm1349_vm15, %v11493_v53, %v11501_v15 }
0x1355   :  { %v20838_v2 = vmul.f32 %v20818_v50, %v11518_v41  ;;  %v20843_v60 = vmul.f32 %v20818_v50, %v11519_v24  ;;  %v11507_v41 = vsel %vm1349_vm15, %v11495_v58, %v11503_v47  ;;  %v20861_v24 = vmul.f32 %v20852_v46, %v11506_v17 }
0x1356   :  { %22052 = vst [vmem:[#allocation56_spill] sm:$0xff] %v20846_v19  ;;  %v20864_v7 = vmul.f32 %v20852_v46, %v11507_v41  ;;  %v21071_v46 = vld [vmem:[%s21882_s24 + $0x58] sm:$0xff] }
0x1357   :  { %22050 = vst [vmem:[#allocation54_spill] sm:$0xff] %v20838_v2  ;;  %22051 = vst [vmem:[#allocation55_spill] sm:$0xff] %v20843_v60 }
0x1358   :  { %22055 = vst [vmem:[#allocation59_spill] sm:$0xff] %v20861_v24  ;;  %22056 = vst [vmem:[#allocation60_spill] sm:$0xff] %v20864_v7 }
0x1359   :  { %22070 = vst [vmem:[#allocation74_spill] sm:$0xff] %v21071_v46 }
0x13aa   :  { %v10106_v15 = vpop.f32.mrb[102].mxu1  ;;  %v10183_v53 = vpop.f32.mrb[72].mxu0 }
0x13ab   :  { %v16099_v58 = vadd.f32 %v10106_v15, %v20624_v48  ;;  %v16103_v47 = vadd.f32 %v10183_v53, %v20624_v48  ;;  %v10108_v52 = vpop.f32.mrb[103].mxu1  ;;  %v10185_v17 = vpop.f32.mrb[73].mxu0 }
0x13ac   :  { %v20875_v49 = vadd.f32 %v10108_v52, %v20624_v48  ;;  %v20878_v41 = vadd.f32 %v10185_v17, %v20624_v48  ;;  %v20893_v52 = vrot.slane %v20870_v54, %v17331_v42 }
0x13ad   :  { %10202 = vst [vmem:[%s21882_s24] sm:$0xff] %v16099_v58  ;;  %10204 = vst [vmem:[%s21882_s24 + $0x10] sm:$0xff] %v16103_v47  ;;  %10329 = vrot.lane.b32.xlu1 %v16099_v58, %s16822_s4  ;;  %v20912_v60 = vmul.f32 %v16099_v58, %v20882_v57 }
0x13ae   :  { %22058 = vst [vmem:[#allocation62_spill] sm:$0xff] %v20875_v49  ;;  %22059 = vst [vmem:[#allocation63_spill] sm:$0xff] %v20878_v41  ;;  %v10112_v48 = vpop.f32.mrb[104].mxu1  ;;  %v10189_v15 = vpop.f32.mrb[74].mxu0 }
0x13af   :  { %22061 = vst [vmem:[#allocation65_spill] sm:$0xff] %v20893_v52  ;;  %10203 = vst [vmem:[%s21882_s24 + $0x8] sm:$0xff] %v20875_v49  ;;  %v16101_v53 = vadd.f32 %v10112_v48, %v20622_v62  ;;  %v16105_v17 = vadd.f32 %v10189_v15, %v20622_v62  ;;  %v10114_v22 = vpop.f32.mrb[105].mxu1  ;;  %v10191_v24 = vpop.f32.mrb[75].mxu0 }
0x13b0   :  { %10205 = vst [vmem:[%s21882_s24 + $0x18] sm:$0xff] %v20878_v41  ;;  %v20906_v7 = vadd.f32 %v10114_v22, %v20622_v62  ;;  %v20909_v2 = vadd.f32 %v10191_v24, %v20622_v62  ;;  %22064 = vst [vmem:[#allocation68_spill] sm:$0xff] %v20912_v60  ;;  %v20926_v62 = vmul.f32 %v16103_v47, %v20893_v52 }
0x13b1   :  { %10206 = vst [vmem:[%s21882_s24 + $0x20] sm:$0xff] %v16101_v53  ;;  %10208 = vst [vmem:[%s21882_s24 + $0x30] sm:$0xff] %v16105_v17  ;;  %10345 = vrot.lane.b32.xlu1 %v16103_v47, %s16822_s4  ;;  %10331 = vrot.lane.b32.xlu0 %v16101_v53, %s16822_s4  ;;  %v20923_v22 = vmul.f32 %v16101_v53, %v20882_v57  ;;  %v20929_v24 = vmul.f32 %v16105_v17, %v20893_v52 }
0x13b2   :  { %22062 = vst [vmem:[#allocation66_spill] sm:$0xff] %v20906_v7  ;;  %22063 = vst [vmem:[#allocation67_spill] sm:$0xff] %v20909_v2 }
0x13b3   :  { %22065 = vst [vmem:[#allocation69_spill] sm:$0xff] %v20923_v22  ;;  %22066 = vst [vmem:[#allocation70_spill] sm:$0xff] %v20926_v62 }
0x13b4   :  { %22067 = vst [vmem:[#allocation71_spill] sm:$0xff] %v20929_v24  ;;  %10207 = vst [vmem:[%s21882_s24 + $0x28] sm:$0xff] %v20906_v7 }
0x13b5   :  { %10209 = vst [vmem:[%s21882_s24 + $0x38] sm:$0xff] %v20909_v2  ;;  %10234 = vrot.lane.b32.xlu1 %v16099_v58, %s16823_s0  ;;  %10347 = vrot.lane.b32.xlu0 %v16105_v17, %s16822_s4 }
0x13b9   :  { %10250 = vrot.lane.b32.xlu1 %v16103_v47, %s16823_s0  ;;  %10236 = vrot.lane.b32.xlu0 %v16101_v53, %s16823_s0 }
0x13bd   :  { %10595 = vrot.lane.b32.xlu1 %v16099_v58, %s16825_s1  ;;  %10252 = vrot.lane.b32.xlu0 %v16105_v17, %s16823_s0 }
0x13c1   :  { %10611 = vrot.lane.b32.xlu1 %v16103_v47, %s16825_s1  ;;  %10597 = vrot.lane.b32.xlu0 %v16101_v53, %s16825_s1 }
0x13c5   :  { %10780 = vrot.lane.b32.xlu1 %v16099_v58, %s16826_s23  ;;  %10613 = vrot.lane.b32.xlu0 %v16105_v17, %s16825_s1 }
0x13c9   :  { %10796 = vrot.lane.b32.xlu1 %v16103_v47, %s16826_s23  ;;  %10782 = vrot.lane.b32.xlu0 %v16101_v53, %s16826_s23 }
0x13cd   :  { %11102 = vrot.lane.b32.xlu1 %v16099_v58, %s16827_s28  ;;  %10798 = vrot.lane.b32.xlu0 %v16105_v17, %s16826_s23 }
0x13d1   :  { %11118 = vrot.lane.b32.xlu1 %v16103_v47, %s16827_s28  ;;  %11104 = vrot.lane.b32.xlu0 %v16101_v53, %s16827_s28 }
0x13d5   :  { %11287 = vrot.lane.b32.xlu1 %v16099_v58, %s16828_s15  ;;  %11120 = vrot.lane.b32.xlu0 %v16105_v17, %s16827_s28 }
0x13d9   :  { %11303 = vrot.lane.b32.xlu1 %v16103_v47, %s16828_s15  ;;  %11289 = vrot.lane.b32.xlu0 %v16101_v53, %s16828_s15 }
0x13dd   :  { %11472 = vrot.lane.b32.xlu1 %v16099_v58, %s16829_s7  ;;  %11305 = vrot.lane.b32.xlu0 %v16105_v17, %s16828_s15 }
0x13e1   :  { %11488 = vrot.lane.b32.xlu1 %v16103_v47, %s16829_s7  ;;  %11474 = vrot.lane.b32.xlu0 %v16101_v53, %s16829_s7 }
0x13e5   :  { %11657 = vrot.lane.b32.xlu1 %v16099_v58, %s16830_s25  ;;  %11490 = vrot.lane.b32.xlu0 %v16105_v17, %s16829_s7 }
0x13e9   :  { %11673 = vrot.lane.b32.xlu1 %v16103_v47, %s16830_s25  ;;  %11659 = vrot.lane.b32.xlu0 %v16101_v53, %s16830_s25 }
0x13ed   :  { %10337 = vrot.lane.b32.xlu1 %v20875_v49, %s16822_s4  ;;  %11675 = vrot.lane.b32.xlu0 %v16105_v17, %s16830_s25 }
0x13f1   :  { %10353 = vrot.lane.b32.xlu1 %v20878_v41, %s16822_s4  ;;  %10339 = vrot.lane.b32.xlu0 %v20906_v7, %s16822_s4 }
0x13f5   :  { %10242 = vrot.lane.b32.xlu1 %v20875_v49, %s16823_s0  ;;  %10355 = vrot.lane.b32.xlu0 %v20909_v2, %s16822_s4 }
0x13f9   :  { %10258 = vrot.lane.b32.xlu1 %v20878_v41, %s16823_s0  ;;  %10244 = vrot.lane.b32.xlu0 %v20906_v7, %s16823_s0 }
0x13fd   :  { %10603 = vrot.lane.b32.xlu1 %v20875_v49, %s16825_s1  ;;  %10260 = vrot.lane.b32.xlu0 %v20909_v2, %s16823_s0 }
0x1401   :  { %10619 = vrot.lane.b32.xlu1 %v20878_v41, %s16825_s1  ;;  %10605 = vrot.lane.b32.xlu0 %v20906_v7, %s16825_s1 }
0x1405   :  { %10788 = vrot.lane.b32.xlu1 %v20875_v49, %s16826_s23  ;;  %10621 = vrot.lane.b32.xlu0 %v20909_v2, %s16825_s1 }
0x1409   :  { %10804 = vrot.lane.b32.xlu1 %v20878_v41, %s16826_s23  ;;  %10790 = vrot.lane.b32.xlu0 %v20906_v7, %s16826_s23 }
0x140d   :  { %11669 = vrot.lane.b32.xlu1 %v20591_v35, %s16830_s25  ;;  %10806 = vrot.lane.b32.xlu0 %v20909_v2, %s16826_s23  ;;  %v21018_v35 = vpop.permute.xlu1 %11661 }
0x140e   :  { %22068 = vst [vmem:[#allocation72_spill] sm:$0xff] %v21018_v35 }
0x1411   :  { %11110 = vrot.lane.b32.xlu1 %v20875_v49, %s16827_s28  ;;  %11671 = vrot.lane.b32.xlu0 %v20598_v11, %s16830_s25  ;;  %v21024_v11 = vpop.permute.xlu0 %11663 }
0x1412   :  { %22069 = vst [vmem:[#allocation73_spill] sm:$0xff] %v21024_v11 }
0x1415   :  { %11126 = vrot.lane.b32.xlu1 %v20878_v41, %s16827_s28  ;;  %11679 = vrot.lane.b32.xlu0 %v20612_v31, %s16830_s25 }
0x1419   :  { %11295 = vrot.lane.b32.xlu1 %v20875_v49, %s16828_s15  ;;  %11112 = vrot.lane.b32.xlu0 %v20906_v7, %s16827_s28 }
0x141d   :  { %11311 = vrot.lane.b32.xlu1 %v20878_v41, %s16828_s15  ;;  %11128 = vrot.lane.b32.xlu0 %v20909_v2, %s16827_s28  ;;  %s22071_s28 = sld [smem:[#allocation113_spill]] }
0x141f   :  { %v21026_v58 = vpop.permute.xlu1 %10329 }
0x1421   :  { %11480 = vrot.lane.b32.xlu1 %v20875_v49, %s16829_s7  ;;  %11297 = vrot.lane.b32.xlu0 %v20906_v7, %s16828_s15 }
0x1423   :  { %v21032_v31 = vpop.permute.xlu1 %10345  ;;  %v21034_v47 = vpop.permute.xlu0 %10331 }
0x1425   :  { %11496 = vrot.lane.b32.xlu1 %v20878_v41, %s16829_s7  ;;  %11313 = vrot.lane.b32.xlu0 %v20909_v2, %s16828_s15 }
0x1427   :  { %v21040_v53 = vpop.permute.xlu1 %10234  ;;  %v21042_v17 = vpop.permute.xlu0 %10347 }
0x1429   :  { %11665 = vrot.lane.b32.xlu1 %v20875_v49, %s16830_s25  ;;  %11482 = vrot.lane.b32.xlu0 %v20906_v7, %s16829_s7 }
0x142b   :  { %v21048_v15 = vpop.permute.xlu1 %10250  ;;  %v21050_v48 = vpop.permute.xlu0 %10236 }
0x142d   :  { %11681 = vrot.lane.b32.xlu1 %v20878_v41, %s16830_s25  ;;  %11498 = vrot.lane.b32.xlu0 %v20909_v2, %s16829_s7 }
0x142f   :  { %v21056_v11 = vpop.permute.xlu1 %10595  ;;  %v21058_v19 = vpop.permute.xlu0 %10252 }
0x1431   :  { %11677 = vrot.lane.b32.xlu1 %v20605_v4, %s16830_s25  ;;  %11667 = vrot.lane.b32.xlu0 %v20906_v7, %s16830_s25  ;;  %v11842_v4 = vld [vmem:[%s22071_s28] sm:$0xff] }
0x1433   :  { %v21064_v56 = vpop.permute.xlu1 %10611  ;;  %v21066_v35 = vpop.permute.xlu0 %10597 }
0x1435   :  { %11685 = vrot.lane.b32.xlu1 %v21071_v46, %s16830_s25  ;;  %11683 = vrot.lane.b32.xlu0 %v20909_v2, %s16830_s25  ;;  %v10377_v2 = vld [vmem:[#allocation3 + $0x4] sm:$0xf] }
0x1437   :  { %v21080_v50 = vpop.permute.xlu1 %10780  ;;  %v21082_v37 = vpop.permute.xlu0 %10613 }
0x1438   :  { %22072 = vst [vmem:[#allocation75_spill] sm:$0xff] %v21080_v50 }
0x1439   :  { %11845 = vperm.xlu1 %16464, %v11842_v4   ;;  %11687 = vrot.lane.b32.xlu0 %v21087_v63, %s16830_s25 }
0x143b   :  { %v21091_v10 = vpop.permute.xlu1 %10796  ;;  %v21093_v62 = vpop.permute.xlu0 %10782 }
0x143c   :  { %22074 = vst [vmem:[#allocation77_spill] sm:$0xff] %v21091_v10  ;;  %22075 = vst [vmem:[#allocation78_spill] sm:$0xff] %v21093_v62 }
0x143f   :  { %v21095_v24 = vpop.permute.xlu1 %11102  ;;  %v21097_v60 = vpop.permute.xlu0 %10798 }
0x1440   :  { %22076 = vst [vmem:[#allocation79_spill] sm:$0xff] %v21095_v24  ;;  %22077 = vst [vmem:[#allocation80_spill] sm:$0xff] %v21097_v60  ;;  %v21116_v24 = vrot.slane %v10377_v2, %v17310_v28  ;;  %v10390_v60 = vrot.slane %v10377_v2, %v17331_v42 }
0x1443   :  { %v21099_v22 = vpop.permute.xlu1 %11118  ;;  %v21101_v52 = vpop.permute.xlu0 %11104 }
0x1444   :  { %22078 = vst [vmem:[#allocation81_spill] sm:$0xff] %v21099_v22  ;;  %22079 = vst [vmem:[#allocation82_spill] sm:$0xff] %v21101_v52  ;;  %v10282_v52 = vld [vmem:[#allocation3] sm:$0xf] }
0x1447   :  { %v21103_v4 = vpop.permute.xlu1 %11287  ;;  %v21105_v57 = vpop.permute.xlu0 %11120 }
0x1448   :  { %22080 = vst [vmem:[#allocation83_spill] sm:$0xff] %v21103_v4  ;;  %22081 = vst [vmem:[#allocation84_spill] sm:$0xff] %v21105_v57  ;;  %v10371_v4 = vsel %vm297_vm8, %v20626_v8, %v20630_v32 }
0x144b   :  { %v21107_v46 = vpop.permute.xlu1 %11303  ;;  %v21109_v41 = vpop.permute.xlu0 %11289 }
0x144c   :  { %22082 = vst [vmem:[#allocation85_spill] sm:$0xff] %v21107_v46  ;;  %22083 = vst [vmem:[#allocation86_spill] sm:$0xff] %v21109_v41  ;;  %v21131_v41 = vrot.slane %v10377_v2, %v17318_v33 }
0x144f   :  { %v21111_v63 = vpop.permute.xlu1 %11472  ;;  %v21113_v49 = vpop.permute.xlu0 %11305 }
0x1450   :  { %22084 = vst [vmem:[#allocation87_spill] sm:$0xff] %v21111_v63  ;;  %22085 = vst [vmem:[#allocation88_spill] sm:$0xff] %v21113_v49  ;;  %v10372_v63 = vsel %vm297_vm8, %v20628_v39, %v20632_v13  ;;  %v21142_v49 = vmul.f32 %v21116_v24, %v10371_v4 }
0x1451   :  { %v21145_v46 = vmul.f32 %v21116_v24, %v10372_v63  ;;  %v10368_v63 = vsel %vm297_vm8, %v20632_v13, %v20636_v34  ;;  %v10276_v13 = vsel %vm236_vm10, %v20642_v44, %v20646_v5 }
0x1453   :  { %v21118_v7 = vpop.permute.xlu1 %11488  ;;  %v21120_v22 = vpop.permute.xlu0 %11474 }
0x1454   :  { %22086 = vst [vmem:[#allocation89_spill] sm:$0xff] %v21118_v7  ;;  %22087 = vst [vmem:[#allocation90_spill] sm:$0xff] %v21120_v22  ;;  %v10375_v7 = vsel %vm297_vm8, %v20638_v30, %v20626_v8  ;;  %v10376_v22 = vsel %vm297_vm8, %v20640_v43, %v20628_v39  ;;  %v10367_v8 = vsel %vm297_vm8, %v20630_v32, %v20634_v26 }
0x1455   :  { %v21157_v39 = vmul.f32 %v21131_v41, %v10375_v7  ;;  %v21160_v4 = vmul.f32 %v21131_v41, %v10376_v22  ;;  %v10364_v32 = vsel %vm297_vm8, %v20636_v34, %v20640_v43  ;;  %v21178_v7 = vrot.slane %v10282_v52, %v17310_v28 }
0x1456   :  { %v21195_v34 = vrot.slane %v10282_v52, %v17324_v38  ;;  %v10280_v43 = vsel %vm236_vm10, %v20654_v21, %v20642_v44  ;;  %v10281_v22 = vsel %vm236_vm10, %v20656_v1, %v20644_v6  ;;  %v10268_v44 = vsel %vm236_vm10, %v20650_v9, %v20654_v21 }
0x1457   :  { %v21147_v57 = vpop.permute.xlu1 %11657  ;;  %v21149_v62 = vpop.permute.xlu0 %11490 }
0x1458   :  { %22088 = vst [vmem:[#allocation91_spill] sm:$0xff] %v21147_v57  ;;  %22089 = vst [vmem:[#allocation92_spill] sm:$0xff] %v21149_v62  ;;  %v21167_v57 = vrot.slane %v10377_v2, %v17324_v38  ;;  %v10363_v62 = vsel %vm297_vm8, %v20634_v26, %v20638_v30  ;;  %v10277_v2 = vsel %vm236_vm10, %v20644_v6, %v20648_v16 }
0x1459   :  { %v21189_v26 = vrot.slane %v10282_v52, %v17318_v33  ;;  %v21192_v30 = vrot.slane %v10282_v52, %v17331_v42  ;;  %v10272_v52 = vsel %vm236_vm10, %v20646_v5, %v20650_v9  ;;  %v10269_v6 = vsel %vm236_vm10, %v20652_v18, %v20656_v1 }
0x145a   :  { %v21230_v5 = vmul.f32 %v21167_v57, %v10363_v62  ;;  %v21233_v50 = vmul.f32 %v21167_v57, %v10364_v32  ;;  %v21236_v16 = vmul.f32 %v21178_v7, %v10276_v13  ;;  %v21239_v9 = vmul.f32 %v21178_v7, %v10277_v2  ;;  %v10643_v32 = vld [vmem:[#allocation3 + $0x8] sm:$0xf] }
0x145b   :  { %v21205_v36 = vpop.permute.xlu1 %11673  ;;  %v21207_v10 = vpop.permute.xlu0 %11659  ;;  %v21242_v21 = vmul.f32 %v21189_v26, %v10280_v43  ;;  %v21245_v18 = vmul.f32 %v21189_v26, %v10281_v22  ;;  %v21248_v1 = vmul.f32 %v21192_v30, %v10272_v52  ;;  %v21251_v62 = vmul.f32 %v21192_v30, %v10273_v20 }
0x145c   :  { %22090 = vst [vmem:[#allocation93_spill] sm:$0xff] %v21205_v36  ;;  %22091 = vst [vmem:[#allocation94_spill] sm:$0xff] %v21207_v10  ;;  %v21225_v10 = vmul.f32 %v10390_v60, %v10367_v8  ;;  %v21227_v36 = vmul.f32 %v10390_v60, %v10368_v63  ;;  %v21254_v8 = vmul.f32 %v21195_v34, %v10268_v44 }
0x145d   :  { %22092 = vst [vmem:[#allocation95_spill] sm:$0xff] %v21242_v21  ;;  %22093 = vst [vmem:[#allocation96_spill] sm:$0xff] %v21245_v18  ;;  %v21257_v63 = vmul.f32 %v21195_v34, %v10269_v6  ;;  %v21265_v22 = vrot.slane %v20870_v54, %v17310_v28  ;;  %v10422_v44 = vpack.c.bf16 %v21145_v46, %v21142_v49 }
0x145e   :  { %22094 = vst [vmem:[#allocation97_spill] sm:$0xff] %v21248_v1  ;;  %22095 = vst [vmem:[#allocation98_spill] sm:$0xff] %v21251_v62  ;;  %v10637_v49 = vsel %vm549_vm11, %v20658_v55, %v20662_v51  ;;  %v10638_v46 = vsel %vm549_vm11, %v20660_v23, %v20664_v61  ;;  %v10633_v55 = vsel %vm549_vm11, %v20662_v51, %v20666_v25 }
0x145f   :  { %22096 = vst [vmem:[#allocation99_spill] sm:$0xff] %v21254_v8  ;;  %22097 = vst [vmem:[#allocation100_spill] sm:$0xff] %v21257_v63  ;;  %v10338_v13 = vpop.permute.xlu1 %10337  ;;  %v21259_v2 = vpop.permute.xlu0 %11675 }
0x1460   :  { %22098 = vst [vmem:[#allocation101_spill] sm:$0xff] %v21259_v2  ;;  %22099 = vst [vmem:[#allocation102_spill] sm:$0xff] %v21265_v22  ;;  %v10369_v52 = vsel %vm297_vm8, %v21026_v58, %v10338_v13  ;;  %v21279_v2 = vrot.slane %v10643_v32, %v17310_v28  ;;  %v10365_v20 = vsel %vm297_vm8, %v10338_v13, %v21032_v31 }
0x1461   :  { %v21299_v22 = vrot.slane %v10643_v32, %v17318_v33  ;;  %v10400_v54 = vmul.f32 %v21116_v24, %v10369_v52  ;;  %v10401_v21 = vmul.f32 %v10390_v60, %v10365_v20 }
0x1462   :  { %v21313_v63 = vmul.f32 %v21279_v2, %v10637_v49  ;;  %v21316_v52 = vmul.f32 %v21279_v2, %v10638_v46 }
0x1463   :  { %v10354_v43 = vpop.permute.xlu1 %10353  ;;  %v10340_v6 = vpop.permute.xlu0 %10339 }
0x1464   :  { %v10366_v1 = vsel %vm297_vm8, %v10340_v6, %v21042_v17  ;;  %v10370_v62 = vsel %vm297_vm8, %v21034_v47, %v10340_v6  ;;  %v10373_v18 = vsel %vm297_vm8, %v10354_v43, %v21026_v58  ;;  %v10361_v20 = vsel %vm297_vm8, %v21032_v31, %v10354_v43 }
0x1465   :  { %v10404_v13 = vmul.f32 %v21116_v24, %v10370_v62  ;;  %v10405_v8 = vmul.f32 %v10390_v60, %v10366_v1  ;;  %v21326_v58 = vrot.slane %v10643_v32, %v17331_v42  ;;  %v10642_v60 = vsel %vm549_vm11, %v20672_v0, %v20660_v23 }
0x1466   :  { %v10399_v49 = vmul.f32 %v21131_v41, %v10373_v18  ;;  %v10402_v23 = vmul.f32 %v21167_v57, %v10361_v20  ;;  %v21354_v18 = vmul.f32 %v21299_v22, %v10641_v12  ;;  %v10630_v20 = vsel %vm549_vm11, %v20668_v40, %v20672_v0 }
0x1467   :  { %v10419_v24 = vpack.c.bf16 %v10405_v8, %v10401_v21  ;;  %v10243_v1 = vpop.permute.xlu1 %10242  ;;  %v10356_v62 = vpop.permute.xlu0 %10355  ;;  %v10418_v6 = vpack.c.bf16 %v10404_v13, %v10400_v54  ;;  %v21387_v0 = vmul.f32 %v21326_v58, %v10633_v55 }
0x1468   :  { %v10362_v31 = vsel %vm297_vm8, %v21042_v17, %v10356_v62  ;;  %v10374_v43 = vsel %vm297_vm8, %v10356_v62, %v21034_v47  ;;  %v10274_v54 = vsel %vm236_vm10, %v21040_v53, %v10243_v1  ;;  %v10634_v17 = vsel %vm549_vm11, %v20664_v61, %v20668_v40 }
0x1469   :  { %v10403_v21 = vmul.f32 %v21131_v41, %v10374_v43  ;;  %v10406_v51 = vmul.f32 %v21167_v57, %v10362_v31  ;;  %10428 = vmatprep.subr.bf16.mxu1 %v10418_v6  ;;  %v21357_v47 = vmul.f32 %v21299_v22, %v10642_v60  ;;  %v10270_v8 = vsel %vm236_vm10, %v10243_v1, %v21048_v15 }
0x146a   :  { %v21363_v41 = vrot.slane %v10643_v32, %v17324_v38  ;;  %v10629_v57 = vsel %vm549_vm11, %v20666_v25, %v20670_v29  ;;  %v10305_v60 = vmul.f32 %v21178_v7, %v10274_v54  ;;  %v10306_v25 = vmul.f32 %v21192_v30, %v10270_v8 }
0x146b   :  { %v10417_v46 = vpack.c.bf16 %v10403_v21, %v10399_v49  ;;  %v10259_v61 = vpop.permute.xlu1 %10258  ;;  %v10245_v13 = vpop.permute.xlu0 %10244  ;;  %v10420_v12 = vpack.c.bf16 %v10406_v51, %v10402_v23  ;;  %v21390_v6 = vmul.f32 %v21326_v58, %v10634_v17  ;;  %v10687_v54 = vpack.c.bf16 %v21357_v47, %v21354_v18  ;;  %v22122_v47 = vld [vmem:[#allocation61_spill] sm:$0xff] }
0x146c   :  { %v10271_v32 = vsel %vm236_vm10, %v10245_v13, %v21058_v19  ;;  %v10275_v1 = vsel %vm236_vm10, %v21050_v48, %v10245_v13  ;;  %v10278_v29 = vsel %vm236_vm10, %v10259_v61, %v21040_v53  ;;  %v10266_v49 = vsel %vm236_vm10, %v21048_v15, %v10259_v61 }
0x146d   :  { %v10309_v62 = vmul.f32 %v21178_v7, %v10275_v1  ;;  %v10310_v40 = vmul.f32 %v21192_v30, %v10271_v32  ;;  %10429 = vmatpush1.bf16.msra.mxu1 %v10417_v46  ;;  %10469 = vmatprep.subr.bf16.mxu0 %v10420_v12  ;;  %v21396_v31 = vmul.f32 %v21363_v41, %v10629_v57  ;;  %v21401_v7 = vld [vmem:[#allocation3 + $0xc] sm:$0xf] }
0x146e   :  { %10430 = vmatprep.subr.bf16.mxu1 %v10422_v44  ;;  %v21399_v53 = vmul.f32 %v21363_v41, %v10630_v20  ;;  %10470 = vmatpush1.bf16.msra.mxu0 %v10419_v24  ;;  %v10304_v15 = vmul.f32 %v21189_v26, %v10278_v29  ;;  %v22100_v44 = vpack.c.bf16 %v21233_v50, %v21230_v5  ;;  %v10416_v5 = vld [vmem:[#allocation14 + $0x4] sm:$0xf] }
0x146f   :  { %v10323_v30 = vpack.c.bf16 %v10310_v40, %v10306_v25  ;;  %v10604_v55 = vpop.permute.xlu1 %10603  ;;  %v10261_v43 = vpop.permute.xlu0 %10260  ;;  %v10322_v23 = vpack.c.bf16 %v10309_v62, %v10305_v60  ;;  %v10307_v51 = vmul.f32 %v21195_v34, %v10266_v49  ;;  %v22101_v50 = vpack.c.bf16 %v21160_v4, %v21157_v39 }
0x1470   :  { %10471 = vmatprep.subr.bf16.mxu0 %v22100_v44  ;;  %v10267_v21 = vsel %vm236_vm10, %v21058_v19, %v10261_v43  ;;  %v10279_v24 = vsel %vm236_vm10, %v10261_v43, %v21050_v48  ;;  %v10635_v17 = vsel %vm549_vm11, %v21056_v11, %v10604_v55  ;;  %v10689_v19 = vpack.c.bf16 %v21390_v6, %v21387_v0  ;;  %v22104_v44 = vld [vmem:[#allocation23_spill] sm:$0xff] }
0x1471   :  { %v10308_v8 = vmul.f32 %v21189_v26, %v10279_v24  ;;  %v10311_v57 = vmul.f32 %v21195_v34, %v10267_v21  ;;  %10431 = vmatpush1.bf16.msra.mxu1 %v22101_v50  ;;  %v21428_v48 = vrot.slane %v21401_v7, %v17310_v28  ;;  %v10631_v46 = vsel %vm549_vm11, %v10604_v55, %v21064_v56  ;;  %v22105_v24 = vld [vmem:[#allocation100_spill] sm:$0xff]  ;;  %v22125_v0 = vld [vmem:[#allocation67_spill] sm:$0xff] }
0x1472   :  { %10513 = vmatprep.subr.bf16.mxu1 %v10322_v23  ;;  %v10688_v26 = vpack.c.bf16 %v21316_v52, %v21313_v63  ;;  %v10822_v39 = vsel %vm714_vm12, %v20674_v14, %v20678_v3  ;;  %v22102_v34 = vpack.c.bf16 %v21227_v36, %v21225_v10  ;;  %v10690_v20 = vpack.c.bf16 %v21399_v53, %v21396_v31  ;;  %v10682_v31 = vld [vmem:[#allocation14 + $0x8] sm:$0xf] }
0x1473   :  { %v10321_v4 = vpack.c.bf16 %v10308_v8, %v10304_v15  ;;  %v10620_v61 = vpop.permute.xlu1 %10619  ;;  %v10606_v13 = vpop.permute.xlu0 %10605  ;;  %v10324_v12 = vpack.c.bf16 %v10311_v57, %v10307_v51  ;;  %v10823_v60 = vsel %vm714_vm12, %v20676_v59, %v20680_v45  ;;  %v10666_v32 = vmul.f32 %v21279_v2, %v10635_v17  ;;  %v22106_v51 = vld [vmem:[#allocation99_spill] sm:$0xff] }
0x1474   :  { %10472 = vmatpush1.bf16.msra.mxu0 %v22102_v34  ;;  %v10632_v1 = vsel %vm549_vm11, %v10606_v13, %v21082_v37  ;;  %v10636_v36 = vsel %vm549_vm11, %v21066_v35, %v10606_v13  ;;  %12920 = vmatmul.mubr.msk.bf16.vlgmr.msra.gmra.mrb[108].mxu1 %vm3894_vm3, %v10416_v5  ;;  %v10667_v10 = vmul.f32 %v21326_v58, %v10631_v46  ;;  %v22108_v8 = vld [vmem:[#allocation75_spill] sm:$0xff] }
0x1475   :  { %v10639_v25 = vsel %vm549_vm11, %v10620_v61, %v21056_v11  ;;  %v10670_v29 = vmul.f32 %v21279_v2, %v10636_v36  ;;  %v10671_v62 = vmul.f32 %v21326_v58, %v10632_v1  ;;  %10514 = vmatpush1.bf16.msra.mxu1 %v10321_v4  ;;  %v21463_v40 = vmul.f32 %v21428_v48, %v10822_v39  ;;  %v22110_v46 = vld [vmem:[#allocation95_spill] sm:$0xff]  ;;  %v10320_v4 = vld [vmem:[#allocation14] sm:$0xf]  ;;  %v22117_v1 = vld [vmem:[#allocation97_spill] sm:$0xff] }
0x1476   :  { %v21467_v49 = vrot.slane %v21401_v7, %v17318_v33  ;;  %v10627_v55 = vsel %vm549_vm11, %v21064_v56, %v10620_v61  ;;  %10554 = vmatprep.subr.bf16.mxu0 %v10324_v12  ;;  %v21474_v11 = vmul.f32 %v21428_v48, %v10823_v60  ;;  %v22103_v58 = vpack.c.bf16 %v21239_v9, %v21236_v16  ;;  %v22113_v61 = vld [vmem:[#allocation77_spill] sm:$0xff] }
0x1477   :  { %12921 = vmatmul.mubr.msk.bf16.vlgmr.msra.gmra.mrb[76].mxu0 %vm3894_vm3, %v10416_v5  ;;  %v10685_v2 = vpack.c.bf16 %v10671_v62, %v10667_v10  ;;  %v10789_v43 = vpop.permute.xlu1 %10788  ;;  %v10622_v23 = vpop.permute.xlu0 %10621  ;;  %v10684_v15 = vpack.c.bf16 %v10670_v29, %v10666_v32  ;;  %v10826_v56 = vsel %vm714_vm12, %v22104_v44, %v20674_v14  ;;  %v10665_v21 = vmul.f32 %v21299_v22, %v10639_v25  ;;  %v22109_v5 = vld [vmem:[#allocation96_spill] sm:$0xff]  ;;  %v22116_v32 = vld [vmem:[#allocation98_spill] sm:$0xff] }
0x1478   :  { %10515 = vmatprep.subr.bf16.mxu1 %v22103_v58  ;;  %10555 = vmatpush1.bf16.msra.mxu0 %v10323_v30  ;;  %v22107_v17 = vpack.c.bf16 %v22105_v24, %v22106_v51  ;;  %v10628_v16 = vsel %vm549_vm11, %v21082_v37, %v10622_v23  ;;  %v10640_v9 = vsel %vm549_vm11, %v10622_v23, %v21066_v35  ;;  %v22112_v35 = vld [vmem:[#allocation24_spill] sm:$0xff]  ;;  %v22119_v29 = vld [vmem:[#allocation22_spill] sm:$0xff] }
0x1479   :  { %v10668_v30 = vmul.f32 %v21363_v41, %v10627_v55  ;;  %v10820_v14 = vsel %vm714_vm12, %v22108_v8, %v10789_v43  ;;  %v10669_v57 = vmul.f32 %v21299_v22, %v10640_v9  ;;  %v10672_v50 = vmul.f32 %v21363_v41, %v10628_v16  ;;  %v22115_v41 = vld [vmem:[#allocation21_spill] sm:$0xff]  ;;  %v22120_v58 = vld [vmem:[#allocation80_spill] sm:$0xff] }
0x147a   :  { %10556 = vmatprep.subr.bf16.mxu0 %v22107_v17  ;;  %v22111_v39 = vpack.c.bf16 %v22109_v5, %v22110_v46  ;;  %v10841_v37 = vrot.slane %v21401_v7, %v17331_v42  ;;  %v10827_v34 = vsel %vm714_vm12, %v22112_v35, %v20676_v59  ;;  %v10816_v13 = vsel %vm714_vm12, %v10789_v43, %v22113_v61  ;;  %v22121_v43 = vld [vmem:[#allocation78_spill] sm:$0xff] }
0x147b   :  { %v22114_v22 = vmov 0   ;;  %v10818_v12 = vsel %vm714_vm12, %v20678_v3, %v22115_v41  ;;  %v10683_v60 = vpack.c.bf16 %v10669_v57, %v10665_v21  ;;  %v22118_v36 = vpack.c.bf16 %v22116_v32, %v22117_v1  ;;  %v10805_v10 = vpop.permute.xlu1 %10804  ;;  %v10791_v25 = vpop.permute.xlu0 %10790 }
0x147c   :  { %10516 = vmatpush1.bf16.msra.mxu1 %v22111_v39  ;;  %10545 = vmatprep.mubr.bf16.mxu1 %v22114_v22  ;;  %v10686_v59 = vpack.c.bf16 %v10672_v50, %v10668_v30  ;;  %v10819_v62 = vsel %vm714_vm12, %v20680_v45, %v22119_v29  ;;  %v10851_v55 = vmul.f32 %v21428_v48, %v10820_v14 }
0x147d   :  { %10694 = vmatprep.subr.bf16.mxu1 %v10684_v15  ;;  %10557 = vmatpush1.bf16.msra.mxu0 %v22118_v36  ;;  %v10817_v3 = vsel %vm714_vm12, %v10791_v25, %v22120_v58  ;;  %v10821_v23 = vsel %vm714_vm12, %v22121_v43, %v10791_v25  ;;  %v10852_v15 = vmul.f32 %v10841_v37, %v10816_v13  ;;  %v16617_v36 = vld [vmem:[%s21882_s24 + $0x68] sm:$0xff] }
0x147e   :  { %10586 = vmatprep.mubr.bf16.mxu0 %v22114_v22  ;;  %v10824_v21 = vsel %vm714_vm12, %v10805_v10, %v22108_v8  ;;  %v10855_v24 = vmul.f32 %v21428_v48, %v10821_v23  ;;  %v10856_v45 = vmul.f32 %v10841_v37, %v10817_v3  ;;  %v10845_v51 = vrot.slane %v21401_v7, %v17324_v38  ;;  %v22130_v23 = vld [vmem:[#allocation64_spill] sm:$0xff] }
0x147f   :  { %12922 = vmatmul.mubr.msk.bf16.vlgmr.msra.gmra.mrb[112].mxu1 %vm3894_vm3, %v10320_v4  ;;  %v10814_v17 = vsel %vm714_vm12, %v22115_v41, %v22104_v44  ;;  %v10812_v16 = vsel %vm714_vm12, %v22113_v61, %v10805_v10  ;;  %10735 = vmatprep.subr.bf16.mxu0 %v10686_v59  ;;  %v10815_v48 = vsel %vm714_vm12, %v22119_v29, %v22112_v35  ;;  %v21553_v7 = vpop.permute.xlu1 %11669  ;;  %v10807_v44 = vpop.permute.xlu0 %10806  ;;  %v22126_v41 = vld [vmem:[#allocation62_spill] sm:$0xff] }
0x1480   :  { %10695 = vmatpush1.bf16.msra.mxu1 %v10683_v60  ;;  %12923 = vmatmul.mubr.msk.bf16.vlgmr.msra.gmra.mrb[80].mxu0 %vm3894_vm3, %v10320_v4  ;;  %v10870_v9 = vpack.c.bf16 %v10856_v45, %v10852_v15  ;;  %v10869_v30 = vpack.c.bf16 %v10855_v24, %v10851_v55  ;;  %v10850_v8 = vmul.f32 %v21467_v49, %v10824_v21  ;;  %v22124_v4 = vld [vmem:[#allocation66_spill] sm:$0xff]  ;;  %v22131_v21 = vld [vmem:[#allocation81_spill] sm:$0xff] }
0x1481   :  { %10696 = vmatprep.subr.bf16.mxu1 %v10688_v26  ;;  %10736 = vmatpush1.bf16.msra.mxu0 %v10685_v2  ;;  %v10813_v14 = vsel %vm714_vm12, %v22120_v58, %v10807_v44  ;;  %v10825_v63 = vsel %vm714_vm12, %v10807_v44, %v22121_v43  ;;  %v10853_v52 = vmul.f32 %v10845_v51, %v10812_v16  ;;  %v22128_v59 = vld [vmem:[#allocation74_spill] sm:$0xff]  ;;  %v16618_v43 = vld [vmem:[%s21882_s24 + $0x40] sm:$0xff]  ;;  %v16620_v16 = vld [vmem:[%s21882_s24 + $0x50] sm:$0xff] }
0x1482   :  { %10737 = vmatprep.subr.bf16.mxu0 %v10690_v20  ;;  %10726 = vmatprep.mubr.bf16.mxu1 %v22114_v22  ;;  %v10854_v26 = vmul.f32 %v21467_v49, %v10825_v63  ;;  %v10857_v2 = vmul.f32 %v10845_v51, %v10813_v14  ;;  %v10858_v53 = vmul.f32 %v21467_v49, %v10826_v56  ;;  %v10867_v45 = vld [vmem:[#allocation14 + $0xc] sm:$0xf]  ;;  %v16621_v44 = vld [vmem:[%s21882_s24 + $0x70] sm:$0xff] }
0x1483   :  { %10767 = vmatprep.mubr.bf16.mxu0 %v22114_v22  ;;  %v10861_v20 = vmul.f32 %v10845_v51, %v10814_v17  ;;  %v10862_v57 = vmul.f32 %v21467_v49, %v10827_v34  ;;  %v10865_v50 = vmul.f32 %v10845_v51, %v10815_v48  ;;  %v11111_v46 = vpop.permute.xlu1 %11110  ;;  %v21576_v39 = vpop.permute.xlu0 %11671  ;;  %v10873_v56 = vpack.c.bf16 %v21474_v11, %v21463_v40  ;;  %v22123_v49 = vld [vmem:[#allocation102_spill] sm:$0xff]  ;;  %v22127_v11 = vld [vmem:[#allocation63_spill] sm:$0xff]  ;;  %v16619_v51 = vld [vmem:[%s21882_s24 + $0x60] sm:$0xff] }
0x1484   :  { %10697 = vmatpush1.bf16.msra.mxu1 %v10687_v54  ;;  %v10868_v5 = vpack.c.bf16 %v10854_v26, %v10850_v8  ;;  %v10871_v18 = vpack.c.bf16 %v10857_v2, %v10853_v52  ;;  %v10982_v54 = vrot.slane %v22122_v47, %v17324_v38  ;;  %v10992_v35 = vmul.f32 %v22124_v4, %v22123_v49  ;;  %v22132_v48 = vld [vmem:[#allocation65_spill] sm:$0xff]  ;;  %v22133_v52 = vld [vmem:[#allocation84_spill] sm:$0xff] }
0x1485   :  { %10879 = vmatprep.subr.bf16.mxu1 %v10869_v30  ;;  %10738 = vmatpush1.bf16.msra.mxu0 %v10689_v19  ;;  %v10860_v34 = vmul.f32 %v10841_v37, %v10818_v12  ;;  %v10864_v61 = vmul.f32 %v10841_v37, %v10819_v62  ;;  %v10872_v19 = vpack.c.bf16 %v10862_v57, %v10858_v53  ;;  %v16616_v12 = vld [vmem:[%s21882_s24 + $0x48] sm:$0xff]  ;;  %v22129_v62 = vld [vmem:[#allocation76_spill] sm:$0xff]  ;;  %v22137_v47 = vld [vmem:[#allocation69_spill] sm:$0xff] }
0x1486   :  { %10920 = vmatprep.subr.bf16.mxu0 %v10871_v18  ;;  %v10994_v6 = vmul.f32 %v22125_v0, %v10982_v54  ;;  %v10875_v13 = vpack.c.bf16 %v10865_v50, %v10861_v20  ;;  %v10988_v60 = vmul.f32 %v22126_v41, %v22123_v49  ;;  %v10990_v37 = vmul.f32 %v22127_v11, %v10982_v54  ;;  %v22135_v20 = vld [vmem:[#allocation82_spill] sm:$0xff] }
0x1487   :  { %12924 = vmatmul.mubr.msk.bf16.vlgmr.msra.gmra.mrb[116].mxu1 %vm3894_vm3, %v10682_v31  ;;  %v11127_v32 = vpop.permute.xlu1 %11126  ;;  %v21589_v40 = vpop.permute.xlu0 %11679  ;;  %v10996_v1 = vmul.f32 %v16616_v12, %v22123_v49  ;;  %v11000_v10 = vmul.f32 %v16617_v36, %v22123_v49  ;;  %v10998_v29 = vmul.f32 %v22128_v59, %v10982_v54  ;;  %v11002_v55 = vmul.f32 %v22129_v62, %v10982_v54  ;;  %v22138_v54 = vld [vmem:[#allocation68_spill] sm:$0xff]  ;;  %v22141_v0 = vld [vmem:[#allocation70_spill] sm:$0xff] }
0x1488   :  { %10880 = vmatpush1.bf16.msra.mxu1 %v10868_v5  ;;  %12925 = vmatmul.mubr.msk.bf16.vlgmr.msra.gmra.mrb[84].mxu0 %vm3894_vm3, %v10682_v31  ;;  %v11006_v25 = vpack.c.bf16 %v10992_v35, %v10988_v60  ;;  %v10874_v58 = vpack.c.bf16 %v10864_v61, %v10860_v34  ;;  %v11008_v3 = vpack.c.bf16 %v10994_v6, %v10990_v37  ;;  %v22134_v31 = vld [vmem:[#allocation29_spill] sm:$0xff]  ;;  %v22136_v5 = vld [vmem:[#allocation79_spill] sm:$0xff] }
0x1489   :  { %10881 = vmatprep.subr.bf16.mxu1 %v10873_v56  ;;  %10921 = vmatpush1.bf16.msra.mxu0 %v10870_v9  ;;  %v10995_v15 = vmul.f32 %v16618_v43, %v22130_v23  ;;  %v11138_v24 = vsel %vm1019_vm13, %v11111_v46, %v22131_v21  ;;  %v10999_v17 = vmul.f32 %v16619_v51, %v22130_v23  ;;  %v22140_v61 = vld [vmem:[#allocation71_spill] sm:$0xff]  ;;  %v22143_v60 = vld [vmem:[#allocation25_spill] sm:$0xff] }
0x148a   :  { %10911 = vmatprep.mubr.bf16.mxu1 %v22114_v22  ;;  %10922 = vmatprep.subr.bf16.mxu0 %v10875_v13  ;;  %v10997_v9 = vmul.f32 %v16620_v16, %v22132_v48  ;;  %v11001_v30 = vmul.f32 %v16621_v44, %v22132_v48  ;;  %v11010_v63 = vpack.c.bf16 %v11000_v10, %v10996_v1  ;;  %v22145_v1 = vld [vmem:[#allocation34_spill] sm:$0xff] }
0x148b   :  { %10952 = vmatprep.mubr.bf16.mxu0 %v22114_v22  ;;  %v11296_v8 = vpop.permute.xlu1 %11295  ;;  %v11113_v14 = vpop.permute.xlu0 %11112  ;;  %v11012_v2 = vpack.c.bf16 %v11002_v55, %v10998_v29  ;;  %v11173_v53 = vmul.f32 %v22134_v31, %v11138_v24  ;;  %v11146_v18 = vsel %vm1019_vm13, %v11127_v32, %v22136_v5  ;;  %v22139_v56 = vpack.c.bf16 %v22137_v47, %v22138_v54  ;;  %v22146_v29 = vld [vmem:[#allocation85_spill] sm:$0xff]  ;;  %v11004_v55 = vld [vmem:[#allocation14 + $0x10] sm:$0xf]  ;;  %v22156_v47 = vld [vmem:[#allocation31_spill] sm:$0xff] }
0x148c   :  { %10882 = vmatpush1.bf16.msra.mxu1 %v10872_v19  ;;  %v11139_v26 = vsel %vm1019_vm13, %v11113_v14, %v22133_v52  ;;  %v11143_v57 = vsel %vm1019_vm13, %v22135_v20, %v11113_v14  ;;  %v11009_v49 = vpack.c.bf16 %v10999_v17, %v10995_v15  ;;  %v11011_v4 = vpack.c.bf16 %v11001_v30, %v10997_v9  ;;  %v22149_v17 = vld [vmem:[#allocation86_spill] sm:$0xff]  ;;  %v22150_v9 = vld [vmem:[#allocation83_spill] sm:$0xff] }
0x148d   :  { %11016 = vmatprep.subr.bf16.mxu1 %v11006_v25  ;;  %10923 = vmatpush1.bf16.msra.mxu0 %v10874_v58  ;;  %v11177_v50 = vmul.f32 %v22134_v31, %v11139_v26  ;;  %v11142_v35 = vsel %vm1019_vm13, %v22136_v5, %v11111_v46  ;;  %v11134_v34 = vsel %vm1019_vm13, %v22131_v21, %v11127_v32  ;;  %v22144_v32 = vld [vmem:[#allocation26_spill] sm:$0xff]  ;;  %v22147_v21 = vld [vmem:[#allocation88_spill] sm:$0xff] }
0x148e   :  { %11057 = vmatprep.subr.bf16.mxu0 %v11008_v3  ;;  %v22142_v6 = vpack.c.bf16 %v22140_v61, %v22141_v0  ;;  %v11176_v11 = vmul.f32 %v22143_v60, %v11143_v57  ;;  %v11175_v12 = vmul.f32 %v22144_v32, %v11146_v18  ;;  %v11172_v25 = vmul.f32 %v22143_v60, %v11142_v35  ;;  %v22155_v5 = vld [vmem:[#allocation38_spill] sm:$0xff]  ;;  %v22160_v0 = vld [vmem:[#allocation89_spill] sm:$0xff]  ;;  %v11189_v60 = vld [vmem:[#allocation14 + $0x14] sm:$0xf] }
0x148f   :  { %12926 = vmatmul.mubr.msk.bf16.vlgmr.msra.gmra.mrb[120].mxu1 %vm3894_vm3, %v10867_v45  ;;  %v11312_v19 = vpop.permute.xlu1 %11311  ;;  %v11129_v13 = vpop.permute.xlu0 %11128  ;;  %v11191_v41 = vpack.c.bf16 %v11177_v50, %v11173_v53  ;;  %v11174_v59 = vmul.f32 %v22145_v1, %v11134_v34  ;;  %v11323_v62 = vsel %vm1184_vm14, %v11296_v8, %v22146_v29  ;;  %v11327_v30 = vsel %vm1184_vm14, %v22150_v9, %v11296_v8  ;;  %v22157_v54 = vld [vmem:[#allocation30_spill] sm:$0xff] }
0x1490   :  { %12927 = vmatmul.mubr.msk.bf16.vlgmr.msra.gmra.mrb[88].mxu0 %vm3894_vm3, %v10867_v45  ;;  %11017 = vmatpush1.bf16.msra.mxu1 %v22139_v56  ;;  %v11135_v37 = vsel %vm1019_vm13, %v22133_v52, %v11129_v13  ;;  %v11147_v46 = vsel %vm1019_vm13, %v11129_v13, %v22135_v20  ;;  %v11190_v23 = vpack.c.bf16 %v11176_v11, %v11172_v25  ;;  %v22148_v45 = vld [vmem:[#allocation41_spill] sm:$0xff]  ;;  %v22152_v52 = vld [vmem:[#allocation32_spill] sm:$0xff]  ;;  %v22162_v13 = vld [vmem:[#allocation27_spill] sm:$0xff] }
0x1491   :  { %11058 = vmatpush1.bf16.msra.mxu0 %v22142_v6  ;;  %11018 = vmatprep.subr.bf16.mxu1 %v11010_v63  ;;  %v11178_v36 = vmul.f32 %v22145_v1, %v11135_v37  ;;  %v11179_v10 = vmul.f32 %v22144_v32, %v11147_v46  ;;  %v11358_v51 = vmul.f32 %v22148_v45, %v11323_v62  ;;  %v22151_v63 = vld [vmem:[#allocation33_spill] sm:$0xff] }
0x1492   :  { %11059 = vmatprep.subr.bf16.mxu0 %v11012_v2  ;;  %11048 = vmatprep.mubr.bf16.mxu1 %v22114_v22  ;;  %v11331_v44 = vsel %vm1184_vm14, %v11312_v19, %v22150_v9  ;;  %v11319_v14 = vsel %vm1184_vm14, %v22146_v29, %v11312_v19  ;;  %v22153_v26 = vpack.c.bf16 %v22151_v63, %v22152_v52  ;;  %v22154_v20 = vld [vmem:[#allocation37_spill] sm:$0xff]  ;;  %v22161_v19 = vld [vmem:[#allocation28_spill] sm:$0xff] }
0x1493   :  { %11089 = vmatprep.mubr.bf16.mxu0 %v22114_v22  ;;  %v11481_v58 = vpop.permute.xlu1 %11480  ;;  %v11298_v3 = vpop.permute.xlu0 %11297  ;;  %v11193_v43 = vpack.c.bf16 %v11179_v10, %v11175_v12  ;;  %v11192_v15 = vpack.c.bf16 %v11178_v36, %v11174_v59  ;;  %v11360_v18 = vmul.f32 %v22155_v5, %v11331_v44  ;;  %v22158_v56 = vpack.c.bf16 %v22156_v47, %v22157_v54  ;;  %v11705_v11 = vld [vmem:[#allocation3 + $0x20] sm:$0xf]  ;;  %v22164_v36 = vld [vmem:[#allocation36_spill] sm:$0xff]  ;;  %v22165_v10 = vld [vmem:[#allocation35_spill] sm:$0xff] }
0x1494   :  { %11019 = vmatpush1.bf16.msra.mxu1 %v11009_v49  ;;  %v11324_v24 = vsel %vm1184_vm14, %v11298_v3, %v22147_v21  ;;  %v11328_v16 = vsel %vm1184_vm14, %v22149_v17, %v11298_v3  ;;  %v22159_v49 = vld [vmem:[#allocation46_spill] sm:$0xff]  ;;  %v11357_v34 = vmul.f32 %v22154_v20, %v11327_v30  ;;  %v11508_v6 = vsel %vm1349_vm15, %v11481_v58, %v22160_v0  ;;  %v22167_v59 = vld [vmem:[#allocation92_spill] sm:$0xff]  ;;  %v22168_v62 = vld [vmem:[#allocation53_spill] sm:$0xff] }
0x1495   :  { %11060 = vmatpush1.bf16.msra.mxu0 %v11011_v4  ;;  %11201 = vmatprep.subr.bf16.mxu1 %v11191_v41  ;;  %v11362_v48 = vmul.f32 %v22148_v45, %v11324_v24  ;;  %v11361_v57 = vmul.f32 %v22154_v20, %v11328_v16  ;;  %v11359_v61 = vmul.f32 %v22159_v49, %v11319_v14  ;;  %v22169_v3 = vld [vmem:[#allocation90_spill] sm:$0xff]  ;;  %v22172_v16 = vld [vmem:[#allocation44_spill] sm:$0xff]  ;;  %v22174_v14 = vld [vmem:[#allocation49_spill] sm:$0xff] }
0x1496   :  { %11242 = vmatprep.subr.bf16.mxu0 %v11193_v43  ;;  %v22163_v41 = vpack.c.bf16 %v22161_v19, %v22162_v13  ;;  %v22166_v25 = vpack.c.bf16 %v22164_v36, %v22165_v10  ;;  %v11714_v30 = vrot.slane %v11705_v11, %v17310_v28  ;;  %v22177_v20 = vld [vmem:[#allocation42_spill] sm:$0xff]  ;;  %v22180_v47 = vld [vmem:[#allocation93_spill] sm:$0xff] }
0x1497   :  { %12928 = vmatmul.mubr.msk.bf16.vlgmr.msra.gmra.mrb[124].mxu1 %vm3894_vm3, %v11004_v55  ;;  %v11497_v2 = vpop.permute.xlu1 %11496  ;;  %v11314_v31 = vpop.permute.xlu0 %11313  ;;  %v11376_v53 = vpack.c.bf16 %v11362_v48, %v11358_v51  ;;  %v11375_v12 = vpack.c.bf16 %v11361_v57, %v11357_v34  ;;  %v22179_v28 = vld [vmem:[#allocation58_spill] sm:$0xff] }
0x1498   :  { %12929 = vmatmul.mubr.msk.bf16.vlgmr.msra.gmra.mrb[92].mxu0 %vm3894_vm3, %v11004_v55  ;;  %11202 = vmatpush1.bf16.msra.mxu1 %v11190_v23  ;;  %v11320_v50 = vsel %vm1184_vm14, %v22147_v21, %v11314_v31  ;;  %v11332_v8 = vsel %vm1184_vm14, %v11314_v31, %v22149_v17  ;;  %v11543_v55 = vmul.f32 %v22168_v62, %v11508_v6  ;;  %v22170_v21 = vld [vmem:[#allocation87_spill] sm:$0xff]  ;;  %v22171_v17 = vld [vmem:[#allocation45_spill] sm:$0xff]  ;;  %v22189_v36 = vld [vmem:[#allocation94_spill] sm:$0xff] }
0x1499   :  { %11203 = vmatprep.subr.bf16.mxu1 %v22153_v26  ;;  %11243 = vmatpush1.bf16.msra.mxu0 %v11192_v15  ;;  %v11363_v4 = vmul.f32 %v22159_v49, %v11320_v50  ;;  %v11364_v35 = vmul.f32 %v22155_v5, %v11332_v8  ;;  %v21723_v15 = vrot.slane %v11705_v11, %v17318_v33  ;;  %v22175_v26 = vld [vmem:[#allocation50_spill] sm:$0xff]  ;;  %v22182_v49 = vld [vmem:[#allocation39_spill] sm:$0xff] }
0x149a   :  { %11244 = vmatprep.subr.bf16.mxu0 %v22158_v56  ;;  %11233 = vmatprep.mubr.bf16.mxu1 %v22114_v22  ;;  %v11516_v24 = vsel %vm1349_vm15, %v11497_v2, %v22170_v21  ;;  %v11512_v45 = vsel %vm1349_vm15, %v22170_v21, %v11481_v58  ;;  %v11504_v51 = vsel %vm1349_vm15, %v22160_v0, %v11497_v2  ;;  %v22181_v56 = vld [vmem:[#allocation40_spill] sm:$0xff] }
0x149b   :  { %v11666_v37 = vpop.permute.xlu1 %11665  ;;  %v11483_v46 = vpop.permute.xlu0 %11482  ;;  %11274 = vmatprep.mubr.bf16.mxu0 %v22114_v22  ;;  %v11378_v32 = vpack.c.bf16 %v11364_v35, %v11360_v18  ;;  %v11377_v1 = vpack.c.bf16 %v11363_v4, %v11359_v61  ;;  %v22173_v33 = vpack.c.bf16 %v22171_v17, %v22172_v16  ;;  %v11545_v2 = vmul.f32 %v22175_v26, %v11516_v24  ;;  %v11374_v4 = vld [vmem:[#allocation14 + $0x18] sm:$0xf]  ;;  %v22184_v35 = vld [vmem:[#allocation72_spill] sm:$0xff] }
0x149c   :  { %11204 = vmatpush1.bf16.msra.mxu1 %v22163_v41  ;;  %v11509_v29 = vsel %vm1349_vm15, %v11483_v46, %v22167_v59  ;;  %v11513_v43 = vsel %vm1349_vm15, %v22169_v3, %v11483_v46  ;;  %v21748_v31 = vrot.slane %v11705_v11, %v17331_v42  ;;  %v11542_v5 = vmul.f32 %v22174_v14, %v11512_v45  ;;  %v22186_v46 = vld [vmem:[#allocation47_spill] sm:$0xff] }
0x149d   :  { %11386 = vmatprep.subr.bf16.mxu1 %v11376_v53  ;;  %11245 = vmatpush1.bf16.msra.mxu0 %v22166_v25  ;;  %v11547_v23 = vmul.f32 %v22168_v62, %v11509_v29  ;;  %v11546_v63 = vmul.f32 %v22174_v14, %v11513_v43  ;;  %v22176_v53 = vld [vmem:[#allocation43_spill] sm:$0xff]  ;;  %v11544_v18 = vmul.f32 %v22179_v28, %v11504_v51  ;;  %v22191_v43 = vld [vmem:[#allocation57_spill] sm:$0xff] }
0x149e   :  { %11427 = vmatprep.subr.bf16.mxu0 %v11378_v32  ;;  %v22178_v57 = vpack.c.bf16 %v22176_v53, %v22177_v20  ;;  %v11693_v54 = vsel %vm1514_vm0, %v11666_v37, %v22180_v47  ;;  %v22183_v42 = vpack.c.bf16 %v22181_v56, %v22182_v49  ;;  %v11699_v34 = vsel %vm1514_vm0, %v22184_v35, %v21553_v7  ;;  %v22190_v29 = vld [vmem:[#allocation91_spill] sm:$0xff]  ;;  %v22194_v51 = vld [vmem:[#allocation73_spill] sm:$0xff]  ;;  %v22198_v20 = vld [vmem:[#allocation52_spill] sm:$0xff] }
0x149f   :  { %12930 = vmatmul.mubr.msk.bf16.vlgmr.msra.gmra.mrb[128].mxu1 %vm3894_vm3, %v11189_v60  ;;  %v11682_v48 = vpop.permute.xlu1 %11681  ;;  %v11499_v9 = vpop.permute.xlu0 %11498  ;;  %v11561_v44 = vpack.c.bf16 %v11547_v23, %v11543_v55  ;;  %v11722_v61 = vrot.slane %v11705_v11, %v17324_v38  ;;  %v11560_v13 = vpack.c.bf16 %v11546_v63, %v11542_v5  ;;  %v11728_v11 = vmul.f32 %v11714_v30, %v11693_v54  ;;  %v22192_v23 = vld [vmem:[#allocation56_spill] sm:$0xff]  ;;  %v22195_v14 = vld [vmem:[#allocation55_spill] sm:$0xff]  ;;  %v22196_v63 = vld [vmem:[#allocation54_spill] sm:$0xff] }
0x14a0   :  { %11387 = vmatpush1.bf16.msra.mxu1 %v11375_v12  ;;  %12931 = vmatmul.mubr.msk.bf16.vlgmr.msra.gmra.mrb[96].mxu0 %vm3894_vm3, %v11189_v60  ;;  %v11505_v58 = vsel %vm1349_vm15, %v22167_v59, %v11499_v9  ;;  %v11517_v52 = vsel %vm1349_vm15, %v11499_v9, %v22169_v3  ;;  %v22185_v60 = vld [vmem:[#allocation48_spill] sm:$0xff]  ;;  %v22188_v12 = vld [vmem:[#allocation101_spill] sm:$0xff]  ;;  %v11696_v59 = vsel %vm1514_vm0, %v21576_v39, %v21589_v40  ;;  %v22202_v49 = vld [vmem:[#allocation59_spill] sm:$0xff] }
0x14a1   :  { %11388 = vmatprep.subr.bf16.mxu1 %v22173_v33  ;;  %11428 = vmatpush1.bf16.msra.mxu0 %v11377_v1  ;;  %v11548_v50 = vmul.f32 %v22179_v28, %v11505_v58  ;;  %v11549_v8 = vmul.f32 %v22175_v26, %v11517_v52  ;;  %v22187_v32 = vpack.c.bf16 %v22185_v60, %v22186_v46  ;;  %v22201_v56 = vld [vmem:[#allocation60_spill] sm:$0xff] }
0x14a2   :  { %11429 = vmatprep.subr.bf16.mxu0 %v22178_v57  ;;  %11418 = vmatprep.mubr.bf16.mxu1 %v22114_v22  ;;  %v11697_v62 = vsel %vm1514_vm0, %v22190_v29, %v11666_v37  ;;  %v11701_v55 = vsel %vm1514_vm0, %v11682_v48, %v22190_v29  ;;  %v22193_v21 = vpack.c.bf16 %v22191_v43, %v22192_v23  ;;  %v22199_v57 = vld [vmem:[#allocation51_spill] sm:$0xff] }
0x14a3   :  { %v11678_v0 = vpop.permute.xlu1 %11677  ;;  %v11668_v6 = vpop.permute.xlu0 %11667  ;;  %11459 = vmatprep.mubr.bf16.mxu0 %v22114_v22  ;;  %v11563_v19 = vpack.c.bf16 %v11549_v8, %v11545_v2  ;;  %v11562_v41 = vpack.c.bf16 %v11548_v50, %v11544_v18  ;;  %v11700_v17 = vsel %vm1514_vm0, %v22194_v51, %v21576_v39  ;;  %v11727_v9 = vmul.f32 %v21723_v15, %v11697_v62  ;;  %v11559_v50 = vld [vmem:[#allocation14 + $0x1c] sm:$0xf] }
0x14a4   :  { %11389 = vmatpush1.bf16.msra.mxu1 %v22183_v42  ;;  %v11694_v1 = vsel %vm1514_vm0, %v11668_v6, %v22188_v12  ;;  %v11698_v38 = vsel %vm1514_vm0, %v22189_v36, %v11668_v6  ;;  %v11695_v10 = vsel %vm1514_vm0, %v21553_v7, %v11678_v0  ;;  %v11689_v7 = vsel %vm1514_vm0, %v22180_v47, %v11682_v48 }
0x14a5   :  { %11571 = vmatprep.subr.bf16.mxu1 %v11561_v44  ;;  %11430 = vmatpush1.bf16.msra.mxu0 %v22187_v32  ;;  %v11732_v25 = vmul.f32 %v11714_v30, %v11694_v1  ;;  %v11731_v3 = vmul.f32 %v21723_v15, %v11698_v38  ;;  %v11736_v16 = vmul.f32 %v11714_v30, %v11695_v10 }
0x14a6   :  { %11612 = vmatprep.subr.bf16.mxu0 %v11563_v19  ;;  %v11730_v44 = vmul.f32 %v11722_v61, %v11701_v55  ;;  %v22197_v58 = vpack.c.bf16 %v22195_v14, %v22196_v63  ;;  %v11740_v26 = vmul.f32 %v11714_v30, %v11696_v59  ;;  %v11729_v2 = vmul.f32 %v21748_v31, %v11689_v7 }
0x14a7   :  { %12932 = vmatmul.mubr.msk.bf16.vlgmr.msra.gmra.mrb[132].mxu1 %vm3894_vm3, %v11374_v4  ;;  %v11686_v37 = vpop.permute.xlu1 %11685  ;;  %v11684_v24 = vpop.permute.xlu0 %11683  ;;  %v11746_v45 = vpack.c.bf16 %v11732_v25, %v11728_v11  ;;  %v22200_v28 = vpack.c.bf16 %v22198_v20, %v22199_v57  ;;  %v11739_v8 = vmul.f32 %v21723_v15, %v11700_v17  ;;  %v11745_v5 = vpack.c.bf16 %v11731_v3, %v11727_v9 }
0x14a8   :  { %11572 = vmatpush1.bf16.msra.mxu1 %v11560_v13  ;;  %11603 = vmatprep.mubr.bf16.mxu1 %v22114_v22  ;;  %v11690_v33 = vsel %vm1514_vm0, %v22188_v12, %v11684_v24  ;;  %v11702_v48 = vsel %vm1514_vm0, %v11684_v24, %v22189_v36  ;;  %v11703_v53 = vsel %vm1514_vm0, %v11686_v37, %v22184_v35 }
0x14a9   :  { %12933 = vmatmul.mubr.msk.bf16.vlgmr.msra.gmra.mrb[100].mxu0 %vm3894_vm3, %v11374_v4  ;;  %11573 = vmatprep.subr.bf16.mxu1 %v22193_v21  ;;  %v11733_v52 = vmul.f32 %v21748_v31, %v11690_v33  ;;  %v11734_v39 = vmul.f32 %v11722_v61, %v11702_v48  ;;  %v11691_v18 = vsel %vm1514_vm0, %v11678_v0, %v11686_v37 }
0x14aa   :  { %11613 = vmatpush1.bf16.msra.mxu0 %v11562_v41  ;;  %11644 = vmatprep.mubr.bf16.mxu0 %v22114_v22  ;;  %v22203_v42 = vpack.c.bf16 %v22201_v56, %v22202_v49  ;;  %v11750_v6 = vpack.c.bf16 %v11740_v26, %v11736_v16  ;;  %v11738_v19 = vmul.f32 %v11722_v61, %v11703_v53 }
0x14ab   :  { %11614 = vmatprep.subr.bf16.mxu0 %v22197_v58  ;;  %v11688_v30 = vpop.permute.xlu0 %11687  ;;  %v11748_v47 = vpack.c.bf16 %v11734_v39, %v11730_v44  ;;  %v11747_v54 = vpack.c.bf16 %v11733_v52, %v11729_v2  ;;  %v11735_v41 = vmul.f32 %v21723_v15, %v11699_v34  ;;  %v11737_v60 = vmul.f32 %v21748_v31, %v11691_v18 }
0x14ac   :  { %11574 = vmatpush1.bf16.msra.mxu1 %v22200_v28  ;;  %v11692_v4 = vsel %vm1514_vm0, %v21589_v40, %v11688_v30  ;;  %v11704_v35 = vsel %vm1514_vm0, %v11688_v30, %v22194_v51 }
0x14ad   :  { %11756 = vmatprep.subr.bf16.mxu1 %v11746_v45  ;;  %v11741_v0 = vmul.f32 %v21748_v31, %v11692_v4  ;;  %v11742_v13 = vmul.f32 %v11722_v61, %v11704_v35  ;;  %v11749_v40 = vpack.c.bf16 %v11739_v8, %v11735_v41  ;;  %v11744_v61 = vld [vmem:[#allocation14 + $0x20] sm:$0xf] }
0x14ae   :  { %11615 = vmatpush1.bf16.msra.mxu0 %v22203_v42 }
0x14af   :  { %12934 = vmatmul.mubr.msk.bf16.vlgmr.msra.gmra.mrb[136].mxu1 %vm3894_vm3, %v11559_v50  ;;  %11797 = vmatprep.subr.bf16.mxu0 %v11748_v47  ;;  %v11752_v27 = vpack.c.bf16 %v11742_v13, %v11738_v19  ;;  %v11751_v46 = vpack.c.bf16 %v11741_v0, %v11737_v60 }
0x14b0   :  { %11757 = vmatpush1.bf16.msra.mxu1 %v11745_v5  ;;  %11788 = vmatprep.mubr.bf16.mxu1 %v22114_v22 }
0x14b1   :  { %12935 = vmatmul.mubr.msk.bf16.vlgmr.msra.gmra.mrb[104].mxu0 %vm3894_vm3, %v11559_v50  ;;  %11758 = vmatprep.subr.bf16.mxu1 %v11750_v6 }
0x14b2   :  { %11798 = vmatpush1.bf16.msra.mxu0 %v11747_v54  ;;  %11829 = vmatprep.mubr.bf16.mxu0 %v22114_v22 }
0x14b3   :  { %11799 = vmatprep.subr.bf16.mxu0 %v11752_v27 }
0x14b4   :  { %11759 = vmatpush1.bf16.msra.mxu1 %v11749_v40 }
0x14b6   :  { %11800 = vmatpush1.bf16.msra.mxu0 %v11751_v46 }
0x14b7   :  { %12936 = vmatmul.mubr.msk.bf16.vlgmr.msra.gmra.mrb[140].mxu1 %vm3894_vm3, %v11744_v61 }
0x14b9   :  { %12937 = vmatmul.mubr.msk.bf16.vlgmr.msra.gmra.mrb[108].mxu0 %vm3894_vm3, %v11744_v61 }
0x1547   :  { %v10462_v15 = vpop.f32.mrb[108].mxu1 }
0x1548   :  { %v10464_v31 = vpop.f32.mrb[109].mxu1 }
0x1549   :  { %v10466_v32 = vpop.f32.mrb[110].mxu1 }
0x154a   :  { %v10503_v34 = vpop.f32.mrb[76].mxu0  ;;  %v10467_v1 = vpop.f32.mrb[111].mxu1 }
0x154b   :  { %v10505_v12 = vpop.f32.mrb[77].mxu0 }
0x154c   :  { %v10507_v36 = vpop.f32.mrb[78].mxu0 }
0x154d   :  { %v10508_v38 = vpop.f32.mrb[79].mxu0 }
0x1552   :  { %v10547_v11 = vpop.f32.mrb[112].mxu1 }
0x1553   :  { %v10548_v10 = vadd.f32 %v10547_v11, %v10462_v15  ;;  %v10549_v25 = vpop.f32.mrb[113].mxu1  ;;  %v10588_v59 = vpop.f32.mrb[80].mxu0 }
0x1554   :  { %v10550_v22 = vadd.f32 %v10549_v25, %v10464_v31  ;;  %v10551_v29 = vpop.f32.mrb[114].mxu1  ;;  %v10589_v62 = vadd.f32 %v10588_v59, %v10503_v34  ;;  %v10590_v55 = vpop.f32.mrb[81].mxu0 }
0x1555   :  { %v10552_v7 = vpop.f32.mrb[115].mxu1  ;;  %v10591_v3 = vadd.f32 %v10590_v55, %v10505_v12  ;;  %v10592_v43 = vpop.f32.mrb[82].mxu0 }
0x1556   :  { %v10593_v23 = vpop.f32.mrb[83].mxu0 }
0x155a   :  { %v10728_v21 = vpop.f32.mrb[116].mxu1 }
0x155b   :  { %v10776_v37 = vadd.f32 %v10728_v21, %v10548_v10  ;;  %v10730_v24 = vpop.f32.mrb[117].mxu1  ;;  %v10769_v51 = vpop.f32.mrb[84].mxu0 }
0x155c   :  { %v10777_v45 = vadd.f32 %v10730_v24, %v10550_v22  ;;  %v10732_v17 = vpop.f32.mrb[118].mxu1  ;;  %v10778_v16 = vadd.f32 %v10769_v51, %v10589_v62  ;;  %v10771_v33 = vpop.f32.mrb[85].mxu0 }
0x155d   :  { %v10733_v48 = vpop.f32.mrb[119].mxu1  ;;  %v10779_v9 = vadd.f32 %v10771_v33, %v10591_v3  ;;  %v10773_v44 = vpop.f32.mrb[86].mxu0 }
0x155e   :  { %v10774_v14 = vpop.f32.mrb[87].mxu0 }
0x1562   :  { %v10913_v63 = vpop.f32.mrb[120].mxu1 }
0x1563   :  { %v10961_v58 = vadd.f32 %v10913_v63, %v10776_v37  ;;  %v10915_v52 = vpop.f32.mrb[121].mxu1  ;;  %v10954_v39 = vpop.f32.mrb[88].mxu0 }
0x1564   :  { %v10962_v26 = vadd.f32 %v10915_v52, %v10777_v45  ;;  %v10963_v2 = vadd.f32 %v10954_v39, %v10778_v16  ;;  %v10956_v53 = vpop.f32.mrb[89].mxu0  ;;  %v10917_v20 = vpop.f32.mrb[122].mxu1 }
0x1565   :  { %v10964_v57 = vadd.f32 %v10956_v53, %v10779_v9  ;;  %v10918_v28 = vpop.f32.mrb[123].mxu1  ;;  %v10958_v50 = vpop.f32.mrb[90].mxu0 }
0x1566   :  { %v10959_v8 = vpop.f32.mrb[91].mxu0  ;;  %v11846_v9 = vpop.permute.xlu1 %11845 }
0x156a   :  { %v11050_v5 = vpop.f32.mrb[124].mxu1 }
0x156b   :  { %v11098_v18 = vadd.f32 %v11050_v5, %v10961_v58  ;;  %v11052_v30 = vpop.f32.mrb[125].mxu1  ;;  %v11091_v47 = vpop.f32.mrb[92].mxu0 }
0x156c   :  { %v11099_v54 = vadd.f32 %v11052_v30, %v10962_v26  ;;  %v11100_v56 = vadd.f32 %v11091_v47, %v10963_v2  ;;  %v11093_v49 = vpop.f32.mrb[93].mxu0  ;;  %v11054_v42 = vpop.f32.mrb[126].mxu1 }
0x156d   :  { %v11101_v4 = vadd.f32 %v11093_v49, %v10964_v57  ;;  %v11055_v35 = vpop.f32.mrb[127].mxu1  ;;  %v11095_v6 = vpop.f32.mrb[94].mxu0 }
0x156e   :  { %v11096_v19 = vpop.f32.mrb[95].mxu0 }
0x1572   :  { %v11235_v0 = vpop.f32.mrb[128].mxu1 }
0x1573   :  { %v11283_v13 = vadd.f32 %v11235_v0, %v11098_v18  ;;  %v11237_v41 = vpop.f32.mrb[129].mxu1  ;;  %v11276_v27 = vpop.f32.mrb[96].mxu0 }
0x1574   :  { %v11284_v60 = vadd.f32 %v11237_v41, %v11099_v54  ;;  %v11239_v40 = vpop.f32.mrb[130].mxu1  ;;  %v11285_v46 = vadd.f32 %v11276_v27, %v11100_v56  ;;  %v11278_v61 = vpop.f32.mrb[97].mxu0 }
0x1575   :  { %v11240_v15 = vpop.f32.mrb[131].mxu1  ;;  %v11286_v31 = vadd.f32 %v11278_v61, %v11101_v4  ;;  %v11280_v34 = vpop.f32.mrb[98].mxu0 }
0x1576   :  { %v11281_v32 = vpop.f32.mrb[99].mxu0 }
0x157a   :  { %v11420_v12 = vpop.f32.mrb[132].mxu1 }
0x157b   :  { %v11468_v1 = vadd.f32 %v11420_v12, %v11283_v13  ;;  %v11422_v36 = vpop.f32.mrb[133].mxu1 }
0x157c   :  { %v11469_v38 = vadd.f32 %v11422_v36, %v11284_v60  ;;  %v11461_v11 = vpop.f32.mrb[100].mxu0  ;;  %v11424_v10 = vpop.f32.mrb[134].mxu1 }
0x157d   :  { %v11470_v25 = vadd.f32 %v11461_v11, %v11285_v46  ;;  %v11463_v22 = vpop.f32.mrb[101].mxu0  ;;  %v11425_v59 = vpop.f32.mrb[135].mxu1 }
0x157e   :  { %v11471_v29 = vadd.f32 %v11463_v22, %v11286_v31  ;;  %v11465_v62 = vpop.f32.mrb[102].mxu0 }
0x157f   :  { %v11466_v55 = vpop.f32.mrb[103].mxu0 }
0x1582   :  { %v11605_v7 = vpop.f32.mrb[136].mxu1 }
0x1583   :  { %v11653_v3 = vadd.f32 %v11605_v7, %v11468_v1  ;;  %v11607_v43 = vpop.f32.mrb[137].mxu1 }
0x1584   :  { %v11654_v23 = vadd.f32 %v11607_v43, %v11469_v38  ;;  %v11646_v21 = vpop.f32.mrb[104].mxu0  ;;  %v11609_v37 = vpop.f32.mrb[138].mxu1 }
0x1585   :  { %v11655_v24 = vadd.f32 %v11646_v21, %v11470_v25  ;;  %v11648_v45 = vpop.f32.mrb[105].mxu0  ;;  %v11610_v51 = vpop.f32.mrb[139].mxu1 }
0x1586   :  { %v11656_v17 = vadd.f32 %v11648_v45, %v11471_v29  ;;  %v11650_v16 = vpop.f32.mrb[106].mxu0 }
0x1587   :  { %v11651_v33 = vpop.f32.mrb[107].mxu0 }
0x158a   :  { %v11790_v48 = vpop.f32.mrb[140].mxu1 }
0x158b   :  { %v11838_v44 = vadd.f32 %v11790_v48, %v11653_v3  ;;  %v11792_v14 = vpop.f32.mrb[141].mxu1 }
0x158c   :  { %v11839_v63 = vadd.f32 %v11792_v14, %v11654_v23  ;;  %v11831_v58 = vpop.f32.mrb[108].mxu0  ;;  %v11794_v52 = vpop.f32.mrb[142].mxu1 }
0x158d   :  { %v11848_v39 = vadd.f32 %v11846_v9, %v11838_v44  ;;  %v11840_v26 = vadd.f32 %v11831_v58, %v11655_v24  ;;  %v11833_v2 = vpop.f32.mrb[109].mxu0  ;;  %v11795_v53 = vpop.f32.mrb[143].mxu1 }
0x158e   :  { %v11849_v20 = vadd.f32 %v11846_v9, %v11839_v63  ;;  %v11841_v57 = vadd.f32 %v11833_v2, %v11656_v17  ;;  %v11835_v28 = vpop.f32.mrb[110].mxu0 }
0x158f   :  { %v11852_v50 = vmul.f32 0.1, %v11848_v39  ;;  %v11850_v8 = vadd.f32 %v11846_v9, %v11840_v26  ;;  %v11836_v5 = vpop.f32.mrb[111].mxu0 }
0x1590   :  { %v11853_v18 = vmul.f32 0.1, %v11849_v20  ;;  %v11851_v30 = vadd.f32 %v11846_v9, %v11841_v57 }
0x1591   :  { %11856 = vst [vmem:[%s22204_s30] sm:$0xff] %v11852_v50  ;;  %v11854_v47 = vmul.f32 0.1, %v11850_v8 }
0x1592   :  { %11857 = vst [vmem:[%s22204_s30 + $0x8] sm:$0xff] %v11853_v18  ;;  %v11855_v54 = vmul.f32 0.1, %v11851_v30 }
0x1593   :  { %11858 = vst [vmem:[%s22204_s30 + $0x10] sm:$0xff] %v11854_v47 }
0x1594   :  { %11859 = vst [vmem:[%s22204_s30 + $0x18] sm:$0xff] %v11855_v54 }
0x1595   :  { %11868 = vsyncpa [#allocation4], 1 }
0x1596   :  { %11869 = vsyncpa [#allocation6], 1 }
0x1597   :  { %11870 = vsyncpa [#allocation9], 1 }
0x1598   :  { %11871 = vsyncpa [#allocation12], 1 }
0x1599   :  { %11872 = vsyncpa [#allocation15], 1 }

</bundles_post_ra>
